<compile_context>
chip_gen: v6e
topology: v6e:2x2x1
jax: 0.10.0
libtpu: 0.0.40
codegen_flags: <defaults>
</compile_context>

<pallas_src>
import functools

import jax
import jax.numpy as jnp
from jax.experimental import pallas as pl
from jax.experimental.pallas import tpu as pltpu


# ---------------------------------------------------------------------------
# Pallas kernel: all residual blocks for one image.
# ---------------------------------------------------------------------------
def _res_blocks_kernel(x_ref, w_ref, b_ref, o_ref, *, block_num, c, h, w,
                       kh, kw, sh, sw, p_top, p_bot, p_lft, p_rgt, ho, wo):
    # x_ref: (1, C, H*W)            lane-dense activations
    # w_ref: (L, Cout, K) bf16      L = 2*block_num, K = kh*kw*Cin (BN folded)
    # b_ref: (L, Cout, 1) f32       folded biases
    # o_ref: (1, C, Ho*Wo)

    def reflect_pad(img):
        # img: (c, h, w) -> (c, h + p_top + p_bot, w + p_lft + p_rgt)
        if p_top or p_bot:
            top = [img[:, p_top - t:p_top - t + 1, :] for t in range(p_top)]
            bot = [img[:, h - 2 - t:h - 1 - t, :] for t in range(p_bot)]
            img = jnp.concatenate(top + [img] + bot, axis=1)
        if p_lft or p_rgt:
            lft = [img[:, :, p_lft - t:p_lft - t + 1] for t in range(p_lft)]
            rgt = [img[:, :, w - 2 - t:w - 1 - t] for t in range(p_rgt)]
            img = jnp.concatenate(lft + [img] + rgt, axis=2)
        return img

    def im2col(img_p):
        # img_p: (c, hp, wp) -> (kh*kw*c, ho*wo), tap-major / channel-minor,
        # matching the (Cout, kh, kw, Cin)-flattened weights.
        pieces = []
        for dy in range(kh):
            for dx in range(kw):
                if sh == 1 and sw == 1:
                    piece = img_p[:, dy:dy + ho, dx:dx + wo]
                else:
                    piece = jax.lax.slice(
                        img_p, (0, dy, dx),
                        (c, dy + (ho - 1) * sh + 1, dx + (wo - 1) * sw + 1),
                        (1, sh, sw))
                pieces.append(piece)
        cols = jnp.concatenate(pieces, axis=0)          # (kh*kw*c, ho, wo)
        return cols.reshape(kh * kw * c, ho * wo)

    y = x_ref[0].astype(jnp.float32)                    # (c, h*w)
    for blk in range(block_num):
        y_res = y
        for half in range(2):
            layer = 2 * blk + half
            img = reflect_pad(y.reshape(c, h, w))
            cols = im2col(img).astype(jnp.bfloat16)     # bf16 operands -> MXU
            acc = jnp.dot(w_ref[layer], cols,
                          preferred_element_type=jnp.float32)   # (c, ho*wo)
            acc = acc + b_ref[layer]                    # (c, 1) lane-broadcast
            y = jnp.maximum(acc, 0.0)                   # ReLU in f32
        y = y_res + y                                   # residual add in f32
    o_ref[0] = y.astype(o_ref.dtype)


# ---------------------------------------------------------------------------
# Wrapper: BN folding + layout plumbing + pallas_call.
# ---------------------------------------------------------------------------
def _fold_bn_into_conv(conv_w, conv_b, gamma, beta, mean, var, eps):
    # BN (inference) then reflection pad then conv  ==  pad then conv with
    # per-input-channel-scaled weights and an adjusted bias (exact).
    scale = gamma / jnp.sqrt(var + eps)                 # (Cin,)
    shift = beta - mean * scale                         # (Cin,)
    w_f = conv_w * scale[None, :, None, None]           # (O, I, kh, kw)
    b_f = conv_b + jnp.einsum("oihw,i->o", conv_w, shift)
    return w_f, b_f


def residual_blocks_forward(x, params, *, ks=3, stride=1, eps=1e-5):
    """Forward pass of ResidualBlocks(block_num=len(params), dim=C)."""
    n, c, h, w = x.shape
    kh, kw = (ks if isinstance(ks, tuple) else (ks, ks))
    sh, sw = (stride if isinstance(stride, tuple) else (stride, stride))
    pad_h, pad_w = kh - sh, kw - sw
    p_top, p_lft = pad_h // 2, pad_w // 2
    p_bot, p_rgt = pad_h - p_top, pad_w - p_lft
    hp, wp = h + p_top + p_bot, w + p_lft + p_rgt
    ho = (hp - kh) // sh + 1
    wo = (wp - kw) // sw + 1
    assert (ho, wo) == (h, w), "residual add needs spatial-preserving conv"

    block_num = len(params)
    n_layers = 2 * block_num
    k_dim = kh * kw * c

    # Fold BN into each conv; flatten weights to (Cout, kh*kw*Cin), bf16.
    w_all, b_all = [], []
    for block_params in params:
        for layer_p in block_params:
            w_f, b_f = _fold_bn_into_conv(
                layer_p["conv_w"], layer_p["conv_b"], layer_p["gamma"],
                layer_p["beta"], layer_p["mean"], layer_p["var"], eps)
            w_all.append(jnp.transpose(w_f, (0, 2, 3, 1)).reshape(c, k_dim))
            b_all.append(b_f.reshape(c, 1))
    w_all = jnp.stack(w_all).astype(jnp.bfloat16)        # (L, C, K)
    b_all = jnp.stack(b_all).astype(jnp.float32)         # (L, C, 1)

    x_flat = x.reshape(n, c, h * w)                      # free reshape

    kern = functools.partial(
        _res_blocks_kernel, block_num=block_num, c=c, h=h, w=w, kh=kh, kw=kw,
        sh=sh, sw=sw, p_top=p_top, p_bot=p_bot, p_lft=p_lft, p_rgt=p_rgt,
        ho=ho, wo=wo)

    out_flat = pl.pallas_call(
        kern,
        out_shape=jax.ShapeDtypeStruct((n, c, ho * wo), x.dtype),
        grid=(n,),
        in_specs=[
            pl.BlockSpec((1, c, h * w), lambda b: (b, 0, 0)),
            pl.BlockSpec((n_layers, c, k_dim), lambda b: (0, 0, 0)),
            pl.BlockSpec((n_layers, c, 1), lambda b: (0, 0, 0)),
        ],
        out_specs=pl.BlockSpec((1, c, ho * wo), lambda b: (b, 0, 0)),
        compiler_params=pltpu.CompilerParams(
            dimension_semantics=("parallel",)),
    )(x_flat, w_all, b_all)

    return out_flat.reshape(n, c, ho, wo)                # free reshape


# ---------------------------------------------------------------------------
# Pure-JAX reference (inference-mode BN, reflect pad, conv, ReLU, residual).
# ---------------------------------------------------------------------------
def _reference_forward(x, params, *, ks=3, stride=1, eps=1e-5):
    kh, kw = (ks if isinstance(ks, tuple) else (ks, ks))
    sh, sw = (stride if isinstance(stride, tuple) else (stride, stride))
    pad_h, pad_w = kh - sh, kw - sw
    p_top, p_lft = pad_h // 2, pad_w // 2
    p_bot, p_rgt = pad_h - p_top, pad_w - p_lft

    def bn(t, p):
        inv = 1.0 / jnp.sqrt(p["var"] + eps)
        return ((t - p["mean"][None, :, None, None]) * inv[None, :, None, None]
                * p["gamma"][None, :, None, None]
                + p["beta"][None, :, None, None])

    def padded_conv(t, p):
        t = jnp.pad(t, ((0, 0), (0, 0), (p_top, p_bot), (p_lft, p_rgt)),
                    mode="reflect")
        t = jax.lax.conv_general_dilated(
            t, p["conv_w"], window_strides=(sh, sw), padding="VALID",
            dimension_numbers=("NCHW", "OIHW", "NCHW"))
        return t + p["conv_b"].reshape(1, -1, 1, 1)

    y = x
    for layer1, layer2 in params:
        z = jnp.maximum(padded_conv(bn(y, layer1), layer1), 0.0)
        z = jnp.maximum(padded_conv(bn(z, layer2), layer2), 0.0)
        y = y + z
    return y


# ---------------------------------------------------------------------------
if __name__ == "__main__":
    BLOCK_NUM, DIM, KS, STRIDE = 2, 4, 3, 1
    N, H, W = 2, 16, 16

    key = jax.random.PRNGKey(0)
    key, kx = jax.random.split(key)
    x = jax.random.normal(kx, (N, DIM, H, W), dtype=jnp.float32)

    bound = 1.0 / float((DIM * KS * KS) ** 0.5)
    params = []
    for _ in range(BLOCK_NUM):
        block_params = []
        for _ in range(2):
            key, k1, k2, k3, k4, k5, k6 = jax.random.split(key, 7)
            block_params.append({
                "conv_w": jax.random.uniform(k1, (DIM, DIM, KS, KS),
                                             minval=-bound, maxval=bound,
                                             dtype=jnp.float32),
                "conv_b": jax.random.uniform(k2, (DIM,), minval=-bound,
                                             maxval=bound, dtype=jnp.float32),
                "gamma": jax.random.uniform(k3, (DIM,), minval=0.8, maxval=1.2,
                                            dtype=jnp.float32),
                "beta": jax.random.uniform(k4, (DIM,), minval=-0.2, maxval=0.2,
                                           dtype=jnp.float32),
                "mean": 0.2 * jax.random.normal(k5, (DIM,), dtype=jnp.float32),
                "var": jax.random.uniform(k6, (DIM,), minval=0.8, maxval=1.2,
                                          dtype=jnp.float32),
            })
        params.append(tuple(block_params))

    out = residual_blocks_forward(x, params, ks=KS, stride=STRIDE)
    out = jax.block_until_ready(out)
    ref = _reference_forward(x, params, ks=KS, stride=STRIDE)

    assert out.shape == (N, DIM, H, W), out.shape
    max_err = float(jnp.max(jnp.abs(out - ref)))
    mean_err = float(jnp.mean(jnp.abs(out - ref)))
    # bf16 MXU operands with f32 accumulation -> small but nonzero error budget.
    assert max_err < 1e-1 and mean_err < 2e-2, (max_err, mean_err)
    print("KERNEL_OK")
</pallas_src>

<mosaic_0001>
module attributes {stable_mosaic.version = 11 : i64} {
  func.func @_res_blocks_kernel(%arg0: i32, %arg1: memref<1x4x256xf32, #tpu.memory_space<vmem>>, %arg2: memref<4x4x36xbf16, #tpu.memory_space<vmem>>, %arg3: memref<4x4x1xf32, #tpu.memory_space<vmem>>, %arg4: memref<1x4x256xf32, #tpu.memory_space<vmem>>) attributes {dimension_semantics = [#tpu.dimension_semantics<parallel>], iteration_bounds = array<i64: 2>, scalar_prefetch = 0 : i64, scratch_operands = 0 : i64, tpu.core_type = #tpu.core_type<tc>, window_params = [{transform_indices = @transform_0, window_bounds = array<i64: 1, 4, 256>}, {pipeline_mode = #tpu.pipeline_mode<synchronous>, transform_indices = @transform_1, window_bounds = array<i64: 4, 4, 36>}, {pipeline_mode = #tpu.pipeline_mode<synchronous>, transform_indices = @transform_2, window_bounds = array<i64: 4, 4, 1>}, {transform_indices = @transform_3, window_bounds = array<i64: 1, 4, 256>}]} {
    %c0 = arith.constant 0 : index
    %c0_0 = arith.constant 0 : index
    %c0_1 = arith.constant 0 : index
    %0 = vector.load %arg1[%c0, %c0_0, %c0_1] : memref<1x4x256xf32, #tpu.memory_space<vmem>>, vector<1x4x256xf32>
    %1 = vector.shape_cast %0 : vector<1x4x256xf32> to vector<4x256xf32>
    %2 = vector.shape_cast %1 : vector<4x256xf32> to vector<4x16x16xf32>
    %3 = vector.extract_strided_slice %2 {offsets = [0, 1, 0], sizes = [4, 1, 16], strides = [1, 1, 1]} : vector<4x16x16xf32> to vector<4x1x16xf32>
    %4 = vector.extract_strided_slice %2 {offsets = [0, 14, 0], sizes = [4, 1, 16], strides = [1, 1, 1]} : vector<4x16x16xf32> to vector<4x1x16xf32>
    %5 = tpu.concatenate %3, %2, %4 in 1 : vector<4x1x16xf32>, vector<4x16x16xf32>, vector<4x1x16xf32> -> vector<4x18x16xf32>
    %6 = vector.extract_strided_slice %5 {offsets = [0, 0, 1], sizes = [4, 18, 1], strides = [1, 1, 1]} : vector<4x18x16xf32> to vector<4x18x1xf32>
    %7 = vector.extract_strided_slice %5 {offsets = [0, 0, 14], sizes = [4, 18, 1], strides = [1, 1, 1]} : vector<4x18x16xf32> to vector<4x18x1xf32>
    %8 = tpu.concatenate %6, %5, %7 in 2 : vector<4x18x1xf32>, vector<4x18x16xf32>, vector<4x18x1xf32> -> vector<4x18x18xf32>
    %9 = vector.extract_strided_slice %8 {offsets = [0, 0, 0], sizes = [4, 16, 16], strides = [1, 1, 1]} : vector<4x18x18xf32> to vector<4x16x16xf32>
    %10 = vector.extract_strided_slice %8 {offsets = [0, 0, 1], sizes = [4, 16, 16], strides = [1, 1, 1]} : vector<4x18x18xf32> to vector<4x16x16xf32>
    %11 = vector.extract_strided_slice %8 {offsets = [0, 0, 2], sizes = [4, 16, 16], strides = [1, 1, 1]} : vector<4x18x18xf32> to vector<4x16x16xf32>
    %12 = vector.extract_strided_slice %8 {offsets = [0, 1, 0], sizes = [4, 16, 16], strides = [1, 1, 1]} : vector<4x18x18xf32> to vector<4x16x16xf32>
    %13 = vector.extract_strided_slice %8 {offsets = [0, 1, 1], sizes = [4, 16, 16], strides = [1, 1, 1]} : vector<4x18x18xf32> to vector<4x16x16xf32>
    %14 = vector.extract_strided_slice %8 {offsets = [0, 1, 2], sizes = [4, 16, 16], strides = [1, 1, 1]} : vector<4x18x18xf32> to vector<4x16x16xf32>
    %15 = vector.extract_strided_slice %8 {offsets = [0, 2, 0], sizes = [4, 16, 16], strides = [1, 1, 1]} : vector<4x18x18xf32> to vector<4x16x16xf32>
    %16 = vector.extract_strided_slice %8 {offsets = [0, 2, 1], sizes = [4, 16, 16], strides = [1, 1, 1]} : vector<4x18x18xf32> to vector<4x16x16xf32>
    %17 = vector.extract_strided_slice %8 {offsets = [0, 2, 2], sizes = [4, 16, 16], strides = [1, 1, 1]} : vector<4x18x18xf32> to vector<4x16x16xf32>
    %18 = tpu.concatenate %9, %10, %11, %12, %13, %14, %15, %16, %17 in 0 : vector<4x16x16xf32>, vector<4x16x16xf32>, vector<4x16x16xf32>, vector<4x16x16xf32>, vector<4x16x16xf32>, vector<4x16x16xf32>, vector<4x16x16xf32>, vector<4x16x16xf32>, vector<4x16x16xf32> -> vector<36x16x16xf32>
    %19 = vector.shape_cast %18 : vector<36x16x16xf32> to vector<36x256xf32>
    %20 = arith.truncf %19 : vector<36x256xf32> to vector<36x256xbf16>
    %c0_2 = arith.constant 0 : index
    %c0_3 = arith.constant 0 : index
    %c0_4 = arith.constant 0 : index
    %21 = vector.load %arg2[%c0_2, %c0_3, %c0_4] : memref<4x4x36xbf16, #tpu.memory_space<vmem>>, vector<1x4x36xbf16>
    %22 = vector.shape_cast %21 : vector<1x4x36xbf16> to vector<4x36xbf16>
    %cst = arith.constant dense<0.000000e+00> : vector<4x256xf32>
    %23 = tpu.matmul %22, %20, %cst {dimension_numbers = #tpu.dot_dimension_numbers<[1], [0], [0], [1], [0, 0, 1, 1], [], []>} : vector<4x36xbf16>, vector<36x256xbf16>, vector<4x256xf32> -> vector<4x256xf32>
    %c0_5 = arith.constant 0 : index
    %c0_6 = arith.constant 0 : index
    %c0_7 = arith.constant 0 : index
    %24 = vector.load %arg3[%c0_5, %c0_6, %c0_7] : memref<4x4x1xf32, #tpu.memory_space<vmem>>, vector<1x4x1xf32>
    %25 = vector.shape_cast %24 : vector<1x4x1xf32> to vector<4x1xf32>
    %26 = vector.broadcast %25 : vector<4x1xf32> to vector<4x256xf32>
    %27 = arith.addf %23, %26 : vector<4x256xf32>
    %cst_8 = arith.constant 0.000000e+00 : f32
    %28 = vector.broadcast %cst_8 : f32 to vector<4x256xf32>
    %29 = arith.maximumf %27, %28 : vector<4x256xf32>
    %30 = vector.shape_cast %29 : vector<4x256xf32> to vector<4x16x16xf32>
    %31 = vector.extract_strided_slice %30 {offsets = [0, 1, 0], sizes = [4, 1, 16], strides = [1, 1, 1]} : vector<4x16x16xf32> to vector<4x1x16xf32>
    %32 = vector.extract_strided_slice %30 {offsets = [0, 14, 0], sizes = [4, 1, 16], strides = [1, 1, 1]} : vector<4x16x16xf32> to vector<4x1x16xf32>
    %33 = tpu.concatenate %31, %30, %32 in 1 : vector<4x1x16xf32>, vector<4x16x16xf32>, vector<4x1x16xf32> -> vector<4x18x16xf32>
    %34 = vector.extract_strided_slice %33 {offsets = [0, 0, 1], sizes = [4, 18, 1], strides = [1, 1, 1]} : vector<4x18x16xf32> to vector<4x18x1xf32>
    %35 = vector.extract_strided_slice %33 {offsets = [0, 0, 14], sizes = [4, 18, 1], strides = [1, 1, 1]} : vector<4x18x16xf32> to vector<4x18x1xf32>
    %36 = tpu.concatenate %34, %33, %35 in 2 : vector<4x18x1xf32>, vector<4x18x16xf32>, vector<4x18x1xf32> -> vector<4x18x18xf32>
    %37 = vector.extract_strided_slice %36 {offsets = [0, 0, 0], sizes = [4, 16, 16], strides = [1, 1, 1]} : vector<4x18x18xf32> to vector<4x16x16xf32>
    %38 = vector.extract_strided_slice %36 {offsets = [0, 0, 1], sizes = [4, 16, 16], strides = [1, 1, 1]} : vector<4x18x18xf32> to vector<4x16x16xf32>
    %39 = vector.extract_strided_slice %36 {offsets = [0, 0, 2], sizes = [4, 16, 16], strides = [1, 1, 1]} : vector<4x18x18xf32> to vector<4x16x16xf32>
    %40 = vector.extract_strided_slice %36 {offsets = [0, 1, 0], sizes = [4, 16, 16], strides = [1, 1, 1]} : vector<4x18x18xf32> to vector<4x16x16xf32>
    %41 = vector.extract_strided_slice %36 {offsets = [0, 1, 1], sizes = [4, 16, 16], strides = [1, 1, 1]} : vector<4x18x18xf32> to vector<4x16x16xf32>
    %42 = vector.extract_strided_slice %36 {offsets = [0, 1, 2], sizes = [4, 16, 16], strides = [1, 1, 1]} : vector<4x18x18xf32> to vector<4x16x16xf32>
    %43 = vector.extract_strided_slice %36 {offsets = [0, 2, 0], sizes = [4, 16, 16], strides = [1, 1, 1]} : vector<4x18x18xf32> to vector<4x16x16xf32>
    %44 = vector.extract_strided_slice %36 {offsets = [0, 2, 1], sizes = [4, 16, 16], strides = [1, 1, 1]} : vector<4x18x18xf32> to vector<4x16x16xf32>
    %45 = vector.extract_strided_slice %36 {offsets = [0, 2, 2], sizes = [4, 16, 16], strides = [1, 1, 1]} : vector<4x18x18xf32> to vector<4x16x16xf32>
    %46 = tpu.concatenate %37, %38, %39, %40, %41, %42, %43, %44, %45 in 0 : vector<4x16x16xf32>, vector<4x16x16xf32>, vector<4x16x16xf32>, vector<4x16x16xf32>, vector<4x16x16xf32>, vector<4x16x16xf32>, vector<4x16x16xf32>, vector<4x16x16xf32>, vector<4x16x16xf32> -> vector<36x16x16xf32>
    %47 = vector.shape_cast %46 : vector<36x16x16xf32> to vector<36x256xf32>
    %48 = arith.truncf %47 : vector<36x256xf32> to vector<36x256xbf16>
    %c1 = arith.constant 1 : index
    %c0_9 = arith.constant 0 : index
    %c0_10 = arith.constant 0 : index
    %49 = vector.load %arg2[%c1, %c0_9, %c0_10] : memref<4x4x36xbf16, #tpu.memory_space<vmem>>, vector<1x4x36xbf16>
    %50 = vector.shape_cast %49 : vector<1x4x36xbf16> to vector<4x36xbf16>
    %cst_11 = arith.constant dense<0.000000e+00> : vector<4x256xf32>
    %51 = tpu.matmul %50, %48, %cst_11 {dimension_numbers = #tpu.dot_dimension_numbers<[1], [0], [0], [1], [0, 0, 1, 1], [], []>} : vector<4x36xbf16>, vector<36x256xbf16>, vector<4x256xf32> -> vector<4x256xf32>
    %c1_12 = arith.constant 1 : index
    %c0_13 = arith.constant 0 : index
    %c0_14 = arith.constant 0 : index
    %52 = vector.load %arg3[%c1_12, %c0_13, %c0_14] : memref<4x4x1xf32, #tpu.memory_space<vmem>>, vector<1x4x1xf32>
    %53 = vector.shape_cast %52 : vector<1x4x1xf32> to vector<4x1xf32>
    %54 = vector.broadcast %53 : vector<4x1xf32> to vector<4x256xf32>
    %55 = arith.addf %51, %54 : vector<4x256xf32>
    %cst_15 = arith.constant 0.000000e+00 : f32
    %56 = vector.broadcast %cst_15 : f32 to vector<4x256xf32>
    %57 = arith.maximumf %55, %56 : vector<4x256xf32>
    %58 = arith.addf %1, %57 : vector<4x256xf32>
    %59 = vector.shape_cast %58 : vector<4x256xf32> to vector<4x16x16xf32>
    %60 = vector.extract_strided_slice %59 {offsets = [0, 1, 0], sizes = [4, 1, 16], strides = [1, 1, 1]} : vector<4x16x16xf32> to vector<4x1x16xf32>
    %61 = vector.extract_strided_slice %59 {offsets = [0, 14, 0], sizes = [4, 1, 16], strides = [1, 1, 1]} : vector<4x16x16xf32> to vector<4x1x16xf32>
    %62 = tpu.concatenate %60, %59, %61 in 1 : vector<4x1x16xf32>, vector<4x16x16xf32>, vector<4x1x16xf32> -> vector<4x18x16xf32>
    %63 = vector.extract_strided_slice %62 {offsets = [0, 0, 1], sizes = [4, 18, 1], strides = [1, 1, 1]} : vector<4x18x16xf32> to vector<4x18x1xf32>
    %64 = vector.extract_strided_slice %62 {offsets = [0, 0, 14], sizes = [4, 18, 1], strides = [1, 1, 1]} : vector<4x18x16xf32> to vector<4x18x1xf32>
    %65 = tpu.concatenate %63, %62, %64 in 2 : vector<4x18x1xf32>, vector<4x18x16xf32>, vector<4x18x1xf32> -> vector<4x18x18xf32>
    %66 = vector.extract_strided_slice %65 {offsets = [0, 0, 0], sizes = [4, 16, 16], strides = [1, 1, 1]} : vector<4x18x18xf32> to vector<4x16x16xf32>
    %67 = vector.extract_strided_slice %65 {offsets = [0, 0, 1], sizes = [4, 16, 16], strides = [1, 1, 1]} : vector<4x18x18xf32> to vector<4x16x16xf32>
    %68 = vector.extract_strided_slice %65 {offsets = [0, 0, 2], sizes = [4, 16, 16], strides = [1, 1, 1]} : vector<4x18x18xf32> to vector<4x16x16xf32>
    %69 = vector.extract_strided_slice %65 {offsets = [0, 1, 0], sizes = [4, 16, 16], strides = [1, 1, 1]} : vector<4x18x18xf32> to vector<4x16x16xf32>
    %70 = vector.extract_strided_slice %65 {offsets = [0, 1, 1], sizes = [4, 16, 16], strides = [1, 1, 1]} : vector<4x18x18xf32> to vector<4x16x16xf32>
    %71 = vector.extract_strided_slice %65 {offsets = [0, 1, 2], sizes = [4, 16, 16], strides = [1, 1, 1]} : vector<4x18x18xf32> to vector<4x16x16xf32>
    %72 = vector.extract_strided_slice %65 {offsets = [0, 2, 0], sizes = [4, 16, 16], strides = [1, 1, 1]} : vector<4x18x18xf32> to vector<4x16x16xf32>
    %73 = vector.extract_strided_slice %65 {offsets = [0, 2, 1], sizes = [4, 16, 16], strides = [1, 1, 1]} : vector<4x18x18xf32> to vector<4x16x16xf32>
    %74 = vector.extract_strided_slice %65 {offsets = [0, 2, 2], sizes = [4, 16, 16], strides = [1, 1, 1]} : vector<4x18x18xf32> to vector<4x16x16xf32>
    %75 = tpu.concatenate %66, %67, %68, %69, %70, %71, %72, %73, %74 in 0 : vector<4x16x16xf32>, vector<4x16x16xf32>, vector<4x16x16xf32>, vector<4x16x16xf32>, vector<4x16x16xf32>, vector<4x16x16xf32>, vector<4x16x16xf32>, vector<4x16x16xf32>, vector<4x16x16xf32> -> vector<36x16x16xf32>
    %76 = vector.shape_cast %75 : vector<36x16x16xf32> to vector<36x256xf32>
    %77 = arith.truncf %76 : vector<36x256xf32> to vector<36x256xbf16>
    %c2 = arith.constant 2 : index
    %c0_16 = arith.constant 0 : index
    %c0_17 = arith.constant 0 : index
    %78 = vector.load %arg2[%c2, %c0_16, %c0_17] : memref<4x4x36xbf16, #tpu.memory_space<vmem>>, vector<1x4x36xbf16>
    %79 = vector.shape_cast %78 : vector<1x4x36xbf16> to vector<4x36xbf16>
    %cst_18 = arith.constant dense<0.000000e+00> : vector<4x256xf32>
    %80 = tpu.matmul %79, %77, %cst_18 {dimension_numbers = #tpu.dot_dimension_numbers<[1], [0], [0], [1], [0, 0, 1, 1], [], []>} : vector<4x36xbf16>, vector<36x256xbf16>, vector<4x256xf32> -> vector<4x256xf32>
    %c2_19 = arith.constant 2 : index
    %c0_20 = arith.constant 0 : index
    %c0_21 = arith.constant 0 : index
    %81 = vector.load %arg3[%c2_19, %c0_20, %c0_21] : memref<4x4x1xf32, #tpu.memory_space<vmem>>, vector<1x4x1xf32>
    %82 = vector.shape_cast %81 : vector<1x4x1xf32> to vector<4x1xf32>
    %83 = vector.broadcast %82 : vector<4x1xf32> to vector<4x256xf32>
    %84 = arith.addf %80, %83 : vector<4x256xf32>
    %cst_22 = arith.constant 0.000000e+00 : f32
    %85 = vector.broadcast %cst_22 : f32 to vector<4x256xf32>
    %86 = arith.maximumf %84, %85 : vector<4x256xf32>
    %87 = vector.shape_cast %86 : vector<4x256xf32> to vector<4x16x16xf32>
    %88 = vector.extract_strided_slice %87 {offsets = [0, 1, 0], sizes = [4, 1, 16], strides = [1, 1, 1]} : vector<4x16x16xf32> to vector<4x1x16xf32>
    %89 = vector.extract_strided_slice %87 {offsets = [0, 14, 0], sizes = [4, 1, 16], strides = [1, 1, 1]} : vector<4x16x16xf32> to vector<4x1x16xf32>
    %90 = tpu.concatenate %88, %87, %89 in 1 : vector<4x1x16xf32>, vector<4x16x16xf32>, vector<4x1x16xf32> -> vector<4x18x16xf32>
    %91 = vector.extract_strided_slice %90 {offsets = [0, 0, 1], sizes = [4, 18, 1], strides = [1, 1, 1]} : vector<4x18x16xf32> to vector<4x18x1xf32>
    %92 = vector.extract_strided_slice %90 {offsets = [0, 0, 14], sizes = [4, 18, 1], strides = [1, 1, 1]} : vector<4x18x16xf32> to vector<4x18x1xf32>
    %93 = tpu.concatenate %91, %90, %92 in 2 : vector<4x18x1xf32>, vector<4x18x16xf32>, vector<4x18x1xf32> -> vector<4x18x18xf32>
    %94 = vector.extract_strided_slice %93 {offsets = [0, 0, 0], sizes = [4, 16, 16], strides = [1, 1, 1]} : vector<4x18x18xf32> to vector<4x16x16xf32>
    %95 = vector.extract_strided_slice %93 {offsets = [0, 0, 1], sizes = [4, 16, 16], strides = [1, 1, 1]} : vector<4x18x18xf32> to vector<4x16x16xf32>
    %96 = vector.extract_strided_slice %93 {offsets = [0, 0, 2], sizes = [4, 16, 16], strides = [1, 1, 1]} : vector<4x18x18xf32> to vector<4x16x16xf32>
    %97 = vector.extract_strided_slice %93 {offsets = [0, 1, 0], sizes = [4, 16, 16], strides = [1, 1, 1]} : vector<4x18x18xf32> to vector<4x16x16xf32>
    %98 = vector.extract_strided_slice %93 {offsets = [0, 1, 1], sizes = [4, 16, 16], strides = [1, 1, 1]} : vector<4x18x18xf32> to vector<4x16x16xf32>
    %99 = vector.extract_strided_slice %93 {offsets = [0, 1, 2], sizes = [4, 16, 16], strides = [1, 1, 1]} : vector<4x18x18xf32> to vector<4x16x16xf32>
    %100 = vector.extract_strided_slice %93 {offsets = [0, 2, 0], sizes = [4, 16, 16], strides = [1, 1, 1]} : vector<4x18x18xf32> to vector<4x16x16xf32>
    %101 = vector.extract_strided_slice %93 {offsets = [0, 2, 1], sizes = [4, 16, 16], strides = [1, 1, 1]} : vector<4x18x18xf32> to vector<4x16x16xf32>
    %102 = vector.extract_strided_slice %93 {offsets = [0, 2, 2], sizes = [4, 16, 16], strides = [1, 1, 1]} : vector<4x18x18xf32> to vector<4x16x16xf32>
    %103 = tpu.concatenate %94, %95, %96, %97, %98, %99, %100, %101, %102 in 0 : vector<4x16x16xf32>, vector<4x16x16xf32>, vector<4x16x16xf32>, vector<4x16x16xf32>, vector<4x16x16xf32>, vector<4x16x16xf32>, vector<4x16x16xf32>, vector<4x16x16xf32>, vector<4x16x16xf32> -> vector<36x16x16xf32>
    %104 = vector.shape_cast %103 : vector<36x16x16xf32> to vector<36x256xf32>
    %105 = arith.truncf %104 : vector<36x256xf32> to vector<36x256xbf16>
    %c3 = arith.constant 3 : index
    %c0_23 = arith.constant 0 : index
    %c0_24 = arith.constant 0 : index
    %106 = vector.load %arg2[%c3, %c0_23, %c0_24] : memref<4x4x36xbf16, #tpu.memory_space<vmem>>, vector<1x4x36xbf16>
    %107 = vector.shape_cast %106 : vector<1x4x36xbf16> to vector<4x36xbf16>
    %cst_25 = arith.constant dense<0.000000e+00> : vector<4x256xf32>
    %108 = tpu.matmul %107, %105, %cst_25 {dimension_numbers = #tpu.dot_dimension_numbers<[1], [0], [0], [1], [0, 0, 1, 1], [], []>} : vector<4x36xbf16>, vector<36x256xbf16>, vector<4x256xf32> -> vector<4x256xf32>
    %c3_26 = arith.constant 3 : index
    %c0_27 = arith.constant 0 : index
    %c0_28 = arith.constant 0 : index
    %109 = vector.load %arg3[%c3_26, %c0_27, %c0_28] : memref<4x4x1xf32, #tpu.memory_space<vmem>>, vector<1x4x1xf32>
    %110 = vector.shape_cast %109 : vector<1x4x1xf32> to vector<4x1xf32>
    %111 = vector.broadcast %110 : vector<4x1xf32> to vector<4x256xf32>
    %112 = arith.addf %108, %111 : vector<4x256xf32>
    %cst_29 = arith.constant 0.000000e+00 : f32
    %113 = vector.broadcast %cst_29 : f32 to vector<4x256xf32>
    %114 = arith.maximumf %112, %113 : vector<4x256xf32>
    %115 = arith.addf %58, %114 : vector<4x256xf32>
    %c0_30 = arith.constant 0 : index
    %c0_31 = arith.constant 0 : index
    %c0_32 = arith.constant 0 : index
    %116 = vector.load %arg4[%c0_30, %c0_31, %c0_32] : memref<1x4x256xf32, #tpu.memory_space<vmem>>, vector<1x4x256xf32>
    %117 = vector.shape_cast %116 : vector<1x4x256xf32> to vector<4x256xf32>
    %118 = vector.shape_cast %115 : vector<4x256xf32> to vector<1x4x256xf32>
    tpu.vector_store %arg4[%c0_30, %c0_31, %c0_32], %118 {strides = array<i32>} : memref<1x4x256xf32, #tpu.memory_space<vmem>>, vector<1x4x256xf32>,
    return
  }
  func.func @transform_0(%arg0: i32) -> (i32, i32, i32) {
    %c0_i32 = arith.constant 0 : i32
    %c0_i32_0 = arith.constant 0 : i32
    %c0_i32_1 = arith.constant 0 : i32
    return %arg0, %c0_i32, %c0_i32_0 : i32, i32, i32
  }
  func.func @transform_1(%arg0: i32) -> (i32, i32, i32) {
    %c0_i32 = arith.constant 0 : i32
    %c0_i32_0 = arith.constant 0 : i32
    %c0_i32_1 = arith.constant 0 : i32
    %c0_i32_2 = arith.constant 0 : i32
    return %c0_i32, %c0_i32_0, %c0_i32_1 : i32, i32, i32
  }
  func.func @transform_2(%arg0: i32) -> (i32, i32, i32) {
    %c0_i32 = arith.constant 0 : i32
    %c0_i32_0 = arith.constant 0 : i32
    %c0_i32_1 = arith.constant 0 : i32
    %c0_i32_2 = arith.constant 0 : i32
    return %c0_i32, %c0_i32_0, %c0_i32_1 : i32, i32, i32
  }
  func.func @transform_3(%arg0: i32) -> (i32, i32, i32) {
    %c0_i32 = arith.constant 0 : i32
    %c0_i32_0 = arith.constant 0 : i32
    %c0_i32_1 = arith.constant 0 : i32
    return %arg0, %c0_i32, %c0_i32_0 : i32, i32, i32
  }
}

</mosaic_0001>

<bundles_post_ra>
// kernel: tpu_custom_call.1
= control target key start
LH: loop header
LB: loop body
LE: loop exit
PB: predicated region body
PF: predicated region fallthrough
CT: control target
= control target key end

     0   :  { %8 = vsyncpa [#allocation3], 0  ;;  %s15286_s0 = inlined_call_operand.vmem [shape: f32[2,4,256], index: 0, kind: input, shape index: {}]   ;;  %s15287_s1 = inlined_call_operand.hbm [shape: bf16[4,4,36], index: 1, kind: input, shape index: {}]   ;;  %s15288_s2 = inlined_call_operand.vmem [shape: f32[4,4,1], index: 2, kind: input, shape index: {}]   ;;  %s15289_s3 = inlined_call_operand.hbm [shape: f32[2,4,256], index: 3, kind: output, shape index: {}]  }
   0x1   :  { %9 = vsyncpa [#allocation4], 0 }
   0x2   :  { %11 = vsyncpa [#allocation4 + $0x1], 0  ;;  %s10199_s12 = smov 0   ;;  %s10201_s13 = smov 0  }
   0x3   :  { %s10203_s14 = smov 0   ;;  %s10205_s15 = smov 0  }
   0x4 LB: > { %s10220_s16 = sadd.s32 4294967295, %s10158_s15   ;;  %s9263_s17 = sadd.s32 4294967294, %s10158_s15   ;;  %s10158_s15 = sphi %s10205_s15, %s15907_s15   ;;  %s10154_s14 = sphi %s10203_s14, %s15906_s14   ;;  %s10150_s13 = sphi %s10201_s13, %s15905_s13   ;;  %s10146_s12 = sphi %s10199_s12, %s15904_s12  }
   0x5   : > { %s10224_s18 = sadd.s32 1, %s10158_s15   ;;  %s92_s19 = sadd.s32 1, %s10154_s14 }
   0x6   : > { %s89_s20 = ssub.s32 %s10158_s15, %s10224_s18  ;;  %p102_p0 = scmp.ne.s32.totalorder %s10154_s14, %s10150_s13 }
   0x7   : > { %p90_p1 = scmp.eq.s32.totalorder %s89_s20, 0  ;;  %p103_p2 = scmp.eq.s32.totalorder %s10220_s16, 1 }
   0x8   : > { %p108_p3 = scmp.ne.s32.totalorder %s10150_s13, %s10146_s12  ;;  %p109_p4 = scmp.eq.s32.totalorder %s9263_s17, 1 }
   0x9   : > { %s10235_s21 = scalar_select %p90_p1, %s10154_s14, %s92_s19  }
   0xa   : > { %p10237_p5 = por %p103_p2, %p102_p0  ;;  %p10241_p6 = por %p109_p4, %p108_p3 }
   0xb   : > { %p9264_p7 = scmp.ge.s32.totalorder %s10158_s15, 1  ;;  %p116_p8 = scmp.lt.s32.totalorder %s10158_s15, 3 }
   0xc   : > { %s15461_s23 = scalar_select %p10241_p6, 1, 0 }
   0xd   : > { %p9312_p9 = scmp.eq.s32.totalorder %s10220_s16, 0  ;;  %p10248_p10 = pnand %p9264_p7, %p116_p8 }
   0xe   : > { %s10160_s25 = smov [#allocation2]  }
   0xf   : > { %s128_s26 = sshll.u32 %s10160_s25, 4  ;;  %p9304_p11 = pneg %p10248_p10  ;;  %s129_s26 = int_to_ptr.vmem [resolvable:$true] %s128_s26 }
  0x10   : > { %s10079_s27 = scalar_lea.vmem %s129_s26, 128  ;;  %p10087_p3 = scmp.lt.s32.totalorder %s129_s26, %s129_s26 }
  0x11   : > { %p9305_p12 = pnand %p9312_p9, %p9304_p11  ;;  %p10080_p0 = scmp.ne.s32.totalorder %s129_s26, %s10079_s27 }
  0x12   : > { %p10088_p4 = scmp.lt.s32.totalorder %s10079_s27, %s10079_s27 }
  0x13   : > { %p10070_p13 = pneg %p9305_p12 }
  0x14   : > { %p10089_p6 = por %p10088_p4, %p10087_p3 }
  0x15   : > { %p10082_p1 = pnand %p10080_p0, %p10070_p13 }
  0x17   : > { %p10083_p2 = pneg %p10082_p1 }
  0x19   : > { %p10090_p7 = pnand %p10089_p6, %p10083_p2 }
  0x1b   : > { %10093 = shalt.err (!%p10090_p7)
}
  0x1c   : > { %s10161_s28 = smov 32   ;;  %s10162_s29 = smov 2  }
  0x1d   : > { %9307 = dma.hbm_to_vmem [thread:$0]  (!%p9305_p12), %s15287_s1, 128, %s129_s26, [#allocation3], %s10161_s28, %s10161_s28, %s10162_s29  }
  0x1e   : > { %155 = sbr.rel (%p10248_p10) target bundleno = 3731 (0xe93), region = 32 }
  0x23   : > { %10137 = dma.done.wait (%p9312_p9), [#allocation3], 128  }
  0x24   : > { %10139 = vsyncadd (%p9312_p9), [#allocation3], 4294967168  ;;  %p179_p8 = scmp.lt.s32.totalorder %s10220_s16, 1  ;;  %s10163_s10 = smov 80   ;;  %v10170_v1 = vmov 1983009808   ;;  %v228_v3 = vlaneseq }
  0x25   : > { %s10164_s11 = smov 112   ;;  %s10165_s17 = smov 64   ;;  %v226_v2 = vunpack.c.l.s4 %v10170_v1  ;;  %v10171_v8 = vmov 1934713408   ;;  %v15290_v33 = vmov 0.0   ;;  %vm404_vm0 = vcmask 1040384  }
  0x26   : > { %s180_s5 = scalar_select %p179_p8, %s10220_s16, 1  ;;  %v10293_v7 = vshrl.u32 %v228_v3, 7  ;;  %v243_v9 = vunpack.c.l.s4 %v10171_v8  ;;  %vm569_vm1 = vcmask 7168   ;;  %vm582_vm2 = vcmask 138240  }
  0x27   : > { %s10166_s19 = smov 96   ;;  %s10167_s20 = smov 32   ;;  %v227_v6 = vunpack.c.0.s8 %v226_v2  ;;  %vm732_vm3 = vcmask 1045504   ;;  %vm655_vm4 = vcmask 1046528   ;;  %vm2313_vm5 = vcmask 130048  }
  0x28   : > { %s9296_s6 = sshll.u32 %s180_s5, 3  ;;  %s10168_s24 = smov 48   ;;  %v244_v15 = vunpack.c.0.s8 %v243_v9  ;;  %v10310_v31 = vsub.s32 1, %v10293_v7  ;;  %vm2319_vm6 = vcmask 261120   ;;  %vm2325_vm7 = vcmask 392192  }
  0x29   : > { %s10270_s9 = scalar_lea.vmem %s15286_s0, %s9296_s6  ;;  %s10169_s25 = smov 16   ;;  %v10296_v12 = vsub.s32 %v227_v6, %v10293_v7  ;;  %vm2331_vm8 = vcmask 523264   ;;  %vm2337_vm9 = vcmask 654336   ;;  %vm2343_vm10 = vcmask 785408  }
  0x2a   : > { %v10273_v0 = vld [vmem:[%s10270_s9] sm:$0xff]  ;;  %v10304_v20 = vsub.s32 %v244_v15, %v10293_v7  ;;  %15463 = vst [vmem:[#allocation8_spill] sm:$0xff] %v10310_v31  ;;  %s10173_s26 = smov 127   ;;  %s10174_s27 = smov 1   ;;  %v10348_v15 = vsub.s32 2, %v10293_v7  ;;  %vm2349_vm11 = vcmask 916480  }
  0x2b   : > { %197 = vrot.lane.b32.xlu1 %v10273_v0, %s10163_s10  ;;  %189 = vrot.lane.b32.xlu0 %v10273_v0, %s10164_s11  ;;  %v187_v38 = vrot.slane %v10273_v0, 4  ;;  %s10175_s28 = smov 3   ;;  %s10176_s29 = smov 126   ;;  %vm2407_vm12 = vcmask 1041408   ;;  %vm2403_vm13 = vcmask 293888  }
  0x2c   : > { %15464 = vst [vmem:[#allocation9_spill] sm:$0xff] %v10348_v15  ;;  %s10178_s30 = smov [#allocation5]  }
  0x2d   : > { %s10098_s4 = sshll.u32 %s10178_s30, 4  ;;  %s10099_s4 = int_to_ptr.vmem [resolvable:$false] %s10098_s4 }
  0x2f   : > { %201 = vrot.lane.b32.xlu1 %v10273_v0, %s10165_s17  ;;  %193 = vrot.lane.b32.xlu0 %v10273_v0, %s10166_s19 }
  0x33   : > { %209 = vrot.lane.b32.xlu1 %v10273_v0, %s10167_s20  ;;  %205 = vrot.lane.b32.xlu0 %v10273_v0, %s10168_s24 }
  0x37   : > { %213 = vrot.lane.b32.xlu0 %v10273_v0, %s10169_s25 }
  0x9d   : > { %v10289_v4 = vpop.permute.xlu1 %197  ;;  %v10291_v5 = vpop.permute.xlu0 %189 }
  0x9e   : > { %v232_v13 = vcombine.low %v10291_v5, %v10289_v4  ;;  %v199_v52 = vrot.slane %v10289_v4, 4  ;;  %v191_v53 = vrot.slane %v10291_v5, 4 }
  0xa0   : > { %v239_v19 = vrot.slane %v232_v13, %v10296_v12  ;;  %v300_v63 = vcombine.low %v191_v53, %v199_v52 }
  0xa1   : > { %v202_v10 = vpop.permute.xlu1 %201  ;;  %v194_v11 = vpop.permute.xlu0 %193 }
  0xa2   : > { %v224_v14 = vcombine.low %v10273_v0, %v194_v11  ;;  %v203_v37 = vrot.slane %v202_v10, 4  ;;  %v195_v40 = vrot.slane %v194_v11, 4  ;;  %v307_v5 = vrot.slane %v300_v63, %v10296_v12 }
  0xa4   : > { %v231_v16 = vrot.slane %v224_v14, %v10296_v12  ;;  %v292_v59 = vcombine.low %v187_v38, %v195_v40 }
  0xa5   : > { %v210_v17 = vpop.permute.xlu1 %209  ;;  %v206_v18 = vpop.permute.xlu0 %205 }
  0xa6   : > { %v240_v21 = vcombine.low %v231_v16, %v239_v19  ;;  %v258_v22 = vcombine.low %v202_v10, %v210_v17  ;;  %v241_v25 = vcombine.high %v231_v16, %v239_v19  ;;  %v211_v41 = vrot.slane %v210_v17, 4 }
  0xa7   : > { %v207_v44 = vrot.slane %v206_v18, 4  ;;  %v299_v3 = vrot.slane %v292_v59, %v10296_v12 }
  0xa8   : > { %v248_v26 = vrot.slane %v240_v21, %v10304_v20  ;;  %v265_v27 = vrot.slane %v258_v22, %v10296_v12  ;;  %v255_v32 = vrot.slane %v241_v25, %v10304_v20  ;;  %v326_v60 = vcombine.low %v203_v37, %v211_v41 }
  0xa9   : > { %v214_v23 = vpop.permute.xlu0 %213  ;;  %v308_v8 = vcombine.low %v299_v3, %v307_v5  ;;  %v309_v14 = vcombine.high %v299_v3, %v307_v5 }
  0xaa   : > { %v266_v24 = vcombine.low %v206_v18, %v214_v23  ;;  %v256_v34 = vcombine.high %v248_v26, %v15290_v33  ;;  %v215_v39 = vrot.slane %v214_v23, 4  ;;  %v367_v45 = vrot.slane %v248_v26, %v10310_v31 }
  0xab   : > { %v257_v51 = vcombine.high %v255_v32, %v15290_v33  ;;  %v375_v62 = vrot.slane %v255_v32, %v10310_v31  ;;  %v333_v4 = vrot.slane %v326_v60, %v10296_v12  ;;  %v316_v10 = vrot.slane %v308_v8, %v10304_v20 }
  0xac   : > { %v273_v28 = vrot.slane %v266_v24, %v10296_v12  ;;  %v371_v48 = vrot.slane %v256_v34, %v10310_v31  ;;  %v334_v54 = vcombine.low %v207_v44, %v215_v39  ;;  %v323_v21 = vrot.slane %v309_v14, %v10304_v20 }
  0xad   : > { %v379_v61 = vrot.slane %v257_v51, %v10310_v31 }
  0xae   : > { %v274_v29 = vcombine.low %v265_v27, %v273_v28  ;;  %v275_v30 = vcombine.high %v265_v27, %v273_v28  ;;  %v341_v0 = vrot.slane %v334_v54, %v10296_v12 }
  0xb0   : > { %v282_v35 = vrot.slane %v274_v29, %v10304_v20  ;;  %v289_v36 = vrot.slane %v275_v30, %v10304_v20  ;;  %v342_v6 = vcombine.low %v333_v4, %v341_v0  ;;  %v343_v11 = vcombine.high %v333_v4, %v341_v0 }
  0xb2   : > { %v9272_v42 = vcombine.high %v248_v26, %v282_v35  ;;  %v396_v43 = vcombine.low %v248_v26, %v282_v35  ;;  %v9274_v46 = vcombine.high %v255_v32, %v289_v36  ;;  %v400_v47 = vcombine.low %v255_v32, %v289_v36 }
  0xb3   : > { %v350_v9 = vrot.slane %v342_v6, %v10304_v20  ;;  %v357_v16 = vrot.slane %v343_v11, %v10304_v20 }
  0xb4   : > { %v408_v49 = vrot.slane %v9272_v42, 7  ;;  %v405_v50 = vrot.slane %v396_v43, 7  ;;  %v10324_v57 = vrot.slane %v9274_v46, 7  ;;  %v411_v58 = vrot.slane %v400_v47, 7 }
  0xb5   : > { %v397_v13 = vcombine.low %v316_v10, %v350_v9  ;;  %v9273_v18 = vcombine.high %v316_v10, %v350_v9  ;;  %v358_v19 = vcombine.high %v350_v9, %v15290_v33  ;;  %v428_v22 = vrot.slane %v350_v9, %v10348_v15 }
  0xb6   : > { %v446_v55 = vsel %vm404_vm0, %v371_v48, %v408_v49  ;;  %v445_v56 = vsel %vm404_vm0, %v367_v45, %v405_v50  ;;  %v448_v1 = vsel %vm404_vm0, %v379_v61, %v10324_v57  ;;  %v447_v2 = vsel %vm404_vm0, %v375_v62, %v411_v58 }
  0xb7   : > { %467 = vrot.lane.b32.xlu0 %v446_v55, %s10173_s26  ;;  %461 = vrot.lane.b32.xlu1 %v445_v56, %s10173_s26  ;;  %v406_v17 = vrot.slane %v397_v13, 7  ;;  %v401_v23 = vcombine.low %v323_v21, %v357_v16  ;;  %v409_v25 = vrot.slane %v9273_v18, 7  ;;  %v432_v26 = vrot.slane %v358_v19, %v10348_v15 }
  0xb8   : > { %v9275_v30 = vcombine.high %v323_v21, %v357_v16  ;;  %v359_v32 = vcombine.high %v357_v16, %v15290_v33  ;;  %v436_v34 = vrot.slane %v357_v16, %v10348_v15 }
  0xb9   : > { %v449_v24 = vsel %vm404_vm0, %v406_v17, %v428_v22  ;;  %v407_v7 = vsel %vm404_vm0, %v405_v50, %v406_v17  ;;  %v412_v27 = vrot.slane %v401_v23, 7  ;;  %v410_v28 = vsel %vm404_vm0, %v408_v49, %v409_v25 }
  0xba   : > { %v450_v29 = vsel %vm404_vm0, %v409_v25, %v432_v26  ;;  %v415_v37 = vrot.slane %v9275_v30, 7  ;;  %v440_v38 = vrot.slane %v359_v32, %v10348_v15 }
  0xbb   : > { %479 = vrot.lane.b32.xlu0 %v448_v1, %s10173_s26  ;;  %473 = vrot.lane.b32.xlu1 %v447_v2, %s10173_s26  ;;  %v451_v35 = vsel %vm404_vm0, %v412_v27, %v436_v34  ;;  %v413_v36 = vsel %vm404_vm0, %v411_v58, %v412_v27 }
  0xbc   : > { %v416_v39 = vsel %vm404_vm0, %v10324_v57, %v415_v37  ;;  %v452_v40 = vsel %vm404_vm0, %v415_v37, %v440_v38 }
  0xbf   : > { %503 = vrot.lane.b32.xlu0 %v446_v55, %s10174_s27  ;;  %497 = vrot.lane.b32.xlu1 %v445_v56, %s10174_s27 }
  0xc3   : > { %515 = vrot.lane.b32.xlu0 %v448_v1, %s10174_s27  ;;  %509 = vrot.lane.b32.xlu1 %v447_v2, %s10174_s27 }
  0xc7   : > { %539 = vrot.lane.b32.xlu0 %v446_v55, %s10175_s28  ;;  %533 = vrot.lane.b32.xlu1 %v445_v56, %s10175_s28 }
  0xcb   : > { %551 = vrot.lane.b32.xlu0 %v448_v1, %s10175_s28  ;;  %545 = vrot.lane.b32.xlu1 %v447_v2, %s10175_s28 }
  0xcf   : > { %465 = vrot.lane.b32.xlu1 %v449_v24, %s10173_s26  ;;  %463 = vrot.lane.b32.xlu0 %v407_v7, %s10173_s26 }
  0xd3   : > { %469 = vrot.lane.b32.xlu1 %v410_v28, %s10173_s26  ;;  %471 = vrot.lane.b32.xlu0 %v450_v29, %s10173_s26 }
  0xd7   : > { %477 = vrot.lane.b32.xlu1 %v451_v35, %s10173_s26  ;;  %475 = vrot.lane.b32.xlu0 %v413_v36, %s10173_s26 }
  0xdb   : > { %481 = vrot.lane.b32.xlu1 %v416_v39, %s10173_s26  ;;  %483 = vrot.lane.b32.xlu0 %v452_v40, %s10173_s26 }
  0xdf   : > { %501 = vrot.lane.b32.xlu1 %v449_v24, %s10174_s27  ;;  %499 = vrot.lane.b32.xlu0 %v407_v7, %s10174_s27 }
  0xe3   : > { %505 = vrot.lane.b32.xlu1 %v410_v28, %s10174_s27  ;;  %507 = vrot.lane.b32.xlu0 %v450_v29, %s10174_s27 }
  0xe7   : > { %513 = vrot.lane.b32.xlu1 %v451_v35, %s10174_s27  ;;  %511 = vrot.lane.b32.xlu0 %v413_v36, %s10174_s27 }
  0xeb   : > { %517 = vrot.lane.b32.xlu1 %v416_v39, %s10174_s27  ;;  %519 = vrot.lane.b32.xlu0 %v452_v40, %s10174_s27 }
  0xef   : > { %537 = vrot.lane.b32.xlu1 %v449_v24, %s10175_s28  ;;  %535 = vrot.lane.b32.xlu0 %v407_v7, %s10175_s28 }
  0xf3   : > { %541 = vrot.lane.b32.xlu1 %v410_v28, %s10175_s28  ;;  %543 = vrot.lane.b32.xlu0 %v450_v29, %s10175_s28 }
  0xf7   : > { %549 = vrot.lane.b32.xlu1 %v451_v35, %s10175_s28  ;;  %547 = vrot.lane.b32.xlu0 %v413_v36, %s10175_s28 }
  0xfb   : > { %553 = vrot.lane.b32.xlu1 %v416_v39, %s10175_s28  ;;  %555 = vrot.lane.b32.xlu0 %v452_v40, %s10175_s28 }
 0x129   : > { %v468_v41 = vpop.permute.xlu0 %467  ;;  %v462_v42 = vpop.permute.xlu1 %461 }
 0x12d   : > { %v480_v43 = vpop.permute.xlu0 %479  ;;  %v474_v44 = vpop.permute.xlu1 %473 }
 0x131   : > { %v504_v45 = vpop.permute.xlu0 %503  ;;  %v498_v46 = vpop.permute.xlu1 %497 }
 0x132   : > { %v573_v49 = vsel %vm569_vm1, %v468_v41, %v504_v45  ;;  %v570_v50 = vsel %vm569_vm1, %v462_v42, %v498_v46 }
 0x135   : > { %v516_v47 = vpop.permute.xlu0 %515  ;;  %v510_v48 = vpop.permute.xlu1 %509 }
 0x136   : > { %v579_v55 = vsel %vm569_vm1, %v480_v43, %v516_v47  ;;  %v576_v56 = vsel %vm569_vm1, %v474_v44, %v510_v48 }
 0x139   : > { %v540_v51 = vpop.permute.xlu0 %539  ;;  %v534_v52 = vpop.permute.xlu1 %533 }
 0x13a   : > { %v10396_v53 = vsel %vm582_vm2, %v573_v49, %v540_v51  ;;  %v10399_v54 = vsel %vm582_vm2, %v570_v50, %v534_v52 }
 0x13b   : > { %603 = vrot.lane.b32.xlu1 %v10399_v54, %s10173_s26  ;;  %607 = vrot.lane.b32.xlu0 %v10396_v53, %s10173_s26  ;;  %v733_v35 = vrot.slane %v10399_v54, 2  ;;  %v738_v36 = vrot.slane %v10396_v53, 2  ;;  %v656_v42 = vrot.slane %v10399_v54, 1  ;;  %v661_v46 = vrot.slane %v10396_v53, 1 }
 0x13d   : > { %v552_v57 = vpop.permute.xlu0 %551  ;;  %v546_v58 = vpop.permute.xlu1 %545 }
 0x13e   : > { %v10408_v59 = vsel %vm582_vm2, %v579_v55, %v552_v57  ;;  %v10411_v60 = vsel %vm582_vm2, %v576_v56, %v546_v58 }
 0x13f   : > { %v825_v61 = vcombine.low %v10396_v53, %v10408_v59  ;;  %v826_v62 = vcombine.high %v10396_v53, %v10408_v59  ;;  %v809_v63 = vcombine.low %v10399_v54, %v10411_v60  ;;  %v810_v0 = vcombine.high %v10399_v54, %v10411_v60  ;;  %611 = vrot.lane.b32.xlu1 %v10411_v60, %s10173_s26 }
 0x140   : > { %615 = vrot.lane.b32.xlu0 %v10408_v59, %s10173_s26  ;;  %v743_v48 = vrot.slane %v10411_v60, 2  ;;  %v748_v49 = vrot.slane %v10408_v59, 2  ;;  %v666_v50 = vrot.slane %v10411_v60, 1 }
 0x141   : > { %v466_v1 = vpop.permute.xlu1 %465  ;;  %v464_v2 = vpop.permute.xlu0 %463  ;;  %v10426_v3 = vrot.slane %v810_v0, %v10296_v12  ;;  %v10429_v4 = vrot.slane %v826_v62, %v10296_v12  ;;  %v10432_v5 = vrot.slane %v809_v63, %v10296_v12  ;;  %v10435_v6 = vrot.slane %v825_v61, %v10296_v12 }
 0x143   : > { %627 = vrot.lane.b32.xlu1 %v10399_v54, %s10176_s29  ;;  %v873_v9 = vcombine.low %v10432_v5, %v10435_v6 }
 0x144   : > { %631 = vrot.lane.b32.xlu0 %v10396_v53, %s10176_s29 }
 0x145   : > { %v470_v13 = vpop.permute.xlu1 %469  ;;  %v472_v14 = vpop.permute.xlu0 %471 }
 0x149   : > { %v478_v16 = vpop.permute.xlu1 %477  ;;  %v476_v17 = vpop.permute.xlu0 %475 }
 0x14d   : > { %v482_v18 = vpop.permute.xlu1 %481  ;;  %v484_v19 = vpop.permute.xlu0 %483 }
 0x151   : > { %v502_v21 = vpop.permute.xlu1 %501  ;;  %v500_v22 = vpop.permute.xlu0 %499 }
 0x152   : > { %v571_v28 = vsel %vm569_vm1, %v464_v2, %v500_v22  ;;  %v572_v34 = vsel %vm569_vm1, %v466_v1, %v502_v21 }
 0x155   : > { %v506_v23 = vpop.permute.xlu1 %505  ;;  %v508_v24 = vpop.permute.xlu0 %507 }
 0x156   : > { %v574_v37 = vsel %vm569_vm1, %v470_v13, %v506_v23  ;;  %v575_v38 = vsel %vm569_vm1, %v472_v14, %v508_v24 }
 0x159   : > { %v514_v7 = vpop.permute.xlu1 %513  ;;  %v512_v25 = vpop.permute.xlu0 %511 }
 0x15a   : > { %v578_v47 = vsel %vm569_vm1, %v478_v16, %v514_v7  ;;  %v577_v51 = vsel %vm569_vm1, %v476_v17, %v512_v25 }
 0x15d   : > { %v518_v26 = vpop.permute.xlu1 %517  ;;  %v520_v27 = vpop.permute.xlu0 %519 }
 0x15e   : > { %v580_v56 = vsel %vm569_vm1, %v482_v18, %v518_v26  ;;  %v581_v57 = vsel %vm569_vm1, %v484_v19, %v520_v27 }
 0x161   : > { %v538_v29 = vpop.permute.xlu1 %537  ;;  %v536_v30 = vpop.permute.xlu0 %535 }
 0x162   : > { %v10451_v32 = vsel %vm582_vm2, %v571_v28, %v536_v30  ;;  %v585_v39 = vsel %vm582_vm2, %v572_v34, %v538_v29 }
 0x163   : > { %605 = vrot.lane.b32.xlu1 %v10451_v32, %s10173_s26  ;;  %v734_v45 = vrot.slane %v10451_v32, 2  ;;  %v659_v52 = vrot.slane %v585_v39, 1  ;;  %v736_v54 = vrot.slane %v585_v39, 2  ;;  %v657_v55 = vrot.slane %v10451_v32, 1 }
 0x165   : > { %v542_v40 = vpop.permute.xlu1 %541  ;;  %v544_v41 = vpop.permute.xlu0 %543  ;;  %v10484_v13 = vsel %vm732_vm3, %v733_v35, %v734_v45  ;;  %v10494_v19 = vsel %vm732_vm3, %v734_v45, %v736_v54  ;;  %v10498_v22 = vsel %vm655_vm4, %v657_v55, %v659_v52  ;;  %v10501_v23 = vsel %vm655_vm4, %v656_v42, %v657_v55 }
 0x166   : > { %v10463_v43 = vsel %vm582_vm2, %v574_v37, %v542_v40  ;;  %v588_v44 = vsel %vm582_vm2, %v575_v38, %v544_v41 }
 0x167   : > { %609 = vrot.lane.b32.xlu0 %v10463_v43, %s10173_s26  ;;  %v741_v58 = vrot.slane %v588_v44, 2  ;;  %v739_v63 = vrot.slane %v10463_v43, 2  ;;  %v664_v0 = vrot.slane %v588_v44, 1  ;;  %v662_v18 = vrot.slane %v10463_v43, 1 }
 0x169   : > { %v550_v61 = vpop.permute.xlu1 %549  ;;  %v548_v62 = vpop.permute.xlu0 %547  ;;  %v10504_v26 = vsel %vm732_vm3, %v738_v36, %v739_v63  ;;  %v10507_v27 = vsel %vm732_vm3, %v739_v63, %v741_v58  ;;  %v10531_v39 = vsel %vm655_vm4, %v662_v18, %v664_v0 }
 0x16a   : > { %v591_v1 = vsel %vm582_vm2, %v578_v47, %v550_v61  ;;  %v10481_v2 = vsel %vm582_vm2, %v577_v51, %v548_v62 }
 0x16b   : > { %v746_v14 = vrot.slane %v591_v1, 2  ;;  %v1421_v16 = vcombine.low %v10451_v32, %v10481_v2  ;;  %v1422_v17 = vcombine.high %v10451_v32, %v10481_v2  ;;  %613 = vrot.lane.b32.xlu1 %v10481_v2, %s10173_s26  ;;  %v744_v21 = vrot.slane %v10481_v2, 2 }
 0x16c   : > { %v669_v24 = vrot.slane %v591_v1, 1  ;;  %v667_v28 = vrot.slane %v10481_v2, 1 }
 0x16d   : > { %v554_v7 = vpop.permute.xlu1 %553  ;;  %v556_v25 = vpop.permute.xlu0 %555  ;;  %v10515_v34 = vsel %vm732_vm3, %v743_v48, %v744_v21  ;;  %v10518_v35 = vsel %vm732_vm3, %v744_v21, %v746_v14  ;;  %v10542_v45 = vrot.slane %v1421_v16, %v10296_v12  ;;  %v10662_v53 = vrot.slane %v1422_v17, %v10296_v12 }
 0x16e   : > { %v10511_v29 = vsel %vm582_vm2, %v580_v56, %v554_v7  ;;  %v594_v30 = vsel %vm582_vm2, %v581_v57, %v556_v25  ;;  %v1217_v40 = vcombine.low %v10484_v13, %v10515_v34  ;;  %v1218_v41 = vcombine.high %v10484_v13, %v10515_v34 }
 0x16f   : > { %v1437_v36 = vcombine.low %v10463_v43, %v10511_v29  ;;  %v1438_v37 = vcombine.high %v10463_v43, %v10511_v29  ;;  %v751_v38 = vrot.slane %v594_v30, 2  ;;  %617 = vrot.lane.b32.xlu0 %v10511_v29, %s10173_s26  ;;  %629 = vrot.lane.b32.xlu1 %v10451_v32, %s10176_s29  ;;  %v1829_v42 = vcombine.low %v10494_v19, %v10518_v35 }
 0x170   : > { %v1830_v44 = vcombine.high %v10494_v19, %v10518_v35  ;;  %v674_v48 = vrot.slane %v594_v30, 1  ;;  %v749_v51 = vrot.slane %v10511_v29, 2  ;;  %v10549_v52 = vrot.slane %v1217_v40, %v10296_v12 }
 0x171   : > { %v10545_v47 = vrot.slane %v1437_v36, %v10296_v12  ;;  %v10552_v54 = vrot.slane %v1218_v41, %v10296_v12  ;;  %v10555_v55 = vrot.slane %v1829_v42, %v10296_v12  ;;  %v10558_v56 = vsel %vm655_vm4, %v667_v28, %v669_v24 }
 0x172   : > { %v10567_v58 = vsel %vm732_vm3, %v748_v49, %v749_v51  ;;  %v10570_v61 = vsel %vm732_vm3, %v749_v51, %v751_v38  ;;  %v672_v62 = vrot.slane %v10511_v29, 1  ;;  %v10582_v49 = vrot.slane %v1830_v44, %v10296_v12 }
 0x173   : > { %15465 = vst [vmem:[#allocation10_spill] sm:$0xff] %v10552_v54  ;;  %v1485_v57 = vcombine.low %v10542_v45, %v10545_v47  ;;  %633 = vrot.lane.b32.xlu0 %v10463_v43, %s10176_s29  ;;  %637 = vrot.lane.b32.xlu1 %v10481_v2, %s10176_s29  ;;  %v1233_v63 = vcombine.low %v10504_v26, %v10567_v58  ;;  %v671_v42 = vrot.slane %v10408_v59, 1 }
 0x174   : > { %v1234_v0 = vcombine.high %v10504_v26, %v10567_v58  ;;  %v1845_v1 = vcombine.low %v10507_v27, %v10570_v61  ;;  %v1846_v14 = vcombine.high %v10507_v27, %v10570_v61  ;;  %15466 = vst [vmem:[#allocation11_spill] sm:$0xff] %v10582_v49  ;;  %v1589_v16 = vcombine.low %v10498_v22, %v10558_v56 }
 0x175   : > { %v1590_v21 = vcombine.high %v10498_v22, %v10558_v56  ;;  %v675_v24 = vsel %vm655_vm4, %v672_v62, %v674_v48  ;;  %v10590_v7 = vrot.slane %v1233_v63, %v10296_v12  ;;  %v668_v41 = vsel %vm655_vm4, %v666_v50, %v667_v28 }
 0x176   : > { %v10593_v25 = vrot.slane %v1234_v0, %v10296_v12  ;;  %v10596_v30 = vrot.slane %v1845_v1, %v10296_v12  ;;  %v10599_v36 = vrot.slane %v1846_v14, %v10296_v12  ;;  %v10606_v38 = vrot.slane %v1589_v16, %v10296_v12 }
 0x177   : > { %641 = vrot.lane.b32.xlu0 %v10511_v29, %s10176_s29  ;;  %785 = vrot.lane.b32.xlu1 %v10484_v13, %s10176_s29  ;;  %v1605_v40 = vcombine.low %v10531_v39, %v675_v24  ;;  %v1606_v1 = vcombine.high %v10531_v39, %v675_v24  ;;  %v977_v16 = vcombine.low %v10501_v23, %v668_v41 }
 0x178   : > { %15467 = vst [vmem:[#allocation12_spill] sm:$0xff] %v10593_v25  ;;  %15468 = vst [vmem:[#allocation13_spill] sm:$0xff] %v10599_v36  ;;  %v978_v51 = vcombine.high %v10501_v23, %v668_v41  ;;  %v10636_v48 = vrot.slane %v1438_v37, %v10296_v12  ;;  %v673_v0 = vsel %vm655_vm4, %v671_v42, %v672_v62 }
 0x179   : > { %v10631_v14 = vrot.slane %v1605_v40, %v10296_v12  ;;  %v663_v40 = vsel %vm655_vm4, %v661_v46, %v662_v18  ;;  %v10649_v28 = vrot.slane %v1590_v21, %v10296_v12  ;;  %v10652_v37 = vrot.slane %v1606_v1, %v10296_v12 }
 0x17a   : > { %v993_v43 = vcombine.low %v663_v40, %v673_v0  ;;  %v994_v46 = vcombine.high %v663_v40, %v673_v0  ;;  %v10669_v21 = vrot.slane %v977_v16, %v10296_v12  ;;  %v1486_v42 = vcombine.high %v10542_v45, %v10545_v47 }
 0x17b   : > { %787 = vrot.lane.b32.xlu0 %v10494_v19, %s10176_s29  ;;  %789 = vrot.lane.b32.xlu1 %v10504_v26, %s10176_s29  ;;  %v1653_v29 = vcombine.low %v10606_v38, %v10631_v14  ;;  %v1654_v50 = vcombine.high %v10606_v38, %v10631_v14  ;;  %v1669_v18 = vcombine.low %v10649_v28, %v10652_v37 }
 0x17c   : > { %v10678_v32 = vrot.slane %v978_v51, %v10296_v12  ;;  %v10681_v2 = vrot.slane %v993_v43, %v10296_v12  ;;  %v10684_v17 = vrot.slane %v994_v46, %v10296_v12  ;;  %v1501_v1 = vcombine.low %v10662_v53, %v10636_v48 }
 0x17d   : > { %v10791_v8 = vrot.slane %v1485_v57, %v10304_v20  ;;  %v10804_v57 = vrot.slane %v1653_v29, %v10304_v20  ;;  %v1668_v29 = vrot.slane %v1654_v50, %v10304_v20  ;;  %v1677_v45 = vrot.slane %v1669_v18, %v10304_v20 }
 0x17e   : > { %v15474_v47 = vcombine.high %v10649_v28, %v10652_v37  ;;  %v15476_v28 = vcombine.high %v10662_v53, %v10636_v48 }
 0x17f   : > { %791 = vrot.lane.b32.xlu0 %v10507_v27, %s10176_s29  ;;  %793 = vrot.lane.b32.xlu1 %v10515_v34, %s10176_s29  ;;  %15471 = vst [vmem:[#allocation16_spill] sm:$0xff] %v10791_v8  ;;  %15473 = vst [vmem:[#allocation18_spill] sm:$0xff] %v10804_v57 }
 0x180   : > { %v1684_v38 = vrot.slane %v15474_v47, %v10304_v20  ;;  %v1516_v37 = vrot.slane %v15476_v28, %v10304_v20 }
 0x183   : > { %795 = vrot.lane.b32.xlu0 %v10518_v35, %s10176_s29  ;;  %797 = vrot.lane.b32.xlu1 %v10567_v58, %s10176_s29 }
 0x187   : > { %686 = vrot.lane.b32.xlu1 %v10498_v22, %s10173_s26  ;;  %799 = vrot.lane.b32.xlu0 %v10570_v61, %s10176_s29 }
 0x18b   : > { %694 = vrot.lane.b32.xlu1 %v10558_v56, %s10173_s26  ;;  %690 = vrot.lane.b32.xlu0 %v10531_v39, %s10173_s26 }
 0x18f   : > { %710 = vrot.lane.b32.xlu1 %v10498_v22, %s10176_s29  ;;  %698 = vrot.lane.b32.xlu0 %v675_v24, %s10173_s26 }
 0x193   : > { %718 = vrot.lane.b32.xlu1 %v10558_v56, %s10176_s29  ;;  %714 = vrot.lane.b32.xlu0 %v10531_v39, %s10176_s29 }
 0x197   : > { %763 = vrot.lane.b32.xlu1 %v10494_v19, %s10173_s26  ;;  %722 = vrot.lane.b32.xlu0 %v675_v24, %s10176_s29 }
 0x19b   : > { %771 = vrot.lane.b32.xlu1 %v10518_v35, %s10173_s26  ;;  %767 = vrot.lane.b32.xlu0 %v10507_v27, %s10173_s26 }
 0x19f   : > { %684 = vrot.lane.b32.xlu1 %v10501_v23, %s10173_s26  ;;  %775 = vrot.lane.b32.xlu0 %v10570_v61, %s10173_s26 }
 0x1a3   : > { %692 = vrot.lane.b32.xlu1 %v668_v41, %s10173_s26  ;;  %688 = vrot.lane.b32.xlu0 %v663_v40, %s10173_s26 }
 0x1a7   : > { %708 = vrot.lane.b32.xlu1 %v10501_v23, %s10176_s29  ;;  %696 = vrot.lane.b32.xlu0 %v673_v0, %s10173_s26 }
 0x1ab   : > { %716 = vrot.lane.b32.xlu1 %v668_v41, %s10176_s29  ;;  %712 = vrot.lane.b32.xlu0 %v663_v40, %s10176_s29 }
 0x1ad   : > { %v10735_v19 = vpop.permute.xlu1 %603  ;;  %v10737_v22 = vpop.permute.xlu0 %607 }
 0x1af   : > { %761 = vrot.lane.b32.xlu1 %v10484_v13, %s10173_s26  ;;  %720 = vrot.lane.b32.xlu0 %v673_v0, %s10176_s29 }
 0x1b1   : > { %v10742_v27 = vpop.permute.xlu1 %611 }
 0x1b2   : > { %v841_v23 = vcombine.low %v10735_v19, %v10742_v27  ;;  %v10746_v35 = vpop.permute.xlu0 %615 }
 0x1b3   : > { %v857_v39 = vcombine.low %v10737_v22, %v10746_v35  ;;  %769 = vrot.lane.b32.xlu1 %v10515_v34, %s10173_s26  ;;  %765 = vrot.lane.b32.xlu0 %v10504_v26, %s10173_s26  ;;  %v10770_v26 = vrot.slane %v873_v9, %v10304_v20 }
 0x1b4   : > { %v10755_v13 = vrot.slane %v841_v23, %v10296_v12 }
 0x1b5   : > { %v10758_v56 = vrot.slane %v857_v39, %v10296_v12  ;;  %15469 = vst [vmem:[#allocation14_spill] sm:$0xff] %v10770_v26  ;;  %v10779_v41 = vpop.permute.xlu1 %627 }
 0x1b7   : > { %v905_v61 = vcombine.low %v10755_v13, %v10758_v56  ;;  %635 = vrot.lane.b32.xlu1 %v10411_v60, %s10176_s29  ;;  %773 = vrot.lane.b32.xlu0 %v10567_v58, %s10173_s26  ;;  %v10781_v60 = vpop.permute.xlu0 %631 }
 0x1b9   : > { %v10773_v34 = vrot.slane %v905_v61, %v10304_v20 }
 0x1bb   : > { %15470 = vst [vmem:[#allocation15_spill] sm:$0xff] %v10773_v34  ;;  %639 = vrot.lane.b32.xlu0 %v10408_v59, %s10176_s29 }
 0x1d5   : > { %v606_v58 = vpop.permute.xlu1 %605 }
 0x1d9   : > { %v610_v0 = vpop.permute.xlu0 %609 }
 0x1dd   : > { %v614_v40 = vpop.permute.xlu1 %613 }
 0x1de   : > { %v1453_v46 = vcombine.low %v606_v58, %v614_v40  ;;  %v1454_v61 = vcombine.high %v606_v58, %v614_v40 }
 0x1e0   : > { %v1461_v51 = vrot.slane %v1453_v46, %v10296_v12  ;;  %v1468_v10 = vrot.slane %v1454_v61, %v10296_v12 }
 0x1e1   : > { %v630_v23 = vpop.permute.xlu1 %629  ;;  %v618_v9 = vpop.permute.xlu0 %617 }
 0x1e2   : > { %v1469_v39 = vcombine.low %v610_v0, %v618_v9  ;;  %v1470_v16 = vcombine.high %v610_v0, %v618_v9 }
 0x1e4   : > { %v1477_v24 = vrot.slane %v1469_v39, %v10296_v12  ;;  %v1484_v44 = vrot.slane %v1470_v16, %v10296_v12 }
 0x1e5   : > { %v638_v59 = vpop.permute.xlu1 %637  ;;  %v634_v33 = vpop.permute.xlu0 %633 }
 0x1e6   : > { %v1517_v11 = vcombine.low %v1461_v51, %v1477_v24  ;;  %v1557_v58 = vcombine.low %v630_v23, %v638_v59  ;;  %v1558_v40 = vcombine.high %v630_v23, %v638_v59  ;;  %v1518_v46 = vcombine.high %v1461_v51, %v1477_v24 }
 0x1e7   : > { %v1533_v9 = vcombine.low %v1468_v10, %v1484_v44  ;;  %v1534_v62 = vcombine.high %v1468_v10, %v1484_v44  ;;  %v1500_v44 = vrot.slane %v1486_v42, %v10304_v20 }
 0x1e8   : > { %v10794_v0 = vrot.slane %v1517_v11, %v10304_v20  ;;  %v1565_v11 = vrot.slane %v1557_v58, %v10296_v12  ;;  %v1572_v51 = vrot.slane %v1558_v40, %v10296_v12  ;;  %v1532_v59 = vrot.slane %v1518_v46, %v10304_v20 }
 0x1e9   : > { %v10796_v39 = vpop.permute.xlu1 %785  ;;  %v642_v16 = vpop.permute.xlu0 %641  ;;  %v1541_v63 = vrot.slane %v1533_v9, %v10304_v20  ;;  %v1548_v9 = vrot.slane %v1534_v62, %v10304_v20 }
 0x1ea   : > { %15472 = vst [vmem:[#allocation17_spill] sm:$0xff] %v10794_v0  ;;  %v1573_v61 = vcombine.low %v634_v33, %v642_v16  ;;  %v1574_v43 = vcombine.high %v634_v33, %v642_v16  ;;  %v1509_v16 = vrot.slane %v1501_v1, %v10304_v20  ;;  %v1550_v18 = vcombine.high %v10791_v8, %v10794_v0 }
 0x1ec   : > { %v1581_v24 = vrot.slane %v1573_v61, %v10296_v12  ;;  %v1588_v23 = vrot.slane %v1574_v43, %v10296_v12 }
 0x1ed   : > { %v10812_v33 = vpop.permute.xlu1 %789  ;;  %v10814_v10 = vpop.permute.xlu0 %787 }
 0x1ee   : > { %v1621_v58 = vcombine.low %v1565_v11, %v1581_v24  ;;  %v1622_v43 = vcombine.high %v1565_v11, %v1581_v24  ;;  %v1637_v40 = vcombine.low %v1572_v51, %v1588_v23  ;;  %v1638_v46 = vcombine.high %v1572_v51, %v1588_v23 }
 0x1ef   : > { %v1551_v11 = vcombine.low %v1500_v44, %v1532_v59  ;;  %v1552_v51 = vcombine.high %v1500_v44, %v1532_v59  ;;  %v1555_v59 = vcombine.low %v1516_v37, %v1548_v9 }
 0x1f0   : > { %v10838_v50 = vrot.slane %v1621_v58, %v10304_v20  ;;  %v1636_v14 = vrot.slane %v1622_v43, %v10304_v20  ;;  %v1645_v62 = vrot.slane %v1637_v40, %v10304_v20  ;;  %v1652_v42 = vrot.slane %v1638_v46, %v10304_v20 }
 0x1f1   : > { %v10843_v1 = vpop.permute.xlu1 %793  ;;  %v10845_v61 = vpop.permute.xlu0 %791  ;;  %v1553_v58 = vcombine.low %v1509_v16, %v1541_v63  ;;  %v1554_v43 = vcombine.high %v1509_v16, %v1541_v63 }
 0x1f2   : > { %15475 = vst [vmem:[#allocation19_spill] sm:$0xff] %v10838_v50  ;;  %v1686_v23 = vcombine.high %v10838_v50, %v10804_v57  ;;  %v1687_v40 = vcombine.low %v1636_v14, %v1668_v29  ;;  %v1688_v46 = vcombine.high %v1636_v14, %v1668_v29  ;;  %v1689_v47 = vcombine.low %v1645_v62, %v1677_v45 }
 0x1f3   : > { %v1690_v15 = vcombine.high %v1645_v62, %v1677_v45  ;;  %v1691_v44 = vcombine.low %v1652_v42, %v1684_v38  ;;  %v1556_v29 = vcombine.high %v1516_v37, %v1548_v9  ;;  %v1692_v16 = vcombine.high %v1652_v42, %v1684_v38 }
 0x1f4   : > { %v10857_v31 = vpack.i.bf16 %v1686_v23, %v1550_v18  ;;  %v10863_v53 = vpack.i.bf16 %v1687_v40, %v1551_v11  ;;  %v10865_v28 = vpack.i.bf16 %v1688_v46, %v1552_v51  ;;  %v10867_v24 = vpack.i.bf16 %v1689_v47, %v1553_v58 }
 0x1f5   : > { %v10859_v0 = vpop.permute.xlu1 %797  ;;  %v10861_v48 = vpop.permute.xlu0 %795  ;;  %v10869_v8 = vpack.i.bf16 %v1690_v15, %v1554_v43  ;;  %v10871_v63 = vpack.i.bf16 %v1691_v44, %v1555_v59  ;;  %v10877_v62 = vpack.i.bf16 %v1692_v16, %v1556_v29 }
 0x1f6   : > { %15477 = vst [vmem:[#allocation20_spill] sm:$0xff] %v10865_v28  ;;  %15478 = vst [vmem:[#allocation21_spill] sm:$0xff] %v10867_v24 }
 0x1f7   : > { %15479 = vst [vmem:[#allocation22_spill] sm:$0xff] %v10869_v8  ;;  %15480 = vst [vmem:[#allocation23_spill] sm:$0xff] %v10871_v63  ;;  %v15499_v63 = vcombine.low %v10555_v55, %v10596_v30 }
 0x1f8   : > { %15482 = vst [vmem:[#allocation25_spill] sm:$0xff] %v10877_v62 }
 0x1f9   : > { %v10873_v45 = vpop.permute.xlu1 %686  ;;  %v10875_v14 = vpop.permute.xlu0 %799 }
 0x1fa   : > { %15481 = vst [vmem:[#allocation24_spill] sm:$0xff] %v10873_v45 }
 0x1fd   : > { %v10879_v18 = vpop.permute.xlu1 %694  ;;  %v10881_v11 = vpop.permute.xlu0 %690 }
 0x1fe   : > { %15483 = vst [vmem:[#allocation26_spill] sm:$0xff] %v10879_v18  ;;  %15484 = vst [vmem:[#allocation27_spill] sm:$0xff] %v10881_v11  ;;  %v1693_v38 = vcombine.low %v10873_v45, %v10879_v18  ;;  %v842_v18 = vcombine.high %v10735_v19, %v10742_v27 }
 0x200   : > { %v10905_v46 = vrot.slane %v1693_v38, %v10296_v12 }
 0x201   : > { %v10883_v51 = vpop.permute.xlu1 %710  ;;  %v10885_v23 = vpop.permute.xlu0 %698 }
 0x202   : > { %15485 = vst [vmem:[#allocation28_spill] sm:$0xff] %v10883_v51  ;;  %15486 = vst [vmem:[#allocation29_spill] sm:$0xff] %v10885_v23  ;;  %v1709_v15 = vcombine.low %v10881_v11, %v10885_v23  ;;  %v15516_v23 = vcombine.low %v10549_v52, %v10590_v7 }
 0x204   : > { %v10896_v42 = vrot.slane %v1709_v15, %v10296_v12 }
 0x205   : > { %v10889_v58 = vpop.permute.xlu1 %718  ;;  %v10891_v9 = vpop.permute.xlu0 %714 }
 0x206   : > { %15487 = vst [vmem:[#allocation30_spill] sm:$0xff] %v10889_v58  ;;  %15488 = vst [vmem:[#allocation31_spill] sm:$0xff] %v10891_v9  ;;  %v1725_v37 = vcombine.low %v10883_v51, %v10889_v58  ;;  %v1757_v59 = vcombine.low %v10905_v46, %v10896_v42 }
 0x208   : > { %v10912_v44 = vrot.slane %v1725_v37, %v10296_v12  ;;  %v10924_v57 = vrot.slane %v1757_v59, %v10304_v20 }
 0x209   : > { %v10900_v43 = vpop.permute.xlu1 %763  ;;  %v10902_v40 = vpop.permute.xlu0 %722 }
 0x20a   : > { %15489 = vst [vmem:[#allocation32_spill] sm:$0xff] %v10900_v43  ;;  %15490 = vst [vmem:[#allocation33_spill] sm:$0xff] %v10902_v40  ;;  %v1741_v47 = vcombine.low %v10891_v9, %v10902_v40 }
 0x20b   : > { %15493 = vst [vmem:[#allocation36_spill] sm:$0xff] %v10924_v57  ;;  %v10955_v57 = vrot.slane %v15499_v63, %v10304_v20  ;;  %v858_v63 = vcombine.high %v10737_v22, %v10746_v35 }
 0x20c   : > { %v10915_v29 = vrot.slane %v1741_v47, %v10296_v12 }
 0x20d   : > { %v10917_v16 = vpop.permute.xlu1 %771  ;;  %v10919_v15 = vpop.permute.xlu0 %767  ;;  %15500 = vst [vmem:[#allocation42_spill] sm:$0xff] %v10955_v57  ;;  %v856_v57 = vrot.slane %v842_v18, %v10296_v12  ;;  %v872_v19 = vrot.slane %v858_v63, %v10296_v12 }
 0x20e   : > { %15491 = vst [vmem:[#allocation34_spill] sm:$0xff] %v10917_v16  ;;  %15492 = vst [vmem:[#allocation35_spill] sm:$0xff] %v10919_v15  ;;  %v1789_v38 = vcombine.low %v10912_v44, %v10915_v29  ;;  %v1861_v37 = vcombine.low %v10900_v43, %v10917_v16  ;;  %v906_v16 = vcombine.high %v10755_v13, %v10758_v56 }
 0x20f   : > { %v921_v63 = vcombine.low %v856_v57, %v872_v19  ;;  %v922_v9 = vcombine.high %v856_v57, %v872_v19  ;;  %v15513_v13 = vcombine.low %v10426_v3, %v10429_v4  ;;  %v15514_v57 = vcombine.high %v10432_v5, %v10435_v6 }
 0x210   : > { %v10927_v50 = vrot.slane %v1789_v38, %v10304_v20  ;;  %v10940_v49 = vrot.slane %v1861_v37, %v10296_v12  ;;  %v15517_v5 = vcombine.low %v10678_v32, %v10684_v17 }
 0x211   : > { %v10931_v62 = vpop.permute.xlu1 %684  ;;  %v10933_v47 = vpop.permute.xlu0 %775  ;;  %v11019_v11 = vrot.slane %v921_v63, %v10304_v20  ;;  %v11029_v56 = vrot.slane %v15513_v13, %v10304_v20  ;;  %v11035_v19 = vrot.slane %v15514_v57, %v10304_v20  ;;  %v11056_v57 = vrot.slane %v906_v16, %v10304_v20 }
 0x212   : > { %15494 = vst [vmem:[#allocation37_spill] sm:$0xff] %v10927_v50  ;;  %15495 = vst [vmem:[#allocation38_spill] sm:$0xff] %v10931_v62  ;;  %v1877_v36 = vcombine.low %v10919_v15, %v10933_v47  ;;  %v1065_v6 = vrot.slane %v15517_v5, %v10304_v20  ;;  %v15520_v5 = vcombine.high %v10678_v32, %v10684_v17 }
 0x213   : > { %15496 = vst [vmem:[#allocation39_spill] sm:$0xff] %v10933_v47  ;;  %v938_v32 = vcombine.high %v10770_v26, %v10773_v34  ;;  %v942_v17 = vcombine.high %v11029_v56, %v11019_v11  ;;  %v940_v34 = vcombine.high %v11035_v19, %v11056_v57  ;;  %v1370_v26 = vcombine.high %v10812_v33, %v10859_v0 }
 0x214   : > { %v10943_v59 = vrot.slane %v1877_v36, %v10296_v12  ;;  %v11075_v16 = vrot.slane %v15520_v5, %v10304_v20 }
 0x215   : > { %v10945_v38 = vpop.permute.xlu1 %692  ;;  %v10947_v25 = vpop.permute.xlu0 %688 }
 0x216   : > { %15497 = vst [vmem:[#allocation40_spill] sm:$0xff] %v10945_v38  ;;  %15498 = vst [vmem:[#allocation41_spill] sm:$0xff] %v10947_v25  ;;  %v1925_v54 = vcombine.low %v10940_v49, %v10943_v59  ;;  %v1081_v58 = vcombine.low %v10931_v62, %v10945_v38 }
 0x218   : > { %v10958_v50 = vrot.slane %v1925_v54, %v10304_v20  ;;  %v10990_v35 = vrot.slane %v1081_v58, %v10296_v12 }
 0x219   : > { %v10960_v37 = vpop.permute.xlu1 %708  ;;  %v10962_v36 = vpop.permute.xlu0 %696 }
 0x21a   : > { %15501 = vst [vmem:[#allocation43_spill] sm:$0xff] %v10958_v50  ;;  %15502 = vst [vmem:[#allocation44_spill] sm:$0xff] %v10960_v37  ;;  %v1097_v45 = vcombine.low %v10947_v25, %v10962_v36  ;;  %v941_v25 = vcombine.low %v11029_v56, %v11019_v11  ;;  %v1353_v56 = vcombine.low %v10796_v39, %v10843_v1 }
 0x21b   : > { %15503 = vst [vmem:[#allocation45_spill] sm:$0xff] %v10962_v36  ;;  %15509 = vst [vmem:[#allocation51_spill] sm:$0xff] %v10990_v35  ;;  %v939_v36 = vcombine.low %v11035_v19, %v11056_v57 }
 0x21c   : > { %v10979_v24 = vrot.slane %v1097_v45, %v10296_v12 }
 0x21d   : > { %v10972_v51 = vpop.permute.xlu1 %716  ;;  %v10974_v54 = vpop.permute.xlu0 %712 }
 0x21e   : > { %15504 = vst [vmem:[#allocation46_spill] sm:$0xff] %v10972_v51  ;;  %15505 = vst [vmem:[#allocation47_spill] sm:$0xff] %v10974_v54  ;;  %v1113_v8 = vcombine.low %v10960_v37, %v10972_v51  ;;  %v1145_v45 = vcombine.low %v10990_v35, %v10979_v24  ;;  %v11047_v51 = vrot.slane %v15516_v23, %v10304_v20 }
 0x21f   : > { %15506 = vst [vmem:[#allocation48_spill] sm:$0xff] %v10979_v24 }
 0x220   : > { %v10997_v62 = vrot.slane %v1113_v8, %v10296_v12  ;;  %v11011_v40 = vrot.slane %v1145_v45, %v10304_v20  ;;  %v15515_v45 = vcombine.high %v10426_v3, %v10429_v4  ;;  %v11059_v3 = vrot.slane %v922_v9, %v10304_v20 }
 0x221   : > { %v10985_v27 = vpop.permute.xlu1 %761  ;;  %v10987_v22 = vpop.permute.xlu0 %720  ;;  %v15518_v4 = vcombine.low %v10669_v21, %v10681_v2  ;;  %v1981_v9 = vcombine.low %v10845_v61, %v10875_v14 }
 0x222   : > { %15507 = vst [vmem:[#allocation49_spill] sm:$0xff] %v10985_v27  ;;  %15508 = vst [vmem:[#allocation50_spill] sm:$0xff] %v10987_v22  ;;  %v1129_v50 = vcombine.low %v10974_v54, %v10987_v22  ;;  %v11041_v63 = vrot.slane %v15515_v45, %v10304_v20  ;;  %v15519_v45 = vcombine.high %v10669_v21, %v10681_v2 }
 0x223   : > { %15510 = vst [vmem:[#allocation52_spill] sm:$0xff] %v10997_v62  ;;  %v11065_v23 = vrot.slane %v15518_v4, %v10304_v20  ;;  %v1989_v15 = vrot.slane %v1981_v9, %v10296_v12 }
 0x224   : > { %v11000_v18 = vrot.slane %v1129_v50, %v10296_v12  ;;  %v1056_v35 = vrot.slane %v15519_v45, %v10304_v20  ;;  %v943_v11 = vcombine.low %v11041_v63, %v11059_v3 }
 0x225   : > { %v11002_v38 = vpop.permute.xlu1 %769  ;;  %v11004_v43 = vpop.permute.xlu0 %765 }
 0x226   : > { %15511 = vst [vmem:[#allocation53_spill] sm:$0xff] %v11000_v18  ;;  %15512 = vst [vmem:[#allocation54_spill] sm:$0xff] %v11002_v38  ;;  %v1177_v58 = vcombine.low %v10997_v62, %v11000_v18  ;;  %v1249_v50 = vcombine.low %v10985_v27, %v11002_v38 }
 0x228   : > { %v11014_v8 = vrot.slane %v1177_v58, %v10304_v20  ;;  %v11080_v24 = vrot.slane %v1249_v50, %v10296_v12  ;;  %v1369_v50 = vcombine.low %v10812_v33, %v10859_v0  ;;  %v1982_v0 = vcombine.high %v10845_v61, %v10875_v14 }
 0x229   : > { %v11023_v37 = vpop.permute.xlu0 %773  ;;  %v636_v58 = vpop.permute.xlu1 %635 }
 0x22a   : > { %v1265_v13 = vcombine.low %v11004_v43, %v11023_v37  ;;  %v945_v21 = vcombine.low %v10779_v41, %v636_v58  ;;  %v946_v2 = vcombine.high %v10779_v41, %v636_v58 }
 0x22c   : > { %v11083_v4 = vrot.slane %v1265_v13, %v10296_v12  ;;  %v1965_v13 = vcombine.low %v10814_v10, %v10861_v48  ;;  %v953_v28 = vrot.slane %v945_v21, %v10296_v12 }
 0x22d   : > { %v640_v45 = vpop.permute.xlu0 %639 }
 0x22e   : > { %v1313_v5 = vcombine.low %v11080_v24, %v11083_v4  ;;  %v961_v41 = vcombine.low %v10781_v60, %v640_v45  ;;  %v962_v58 = vcombine.high %v10781_v60, %v640_v45  ;;  %v960_v60 = vrot.slane %v946_v2, %v10296_v12 }
 0x22f   : > { %v1377_v45 = vrot.slane %v1369_v50, %v10296_v12  ;;  %v1973_v27 = vrot.slane %v1965_v13, %v10296_v12  ;;  %v1354_v2 = vcombine.high %v10796_v39, %v10843_v1  ;;  %v944_v50 = vcombine.high %v11041_v63, %v11059_v3 }
 0x230   : > { %v11113_v47 = vrot.slane %v1313_v5, %v10304_v20  ;;  %v969_v19 = vrot.slane %v961_v41, %v10296_v12  ;;  %v976_v57 = vrot.slane %v962_v58, %v10296_v12  ;;  %v1361_v41 = vrot.slane %v1353_v56, %v10296_v12 }
 0x231   : > { %v1997_v58 = vcombine.low %v1973_v27, %v1989_v15  ;;  %v1966_v39 = vcombine.high %v10814_v10, %v10861_v48  ;;  %v1996_v1 = vrot.slane %v1982_v0, %v10296_v12 }
 0x232   : > { %v1009_v9 = vcombine.low %v953_v28, %v969_v19  ;;  %v1010_v5 = vcombine.high %v953_v28, %v969_v19  ;;  %v1025_v38 = vcombine.low %v960_v60, %v976_v57  ;;  %v1026_v21 = vcombine.high %v960_v60, %v976_v57 }
 0x233   : > { %v1384_v60 = vrot.slane %v1370_v26, %v10296_v12  ;;  %v1385_v19 = vcombine.low %v1361_v41, %v1377_v45  ;;  %v1998_v57 = vcombine.high %v1973_v27, %v1989_v15  ;;  %v11146_v10 = vrot.slane %v1997_v58, %v10304_v20 }
 0x234   : > { %v1040_v13 = vrot.slane %v1026_v21, %v10304_v20  ;;  %v1033_v61 = vrot.slane %v1025_v38, %v10304_v20  ;;  %v11133_v14 = vrot.slane %v1009_v9, %v10304_v20  ;;  %v1024_v28 = vrot.slane %v1010_v5, %v10304_v20 }
 0x235   : > { %v1980_v48 = vrot.slane %v1966_v39, %v10296_v12  ;;  %v1386_v22 = vcombine.high %v1361_v41, %v1377_v45  ;;  %v11154_v15 = vrot.slane %v1385_v19, %v10304_v20  ;;  %v1368_v27 = vrot.slane %v1354_v2, %v10296_v12 }
 0x236   : > { %v1077_v56 = vcombine.low %v1033_v61, %v1065_v6  ;;  %v1074_v63 = vcombine.high %v11133_v14, %v11065_v23  ;;  %v1073_v38 = vcombine.low %v11133_v14, %v11065_v23  ;;  %v1078_v3 = vcombine.high %v1033_v61, %v1065_v6 }
 0x237   : > { %v1075_v9 = vcombine.low %v1024_v28, %v1056_v35  ;;  %v1076_v21 = vcombine.high %v1024_v28, %v1056_v35  ;;  %v1079_v5 = vcombine.low %v1040_v13, %v11075_v16  ;;  %v2013_v35 = vcombine.low %v1980_v48, %v1996_v1 }
 0x238   : > { %v9380_v26 = vpack.i.bf16 %v1077_v56, %v941_v25  ;;  %v9365_v33 = vpack.i.bf16 %v1074_v63, %v938_v32  ;;  %v9385_v62 = vpack.i.bf16 %v1078_v3, %v942_v17  ;;  %v1080_v25 = vcombine.high %v1040_v13, %v11075_v16 }
 0x239   : > { %v9370_v0 = vpack.i.bf16 %v1075_v9, %v939_v36  ;;  %v9375_v18 = vpack.i.bf16 %v1076_v21, %v940_v34  ;;  %v11149_v54 = vpack.i.bf16 %v1079_v5, %v943_v11  ;;  %v15521_v6 = vmov 0.0   ;;  %v15524_v21 = vld [vmem:[#allocation50_spill] sm:$0xff]  ;;  %v15525_v5 = vld [vmem:[#allocation47_spill] sm:$0xff] }
 0x23a   : > { %9381 = vrot.lane.b32.xlu1 %v9380_v26, %s10165_s17  ;;  %9366 = vrot.lane.b32.xlu0 %v9365_v33, %s10169_s25  ;;  %v2029_v32 = vcombine.high %v11146_v10, %v15521_v6  ;;  %v11161_v34 = vrot.slane %v1998_v57, %v10304_v20  ;;  %v11163_v36 = vpack.i.bf16 %v1080_v25, %v944_v50  ;;  %v15530_v25 = vld [vmem:[#allocation20_spill] sm:$0xff] }
 0x23b   : > { %v1401_v17 = vcombine.low %v1368_v27, %v1384_v60  ;;  %v1417_v11 = vcombine.high %v11154_v15, %v15521_v6  ;;  %v11170_v16 = vrot.slane %v1386_v22, %v10304_v20  ;;  %v11173_v45 = vrot.slane %v2013_v35, %v10304_v20  ;;  %v15532_v35 = vld [vmem:[#allocation35_spill] sm:$0xff] }
 0x23c   : > { %v2030_v2 = vcombine.high %v11161_v34, %v15521_v6  ;;  %v1926_v22 = vcombine.high %v10940_v49, %v10943_v59  ;;  %v1402_v13 = vcombine.high %v1368_v27, %v1384_v60  ;;  %v1790_v61 = vcombine.high %v10912_v44, %v10915_v29  ;;  %v15531_v27 = vld [vmem:[#allocation39_spill] sm:$0xff] }
 0x23d   : > { %v9430_v33 = vpack.i.bf16 %v2029_v32, %v1417_v11  ;;  %v11178_v41 = vrot.slane %v1401_v17, %v10304_v20  ;;  %v2031_v50 = vcombine.high %v11173_v45, %v15521_v6  ;;  %v2014_v28 = vcombine.high %v1980_v48, %v1996_v1 }
 0x23e   : > { %9386 = vrot.lane.b32.xlu1 %v9385_v62, %s10163_s10  ;;  %9371 = vrot.lane.b32.xlu0 %v9370_v0, %s10167_s20  ;;  %v1418_v62 = vcombine.high %v11170_v16, %v15521_v6  ;;  %v1758_v49 = vcombine.high %v10905_v46, %v10896_v42  ;;  %v11198_v59 = vrot.slane %v1926_v22, %v10304_v20 }
 0x23f   : > { %v1346_v60 = vcombine.high %v11047_v51, %v11113_v47  ;;  %v11203_v44 = vrot.slane %v1402_v13, %v10304_v20  ;;  %v11206_v29 = vrot.slane %v1790_v61, %v10304_v20  ;;  %v1210_v42 = vcombine.high %v11011_v40, %v11014_v8 }
 0x240   : > { %v9435_v58 = vpack.i.bf16 %v2030_v2, %v1418_v62  ;;  %v11220_v46 = vrot.slane %v2014_v28, %v10304_v20  ;;  %v11223_v1 = vrot.slane %v1758_v49, %v10304_v20  ;;  %v15523_v57 = vcombine.high %v10549_v52, %v10590_v7  ;;  %v15533_v52 = vld [vmem:[#allocation45_spill] sm:$0xff]  ;;  %v15535_v2 = vld [vmem:[#allocation48_spill] sm:$0xff]  ;;  %v15536_v62 = vld [vmem:[#allocation51_spill] sm:$0xff] }
 0x241   : > { %v9450_v63 = vpack.i.bf16 %v1346_v60, %v1210_v42  ;;  %v1420_v3 = vcombine.high %v11203_v44, %v15521_v6  ;;  %v1130_v26 = vcombine.high %v15525_v5, %v15524_v21  ;;  %v1878_v32 = vcombine.high %v15532_v35, %v15531_v27  ;;  %v15534_v7 = vld [vmem:[#allocation41_spill] sm:$0xff]  ;;  %v15540_v49 = vld [vmem:[#allocation27_spill] sm:$0xff]  ;;  %v15546_v21 = vld [vmem:[#allocation38_spill] sm:$0xff] }
 0x242   : > { %9431 = vrot.lane.b32.xlu1 %v9430_v33, %s10169_s25  ;;  %9376 = vrot.lane.b32.xlu0 %v9375_v18, %s10168_s24  ;;  %v1419_v18 = vcombine.high %v11178_v41, %v15521_v6  ;;  %v11239_v9 = vrot.slane %v15523_v57, %v10304_v20  ;;  %v1098_v17 = vcombine.high %v15534_v7, %v15533_v52  ;;  %v15539_v28 = vld [vmem:[#allocation29_spill] sm:$0xff]  ;;  %v15545_v57 = vld [vmem:[#allocation40_spill] sm:$0xff] }
 0x243   : > { %v2032_v33 = vcombine.high %v11220_v46, %v15521_v6  ;;  %v1146_v22 = vcombine.high %v15536_v62, %v15535_v2  ;;  %v15541_v60 = vld [vmem:[#allocation33_spill] sm:$0xff]  ;;  %v1082_v5 = vcombine.high %v15546_v21, %v15545_v57  ;;  %v1892_v27 = vrot.slane %v1878_v32, %v10296_v12  ;;  %v15551_v2 = vld [vmem:[#allocation24_spill] sm:$0xff] }
 0x244   : > { %v9440_v19 = vpack.i.bf16 %v2031_v50, %v1419_v18  ;;  %v15538_v50 = vld [vmem:[#allocation44_spill] sm:$0xff]  ;;  %v11290_v35 = vrot.slane %v1098_v17, %v10296_v12 }
 0x245   : > { %v15554_v57 = vld [vmem:[#allocation12_spill] sm:$0xff] }
 0x246   : > { %9436 = vrot.lane.b32.xlu1 %v9435_v58, %s10168_s24  ;;  %9391 = vrot.lane.b32.xlu0 %v10857_v31, %s10169_s25  ;;  %v15522_v31 = vcombine.high %v10555_v55, %v10596_v30  ;;  %v1266_v55 = vcombine.high %v11004_v43, %v11023_v37  ;;  %v1314_v30 = vcombine.high %v11080_v24, %v11083_v4  ;;  %v15526_v43 = vld [vmem:[#allocation53_spill] sm:$0xff]  ;;  %v15527_v37 = vld [vmem:[#allocation52_spill] sm:$0xff]  ;;  %v15528_v24 = vld [vmem:[#allocation54_spill] sm:$0xff] }
 0x247   : > { %v1178_v48 = vcombine.high %v15527_v37, %v15526_v43  ;;  %v15529_v4 = vld [vmem:[#allocation49_spill] sm:$0xff]  ;;  %v15537_v58 = vld [vmem:[#allocation46_spill] sm:$0xff]  ;;  %v11275_v43 = vrot.slane %v1130_v26, %v10296_v12  ;;  %v9465_v26 = vpack.i.bf16 %v2032_v33, %v1420_v3  ;;  %v11307_v3 = vrot.slane %v1082_v5, %v10296_v12 }
 0x248   : > { %v11212_v39 = vrot.slane %v15522_v31, %v10304_v20  ;;  %v1250_v0 = vcombine.high %v15529_v4, %v15528_v24  ;;  %v1114_v13 = vcombine.high %v15538_v50, %v15537_v58  ;;  %v11261_v61 = vrot.slane %v1266_v55, %v10296_v12  ;;  %v15542_v31 = vld [vmem:[#allocation31_spill] sm:$0xff]  ;;  %v15547_v37 = vld [vmem:[#allocation21_spill] sm:$0xff]  ;;  %v15548_v24 = vld [vmem:[#allocation30_spill] sm:$0xff] }
 0x249   : > { %v11264_v18 = vrot.slane %v1314_v30, %v10304_v20  ;;  %v1742_v42 = vcombine.high %v15542_v31, %v15541_v60  ;;  %v11278_v55 = vrot.slane %v1178_v48, %v10304_v20  ;;  %v15549_v4 = vld [vmem:[#allocation28_spill] sm:$0xff]  ;;  %v11293_v48 = vrot.slane %v1146_v22, %v10304_v20  ;;  %v15552_v22 = vld [vmem:[#allocation22_spill] sm:$0xff] }
 0x24a   : > { %9441 = vrot.lane.b32.xlu1 %v9440_v19, %s10163_s10  ;;  %9396 = vrot.lane.b32.xlu0 %v10863_v53, %s10167_s20  ;;  %v1959_v56 = vcombine.low %v11212_v39, %v11198_v59  ;;  %v1823_v53 = vcombine.low %v11223_v1, %v11206_v29  ;;  %v1710_v19 = vcombine.high %v15540_v49, %v15539_v28 }
 0x24b   : > { %v11281_v30 = vrot.slane %v1250_v0, %v10296_v12  ;;  %v11296_v0 = vrot.slane %v1114_v13, %v10296_v12  ;;  %v1348_v7 = vcombine.high %v11239_v9, %v11264_v18  ;;  %v1756_v32 = vrot.slane %v1742_v42, %v10296_v12 }
 0x24c   : > { %v9455_v11 = vpack.i.bf16 %v1959_v56, %v1823_v53  ;;  %v15543_v56 = vld [vmem:[#allocation34_spill] sm:$0xff]  ;;  %v1212_v58 = vcombine.high %v11293_v48, %v11278_v55  ;;  %v1724_v50 = vrot.slane %v1710_v19, %v10296_v12  ;;  %v1161_v49 = vcombine.low %v11307_v3, %v11290_v35 }
 0x24d   : > { %v1329_v52 = vcombine.low %v11281_v30, %v11261_v61  ;;  %v1193_v33 = vcombine.low %v11296_v0, %v11275_v43  ;;  %v9415_v42 = vpack.i.bf16 %v11161_v34, %v11170_v16  ;;  %v15553_v19 = vld [vmem:[#allocation10_spill] sm:$0xff]  ;;  %v9420_v34 = vpack.i.bf16 %v11173_v45, %v11178_v41  ;;  %v15559_v41 = vld [vmem:[#allocation43_spill] sm:$0xff] }
 0x24e   : > { %9451 = vrot.lane.b32.xlu1 %v9450_v63, %s10169_s25  ;;  %9401 = vrot.lane.b32.xlu0 %v15530_v25, %s10168_s24  ;;  %v15544_v63 = vld [vmem:[#allocation32_spill] sm:$0xff]  ;;  %v1726_v25 = vcombine.high %v15549_v4, %v15548_v24  ;;  %v9475_v31 = vpack.i.bf16 %v1348_v7, %v1212_v58  ;;  %v15555_v21 = vcombine.low %v15553_v19, %v15554_v57 }
 0x24f   : > { %v1862_v53 = vcombine.high %v15544_v63, %v15543_v56  ;;  %v1337_v60 = vrot.slane %v1329_v52, %v10304_v20  ;;  %v1169_v4 = vrot.slane %v1161_v49, %v10304_v20  ;;  %v15557_v52 = vld [vmem:[#allocation13_spill] sm:$0xff]  ;;  %v9425_v45 = vpack.i.bf16 %v11220_v46, %v11203_v44 }
 0x250   : > { %v1740_v13 = vrot.slane %v1726_v25, %v10296_v12  ;;  %v1305_v5 = vrot.slane %v15555_v21, %v10304_v20 }
 0x251   : > { %v1876_v17 = vrot.slane %v1862_v53, %v10296_v12  ;;  %v1201_v53 = vrot.slane %v1193_v33, %v10304_v20 }
 0x252   : > { %9456 = vrot.lane.b32.xlu1 %v9455_v11, %s10167_s20  ;;  %9406 = vrot.lane.b32.xlu0 %v15547_v37, %s10165_s17  ;;  %v15550_v11 = vld [vmem:[#allocation26_spill] sm:$0xff]  ;;  %v1805_v63 = vcombine.low %v1740_v13, %v1756_v32  ;;  %v1349_v16 = vcombine.low %v1305_v5, %v1337_v60  ;;  %v1350_v46 = vcombine.high %v1305_v5, %v1337_v60 }
 0x253   : > { %v1694_v62 = vcombine.high %v15551_v2, %v15550_v11  ;;  %v1941_v28 = vcombine.low %v1876_v17, %v1892_v27  ;;  %v1213_v2 = vcombine.low %v1169_v4, %v1201_v53  ;;  %v1942_v33 = vcombine.high %v1876_v17, %v1892_v27 }
 0x254   : > { %v1813_v25 = vrot.slane %v1805_v63, %v10304_v20  ;;  %v15562_v63 = vld [vmem:[#allocation36_spill] sm:$0xff]  ;;  %v1960_v60 = vcombine.high %v11212_v39, %v11198_v59  ;;  %v1824_v59 = vcombine.high %v11223_v1, %v11206_v29 }
 0x255   : > { %v1708_v56 = vrot.slane %v1694_v62, %v10296_v12  ;;  %v1949_v24 = vrot.slane %v1941_v28, %v10304_v20  ;;  %v9500_v58 = vpack.i.bf16 %v1349_v16, %v1213_v2  ;;  %v15560_v28 = vld [vmem:[#allocation42_spill] sm:$0xff]  ;;  %v1956_v27 = vrot.slane %v1942_v33, %v10304_v20 }
 0x256   : > { %9466 = vrot.lane.b32.xlu1 %v9465_v26, %s10164_s11  ;;  %9411 = vrot.lane.b32.xlu0 %v15552_v22, %s10163_s10  ;;  %v15556_v26 = vld [vmem:[#allocation11_spill] sm:$0xff]  ;;  %v1958_v49 = vcombine.high %v15560_v28, %v15559_v41 }
 0x257   : > { %v1773_v37 = vcombine.low %v1708_v56, %v1724_v50  ;;  %v15558_v7 = vcombine.low %v15556_v26, %v15557_v52  ;;  %v15563_v16 = vcombine.high %v15556_v26, %v15557_v52  ;;  %v9470_v26 = vpack.i.bf16 %v1960_v60, %v1824_v59 }
 0x259   : > { %v1917_v11 = vrot.slane %v15558_v7, %v10304_v20  ;;  %v1781_v62 = vrot.slane %v1773_v37, %v10304_v20  ;;  %v1330_v37 = vcombine.high %v11281_v30, %v11261_v61  ;;  %v1924_v7 = vrot.slane %v15563_v16, %v10304_v20 }
 0x25a   : > { %9476 = vrot.lane.b32.xlu1 %v9475_v31, %s10168_s24  ;;  %9416 = vrot.lane.b32.xlu0 %v9415_v42, %s10167_s20  ;;  %v1806_v31 = vcombine.high %v1740_v13, %v1756_v32  ;;  %v1347_v32 = vcombine.low %v11239_v9, %v11264_v18  ;;  %v1214_v61 = vcombine.high %v1169_v4, %v1201_v53 }
 0x25b   : > { %v1962_v22 = vcombine.high %v1917_v11, %v1949_v24  ;;  %v1826_v42 = vcombine.high %v1781_v62, %v1813_v25  ;;  %v1211_v30 = vcombine.low %v11293_v48, %v11278_v55  ;;  %v1963_v18 = vcombine.low %v1924_v7, %v1956_v27 }
 0x25c   : > { %v1820_v13 = vrot.slane %v1806_v31, %v10304_v20  ;;  %v1344_v5 = vrot.slane %v1330_v37, %v10304_v20  ;;  %v15564_v53 = vcombine.high %v15553_v19, %v15554_v57  ;;  %v1961_v39 = vcombine.low %v1917_v11, %v1949_v24  ;;  %v15565_v11 = vld [vmem:[#allocation23_spill] sm:$0xff] }
 0x25d   : > { %v9505_v17 = vpack.i.bf16 %v1962_v22, %v1826_v42  ;;  %v1825_v57 = vcombine.low %v1781_v62, %v1813_v25  ;;  %v1964_v22 = vcombine.high %v1924_v7, %v1956_v27  ;;  %v15566_v62 = vld [vmem:[#allocation25_spill] sm:$0xff] }
 0x25e   : > { %9491 = vrot.lane.b32.xlu1 %v11149_v54, %s10166_s19  ;;  %9421 = vrot.lane.b32.xlu0 %v9420_v34, %s10165_s17  ;;  %v15561_v54 = vld [vmem:[#allocation37_spill] sm:$0xff]  ;;  %v1774_v34 = vcombine.high %v1708_v56, %v1724_v50  ;;  %v1194_v50 = vcombine.high %v11296_v0, %v11275_v43  ;;  %v1162_v56 = vcombine.high %v11307_v3, %v11290_v35 }
 0x25f   : > { %v1822_v21 = vcombine.high %v15562_v63, %v15561_v54  ;;  %v9510_v43 = vpack.i.bf16 %v1350_v46, %v1214_v61  ;;  %v9460_v0 = vpack.i.bf16 %v1347_v32, %v1211_v30  ;;  %v1312_v4 = vrot.slane %v15564_v53, %v10304_v20 }
 0x260   : > { %v1788_v9 = vrot.slane %v1774_v34, %v10304_v20  ;;  %v1208_v55 = vrot.slane %v1194_v50, %v10304_v20  ;;  %v1176_v35 = vrot.slane %v1162_v56, %v10304_v20  ;;  %v9480_v33 = vpack.i.bf16 %v1961_v39, %v1825_v57 }
 0x261   : > { %v9445_v44 = vpack.i.bf16 %v1958_v49, %v1822_v21  ;;  %v1351_v52 = vcombine.low %v1312_v4, %v1344_v5  ;;  %v1352_v24 = vcombine.high %v1312_v4, %v1344_v5  ;;  %v2397_v49 = vld [vmem:[%s15288_s2] sm:$0xf] }
 0x262   : > { %9501 = vrot.lane.b32.xlu1 %v9500_v58, %s10165_s17  ;;  %9426 = vrot.lane.b32.xlu0 %v9425_v45, %s10166_s19  ;;  %v1827_v48 = vcombine.low %v1788_v9, %v1820_v13  ;;  %v1215_v19 = vcombine.low %v1176_v35, %v1208_v55  ;;  %v1828_v29 = vcombine.high %v1788_v9, %v1820_v13  ;;  %v15344_v45 = vmov 0  }
 0x263   : > { %v1216_v58 = vcombine.high %v1176_v35, %v1208_v55  ;;  %2446 = vmatprep.mubr.bf16.mxu0 %v15344_v45  ;;  %9540 = vset.pattern.permute.xlu0 %v15344_v45 }
 0x264   : > { %v9515_v3 = vpack.i.bf16 %v1963_v18, %v1827_v48  ;;  %v9520_v2 = vpack.i.bf16 %v1351_v52, %v1215_v19  ;;  %v9525_v1 = vpack.i.bf16 %v1964_v22, %v1828_v29  ;;  %4671 = vmatprep.mubr.bf16.mxu1 %v15344_v45  ;;  %9716 = vset.pattern.permute.xlu1 %v15344_v45  ;;  %v15567_v22 = vld [vmem:[#allocation14_spill] sm:$0xff]  ;;  %v15568_v29 = vld [vmem:[#allocation15_spill] sm:$0xff] }
 0x265   : > { %v9530_v25 = vpack.i.bf16 %v1352_v24, %v1216_v58 }
 0x266   : > { %9506 = vrot.lane.b32.xlu1 %v9505_v17, %s10163_s10  ;;  %9446 = vrot.lane.b32.xlu0 %v9445_v44, %s10169_s25 }
 0x26a   : > { %9511 = vrot.lane.b32.xlu1 %v9510_v43, %s10163_s10  ;;  %9461 = vrot.lane.b32.xlu0 %v9460_v0, %s10167_s20 }
 0x26e   : > { %9516 = vrot.lane.b32.xlu1 %v9515_v3, %s10166_s19  ;;  %9471 = vrot.lane.b32.xlu0 %v9470_v26, %s10168_s24 }
 0x272   : > { %9521 = vrot.lane.b32.xlu1 %v9520_v2, %s10166_s19  ;;  %9481 = vrot.lane.b32.xlu0 %v9480_v33, %s10165_s17 }
 0x276   : > { %9526 = vrot.lane.b32.xlu1 %v9525_v1, %s10164_s11  ;;  %9486 = vrot.lane.b32.xlu0 %v15565_v11, %s10166_s19  ;;  %v15569_v1 = vcombine.low %v15567_v22, %v15568_v29  ;;  %v15570_v29 = vld [vmem:[#allocation19_spill] sm:$0xff] }
 0x27a   : > { %9531 = vrot.lane.b32.xlu1 %v9530_v25, %s10164_s11  ;;  %9496 = vrot.lane.b32.xlu0 %v15566_v62, %s10164_s11 }
 0x27e   : > { %9536 = vrot.lane.b32.xlu1 %v11163_v36, %s10164_s11  ;;  %2400 = vperm.xlu0 %9540, %v2397_v49  }
 0x2ac   : > { %v11403_v31 = vpop.permute.xlu1 %9381  ;;  %v9367_v42 = vpop.permute.xlu0 %9366 }
 0x2ad   : > { %v9369_v53 = vunpack.i.h.bf16 %v9367_v42  ;;  %v9368_v4 = vunpack.i.l.bf16 %v9367_v42 }
 0x2af   : > { %v2314_v24 = vsel %vm2313_vm5, %v15569_v1, %v9368_v4  ;;  %v2315_v11 = vsel %vm2313_vm5, %v1073_v38, %v9369_v53  ;;  %v15571_v1 = vld [vmem:[#allocation18_spill] sm:$0xff] }
 0x2b0   : > { %v11405_v21 = vpop.permute.xlu1 %9386  ;;  %v9372_v34 = vpop.permute.xlu0 %9371 }
 0x2b1   : > { %v9374_v59 = vunpack.i.h.bf16 %v9372_v34  ;;  %v9373_v39 = vunpack.i.l.bf16 %v9372_v34  ;;  %v9389_v53 = vunpack.i.h.bf16 %v11405_v21 }
 0x2b3   : > { %v2320_v62 = vsel %vm2319_vm6, %v2314_v24, %v9373_v39  ;;  %v2321_v49 = vsel %vm2319_vm6, %v2315_v11, %v9374_v59  ;;  %v9388_v39 = vunpack.i.l.bf16 %v11405_v21  ;;  %v15572_v24 = vcombine.low %v15570_v29, %v15571_v1 }
 0x2b4   : > { %v9432_v27 = vpop.permute.xlu1 %9431  ;;  %v9377_v17 = vpop.permute.xlu0 %9376 }
 0x2b5   : > { %v9434_v30 = vunpack.i.h.bf16 %v9432_v27  ;;  %v9433_v9 = vunpack.i.l.bf16 %v9432_v27  ;;  %v9379_v19 = vunpack.i.h.bf16 %v9377_v17 }
 0x2b7   : > { %v2359_v43 = vsel %vm2313_vm5, %v11146_v10, %v9434_v30  ;;  %v2318_v0 = vsel %vm2313_vm5, %v11154_v15, %v9433_v9  ;;  %v9378_v10 = vunpack.i.l.bf16 %v9377_v17  ;;  %v2327_v30 = vsel %vm2325_vm7, %v2321_v49, %v9379_v19  ;;  %v15574_v49 = vld [vmem:[#allocation17_spill] sm:$0xff] }
 0x2b8   : > { %v9437_v37 = vpop.permute.xlu1 %9436  ;;  %v11407_v44 = vpop.permute.xlu0 %9391 }
 0x2b9   : > { %v9439_v35 = vunpack.i.h.bf16 %v9437_v37  ;;  %v9438_v3 = vunpack.i.l.bf16 %v9437_v37  ;;  %v2326_v37 = vsel %vm2325_vm7, %v2320_v62, %v9378_v10  ;;  %v9394_v4 = vunpack.i.h.bf16 %v11407_v44  ;;  %v15573_v62 = vld [vmem:[#allocation16_spill] sm:$0xff] }
 0x2bb   : > { %v2356_v11 = vsel %vm2313_vm5, %v15572_v24, %v9394_v4 }
 0x2bc   : > { %v9442_v46 = vpop.permute.xlu1 %9441  ;;  %v11409_v32 = vpop.permute.xlu0 %9396 }
 0x2bd   : > { %v9444_v42 = vunpack.i.h.bf16 %v9442_v46  ;;  %v9443_v34 = vunpack.i.l.bf16 %v9442_v46  ;;  %v9383_v46 = vunpack.i.l.bf16 %v11403_v31  ;;  %v9398_v19 = vunpack.i.l.bf16 %v11409_v32 }
 0x2c0   : > { %v11411_v13 = vpop.permute.xlu1 %9451  ;;  %v11413_v16 = vpop.permute.xlu0 %9401 }
 0x2c1   : > { %v9403_v22 = vunpack.i.l.bf16 %v11413_v16 }
 0x2c4   : > { %v11415_v36 = vpop.permute.xlu1 %9456  ;;  %v11417_v7 = vpop.permute.xlu0 %9406 }
 0x2c8   : > { %v11419_v50 = vpop.permute.xlu1 %9466  ;;  %v11421_v61 = vpop.permute.xlu0 %9411 }
 0x2c9   : > { %v9469_v38 = vunpack.i.h.bf16 %v11419_v50  ;;  %v9468_v9 = vunpack.i.l.bf16 %v11419_v50 }
 0x2cc   : > { %v11423_v18 = vpop.permute.xlu1 %9476  ;;  %v9417_v60 = vpop.permute.xlu0 %9416 }
 0x2cd   : > { %v9419_v56 = vunpack.i.h.bf16 %v9417_v60  ;;  %v9418_v5 = vunpack.i.l.bf16 %v9417_v60 }
 0x2cf   : > { %v2364_v55 = vsel %vm2319_vm6, %v2359_v43, %v9419_v56  ;;  %v2324_v48 = vsel %vm2319_vm6, %v2318_v0, %v9418_v5  ;;  %v9384_v5 = vunpack.i.h.bf16 %v11403_v31 }
 0x2d0   : > { %v11431_v26 = vpop.permute.xlu1 %9491  ;;  %v9422_v52 = vpop.permute.xlu0 %9421  ;;  %v2330_v15 = vsel %vm2325_vm7, %v2324_v48, %v9438_v3  ;;  %v2369_v33 = vsel %vm2325_vm7, %v2364_v55, %v9439_v35  ;;  %v11467_v35 = vsel %vm2331_vm8, %v2326_v37, %v9383_v46  ;;  %v9393_v3 = vunpack.i.l.bf16 %v11407_v44 }
 0x2d1   : > { %v9424_v57 = vunpack.i.h.bf16 %v9422_v52  ;;  %v9423_v2 = vunpack.i.l.bf16 %v9422_v52  ;;  %v11470_v31 = vsel %vm2331_vm8, %v2327_v30, %v9384_v5  ;;  %v9399_v52 = vunpack.i.h.bf16 %v11409_v32 }
 0x2d2   : > { %v9409_v44 = vunpack.i.h.bf16 %v11417_v7 }
 0x2d3   : > { %v2336_v58 = vsel %vm2331_vm8, %v2330_v15, %v9423_v2  ;;  %v2374_v25 = vsel %vm2331_vm8, %v2369_v33, %v9424_v57  ;;  %v9454_v2 = vunpack.i.h.bf16 %v11411_v13  ;;  %v9453_v15 = vunpack.i.l.bf16 %v11411_v13 }
 0x2d4   : > { %v11447_v27 = vpop.permute.xlu1 %9501  ;;  %v9427_v17 = vpop.permute.xlu0 %9426  ;;  %v2379_v60 = vsel %vm2337_vm9, %v2374_v25, %v9444_v42  ;;  %v2342_v56 = vsel %vm2337_vm9, %v2336_v58, %v9443_v34  ;;  %v9404_v33 = vunpack.i.h.bf16 %v11413_v16  ;;  %v9408_v58 = vunpack.i.l.bf16 %v11417_v7 }
 0x2d5   : > { %v9429_v23 = vunpack.i.h.bf16 %v9427_v17  ;;  %v9428_v14 = vunpack.i.l.bf16 %v9427_v17  ;;  %v15575_v42 = vcombine.low %v15573_v62, %v15574_v49  ;;  %v9413_v34 = vunpack.i.l.bf16 %v11421_v61 }
 0x2d6   : > { %v2361_v7 = vsel %vm2319_vm6, %v2356_v11, %v9399_v52 }
 0x2d7   : > { %v2384_v43 = vsel %vm2343_vm10, %v2379_v60, %v9429_v23  ;;  %v2348_v0 = vsel %vm2343_vm10, %v2342_v56, %v9428_v14  ;;  %v2355_v16 = vsel %vm2313_vm5, %v15575_v42, %v9393_v3  ;;  %v15577_v60 = vcombine.low %v11011_v40, %v11014_v8 }
 0x2d8   : > { %v11461_v55 = vpop.permute.xlu1 %9506  ;;  %v9447_v48 = vpop.permute.xlu0 %9446  ;;  %v2389_v50 = vsel %vm2349_vm11, %v2384_v43, %v9469_v38  ;;  %v2354_v59 = vsel %vm2349_vm11, %v2348_v0, %v9468_v9  ;;  %v2360_v30 = vsel %vm2319_vm6, %v2355_v16, %v9398_v19  ;;  %v15576_v38 = vcombine.low %v11047_v51, %v11113_v47 }
 0x2d9   : > { %v2395_v10 = vpack.c.bf16 %v2389_v50, %v2389_v50  ;;  %v2394_v57 = vpack.c.bf16 %v2354_v59, %v2354_v59  ;;  %v9449_v17 = vunpack.i.h.bf16 %v9447_v48  ;;  %v9448_v37 = vunpack.i.l.bf16 %v9447_v48 }
 0x2da   : > { %v2317_v9 = vsel %vm2313_vm5, %v15576_v38, %v9454_v2  ;;  %v2316_v56 = vsel %vm2313_vm5, %v15577_v60, %v9453_v15  ;;  %v2365_v5 = vsel %vm2325_vm7, %v2360_v30, %v9403_v22  ;;  %v2366_v46 = vsel %vm2325_vm7, %v2361_v7, %v9404_v33 }
 0x2db   : > { %9276 = vmatprep.subr.msk.bf16.mxu0 %vm2407_vm12, %v2395_v10  ;;  %v2409_v13 = vsel %vm2407_vm12, %v2394_v57, 0  ;;  %v9459_v43 = vunpack.i.h.bf16 %v11415_v36  ;;  %v9458_v0 = vunpack.i.l.bf16 %v11415_v36  ;;  %v2370_v4 = vsel %vm2331_vm8, %v2365_v5, %v9408_v58 }
 0x2dc   : > { %v11486_v32 = vpop.permute.xlu1 %9511  ;;  %v9462_v25 = vpop.permute.xlu0 %9461  ;;  %2425 = vmatpush1.bf16.msra.mxu0 %v2409_v13  ;;  %v2371_v48 = vsel %vm2331_vm8, %v2366_v46, %v9409_v44  ;;  %v9414_v50 = vunpack.i.h.bf16 %v11421_v61  ;;  %v2375_v40 = vsel %vm2337_vm9, %v2370_v4, %v9413_v34  ;;  %v15578_v8 = vcombine.low %v15560_v28, %v15559_v41 }
 0x2dd   : > { %v9464_v23 = vunpack.i.h.bf16 %v9462_v25  ;;  %v9463_v14 = vunpack.i.l.bf16 %v9462_v25  ;;  %v15579_v3 = vcombine.low %v15562_v63, %v15561_v54  ;;  %v9479_v61 = vunpack.i.h.bf16 %v11423_v18 }
 0x2de   : > { %v2358_v59 = vsel %vm2313_vm5, %v15578_v8, %v9449_v17  ;;  %v9478_v2 = vunpack.i.l.bf16 %v11423_v18  ;;  %v9504_v15 = vunpack.i.h.bf16 %v11447_v27  ;;  %v9503_v41 = vunpack.i.l.bf16 %v11447_v27 }
 0x2df   : > { %v2357_v36 = vsel %vm2313_vm5, %v15579_v3, %v9448_v37  ;;  %v2323_v52 = vsel %vm2319_vm6, %v2317_v9, %v9464_v23  ;;  %v2322_v19 = vsel %vm2319_vm6, %v2316_v56, %v9463_v14  ;;  %v9509_v28 = vunpack.i.h.bf16 %v11461_v55 }
 0x2e0   : > { %v9517_v51 = vpop.permute.xlu1 %9516  ;;  %v9472_v47 = vpop.permute.xlu0 %9471  ;;  %v9508_v54 = vunpack.i.l.bf16 %v11461_v55  ;;  %v2362_v63 = vsel %vm2319_vm6, %v2357_v36, %v9458_v0  ;;  %v2363_v33 = vsel %vm2319_vm6, %v2358_v59, %v9459_v43  ;;  %v2329_v1 = vsel %vm2325_vm7, %v2323_v52, %v9479_v61 }
 0x2e1   : > { %v9474_v10 = vunpack.i.h.bf16 %v9472_v47  ;;  %v9473_v57 = vunpack.i.l.bf16 %v9472_v47  ;;  %v2328_v24 = vsel %vm2325_vm7, %v2322_v19, %v9478_v2  ;;  %v9514_v44 = vunpack.i.h.bf16 %v11486_v32 }
 0x2e2   : > { %v9513_v27 = vunpack.i.l.bf16 %v11486_v32  ;;  %v9519_v25 = vunpack.i.h.bf16 %v9517_v51  ;;  %v9518_v13 = vunpack.i.l.bf16 %v9517_v51  ;;  %v2334_v37 = vsel %vm2331_vm8, %v2328_v24, %v9503_v41 }
 0x2e3   : > { %v2367_v58 = vsel %vm2325_vm7, %v2362_v63, %v9473_v57  ;;  %v2368_v55 = vsel %vm2325_vm7, %v2363_v33, %v9474_v10  ;;  %v2335_v32 = vsel %vm2331_vm8, %v2329_v1, %v9504_v15  ;;  %v2376_v5 = vsel %vm2337_vm9, %v2371_v48, %v9414_v50 }
 0x2e4   : > { %v9522_v22 = vpop.permute.xlu1 %9521  ;;  %v9482_v29 = vpop.permute.xlu0 %9481  ;;  %v9494_v46 = vunpack.i.h.bf16 %v11431_v26  ;;  %v9493_v4 = vunpack.i.l.bf16 %v11431_v26  ;;  %v2340_v59 = vsel %vm2337_vm9, %v2334_v37, %v9513_v27  ;;  %v2341_v3 = vsel %vm2337_vm9, %v2335_v32, %v9514_v44  ;;  %v2396_v27 = vld [vmem:[#allocation2] sm:$0x3] }
 0x2e5   : > { %v9484_v11 = vunpack.i.h.bf16 %v9482_v29  ;;  %v9483_v18 = vunpack.i.l.bf16 %v9482_v29  ;;  %v9524_v30 = vunpack.i.h.bf16 %v9522_v22  ;;  %v9523_v7 = vunpack.i.l.bf16 %v9522_v22 }
 0x2e6   : > { %v2339_v29 = vsel %vm2337_vm9, %v11470_v31, %v9389_v53 }
 0x2e7   : > { %v2372_v62 = vsel %vm2331_vm8, %v2367_v58, %v9483_v18  ;;  %v2373_v49 = vsel %vm2331_vm8, %v2368_v55, %v9484_v11  ;;  %v2346_v48 = vsel %vm2343_vm10, %v2340_v59, %v9523_v7  ;;  %v2347_v50 = vsel %vm2343_vm10, %v2341_v3, %v9524_v30 }
 0x2e8   : > { %v9527_v42 = vpop.permute.xlu1 %9526  ;;  %v9487_v16 = vpop.permute.xlu0 %9486  ;;  %v2377_v34 = vsel %vm2337_vm9, %v2372_v62, %v9508_v54  ;;  %v2378_v17 = vsel %vm2337_vm9, %v2373_v49, %v9509_v28  ;;  %v2345_v24 = vsel %vm2343_vm10, %v2339_v29, %v9494_v46 }
 0x2e9   : > { %v9529_v23 = vunpack.i.h.bf16 %v9527_v42  ;;  %v9528_v14 = vunpack.i.l.bf16 %v9527_v42  ;;  %v9489_v38 = vunpack.i.h.bf16 %v9487_v16  ;;  %v9488_v9 = vunpack.i.l.bf16 %v9487_v16 }
 0x2ea   : > { %v2382_v60 = vsel %vm2343_vm10, %v2377_v34, %v9518_v13  ;;  %v2383_v56 = vsel %vm2343_vm10, %v2378_v17, %v9519_v25 }
 0x2eb   : > { %v2387_v43 = vsel %vm2349_vm11, %v2382_v60, %v9528_v14  ;;  %v2388_v0 = vsel %vm2349_vm11, %v2383_v56, %v9529_v23  ;;  %v2380_v57 = vsel %vm2343_vm10, %v2375_v40, %v9488_v9  ;;  %v2381_v26 = vsel %vm2343_vm10, %v2376_v5, %v9489_v38 }
 0x2ec   : > { %v9532_v51 = vpop.permute.xlu1 %9531  ;;  %v9497_v47 = vpop.permute.xlu0 %9496  ;;  %v2393_v8 = vpack.c.bf16 %v2388_v0, %v2387_v43  ;;  %v2338_v40 = vsel %vm2337_vm9, %v11467_v35, %v9388_v39 }
 0x2ed   : > { %v9534_v36 = vunpack.i.h.bf16 %v9532_v51  ;;  %v9533_v52 = vunpack.i.l.bf16 %v9532_v51  ;;  %v9499_v19 = vunpack.i.h.bf16 %v9497_v47  ;;  %v9498_v10 = vunpack.i.l.bf16 %v9497_v47 }
 0x2ee   : > { %2426 = vmatprep.subr.bf16.mxu0 %v2393_v8  ;;  %v2344_v1 = vsel %vm2343_vm10, %v2338_v40, %v9493_v4 }
 0x2ef   : > { %v2352_v61 = vsel %vm2349_vm11, %v2346_v48, %v9533_v52  ;;  %v2353_v2 = vsel %vm2349_vm11, %v2347_v50, %v9534_v36  ;;  %v2385_v15 = vsel %vm2349_vm11, %v2380_v57, %v9498_v10  ;;  %v2386_v41 = vsel %vm2349_vm11, %v2381_v26, %v9499_v19 }
 0x2f0   : > { %v9537_v28 = vpop.permute.xlu1 %9536  ;;  %v2392_v54 = vpack.c.bf16 %v2353_v2, %v2352_v61  ;;  %v2391_v63 = vpack.c.bf16 %v2386_v41, %v2385_v15 }
 0x2f1   : > { %v9539_v33 = vunpack.i.h.bf16 %v9537_v28  ;;  %v9538_v22 = vunpack.i.l.bf16 %v9537_v28 }
 0x2f2   : > { %2427 = vmatpush1.bf16.msra.mxu0 %v2392_v54 }
 0x2f3   : > { %2428 = vmatprep.subr.bf16.mxu0 %v2391_v63  ;;  %v2350_v11 = vsel %vm2349_vm11, %v2344_v1, %v9538_v22  ;;  %v2351_v18 = vsel %vm2349_vm11, %v2345_v24, %v9539_v33 }
 0x2f4   : > { %v2390_v44 = vpack.c.bf16 %v2351_v18, %v2350_v11 }
 0x2f6   : > { %2429 = vmatpush1.bf16.msra.mxu0 %v2390_v44 }
 0x2f9   : > { %9277 = vmatmul.mubr.msk.bf16.vlgmr.msra.gmra.mxu0 %vm2403_vm13, %v2396_v27  ;;  %v2401_v21 = vpop.permute.xlu0 %2400 }
 0x2fa   : > { %6935 = vmatprep.mubr.bf16.mxu0 %v15344_v45 }
 0x3b9   : > { %v2448_v53 = vpop.f32.mrf.mxu0 }
 0x3ba   : > { %v2449_v39 = vadd.f32 %v2448_v53, %v2401_v21 }
 0x3bb   : > { %v2450_v35 = vpop.f32.mrf.mxu0 }
 0x3bc   : > { %v2455_v31 = vmax.f32 %v2449_v39, 0.0  ;;  %v2451_v25 = vadd.f32 %v2450_v35, %v2401_v21 }
 0x3bd   : > { %v2452_v58 = vpop.f32.mrf.mxu0 }
 0x3be   : > { %2464 = vrot.lane.b32.xlu0 %v2455_v31, %s10163_s10  ;;  %2458 = vrot.lane.b32.xlu1 %v2455_v31, %s10164_s11  ;;  %v11579_v13 = vmax.f32 %v2451_v25, 0.0 }
 0x3bf   : > { %v2453_v55 = vpop.f32.mrf.mxu0 }
 0x3c2   : > { %2470 = vrot.lane.b32.xlu0 %v2455_v31, %s10168_s24  ;;  %2461 = vrot.lane.b32.xlu1 %v2455_v31, %s10166_s19 }
 0x3c6   : > { %2476 = vrot.lane.b32.xlu0 %v2455_v31, %s10169_s25  ;;  %2467 = vrot.lane.b32.xlu1 %v2455_v31, %s10165_s17 }
 0x3ca   : > { %2483 = vrot.lane.b32.xlu0 %v11579_v13, %s10166_s19  ;;  %2473 = vrot.lane.b32.xlu1 %v2455_v31, %s10167_s20 }
 0x3ce   : > { %2489 = vrot.lane.b32.xlu0 %v11579_v13, %s10165_s17  ;;  %2480 = vrot.lane.b32.xlu1 %v11579_v13, %s10164_s11 }
 0x3d2   : > { %2495 = vrot.lane.b32.xlu0 %v11579_v13, %s10167_s20  ;;  %2486 = vrot.lane.b32.xlu1 %v11579_v13, %s10163_s10 }
 0x3d6   : > { %2492 = vrot.lane.b32.xlu1 %v11579_v13, %s10168_s24 }
 0x3da   : > { %2498 = vrot.lane.b32.xlu1 %v11579_v13, %s10169_s25 }
 0x430   : > { %v2465_v62 = vpop.permute.xlu0 %2464  ;;  %v2459_v49 = vpop.permute.xlu1 %2458 }
 0x431   : > { %v2509_v32 = vcombine.low %v2459_v49, %v2465_v62 }
 0x433   : > { %v2516_v38 = vrot.slane %v2509_v32, %v10296_v12 }
 0x434   : > { %v2471_v42 = vpop.permute.xlu0 %2470  ;;  %v2462_v16 = vpop.permute.xlu1 %2461 }
 0x435   : > { %v2501_v34 = vcombine.low %v2455_v31, %v2462_v16 }
 0x437   : > { %v2508_v30 = vrot.slane %v2501_v34, %v10296_v12 }
 0x438   : > { %v2477_v17 = vpop.permute.xlu0 %2476  ;;  %v2468_v37 = vpop.permute.xlu1 %2467 }
 0x439   : > { %v2525_v7 = vcombine.low %v2471_v42, %v2477_v17  ;;  %v2533_v60 = vcombine.low %v2508_v30, %v2516_v38  ;;  %v2534_v56 = vcombine.high %v2508_v30, %v2516_v38 }
 0x43b   : > { %v2532_v5 = vrot.slane %v2525_v7, %v10296_v12  ;;  %v2541_v47 = vrot.slane %v2533_v60, %v10304_v20  ;;  %v2548_v8 = vrot.slane %v2534_v56, %v10304_v20 }
 0x43c   : > { %v2484_v23 = vpop.permute.xlu0 %2483  ;;  %v2474_v14 = vpop.permute.xlu1 %2473 }
 0x43d   : > { %v2517_v9 = vcombine.low %v2468_v37, %v2474_v14  ;;  %v2569_v24 = vcombine.low %v11579_v13, %v2484_v23 }
 0x43f   : > { %v2524_v46 = vrot.slane %v2517_v9, %v10296_v12  ;;  %v2576_v39 = vrot.slane %v2569_v24, %v10296_v12 }
 0x440   : > { %v2481_v43 = vpop.permute.xlu1 %2480  ;;  %v2490_v51 = vpop.permute.xlu0 %2489 }
 0x441   : > { %v2549_v0 = vcombine.low %v2524_v46, %v2532_v5  ;;  %v2550_v4 = vcombine.high %v2524_v46, %v2532_v5 }
 0x443   : > { %v2557_v59 = vrot.slane %v2549_v0, %v10304_v20  ;;  %v2564_v3 = vrot.slane %v2550_v4, %v10304_v20 }
 0x444   : > { %v2487_v36 = vpop.permute.xlu1 %2486  ;;  %v2496_v2 = vpop.permute.xlu0 %2495 }
 0x445   : > { %v2565_v52 = vcombine.low %v2541_v47, %v2557_v59  ;;  %v2566_v19 = vcombine.high %v2541_v47, %v2557_v59  ;;  %v11604_v10 = vcombine.low %v2548_v8, %v2564_v3  ;;  %v11606_v48 = vcombine.high %v2548_v8, %v2564_v3 }
 0x446   : > { %v2585_v40 = vcombine.low %v2490_v51, %v2496_v2  ;;  %v2577_v29 = vcombine.low %v2481_v43, %v2487_v36 }
 0x447   : > { %v2642_v50 = vrot.slane %v2566_v19, 1  ;;  %v2656_v57 = vrot.slane %v2566_v19, 7  ;;  %v2641_v26 = vrot.slane %v2565_v52, 1  ;;  %v2653_v61 = vrot.slane %v2565_v52, 7 }
 0x448   : > { %v2493_v15 = vpop.permute.xlu1 %2492  ;;  %v2644_v41 = vrot.slane %v11606_v48, 1  ;;  %v2662_v28 = vrot.slane %v11606_v48, 7  ;;  %v2643_v33 = vrot.slane %v11604_v10, 1  ;;  %v2659_v22 = vrot.slane %v11604_v10, 7 }
 0x449   : > { %v2682_v54 = vsel %vm404_vm0, %v2642_v50, %v2656_v57  ;;  %v2681_v63 = vsel %vm404_vm0, %v2641_v26, %v2653_v61  ;;  %v2592_v27 = vrot.slane %v2585_v40, %v10296_v12  ;;  %v2584_v21 = vrot.slane %v2577_v29, %v10296_v12 }
 0x44a   : > { %2703 = vrot.lane.b32.xlu1 %v2682_v54, %s10173_s26  ;;  %2697 = vrot.lane.b32.xlu0 %v2681_v63, %s10173_s26  ;;  %v2684_v18 = vsel %vm404_vm0, %v2644_v41, %v2662_v28  ;;  %v2683_v44 = vsel %vm404_vm0, %v2643_v33, %v2659_v22 }
 0x44b   : > { %v2601_v31 = vcombine.low %v2576_v39, %v2584_v21  ;;  %v2602_v62 = vcombine.high %v2576_v39, %v2584_v21 }
 0x44c   : > { %v2499_v1 = vpop.permute.xlu1 %2498 }
 0x44d   : > { %v2593_v11 = vcombine.low %v2493_v15, %v2499_v1  ;;  %v2609_v55 = vrot.slane %v2601_v31, %v10304_v20  ;;  %v2616_v17 = vrot.slane %v2602_v62, %v10304_v20 }
 0x44e   : > { %2715 = vrot.lane.b32.xlu1 %v2684_v18, %s10173_s26  ;;  %2709 = vrot.lane.b32.xlu0 %v2683_v44, %s10173_s26 }
 0x44f   : > { %v2600_v53 = vrot.slane %v2593_v11, %v10296_v12 }
 0x451   : > { %v2617_v35 = vcombine.low %v2592_v27, %v2600_v53  ;;  %v2618_v25 = vcombine.high %v2592_v27, %v2600_v53 }
 0x452   : > { %2739 = vrot.lane.b32.xlu1 %v2682_v54, %s10174_s27  ;;  %2733 = vrot.lane.b32.xlu0 %v2681_v63, %s10174_s27 }
 0x453   : > { %v2625_v58 = vrot.slane %v2617_v35, %v10304_v20  ;;  %v2632_v49 = vrot.slane %v2618_v25, %v10304_v20 }
 0x455   : > { %v2633_v13 = vcombine.low %v2609_v55, %v2625_v58  ;;  %v2634_v42 = vcombine.high %v2609_v55, %v2625_v58  ;;  %v2635_v37 = vcombine.low %v2616_v17, %v2632_v49  ;;  %v2636_v14 = vcombine.high %v2616_v17, %v2632_v49 }
 0x456   : > { %2751 = vrot.lane.b32.xlu1 %v2684_v18, %s10174_s27  ;;  %2745 = vrot.lane.b32.xlu0 %v2683_v44, %s10174_s27 }
 0x457   : > { %v2654_v16 = vrot.slane %v2633_v13, 7  ;;  %v2673_v34 = vrot.slane %v2633_v13, 5  ;;  %v2657_v7 = vrot.slane %v2634_v42, 7  ;;  %v2674_v23 = vrot.slane %v2634_v42, 5 }
 0x458   : > { %v2660_v60 = vrot.slane %v2635_v37, 7  ;;  %v2675_v56 = vrot.slane %v2635_v37, 5  ;;  %v2663_v43 = vrot.slane %v2636_v14, 7  ;;  %v2676_v0 = vrot.slane %v2636_v14, 5 }
 0x459   : > { %v2685_v32 = vsel %vm404_vm0, %v2654_v16, %v2673_v34  ;;  %v2655_v30 = vsel %vm404_vm0, %v2653_v61, %v2654_v16  ;;  %v2658_v38 = vsel %vm404_vm0, %v2656_v57, %v2657_v7  ;;  %v2686_v9 = vsel %vm404_vm0, %v2657_v7, %v2674_v23 }
 0x45a   : > { %2775 = vrot.lane.b32.xlu1 %v2682_v54, %s10175_s28  ;;  %2769 = vrot.lane.b32.xlu0 %v2681_v63, %s10175_s28  ;;  %v2687_v5 = vsel %vm404_vm0, %v2660_v60, %v2675_v56  ;;  %v2661_v46 = vsel %vm404_vm0, %v2659_v22, %v2660_v60  ;;  %v2664_v4 = vsel %vm404_vm0, %v2662_v28, %v2663_v43 }
 0x45b   : > { %v2688_v51 = vsel %vm404_vm0, %v2663_v43, %v2676_v0 }
 0x45e   : > { %2787 = vrot.lane.b32.xlu1 %v2684_v18, %s10175_s28  ;;  %2781 = vrot.lane.b32.xlu0 %v2683_v44, %s10175_s28 }
 0x462   : > { %2701 = vrot.lane.b32.xlu0 %v2685_v32, %s10173_s26  ;;  %2699 = vrot.lane.b32.xlu1 %v2655_v30, %s10173_s26 }
 0x466   : > { %2705 = vrot.lane.b32.xlu0 %v2658_v38, %s10173_s26  ;;  %2707 = vrot.lane.b32.xlu1 %v2686_v9, %s10173_s26 }
 0x46a   : > { %2713 = vrot.lane.b32.xlu0 %v2687_v5, %s10173_s26  ;;  %2711 = vrot.lane.b32.xlu1 %v2661_v46, %s10173_s26 }
 0x46e   : > { %2717 = vrot.lane.b32.xlu0 %v2664_v4, %s10173_s26  ;;  %2719 = vrot.lane.b32.xlu1 %v2688_v51, %s10173_s26 }
 0x472   : > { %2737 = vrot.lane.b32.xlu0 %v2685_v32, %s10174_s27  ;;  %2735 = vrot.lane.b32.xlu1 %v2655_v30, %s10174_s27 }
 0x476   : > { %2741 = vrot.lane.b32.xlu0 %v2658_v38, %s10174_s27  ;;  %2743 = vrot.lane.b32.xlu1 %v2686_v9, %s10174_s27 }
 0x47a   : > { %2749 = vrot.lane.b32.xlu0 %v2687_v5, %s10174_s27  ;;  %2747 = vrot.lane.b32.xlu1 %v2661_v46, %s10174_s27 }
 0x47e   : > { %2753 = vrot.lane.b32.xlu0 %v2664_v4, %s10174_s27  ;;  %2755 = vrot.lane.b32.xlu1 %v2688_v51, %s10174_s27 }
 0x482   : > { %2773 = vrot.lane.b32.xlu0 %v2685_v32, %s10175_s28  ;;  %2771 = vrot.lane.b32.xlu1 %v2655_v30, %s10175_s28 }
 0x486   : > { %2777 = vrot.lane.b32.xlu0 %v2658_v38, %s10175_s28  ;;  %2779 = vrot.lane.b32.xlu1 %v2686_v9, %s10175_s28 }
 0x48a   : > { %2785 = vrot.lane.b32.xlu0 %v2687_v5, %s10175_s28  ;;  %2783 = vrot.lane.b32.xlu1 %v2661_v46, %s10175_s28 }
 0x48e   : > { %2789 = vrot.lane.b32.xlu0 %v2664_v4, %s10175_s28  ;;  %2791 = vrot.lane.b32.xlu1 %v2688_v51, %s10175_s28 }
 0x4bc   : > { %v2698_v47 = vpop.permute.xlu0 %2697  ;;  %v2704_v8 = vpop.permute.xlu1 %2703 }
 0x4c0   : > { %v2710_v59 = vpop.permute.xlu0 %2709  ;;  %v2716_v3 = vpop.permute.xlu1 %2715 }
 0x4c4   : > { %v2734_v36 = vpop.permute.xlu0 %2733  ;;  %v2740_v52 = vpop.permute.xlu1 %2739 }
 0x4c5   : > { %v2805_v48 = vsel %vm569_vm1, %v2698_v47, %v2734_v36  ;;  %v2808_v50 = vsel %vm569_vm1, %v2704_v8, %v2740_v52 }
 0x4c8   : > { %v2746_v19 = vpop.permute.xlu0 %2745  ;;  %v2752_v10 = vpop.permute.xlu1 %2751 }
 0x4c9   : > { %v2811_v15 = vsel %vm569_vm1, %v2710_v59, %v2746_v19  ;;  %v2814_v41 = vsel %vm569_vm1, %v2716_v3, %v2752_v10 }
 0x4cc   : > { %v2770_v57 = vpop.permute.xlu0 %2769  ;;  %v2776_v26 = vpop.permute.xlu1 %2775 }
 0x4cd   : > { %v11672_v61 = vsel %vm582_vm2, %v2805_v48, %v2770_v57  ;;  %v11675_v2 = vsel %vm582_vm2, %v2808_v50, %v2776_v26 }
 0x4ce   : > { %2837 = vrot.lane.b32.xlu0 %v11672_v61, %s10173_s26  ;;  %2841 = vrot.lane.b32.xlu1 %v11675_v2, %s10173_s26  ;;  %v2965_v56 = vrot.slane %v11672_v61, 2  ;;  %v2970_v5 = vrot.slane %v11675_v2, 2  ;;  %v2889_v47 = vrot.slane %v11672_v61, 1  ;;  %v2894_v36 = vrot.slane %v11675_v2, 1 }
 0x4d0   : > { %v2782_v28 = vpop.permute.xlu0 %2781  ;;  %v2788_v54 = vpop.permute.xlu1 %2787 }
 0x4d1   : > { %v11684_v63 = vsel %vm582_vm2, %v2811_v15, %v2782_v28  ;;  %v11687_v33 = vsel %vm582_vm2, %v2814_v41, %v2788_v54 }
 0x4d2   : > { %v3041_v22 = vcombine.low %v11672_v61, %v11684_v63  ;;  %v3042_v40 = vcombine.high %v11672_v61, %v11684_v63  ;;  %v3057_v29 = vcombine.low %v11675_v2, %v11687_v33  ;;  %v3058_v1 = vcombine.high %v11675_v2, %v11687_v33  ;;  %2845 = vrot.lane.b32.xlu0 %v11684_v63, %s10173_s26 }
 0x4d3   : > { %2849 = vrot.lane.b32.xlu1 %v11687_v33, %s10173_s26  ;;  %v2975_v19 = vrot.slane %v11684_v63, 2  ;;  %v2980_v10 = vrot.slane %v11687_v33, 2  ;;  %v2899_v48 = vrot.slane %v11684_v63, 1 }
 0x4d4   : > { %v11702_v24 = vrot.slane %v3041_v22, %v10296_v12  ;;  %v11705_v11 = vrot.slane %v3042_v40, %v10296_v12  ;;  %v11708_v18 = vrot.slane %v3057_v29, %v10296_v12  ;;  %v11711_v44 = vrot.slane %v3058_v1, %v10296_v12  ;;  %v2702_v27 = vpop.permute.xlu0 %2701  ;;  %v2700_v21 = vpop.permute.xlu1 %2699 }
 0x4d6   : > { %v3105_v53 = vcombine.low %v11702_v24, %v11708_v18  ;;  %2861 = vrot.lane.b32.xlu0 %v11672_v61, %s10176_s29 }
 0x4d7   : > { %2865 = vrot.lane.b32.xlu1 %v11675_v2, %s10176_s29 }
 0x4d8   : > { %v2706_v58 = vpop.permute.xlu0 %2705  ;;  %v2708_v55 = vpop.permute.xlu1 %2707 }
 0x4dc   : > { %v2714_v25 = vpop.permute.xlu0 %2713  ;;  %v2712_v13 = vpop.permute.xlu1 %2711 }
 0x4e0   : > { %v2718_v62 = vpop.permute.xlu0 %2717  ;;  %v2720_v49 = vpop.permute.xlu1 %2719 }
 0x4e4   : > { %v2738_v42 = vpop.permute.xlu0 %2737  ;;  %v2736_v16 = vpop.permute.xlu1 %2735 }
 0x4e5   : > { %v2806_v23 = vsel %vm569_vm1, %v2700_v21, %v2736_v16  ;;  %v2807_v60 = vsel %vm569_vm1, %v2702_v27, %v2738_v42 }
 0x4e8   : > { %v2742_v34 = vpop.permute.xlu0 %2741  ;;  %v2744_v17 = vpop.permute.xlu1 %2743 }
 0x4e9   : > { %v2809_v46 = vsel %vm569_vm1, %v2706_v58, %v2742_v34  ;;  %v2810_v43 = vsel %vm569_vm1, %v2708_v55, %v2744_v17 }
 0x4ec   : > { %v2750_v37 = vpop.permute.xlu0 %2749  ;;  %v2748_v32 = vpop.permute.xlu1 %2747 }
 0x4ed   : > { %v2813_v52 = vsel %vm569_vm1, %v2714_v25, %v2750_v37  ;;  %v2812_v50 = vsel %vm569_vm1, %v2712_v13, %v2748_v32 }
 0x4f0   : > { %v2754_v30 = vpop.permute.xlu0 %2753  ;;  %v2756_v7 = vpop.permute.xlu1 %2755 }
 0x4f1   : > { %v2815_v15 = vsel %vm569_vm1, %v2718_v62, %v2754_v30  ;;  %v2816_v41 = vsel %vm569_vm1, %v2720_v49, %v2756_v7 }
 0x4f4   : > { %v2774_v14 = vpop.permute.xlu0 %2773  ;;  %v2772_v38 = vpop.permute.xlu1 %2771 }
 0x4f5   : > { %v11727_v9 = vsel %vm582_vm2, %v2806_v23, %v2772_v38  ;;  %v2819_v0 = vsel %vm582_vm2, %v2807_v60, %v2774_v14 }
 0x4f6   : > { %2839 = vrot.lane.b32.xlu0 %v11727_v9, %s10173_s26  ;;  %v2966_v3 = vrot.slane %v11727_v9, 2  ;;  %v2892_v57 = vrot.slane %v2819_v0, 1  ;;  %v2968_v26 = vrot.slane %v2819_v0, 2  ;;  %v2890_v61 = vrot.slane %v11727_v9, 1 }
 0x4f8   : > { %v2778_v4 = vpop.permute.xlu0 %2777  ;;  %v2780_v51 = vpop.permute.xlu1 %2779  ;;  %v11760_v21 = vsel %vm732_vm3, %v2965_v56, %v2966_v3  ;;  %v11770_v62 = vsel %vm732_vm3, %v2966_v3, %v2968_v26  ;;  %v11774_v42 = vsel %vm655_vm4, %v2890_v61, %v2892_v57  ;;  %v11777_v16 = vsel %vm655_vm4, %v2889_v47, %v2890_v61 }
 0x4f9   : > { %v11739_v8 = vsel %vm582_vm2, %v2809_v46, %v2778_v4  ;;  %v2822_v59 = vsel %vm582_vm2, %v2810_v43, %v2780_v51 }
 0x4fa   : > { %2843 = vrot.lane.b32.xlu1 %v11739_v8, %s10173_s26  ;;  %v2973_v28 = vrot.slane %v2822_v59, 2  ;;  %v2971_v40 = vrot.slane %v11739_v8, 2  ;;  %v2897_v29 = vrot.slane %v2822_v59, 1  ;;  %v2895_v13 = vrot.slane %v11739_v8, 1 }
 0x4fc   : > { %v2786_v54 = vpop.permute.xlu0 %2785  ;;  %v2784_v22 = vpop.permute.xlu1 %2783  ;;  %v11780_v32 = vsel %vm732_vm3, %v2970_v5, %v2971_v40  ;;  %v11783_v30 = vsel %vm732_vm3, %v2971_v40, %v2973_v28  ;;  %v11807_v43 = vsel %vm655_vm4, %v2895_v13, %v2897_v29 }
 0x4fd   : > { %v2825_v1 = vsel %vm582_vm2, %v2813_v52, %v2786_v54  ;;  %v11757_v27 = vsel %vm582_vm2, %v2812_v50, %v2784_v22 }
 0x4fe   : > { %v2978_v58 = vrot.slane %v2825_v1, 2  ;;  %v3653_v55 = vcombine.low %v11727_v9, %v11757_v27  ;;  %v3654_v25 = vcombine.high %v11727_v9, %v11757_v27  ;;  %2847 = vrot.lane.b32.xlu0 %v11757_v27, %s10173_s26  ;;  %v2976_v49 = vrot.slane %v11757_v27, 2 }
 0x4ff   : > { %v2902_v34 = vrot.slane %v2825_v1, 1  ;;  %v2900_v7 = vrot.slane %v11757_v27, 1 }
 0x500   : > { %v2790_v17 = vpop.permute.xlu0 %2789  ;;  %v2792_v37 = vpop.permute.xlu1 %2791  ;;  %v11791_v38 = vsel %vm732_vm3, %v2975_v19, %v2976_v49  ;;  %v11794_v60 = vsel %vm732_vm3, %v2976_v49, %v2978_v58  ;;  %v11818_v59 = vrot.slane %v3653_v55, %v10296_v12  ;;  %v11938_v2 = vrot.slane %v3654_v25, %v10296_v12 }
 0x501   : > { %v11787_v23 = vsel %vm582_vm2, %v2815_v15, %v2790_v17  ;;  %v2828_v14 = vsel %vm582_vm2, %v2816_v41, %v2792_v37  ;;  %v3449_v0 = vcombine.low %v11760_v21, %v11791_v38  ;;  %v3450_v4 = vcombine.high %v11760_v21, %v11791_v38 }
 0x502   : > { %v3669_v56 = vcombine.low %v11739_v8, %v11787_v23  ;;  %v3670_v5 = vcombine.high %v11739_v8, %v11787_v23  ;;  %v2983_v46 = vrot.slane %v2828_v14, 2  ;;  %2851 = vrot.lane.b32.xlu1 %v11787_v23, %s10173_s26  ;;  %2863 = vrot.lane.b32.xlu0 %v11727_v9, %s10176_s29  ;;  %v4061_v51 = vcombine.low %v11770_v62, %v11794_v60 }
 0x503   : > { %v4062_v47 = vcombine.high %v11770_v62, %v11794_v60  ;;  %v2907_v52 = vrot.slane %v2828_v14, 1  ;;  %v2981_v19 = vrot.slane %v11787_v23, 2  ;;  %v11825_v50 = vrot.slane %v3449_v0, %v10296_v12 }
 0x504   : > { %v11821_v3 = vrot.slane %v3669_v56, %v10296_v12  ;;  %v11828_v57 = vrot.slane %v3450_v4, %v10296_v12  ;;  %v11831_v26 = vrot.slane %v4061_v51, %v10296_v12  ;;  %v11834_v61 = vsel %vm655_vm4, %v2900_v7, %v2902_v34 }
 0x505   : > { %v11843_v41 = vsel %vm732_vm3, %v2980_v10, %v2981_v19  ;;  %v11846_v28 = vsel %vm732_vm3, %v2981_v19, %v2983_v46  ;;  %v2905_v54 = vrot.slane %v11787_v23, 1  ;;  %v11858_v10 = vrot.slane %v4062_v47, %v10296_v12 }
 0x506   : > { %15580 = vst [vmem:[#allocation50_spill] sm:$0xff] %v11828_v57  ;;  %v3717_v15 = vcombine.low %v11818_v59, %v11821_v3  ;;  %2867 = vrot.lane.b32.xlu1 %v11739_v8, %s10176_s29  ;;  %2871 = vrot.lane.b32.xlu0 %v11757_v27, %s10176_s29  ;;  %v3465_v22 = vcombine.low %v11780_v32, %v11843_v41  ;;  %v2904_v4 = vrot.slane %v11687_v33, 1 }
 0x507   : > { %v3466_v40 = vcombine.high %v11780_v32, %v11843_v41  ;;  %v4077_v29 = vcombine.low %v11783_v30, %v11846_v28  ;;  %v4078_v1 = vcombine.high %v11783_v30, %v11846_v28  ;;  %15581 = vst [vmem:[#allocation47_spill] sm:$0xff] %v11858_v10  ;;  %v3821_v58 = vcombine.low %v11774_v42, %v11834_v61 }
 0x508   : > { %v3822_v55 = vcombine.high %v11774_v42, %v11834_v61  ;;  %v2908_v49 = vsel %vm655_vm4, %v2905_v54, %v2907_v52  ;;  %v11866_v34 = vrot.slane %v3465_v22, %v10296_v12  ;;  %v2901_v0 = vsel %vm655_vm4, %v2899_v48, %v2900_v7 }
 0x509   : > { %v11869_v17 = vrot.slane %v3466_v40, %v10296_v12  ;;  %v11872_v37 = vrot.slane %v4077_v29, %v10296_v12  ;;  %v11875_v14 = vrot.slane %v4078_v1, %v10296_v12  ;;  %v11882_v56 = vrot.slane %v3821_v58, %v10296_v12 }
 0x50a   : > { %2875 = vrot.lane.b32.xlu1 %v11787_v23, %s10176_s29  ;;  %3017 = vrot.lane.b32.xlu0 %v11760_v21, %s10176_s29  ;;  %v3837_v46 = vcombine.low %v11807_v43, %v2908_v49  ;;  %v3838_v40 = vcombine.high %v11807_v43, %v2908_v49  ;;  %v3209_v1 = vcombine.low %v11777_v16, %v2901_v0 }
 0x50b   : > { %15582 = vst [vmem:[#allocation53_spill] sm:$0xff] %v11869_v17  ;;  %15583 = vst [vmem:[#allocation52_spill] sm:$0xff] %v11875_v14  ;;  %v3210_v58 = vcombine.high %v11777_v16, %v2901_v0  ;;  %v11912_v45 = vrot.slane %v3670_v5, %v10296_v12  ;;  %v2906_v52 = vsel %vm655_vm4, %v2904_v4, %v2905_v54 }
 0x50c   : > { %v11907_v29 = vrot.slane %v3837_v46, %v10296_v12  ;;  %v2896_v46 = vsel %vm655_vm4, %v2894_v36, %v2895_v13  ;;  %v11925_v22 = vrot.slane %v3822_v55, %v10296_v12  ;;  %v11928_v5 = vrot.slane %v3838_v40, %v10296_v12 }
 0x50d   : > { %v3225_v8 = vcombine.low %v2896_v46, %v2906_v52  ;;  %v3226_v36 = vcombine.high %v2896_v46, %v2906_v52  ;;  %v11945_v55 = vrot.slane %v3209_v1, %v10296_v12  ;;  %v3718_v4 = vcombine.high %v11818_v59, %v11821_v3 }
 0x50e   : > { %3019 = vrot.lane.b32.xlu1 %v11770_v62, %s10176_s29  ;;  %3021 = vrot.lane.b32.xlu0 %v11780_v32, %s10176_s29  ;;  %v3885_v7 = vcombine.low %v11882_v56, %v11907_v29  ;;  %v3886_v47 = vcombine.high %v11882_v56, %v11907_v29  ;;  %v3901_v13 = vcombine.low %v11925_v22, %v11928_v5 }
 0x50f   : > { %v3902_v54 = vcombine.high %v11925_v22, %v11928_v5  ;;  %v11954_v9 = vrot.slane %v3210_v58, %v10296_v12  ;;  %v11957_v27 = vrot.slane %v3225_v8, %v10296_v12  ;;  %v11960_v25 = vrot.slane %v3226_v36, %v10296_v12 }
 0x510   : > { %v3733_v40 = vcombine.low %v11938_v2, %v11912_v45  ;;  %v12067_v35 = vrot.slane %v3717_v15, %v10304_v20  ;;  %v12080_v15 = vrot.slane %v3885_v7, %v10304_v20  ;;  %v3900_v7 = vrot.slane %v3886_v47, %v10304_v20 }
 0x511   : > { %v3909_v59 = vrot.slane %v3901_v13, %v10304_v20  ;;  %v3916_v3 = vrot.slane %v3902_v54, %v10304_v20  ;;  %v15590_v22 = vcombine.high %v11938_v2, %v11912_v45  ;;  %v15613_v14 = vcombine.low %v11831_v26, %v11872_v37 }
 0x512   : > { %3023 = vrot.lane.b32.xlu1 %v11783_v30, %s10176_s29  ;;  %3025 = vrot.lane.b32.xlu0 %v11791_v38, %s10176_s29  ;;  %15586 = vst [vmem:[#allocation20_spill] sm:$0xff] %v12067_v35  ;;  %15588 = vst [vmem:[#allocation35_spill] sm:$0xff] %v12080_v15 }
 0x513   : > { %v3748_v5 = vrot.slane %v15590_v22, %v10304_v20 }
 0x516   : > { %3027 = vrot.lane.b32.xlu1 %v11794_v60, %s10176_s29  ;;  %3029 = vrot.lane.b32.xlu0 %v11843_v41, %s10176_s29 }
 0x51a   : > { %2919 = vrot.lane.b32.xlu0 %v11774_v42, %s10173_s26  ;;  %3031 = vrot.lane.b32.xlu1 %v11846_v28, %s10176_s29 }
 0x51e   : > { %2927 = vrot.lane.b32.xlu0 %v11834_v61, %s10173_s26  ;;  %2923 = vrot.lane.b32.xlu1 %v11807_v43, %s10173_s26 }
 0x522   : > { %2943 = vrot.lane.b32.xlu0 %v11774_v42, %s10176_s29  ;;  %2931 = vrot.lane.b32.xlu1 %v2908_v49, %s10173_s26 }
 0x526   : > { %2951 = vrot.lane.b32.xlu0 %v11834_v61, %s10176_s29  ;;  %2947 = vrot.lane.b32.xlu1 %v11807_v43, %s10176_s29 }
 0x52a   : > { %2995 = vrot.lane.b32.xlu0 %v11770_v62, %s10173_s26  ;;  %2955 = vrot.lane.b32.xlu1 %v2908_v49, %s10176_s29 }
 0x52e   : > { %3003 = vrot.lane.b32.xlu0 %v11794_v60, %s10173_s26  ;;  %2999 = vrot.lane.b32.xlu1 %v11783_v30, %s10173_s26 }
 0x532   : > { %2917 = vrot.lane.b32.xlu0 %v11777_v16, %s10173_s26  ;;  %3007 = vrot.lane.b32.xlu1 %v11846_v28, %s10173_s26 }
 0x536   : > { %2925 = vrot.lane.b32.xlu0 %v2901_v0, %s10173_s26  ;;  %2921 = vrot.lane.b32.xlu1 %v2896_v46, %s10173_s26 }
 0x53a   : > { %2941 = vrot.lane.b32.xlu0 %v11777_v16, %s10176_s29  ;;  %2929 = vrot.lane.b32.xlu1 %v2906_v52, %s10173_s26 }
 0x53e   : > { %2949 = vrot.lane.b32.xlu0 %v2901_v0, %s10176_s29  ;;  %2945 = vrot.lane.b32.xlu1 %v2896_v46, %s10176_s29 }
 0x540   : > { %v12011_v62 = vpop.permute.xlu0 %2837  ;;  %v12013_v42 = vpop.permute.xlu1 %2841 }
 0x542   : > { %2993 = vrot.lane.b32.xlu0 %v11760_v21, %s10173_s26  ;;  %2953 = vrot.lane.b32.xlu1 %v2906_v52, %s10176_s29 }
 0x544   : > { %v12018_v30 = vpop.permute.xlu0 %2845 }
 0x545   : > { %v3073_v16 = vcombine.low %v12011_v62, %v12018_v30  ;;  %v12022_v60 = vpop.permute.xlu1 %2849 }
 0x546   : > { %v3089_v43 = vcombine.low %v12013_v42, %v12022_v60  ;;  %3001 = vrot.lane.b32.xlu0 %v11791_v38, %s10173_s26  ;;  %2997 = vrot.lane.b32.xlu1 %v11780_v32, %s10173_s26  ;;  %v12046_v32 = vrot.slane %v3105_v53, %v10304_v20 }
 0x547   : > { %v12031_v21 = vrot.slane %v3073_v16, %v10296_v12 }
 0x548   : > { %v12034_v61 = vrot.slane %v3089_v43, %v10296_v12  ;;  %15584 = vst [vmem:[#allocation54_spill] sm:$0xff] %v12046_v32  ;;  %v12055_v0 = vpop.permute.xlu0 %2861 }
 0x54a   : > { %v3137_v28 = vcombine.low %v12031_v21, %v12034_v61  ;;  %2869 = vrot.lane.b32.xlu0 %v11684_v63, %s10176_s29  ;;  %3005 = vrot.lane.b32.xlu1 %v11843_v41, %s10173_s26  ;;  %v12057_v63 = vpop.permute.xlu1 %2865 }
 0x54c   : > { %v12049_v38 = vrot.slane %v3137_v28, %v10304_v20 }
 0x54e   : > { %15585 = vst [vmem:[#allocation49_spill] sm:$0xff] %v12049_v38  ;;  %2873 = vrot.lane.b32.xlu1 %v11687_v33, %s10176_s29 }
 0x568   : > { %v2840_v41 = vpop.permute.xlu0 %2839 }
 0x56c   : > { %v2844_v52 = vpop.permute.xlu1 %2843 }
 0x570   : > { %v2848_v46 = vpop.permute.xlu0 %2847 }
 0x571   : > { %v3685_v36 = vcombine.low %v2840_v41, %v2848_v46  ;;  %v3686_v28 = vcombine.high %v2840_v41, %v2848_v46 }
 0x573   : > { %v3693_v23 = vrot.slane %v3685_v36, %v10296_v12  ;;  %v3700_v31 = vrot.slane %v3686_v28, %v10296_v12 }
 0x574   : > { %v2864_v16 = vpop.permute.xlu0 %2863  ;;  %v2852_v53 = vpop.permute.xlu1 %2851 }
 0x575   : > { %v3701_v43 = vcombine.low %v2844_v52, %v2852_v53  ;;  %v3702_v58 = vcombine.high %v2844_v52, %v2852_v53 }
 0x577   : > { %v3709_v49 = vrot.slane %v3701_v43, %v10296_v12  ;;  %v3716_v48 = vrot.slane %v3702_v58, %v10296_v12 }
 0x578   : > { %v2872_v33 = vpop.permute.xlu0 %2871  ;;  %v2868_v1 = vpop.permute.xlu1 %2867 }
 0x579   : > { %v3749_v51 = vcombine.low %v3693_v23, %v3709_v49  ;;  %v3789_v41 = vcombine.low %v2864_v16, %v2872_v33  ;;  %v3790_v46 = vcombine.high %v2864_v16, %v2872_v33  ;;  %v3750_v36 = vcombine.high %v3693_v23, %v3709_v49 }
 0x57a   : > { %v3765_v53 = vcombine.low %v3700_v31, %v3716_v48  ;;  %v3766_v8 = vcombine.high %v3700_v31, %v3716_v48  ;;  %v3732_v48 = vrot.slane %v3718_v4, %v10304_v20 }
 0x57b   : > { %v12070_v52 = vrot.slane %v3749_v51, %v10304_v20  ;;  %v3797_v51 = vrot.slane %v3789_v41, %v10296_v12  ;;  %v3804_v23 = vrot.slane %v3790_v46, %v10296_v12  ;;  %v3764_v33 = vrot.slane %v3750_v36, %v10304_v20 }
 0x57c   : > { %v12072_v43 = vpop.permute.xlu0 %3017  ;;  %v2876_v58 = vpop.permute.xlu1 %2875  ;;  %v3773_v39 = vrot.slane %v3765_v53, %v10304_v20  ;;  %v3780_v53 = vrot.slane %v3766_v8, %v10304_v20 }
 0x57d   : > { %15587 = vst [vmem:[#allocation39_spill] sm:$0xff] %v12070_v52  ;;  %v3805_v28 = vcombine.low %v2868_v1, %v2876_v58  ;;  %v3806_v19 = vcombine.high %v2868_v1, %v2876_v58  ;;  %v3741_v58 = vrot.slane %v3733_v40, %v10304_v20  ;;  %v3782_v13 = vcombine.high %v12067_v35, %v12070_v52 }
 0x57f   : > { %v3813_v49 = vrot.slane %v3805_v28, %v10296_v12  ;;  %v3820_v16 = vrot.slane %v3806_v19, %v10296_v12  ;;  %v3783_v28 = vcombine.low %v3732_v48, %v3764_v33 }
 0x580   : > { %v12088_v1 = vpop.permute.xlu0 %3021  ;;  %v12090_v31 = vpop.permute.xlu1 %3019 }
 0x581   : > { %v3853_v41 = vcombine.low %v3797_v51, %v3813_v49  ;;  %v3854_v19 = vcombine.high %v3797_v51, %v3813_v49  ;;  %v3869_v46 = vcombine.low %v3804_v23, %v3820_v16  ;;  %v3870_v36 = vcombine.high %v3804_v23, %v3820_v16 }
 0x582   : > { %v3784_v51 = vcombine.high %v3732_v48, %v3764_v33  ;;  %v3785_v49 = vcombine.low %v3741_v58, %v3773_v39  ;;  %v3786_v16 = vcombine.high %v3741_v58, %v3773_v39  ;;  %v3787_v33 = vcombine.low %v3748_v5, %v3780_v53 }
 0x583   : > { %v12114_v56 = vrot.slane %v3853_v41, %v10304_v20  ;;  %v3868_v47 = vrot.slane %v3854_v19, %v10304_v20  ;;  %v3877_v29 = vrot.slane %v3869_v46, %v10304_v20  ;;  %v3884_v4 = vrot.slane %v3870_v36, %v10304_v20 }
 0x584   : > { %v12119_v40 = vpop.permute.xlu0 %3025  ;;  %v12121_v8 = vpop.permute.xlu1 %3023 }
 0x585   : > { %15589 = vst [vmem:[#allocation45_spill] sm:$0xff] %v12114_v56  ;;  %v3918_v23 = vcombine.high %v12114_v56, %v12080_v15  ;;  %v3919_v41 = vcombine.low %v3868_v47, %v3900_v7  ;;  %v3920_v19 = vcombine.high %v3868_v47, %v3900_v7  ;;  %v3921_v46 = vcombine.low %v3877_v29, %v3909_v59 }
 0x586   : > { %v3922_v36 = vcombine.high %v3877_v29, %v3909_v59  ;;  %v3923_v48 = vcombine.low %v3884_v4, %v3916_v3  ;;  %v3788_v7 = vcombine.high %v3748_v5, %v3780_v53  ;;  %v3924_v58 = vcombine.high %v3884_v4, %v3916_v3 }
 0x587   : > { %v12133_v52 = vpack.i.bf16 %v3918_v23, %v3782_v13  ;;  %v12139_v2 = vpack.i.bf16 %v3919_v41, %v3783_v28  ;;  %v12141_v22 = vpack.i.bf16 %v3920_v19, %v3784_v51  ;;  %v12143_v54 = vpack.i.bf16 %v3921_v46, %v3785_v49 }
 0x588   : > { %v12135_v35 = vpop.permute.xlu0 %3029  ;;  %v12137_v45 = vpop.permute.xlu1 %3027  ;;  %v12145_v15 = vpack.i.bf16 %v3922_v36, %v3786_v16  ;;  %v12147_v39 = vpack.i.bf16 %v3923_v48, %v3787_v33  ;;  %v12153_v29 = vpack.i.bf16 %v3924_v58, %v3788_v7 }
 0x589   : > { %15591 = vst [vmem:[#allocation41_spill] sm:$0xff] %v12141_v22  ;;  %15592 = vst [vmem:[#allocation48_spill] sm:$0xff] %v12143_v54 }
 0x58a   : > { %15593 = vst [vmem:[#allocation51_spill] sm:$0xff] %v12145_v15  ;;  %15594 = vst [vmem:[#allocation46_spill] sm:$0xff] %v12147_v39 }
 0x58b   : > { %15596 = vst [vmem:[#allocation29_spill] sm:$0xff] %v12153_v29 }
 0x58c   : > { %v12149_v59 = vpop.permute.xlu0 %2919  ;;  %v12151_v47 = vpop.permute.xlu1 %3031 }
 0x58d   : > { %15595 = vst [vmem:[#allocation44_spill] sm:$0xff] %v12149_v59 }
 0x590   : > { %v12155_v13 = vpop.permute.xlu0 %2927  ;;  %v12157_v28 = vpop.permute.xlu1 %2923 }
 0x591   : > { %15597 = vst [vmem:[#allocation27_spill] sm:$0xff] %v12155_v13  ;;  %15598 = vst [vmem:[#allocation33_spill] sm:$0xff] %v12157_v28  ;;  %v3925_v3 = vcombine.low %v12149_v59, %v12155_v13 }
 0x593   : > { %v12181_v46 = vrot.slane %v3925_v3, %v10296_v12 }
 0x594   : > { %v12159_v51 = vpop.permute.xlu0 %2943  ;;  %v12161_v23 = vpop.permute.xlu1 %2931 }
 0x595   : > { %15599 = vst [vmem:[#allocation31_spill] sm:$0xff] %v12159_v51  ;;  %15600 = vst [vmem:[#allocation34_spill] sm:$0xff] %v12161_v23  ;;  %v3941_v49 = vcombine.low %v12157_v28, %v12161_v23 }
 0x597   : > { %v12172_v4 = vrot.slane %v3941_v49, %v10296_v12 }
 0x598   : > { %v12165_v16 = vpop.permute.xlu0 %2951  ;;  %v12167_v53 = vpop.permute.xlu1 %2947 }
 0x599   : > { %15601 = vst [vmem:[#allocation32_spill] sm:$0xff] %v12165_v16  ;;  %15602 = vst [vmem:[#allocation40_spill] sm:$0xff] %v12167_v53  ;;  %v3957_v5 = vcombine.low %v12159_v51, %v12165_v16  ;;  %v3989_v33 = vcombine.low %v12181_v46, %v12172_v4  ;;  %v3074_v51 = vcombine.high %v12011_v62, %v12018_v30 }
 0x59b   : > { %v12188_v48 = vrot.slane %v3957_v5, %v10296_v12  ;;  %v12200_v56 = vrot.slane %v3989_v33, %v10304_v20 }
 0x59c   : > { %v12176_v41 = vpop.permute.xlu0 %2995  ;;  %v12178_v19 = vpop.permute.xlu1 %2955 }
 0x59d   : > { %15603 = vst [vmem:[#allocation38_spill] sm:$0xff] %v12176_v41  ;;  %15604 = vst [vmem:[#allocation21_spill] sm:$0xff] %v12178_v19  ;;  %v3973_v36 = vcombine.low %v12167_v53, %v12178_v19  ;;  %v3138_v53 = vcombine.high %v12031_v21, %v12034_v61  ;;  %v15627_v21 = vcombine.low %v11705_v11, %v11711_v44 }
 0x59e   : > { %15607 = vst [vmem:[#allocation26_spill] sm:$0xff] %v12200_v56  ;;  %v12231_v56 = vrot.slane %v15613_v14, %v10304_v20  ;;  %v3090_v14 = vcombine.high %v12013_v42, %v12022_v60 }
 0x59f   : > { %v12191_v7 = vrot.slane %v3973_v36, %v10296_v12  ;;  %v12305_v61 = vrot.slane %v15627_v21, %v10304_v20  ;;  %v15630_v21 = vcombine.low %v11825_v50, %v11866_v34 }
 0x5a0   : > { %v12193_v58 = vpop.permute.xlu0 %3003  ;;  %v12195_v49 = vpop.permute.xlu1 %2999  ;;  %15614 = vst [vmem:[#allocation13_spill] sm:$0xff] %v12231_v56  ;;  %v3088_v56 = vrot.slane %v3074_v51, %v10296_v12  ;;  %v3104_v62 = vrot.slane %v3090_v14, %v10296_v12 }
 0x5a1   : > { %15605 = vst [vmem:[#allocation30_spill] sm:$0xff] %v12193_v58  ;;  %15606 = vst [vmem:[#allocation28_spill] sm:$0xff] %v12195_v49  ;;  %v4021_v3 = vcombine.low %v12188_v48, %v12191_v7  ;;  %v4093_v5 = vcombine.low %v12176_v41, %v12193_v58 }
 0x5a2   : > { %v3153_v14 = vcombine.low %v3088_v56, %v3104_v62  ;;  %v3154_v19 = vcombine.high %v3088_v56, %v3104_v62  ;;  %v15628_v56 = vcombine.high %v11702_v24, %v11708_v18  ;;  %v15631_v18 = vcombine.low %v11945_v55, %v11957_v27 }
 0x5a3   : > { %v12203_v29 = vrot.slane %v4021_v3, %v10304_v20  ;;  %v12216_v17 = vrot.slane %v4093_v5, %v10296_v12 }
 0x5a4   : > { %v12207_v39 = vpop.permute.xlu0 %2917  ;;  %v12209_v36 = vpop.permute.xlu1 %3007  ;;  %v12311_v62 = vrot.slane %v15628_v56, %v10304_v20 }
 0x5a5   : > { %15608 = vst [vmem:[#allocation24_spill] sm:$0xff] %v12203_v29  ;;  %15609 = vst [vmem:[#allocation22_spill] sm:$0xff] %v12207_v39  ;;  %v4109_v10 = vcombine.low %v12195_v49, %v12209_v36 }
 0x5a6   : > { %15610 = vst [vmem:[#allocation10_spill] sm:$0xff] %v12209_v36 }
 0x5a7   : > { %v12219_v33 = vrot.slane %v4109_v10, %v10296_v12 }
 0x5a8   : > { %v12221_v3 = vpop.permute.xlu0 %2925  ;;  %v12223_v57 = vpop.permute.xlu1 %2921 }
 0x5a9   : > { %15611 = vst [vmem:[#allocation12_spill] sm:$0xff] %v12221_v3  ;;  %15612 = vst [vmem:[#allocation11_spill] sm:$0xff] %v12223_v57  ;;  %v4157_v15 = vcombine.low %v12216_v17, %v12219_v33  ;;  %v3313_v54 = vcombine.low %v12207_v39, %v12221_v3 }
 0x5ab   : > { %v12234_v29 = vrot.slane %v4157_v15, %v10304_v20  ;;  %v12266_v60 = vrot.slane %v3313_v54, %v10296_v12 }
 0x5ac   : > { %v12236_v5 = vpop.permute.xlu0 %2941  ;;  %v12238_v10 = vpop.permute.xlu1 %2929 }
 0x5ad   : > { %15615 = vst [vmem:[#allocation43_spill] sm:$0xff] %v12234_v29  ;;  %15616 = vst [vmem:[#allocation42_spill] sm:$0xff] %v12236_v5  ;;  %v3329_v13 = vcombine.low %v12223_v57, %v12238_v10 }
 0x5ae   : > { %15617 = vst [vmem:[#allocation37_spill] sm:$0xff] %v12238_v10  ;;  %15623 = vst [vmem:[#allocation19_spill] sm:$0xff] %v12266_v60 }
 0x5af   : > { %v12255_v41 = vrot.slane %v3329_v13, %v10296_v12 }
 0x5b0   : > { %v12248_v16 = vpop.permute.xlu0 %2949  ;;  %v12250_v15 = vpop.permute.xlu1 %2945 }
 0x5b1   : > { %15618 = vst [vmem:[#allocation36_spill] sm:$0xff] %v12248_v16  ;;  %15619 = vst [vmem:[#allocation23_spill] sm:$0xff] %v12250_v15  ;;  %v3345_v59 = vcombine.low %v12236_v5, %v12248_v16  ;;  %v3377_v13 = vcombine.low %v12266_v60, %v12255_v41  ;;  %v12326_v60 = vrot.slane %v15630_v21, %v10304_v20 }
 0x5b2   : > { %15620 = vst [vmem:[#allocation25_spill] sm:$0xff] %v12255_v41  ;;  %v15634_v41 = vcombine.high %v11954_v9, %v11960_v25 }
 0x5b3   : > { %v12273_v39 = vrot.slane %v3345_v59, %v10296_v12  ;;  %v12287_v28 = vrot.slane %v3377_v13, %v10304_v20  ;;  %v15629_v13 = vcombine.high %v11705_v11, %v11711_v44  ;;  %v12334_v11 = vrot.slane %v15631_v18, %v10304_v20 }
 0x5b4   : > { %v12261_v30 = vpop.permute.xlu0 %2993  ;;  %v12263_v42 = vpop.permute.xlu1 %2953  ;;  %v12337_v44 = vrot.slane %v3154_v19, %v10304_v20  ;;  %v12351_v57 = vrot.slane %v15634_v41, %v10304_v20  ;;  %v4213_v19 = vcombine.low %v12121_v8, %v12151_v47  ;;  %v4197_v41 = vcombine.low %v12090_v31, %v12137_v45 }
 0x5b5   : > { %15621 = vst [vmem:[#allocation14_spill] sm:$0xff] %v12261_v30  ;;  %15622 = vst [vmem:[#allocation15_spill] sm:$0xff] %v12263_v42  ;;  %v3361_v29 = vcombine.low %v12250_v15, %v12263_v42 }
 0x5b6   : > { %15624 = vst [vmem:[#allocation18_spill] sm:$0xff] %v12273_v39  ;;  %v4221_v36 = vrot.slane %v4213_v19, %v10296_v12 }
 0x5b7   : > { %v12276_v51 = vrot.slane %v3361_v29, %v10296_v12  ;;  %v12293_v29 = vrot.slane %v3153_v14, %v10304_v20  ;;  %v12317_v14 = vrot.slane %v15629_v13, %v10304_v20  ;;  %v15633_v13 = vcombine.high %v11945_v55, %v11957_v27 }
 0x5b8   : > { %v12278_v3 = vpop.permute.xlu0 %3001  ;;  %v12280_v58 = vpop.permute.xlu1 %2997 }
 0x5b9   : > { %15625 = vst [vmem:[#allocation16_spill] sm:$0xff] %v12276_v51  ;;  %15626 = vst [vmem:[#allocation17_spill] sm:$0xff] %v12278_v3  ;;  %v3409_v54 = vcombine.low %v12273_v39, %v12276_v51  ;;  %v3481_v23 = vcombine.low %v12261_v30, %v12278_v3  ;;  %v3288_v21 = vrot.slane %v15633_v13, %v10304_v20 }
 0x5ba   : > { %v4205_v3 = vrot.slane %v4197_v41, %v10296_v12 }
 0x5bb   : > { %v12290_v59 = vrot.slane %v3409_v54, %v10304_v20  ;;  %v12320_v54 = vrot.slane %v3138_v53, %v10304_v20  ;;  %v15632_v53 = vcombine.low %v11954_v9, %v11960_v25  ;;  %v12356_v18 = vrot.slane %v3481_v23, %v10296_v12 }
 0x5bc   : > { %v12299_v16 = vpop.permute.xlu1 %3005  ;;  %v2870_v5 = vpop.permute.xlu0 %2869  ;;  %v3170_v9 = vcombine.high %v12046_v32, %v12049_v38  ;;  %v3174_v25 = vcombine.high %v12305_v61, %v12293_v29  ;;  %v3601_v23 = vcombine.low %v12088_v1, %v12135_v35  ;;  %v3602_v32 = vcombine.high %v12088_v1, %v12135_v35 }
 0x5bd   : > { %v3497_v24 = vcombine.low %v12280_v58, %v12299_v16  ;;  %v3297_v56 = vrot.slane %v15632_v53, %v10304_v20  ;;  %v3173_v53 = vcombine.low %v12305_v61, %v12293_v29  ;;  %v3177_v55 = vcombine.low %v12055_v0, %v2870_v5 }
 0x5be   : > { %v3178_v27 = vcombine.high %v12055_v0, %v2870_v5  ;;  %v3171_v49 = vcombine.low %v12311_v62, %v12320_v54  ;;  %v3172_v38 = vcombine.high %v12311_v62, %v12320_v54  ;;  %v3175_v29 = vcombine.low %v12317_v14, %v12337_v44 }
 0x5bf   : > { %v12359_v10 = vrot.slane %v3497_v24, %v10296_v12  ;;  %v3585_v61 = vcombine.low %v12072_v43, %v12119_v40  ;;  %v3185_v30 = vrot.slane %v3177_v55, %v10296_v12  ;;  %v4214_v35 = vcombine.high %v12121_v8, %v12151_v47 }
 0x5c0   : > { %v2874_v13 = vpop.permute.xlu1 %2873 }
 0x5c1   : > { %v3545_v24 = vcombine.low %v12356_v18, %v12359_v10  ;;  %v3193_v0 = vcombine.low %v12057_v63, %v2874_v13  ;;  %v3194_v5 = vcombine.high %v12057_v63, %v2874_v13  ;;  %v3192_v63 = vrot.slane %v3178_v27, %v10296_v12 }
 0x5c2   : > { %v3609_v13 = vrot.slane %v3601_v23, %v10296_v12  ;;  %v3586_v27 = vcombine.high %v12072_v43, %v12119_v40  ;;  %v3176_v23 = vcombine.high %v12317_v14, %v12337_v44  ;;  %v4198_v43 = vcombine.high %v12090_v31, %v12137_v45 }
 0x5c3   : > { %v12389_v22 = vrot.slane %v3545_v24, %v10304_v20  ;;  %v3201_v62 = vrot.slane %v3193_v0, %v10296_v12  ;;  %v3208_v54 = vrot.slane %v3194_v5, %v10296_v12  ;;  %v3593_v0 = vrot.slane %v3585_v61, %v10296_v12 }
 0x5c4   : > { %v4229_v5 = vcombine.low %v4205_v3, %v4221_v36  ;;  %v4228_v40 = vrot.slane %v4214_v35, %v10296_v12  ;;  %v4212_v35 = vrot.slane %v4198_v43, %v10296_v12 }
 0x5c5   : > { %v3241_v19 = vcombine.low %v3185_v30, %v3201_v62  ;;  %v3242_v24 = vcombine.high %v3185_v30, %v3201_v62  ;;  %v3257_v39 = vcombine.low %v3192_v63, %v3208_v54  ;;  %v3258_v55 = vcombine.high %v3192_v63, %v3208_v54 }
 0x5c6   : > { %v3616_v63 = vrot.slane %v3602_v32, %v10296_v12  ;;  %v3617_v62 = vcombine.low %v3593_v0, %v3609_v13  ;;  %v12422_v32 = vrot.slane %v4229_v5, %v10304_v20  ;;  %v3618_v42 = vcombine.high %v3593_v0, %v3609_v13 }
 0x5c7   : > { %v12407_v41 = vrot.slane %v3241_v19, %v10304_v20  ;;  %v3256_v8 = vrot.slane %v3242_v24, %v10304_v20  ;;  %v3265_v47 = vrot.slane %v3257_v39, %v10304_v20  ;;  %v3272_v30 = vrot.slane %v3258_v55, %v10304_v20 }
 0x5c8   : > { %v4230_v19 = vcombine.high %v4205_v3, %v4221_v36  ;;  %v3600_v3 = vrot.slane %v3586_v27, %v10296_v12 }
 0x5c9   : > { %v3309_v44 = vcombine.low %v3265_v47, %v3297_v56  ;;  %v3306_v61 = vcombine.high %v12407_v41, %v12334_v11  ;;  %v3310_v54 = vcombine.high %v3265_v47, %v3297_v56  ;;  %v3307_v39 = vcombine.low %v3256_v8, %v3288_v21 }
 0x5ca   : > { %v3308_v24 = vcombine.high %v3256_v8, %v3288_v21  ;;  %v3311_v55 = vcombine.low %v3272_v30, %v12351_v57  ;;  %v12428_v56 = vrot.slane %v3617_v62, %v10304_v20  ;;  %v3312_v36 = vcombine.high %v3272_v30, %v12351_v57 }
 0x5cb   : > { %v9556_v1 = vpack.i.bf16 %v3309_v44, %v3173_v53  ;;  %v9541_v31 = vpack.i.bf16 %v3306_v61, %v3170_v9  ;;  %v9561_v45 = vpack.i.bf16 %v3310_v54, %v3174_v25  ;;  %v9546_v51 = vpack.i.bf16 %v3307_v39, %v3171_v49  ;;  %v15637_v39 = vld [vmem:[#allocation15_spill] sm:$0xff] }
 0x5cc   : > { %v9551_v14 = vpack.i.bf16 %v3308_v24, %v3172_v38  ;;  %v12425_v15 = vpack.i.bf16 %v3311_v55, %v3175_v29  ;;  %v12435_v21 = vrot.slane %v4230_v19, %v10304_v20  ;;  %v4245_v53 = vcombine.low %v4212_v35, %v4228_v40  ;;  %v15638_v24 = vld [vmem:[#allocation23_spill] sm:$0xff] }
 0x5cd   : > { %9557 = vrot.lane.b32.xlu0 %v9556_v1, %s10165_s17  ;;  %9542 = vrot.lane.b32.xlu1 %v9541_v31, %s10169_s25  ;;  %v4261_v38 = vcombine.high %v12422_v32, %v15521_v6  ;;  %v12439_v49 = vpack.i.bf16 %v3312_v36, %v3176_v23  ;;  %v12442_v9 = vrot.slane %v3618_v42, %v10304_v20  ;;  %v15644_v36 = vld [vmem:[#allocation10_spill] sm:$0xff] }
 0x5ce   : > { %v3633_v25 = vcombine.low %v3600_v3, %v3616_v63  ;;  %v3649_v57 = vcombine.high %v12428_v56, %v15521_v6  ;;  %v12449_v29 = vrot.slane %v4245_v53, %v10304_v20  ;;  %v4262_v1 = vcombine.high %v12435_v21, %v15521_v6 }
 0x5cf   : > { %v3650_v42 = vcombine.high %v12442_v9, %v15521_v6  ;;  %v3634_v23 = vcombine.high %v3600_v3, %v3616_v63  ;;  %v4022_v8 = vcombine.high %v12188_v48, %v12191_v7  ;;  %v4246_v30 = vcombine.high %v4212_v35, %v4228_v40  ;;  %v15643_v35 = vld [vmem:[#allocation41_spill] sm:$0xff]  ;;  %v15645_v3 = vld [vmem:[#allocation28_spill] sm:$0xff] }
 0x5d0   : > { %v9606_v13 = vpack.i.bf16 %v4261_v38, %v3649_v57  ;;  %v12454_v27 = vrot.slane %v3633_v25, %v10304_v20  ;;  %v4263_v5 = vcombine.high %v12449_v29, %v15521_v6  ;;  %v3578_v63 = vcombine.high %v12326_v60, %v12389_v22 }
 0x5d1   : > { %9562 = vrot.lane.b32.xlu0 %v9561_v45, %s10163_s10  ;;  %9547 = vrot.lane.b32.xlu1 %v9546_v51, %s10167_s20  ;;  %v4158_v51 = vcombine.high %v12216_v17, %v12219_v33  ;;  %v9611_v0 = vpack.i.bf16 %v4262_v1, %v3650_v42  ;;  %v3990_v17 = vcombine.high %v12181_v46, %v12172_v4  ;;  %v15649_v1 = vld [vmem:[#allocation19_spill] sm:$0xff] }
 0x5d2   : > { %v3651_v47 = vcombine.high %v12454_v27, %v15521_v6  ;;  %v12479_v48 = vrot.slane %v3634_v23, %v10304_v20  ;;  %v12482_v7 = vrot.slane %v4022_v8, %v10304_v20  ;;  %v3442_v4 = vcombine.high %v12287_v28, %v12290_v59 }
 0x5d3   : > { %v12474_v33 = vrot.slane %v4158_v51, %v10304_v20  ;;  %v12496_v46 = vrot.slane %v4246_v30, %v10304_v20  ;;  %v12499_v40 = vrot.slane %v3990_v17, %v10304_v20  ;;  %v15636_v54 = vcombine.high %v11825_v50, %v11866_v34  ;;  %v15646_v50 = vld [vmem:[#allocation37_spill] sm:$0xff]  ;;  %v15647_v34 = vld [vmem:[#allocation11_spill] sm:$0xff]  ;;  %v15650_v51 = vld [vmem:[#allocation36_spill] sm:$0xff] }
 0x5d4   : > { %v9616_v62 = vpack.i.bf16 %v4263_v5, %v3651_v47  ;;  %v9626_v44 = vpack.i.bf16 %v3578_v63, %v3442_v4  ;;  %v3652_v61 = vcombine.high %v12479_v48, %v15521_v6  ;;  %v3362_v55 = vcombine.high %v15638_v24, %v15637_v39  ;;  %v15652_v47 = vld [vmem:[#allocation34_spill] sm:$0xff]  ;;  %v15653_v30 = vld [vmem:[#allocation33_spill] sm:$0xff]  ;;  %v15655_v63 = vld [vmem:[#allocation40_spill] sm:$0xff] }
 0x5d5   : > { %9607 = vrot.lane.b32.xlu0 %v9606_v13, %s10169_s25  ;;  %9552 = vrot.lane.b32.xlu1 %v9551_v14, %s10168_s24  ;;  %v12515_v19 = vrot.slane %v15636_v54, %v10304_v20  ;;  %v4110_v53 = vcombine.high %v15645_v3, %v15644_v36  ;;  %v3330_v38 = vcombine.high %v15647_v34, %v15646_v50  ;;  %v15648_v13 = vld [vmem:[#allocation25_spill] sm:$0xff]  ;;  %v15656_v4 = vld [vmem:[#allocation30_spill] sm:$0xff]  ;;  %v15663_v34 = vld [vmem:[#allocation27_spill] sm:$0xff] }
 0x5d6   : > { %v4264_v57 = vcombine.high %v12496_v46, %v15521_v6  ;;  %v3378_v42 = vcombine.high %v15649_v1, %v15648_v13  ;;  %v3942_v17 = vcombine.high %v15653_v30, %v15652_v47  ;;  %v15659_v54 = vld [vmem:[#allocation22_spill] sm:$0xff]  ;;  %v12551_v24 = vrot.slane %v3362_v55, %v10296_v12  ;;  %v15665_v1 = vld [vmem:[#allocation51_spill] sm:$0xff] }
 0x5d7   : > { %v12566_v36 = vrot.slane %v3330_v38, %v10296_v12 }
 0x5d8   : > { %v9641_v55 = vpack.i.bf16 %v4264_v57, %v3652_v61 }
 0x5d9   : > { %9612 = vrot.lane.b32.xlu0 %v9611_v0, %s10168_s24  ;;  %9567 = vrot.lane.b32.xlu1 %v12133_v52, %s10169_s25  ;;  %v15635_v52 = vcombine.high %v11831_v26, %v11872_v37  ;;  %v3498_v26 = vcombine.high %v12280_v58, %v12299_v16  ;;  %v3546_v37 = vcombine.high %v12356_v18, %v12359_v10  ;;  %v15639_v16 = vld [vmem:[#allocation16_spill] sm:$0xff]  ;;  %v15640_v58 = vld [vmem:[#allocation18_spill] sm:$0xff]  ;;  %v15641_v10 = vld [vmem:[#allocation17_spill] sm:$0xff] }
 0x5da   : > { %v3410_v31 = vcombine.high %v15640_v58, %v15639_v16  ;;  %v15642_v18 = vld [vmem:[#allocation14_spill] sm:$0xff]  ;;  %v15660_v16 = vld [vmem:[#allocation48_spill] sm:$0xff] }
 0x5db   : > { %v12488_v43 = vrot.slane %v15635_v52, %v10304_v20  ;;  %v3482_v45 = vcombine.high %v15642_v18, %v15641_v10  ;;  %v15651_v0 = vld [vmem:[#allocation42_spill] sm:$0xff]  ;;  %v12537_v23 = vrot.slane %v3498_v26, %v10296_v12  ;;  %v12540_v8 = vrot.slane %v3546_v37, %v10304_v20  ;;  %v15661_v58 = vld [vmem:[#allocation32_spill] sm:$0xff]  ;;  %v15662_v10 = vld [vmem:[#allocation31_spill] sm:$0xff] }
 0x5dc   : > { %v3346_v5 = vcombine.high %v15651_v0, %v15650_v51  ;;  %v12554_v26 = vrot.slane %v3410_v31, %v10304_v20  ;;  %v3958_v18 = vcombine.high %v15662_v10, %v15661_v58  ;;  %v12569_v31 = vrot.slane %v3378_v42, %v10304_v20 }
 0x5dd   : > { %9617 = vrot.lane.b32.xlu0 %v9616_v62, %s10163_s10  ;;  %9572 = vrot.lane.b32.xlu1 %v12139_v2, %s10167_s20  ;;  %v4191_v14 = vcombine.low %v12488_v43, %v12474_v33  ;;  %v4055_v2 = vcombine.low %v12499_v40, %v12482_v7  ;;  %v15654_v62 = vld [vmem:[#allocation21_spill] sm:$0xff]  ;;  %v12557_v37 = vrot.slane %v3482_v45, %v10296_v12 }
 0x5de   : > { %v3974_v52 = vcombine.high %v15655_v63, %v15654_v62  ;;  %v12572_v45 = vrot.slane %v3346_v5, %v10296_v12  ;;  %v3580_v50 = vcombine.high %v12515_v19, %v12540_v8  ;;  %v3444_v42 = vcombine.high %v12569_v31, %v12554_v26 }
 0x5df   : > { %v9631_v25 = vpack.i.bf16 %v4191_v14, %v4055_v2  ;;  %v15657_v14 = vld [vmem:[#allocation38_spill] sm:$0xff]  ;;  %v15658_v2 = vld [vmem:[#allocation12_spill] sm:$0xff]  ;;  %v3561_v3 = vcombine.low %v12557_v37, %v12537_v23  ;;  %v3956_v51 = vrot.slane %v3942_v17, %v10296_v12  ;;  %v3972_v0 = vrot.slane %v3958_v18, %v10296_v12  ;;  %v15669_v18 = vld [vmem:[#allocation47_spill] sm:$0xff] }
 0x5e0   : > { %v3314_v39 = vcombine.high %v15659_v54, %v15658_v2  ;;  %v3425_v57 = vcombine.low %v12572_v45, %v12551_v24  ;;  %v9651_v62 = vpack.i.bf16 %v3580_v50, %v3444_v42  ;;  %v9591_v63 = vpack.i.bf16 %v12435_v21, %v12442_v9  ;;  %v15666_v17 = vld [vmem:[#allocation50_spill] sm:$0xff]  ;;  %v15673_v42 = vld [vmem:[#allocation13_spill] sm:$0xff] }
 0x5e1   : > { %9627 = vrot.lane.b32.xlu0 %v9626_v44, %s10169_s25  ;;  %9577 = vrot.lane.b32.xlu1 %v15643_v35, %s10168_s24  ;;  %v4094_v44 = vcombine.high %v15657_v14, %v15656_v4  ;;  %v4124_v35 = vrot.slane %v4110_v53, %v10296_v12  ;;  %v3988_v53 = vrot.slane %v3974_v52, %v10296_v12 }
 0x5e2   : > { %v12583_v61 = vrot.slane %v3314_v39, %v10296_v12  ;;  %v3569_v30 = vrot.slane %v3561_v3, %v10304_v20  ;;  %v3433_v14 = vrot.slane %v3425_v57, %v10304_v20  ;;  %v9596_v21 = vpack.i.bf16 %v12449_v29, %v12454_v27  ;;  %v15672_v27 = vld [vmem:[#allocation43_spill] sm:$0xff] }
 0x5e3   : > { %v4108_v38 = vrot.slane %v4094_v44, %v10296_v12  ;;  %v4037_v4 = vcombine.low %v3972_v0, %v3988_v53  ;;  %v15667_v44 = vld [vmem:[#allocation53_spill] sm:$0xff]  ;;  %v9601_v29 = vpack.i.bf16 %v12496_v46, %v12479_v48 }
 0x5e4   : > { %v3393_v47 = vcombine.low %v12583_v61, %v12566_v36  ;;  %v15668_v2 = vcombine.low %v15666_v17, %v15667_v44 }
 0x5e5   : > { %9632 = vrot.lane.b32.xlu0 %v9631_v25, %s10167_s20  ;;  %9582 = vrot.lane.b32.xlu1 %v15660_v16, %s10165_s17  ;;  %v15664_v25 = vld [vmem:[#allocation44_spill] sm:$0xff]  ;;  %v4173_v5 = vcombine.low %v4108_v38, %v4124_v35  ;;  %v4045_v10 = vrot.slane %v4037_v4, %v10304_v20 }
 0x5e6   : > { %v3926_v13 = vcombine.high %v15664_v25, %v15663_v34  ;;  %v3537_v54 = vrot.slane %v15668_v2, %v10304_v20  ;;  %v3401_v58 = vrot.slane %v3393_v47, %v10304_v20  ;;  %v4038_v47 = vcombine.high %v3972_v0, %v3988_v53 }
 0x5e7   : > { %v4181_v16 = vrot.slane %v4173_v5, %v10304_v20  ;;  %v4190_v5 = vcombine.high %v15673_v42, %v15672_v27  ;;  %v3579_v53 = vcombine.low %v12515_v19, %v12540_v8 }
 0x5e8   : > { %v3940_v52 = vrot.slane %v3926_v13, %v10296_v12  ;;  %v3581_v9 = vcombine.low %v3537_v54, %v3569_v30  ;;  %v3445_v34 = vcombine.low %v3401_v58, %v3433_v14  ;;  %v4174_v13 = vcombine.high %v4108_v38, %v4124_v35 }
 0x5e9   : > { %9642 = vrot.lane.b32.xlu0 %v9641_v55, %s10164_s11  ;;  %9587 = vrot.lane.b32.xlu1 %v15665_v1, %s10163_s10  ;;  %v15670_v55 = vld [vmem:[#allocation52_spill] sm:$0xff]  ;;  %v3582_v46 = vcombine.high %v3537_v54, %v3569_v30  ;;  %v4052_v0 = vrot.slane %v4038_v47, %v10304_v20  ;;  %v4192_v30 = vcombine.high %v12488_v43, %v12474_v33 }
 0x5ea   : > { %v4005_v39 = vcombine.low %v3940_v52, %v3956_v51  ;;  %v15671_v3 = vcombine.low %v15669_v18, %v15670_v55  ;;  %v9676_v1 = vpack.i.bf16 %v3581_v9, %v3445_v34  ;;  %v4006_v2 = vcombine.high %v3940_v52, %v3956_v51 }
 0x5eb   : > { %v4188_v35 = vrot.slane %v4174_v13, %v10304_v20  ;;  %v3426_v51 = vcombine.high %v12572_v45, %v12551_v24  ;;  %v3394_v52 = vcombine.high %v12583_v61, %v12566_v36  ;;  %v4056_v33 = vcombine.high %v12499_v40, %v12482_v7 }
 0x5ec   : > { %v4149_v50 = vrot.slane %v15671_v3, %v10304_v20  ;;  %v4013_v25 = vrot.slane %v4005_v39, %v10304_v20  ;;  %v3562_v39 = vcombine.high %v12557_v37, %v12537_v23  ;;  %v3446_v23 = vcombine.high %v3401_v58, %v3433_v14 }
 0x5ed   : > { %9652 = vrot.lane.b32.xlu0 %v9651_v62, %s10168_s24  ;;  %9592 = vrot.lane.b32.xlu1 %v9591_v63, %s10167_s20  ;;  %v15675_v63 = vld [vmem:[#allocation26_spill] sm:$0xff]  ;;  %v3443_v37 = vcombine.low %v12569_v31, %v12554_v26  ;;  %v4020_v19 = vrot.slane %v4006_v2, %v10304_v20  ;;  %v15677_v14 = vcombine.high %v15666_v17, %v15667_v44 }
 0x5ee   : > { %v4194_v57 = vcombine.high %v4149_v50, %v4181_v16  ;;  %v4058_v62 = vcombine.high %v4013_v25, %v4045_v10  ;;  %v3576_v54 = vrot.slane %v3562_v39, %v10304_v20  ;;  %v9686_v24 = vpack.i.bf16 %v3582_v46, %v3446_v23 }
 0x5ef   : > { %v9636_v45 = vpack.i.bf16 %v3579_v53, %v3443_v37  ;;  %v3544_v58 = vrot.slane %v15677_v14, %v10304_v20  ;;  %v3440_v26 = vrot.slane %v3426_v51, %v10304_v20  ;;  %v4059_v31 = vcombine.low %v4020_v19, %v4052_v0 }
 0x5f0   : > { %v9681_v38 = vpack.i.bf16 %v4194_v57, %v4058_v62  ;;  %v4193_v43 = vcombine.low %v4149_v50, %v4181_v16  ;;  %v3408_v36 = vrot.slane %v3394_v52, %v10304_v20  ;;  %v4057_v44 = vcombine.low %v4013_v25, %v4045_v10  ;;  %v15678_v50 = vld [vmem:[#allocation46_spill] sm:$0xff]  ;;  %v15679_v10 = vld [vmem:[#allocation29_spill] sm:$0xff] }
 0x5f1   : > { %9667 = vrot.lane.b32.xlu0 %v12425_v15, %s10166_s19  ;;  %9597 = vrot.lane.b32.xlu1 %v9596_v21, %s10165_s17  ;;  %v15674_v15 = vld [vmem:[#allocation24_spill] sm:$0xff]  ;;  %v15676_v21 = vcombine.high %v15669_v18, %v15670_v55  ;;  %v9646_v18 = vpack.i.bf16 %v4192_v30, %v4056_v33  ;;  %v3583_v55 = vcombine.low %v3544_v58, %v3576_v54  ;;  %v9278_v25 = vld [vmem:[%s15288_s2 + $0x4] sm:$0xf] }
 0x5f2   : > { %v4054_v4 = vcombine.high %v15675_v63, %v15674_v15  ;;  %v3447_v17 = vcombine.low %v3408_v36, %v3440_v26  ;;  %v9656_v34 = vpack.i.bf16 %v4193_v43, %v4057_v44  ;;  %v4060_v7 = vcombine.high %v4020_v19, %v4052_v0 }
 0x5f3   : > { %v4156_v9 = vrot.slane %v15676_v21, %v10304_v20  ;;  %v3584_v16 = vcombine.high %v3544_v58, %v3576_v54  ;;  %v3448_v57 = vcombine.high %v3408_v36, %v3440_v26 }
 0x5f4   : > { %v9621_v48 = vpack.i.bf16 %v4190_v5, %v4054_v4  ;;  %v9696_v3 = vpack.i.bf16 %v3583_v55, %v3447_v17 }
 0x5f5   : > { %9677 = vrot.lane.b32.xlu0 %v9676_v1, %s10165_s17  ;;  %9602 = vrot.lane.b32.xlu1 %v9601_v29, %s10166_s19  ;;  %v4195_v8 = vcombine.low %v4156_v9, %v4188_v35  ;;  %v4196_v13 = vcombine.high %v4156_v9, %v4188_v35  ;;  %v9706_v1 = vpack.i.bf16 %v3584_v16, %v3448_v57 }
 0x5f7   : > { %v9691_v61 = vpack.i.bf16 %v4195_v8, %v4059_v31  ;;  %v9701_v40 = vpack.i.bf16 %v4196_v13, %v4060_v7 }
 0x5f9   : > { %9682 = vrot.lane.b32.xlu0 %v9681_v38, %s10163_s10  ;;  %9622 = vrot.lane.b32.xlu1 %v9621_v48, %s10169_s25 }
 0x5fd   : > { %9687 = vrot.lane.b32.xlu0 %v9686_v24, %s10163_s10  ;;  %9637 = vrot.lane.b32.xlu1 %v9636_v45, %s10167_s20 }
 0x601   : > { %9692 = vrot.lane.b32.xlu0 %v9691_v61, %s10166_s19  ;;  %9647 = vrot.lane.b32.xlu1 %v9646_v18, %s10168_s24 }
 0x605   : > { %9697 = vrot.lane.b32.xlu0 %v9696_v3, %s10166_s19  ;;  %9657 = vrot.lane.b32.xlu1 %v9656_v34, %s10165_s17  ;;  %v15680_v3 = vld [vmem:[#allocation54_spill] sm:$0xff]  ;;  %v15681_v34 = vld [vmem:[#allocation49_spill] sm:$0xff] }
 0x606   : > { %v15682_v13 = vcombine.low %v15680_v3, %v15681_v34  ;;  %v15684_v34 = vld [vmem:[#allocation45_spill] sm:$0xff] }
 0x609   : > { %9702 = vrot.lane.b32.xlu0 %v9701_v40, %s10164_s11  ;;  %9662 = vrot.lane.b32.xlu1 %v15678_v50, %s10166_s19  ;;  %v15683_v40 = vcombine.low %v12407_v41, %v12334_v11 }
 0x60d   : > { %9707 = vrot.lane.b32.xlu0 %v9706_v1, %s10164_s11  ;;  %9672 = vrot.lane.b32.xlu1 %v15679_v10, %s10164_s11 }
 0x611   : > { %9712 = vrot.lane.b32.xlu0 %v12439_v49, %s10164_s11  ;;  %4627 = vperm.xlu1 %9716, %v9278_v25  }
 0x63f   : > { %v12675_v29 = vpop.permute.xlu0 %9557  ;;  %v9543_v5 = vpop.permute.xlu1 %9542 }
 0x640   : > { %v9545_v24 = vunpack.i.h.bf16 %v9543_v5  ;;  %v9544_v45 = vunpack.i.l.bf16 %v9543_v5 }
 0x642   : > { %v4545_v7 = vsel %vm2313_vm5, %v15682_v13, %v9544_v45  ;;  %v4546_v16 = vsel %vm2313_vm5, %v15683_v40, %v9545_v24  ;;  %v15685_v13 = vld [vmem:[#allocation35_spill] sm:$0xff] }
 0x643   : > { %v12677_v47 = vpop.permute.xlu0 %9562  ;;  %v9548_v62 = vpop.permute.xlu1 %9547 }
 0x644   : > { %v9550_v26 = vunpack.i.h.bf16 %v9548_v62  ;;  %v9549_v31 = vunpack.i.l.bf16 %v9548_v62  ;;  %v9565_v24 = vunpack.i.h.bf16 %v12677_v47 }
 0x646   : > { %v4550_v1 = vsel %vm2319_vm6, %v4545_v7, %v9549_v31  ;;  %v4551_v10 = vsel %vm2319_vm6, %v4546_v16, %v9550_v26  ;;  %v9564_v31 = vunpack.i.l.bf16 %v12677_v47  ;;  %v15686_v7 = vcombine.low %v15684_v34, %v15685_v13 }
 0x647   : > { %v9608_v4 = vpop.permute.xlu0 %9607  ;;  %v9553_v2 = vpop.permute.xlu1 %9552  ;;  %v15694_v47 = vmov 0  }
 0x648   : > { %v9610_v51 = vunpack.i.h.bf16 %v9608_v4  ;;  %v9609_v23 = vunpack.i.l.bf16 %v9608_v4  ;;  %v9555_v18 = vunpack.i.h.bf16 %v9553_v2  ;;  %v9554_v55 = vunpack.i.l.bf16 %v9553_v2 }
 0x64a   : > { %v4584_v52 = vsel %vm2313_vm5, %v12422_v32, %v9610_v51  ;;  %v4549_v54 = vsel %vm2313_vm5, %v12428_v56, %v9609_v23  ;;  %v4555_v2 = vsel %vm2325_vm7, %v4550_v1, %v9554_v55  ;;  %v15688_v1 = vld [vmem:[#allocation39_spill] sm:$0xff] }
 0x64b   : > { %v9613_v35 = vpop.permute.xlu0 %9612  ;;  %v12679_v38 = vpop.permute.xlu1 %9567 }
 0x64c   : > { %v9615_v33 = vunpack.i.h.bf16 %v9613_v35  ;;  %v9614_v43 = vunpack.i.l.bf16 %v9613_v35  ;;  %v4556_v35 = vsel %vm2325_vm7, %v4551_v10, %v9555_v18  ;;  %v9570_v45 = vunpack.i.h.bf16 %v12679_v38 }
 0x64e   : > { %v4581_v40 = vsel %vm2313_vm5, %v15686_v7, %v9570_v45 }
 0x64f   : > { %v9618_v39 = vpop.permute.xlu0 %9617  ;;  %v12681_v48 = vpop.permute.xlu1 %9572 }
 0x650   : > { %v9620_v25 = vunpack.i.h.bf16 %v9618_v39  ;;  %v9619_v5 = vunpack.i.l.bf16 %v9618_v39  ;;  %v9574_v18 = vunpack.i.l.bf16 %v12681_v48 }
 0x653   : > { %v12683_v46 = vpop.permute.xlu0 %9627  ;;  %v12685_v53 = vpop.permute.xlu1 %9577 }
 0x654   : > { %v9579_v3 = vunpack.i.l.bf16 %v12685_v53 }
 0x657   : > { %v12687_v49 = vpop.permute.xlu0 %9632  ;;  %v12689_v0 = vpop.permute.xlu1 %9582 }
 0x658   : > { %v9584_v16 = vunpack.i.l.bf16 %v12689_v0 }
 0x65b   : > { %v9643_v21 = vpop.permute.xlu0 %9642  ;;  %v12691_v9 = vpop.permute.xlu1 %9587 }
 0x65c   : > { %v9645_v51 = vunpack.i.h.bf16 %v9643_v21  ;;  %v9644_v23 = vunpack.i.l.bf16 %v9643_v21 }
 0x65f   : > { %v12693_v37 = vpop.permute.xlu0 %9652  ;;  %v9593_v19 = vpop.permute.xlu1 %9592 }
 0x660   : > { %v9595_v8 = vunpack.i.h.bf16 %v9593_v19  ;;  %v9594_v30 = vunpack.i.l.bf16 %v9593_v19 }
 0x662   : > { %v4589_v14 = vsel %vm2319_vm6, %v4584_v52, %v9595_v8  ;;  %v4554_v58 = vsel %vm2319_vm6, %v4549_v54, %v9594_v30  ;;  %v9560_v30 = vunpack.i.h.bf16 %v12675_v29  ;;  %v9559_v52 = vunpack.i.l.bf16 %v12675_v29 }
 0x663   : > { %v12701_v36 = vpop.permute.xlu0 %9667  ;;  %v9598_v61 = vpop.permute.xlu1 %9597  ;;  %v4559_v44 = vsel %vm2325_vm7, %v4554_v58, %v9614_v43  ;;  %v4594_v56 = vsel %vm2325_vm7, %v4589_v14, %v9615_v33  ;;  %v9569_v43 = vunpack.i.l.bf16 %v12679_v38  ;;  %v9585_v38 = vunpack.i.h.bf16 %v12689_v0 }
 0x664   : > { %v9600_v17 = vunpack.i.h.bf16 %v9598_v61  ;;  %v9599_v32 = vunpack.i.l.bf16 %v9598_v61  ;;  %v12735_v33 = vsel %vm2331_vm8, %v4555_v2, %v9559_v52  ;;  %v12738_v29 = vsel %vm2331_vm8, %v4556_v35, %v9560_v30 }
 0x665   : > { %v9575_v61 = vunpack.i.h.bf16 %v12681_v48  ;;  %v9635_v52 = vunpack.i.h.bf16 %v12687_v49 }
 0x666   : > { %v4564_v50 = vsel %vm2331_vm8, %v4559_v44, %v9599_v32  ;;  %v4599_v57 = vsel %vm2331_vm8, %v4594_v56, %v9600_v17  ;;  %v9630_v32 = vunpack.i.h.bf16 %v12683_v46  ;;  %v9629_v44 = vunpack.i.l.bf16 %v12683_v46 }
 0x667   : > { %v12717_v62 = vpop.permute.xlu0 %9677  ;;  %v9603_v4 = vpop.permute.xlu1 %9602  ;;  %v4604_v19 = vsel %vm2337_vm9, %v4599_v57, %v9620_v25  ;;  %v4569_v8 = vsel %vm2337_vm9, %v4564_v50, %v9619_v5  ;;  %v9580_v56 = vunpack.i.h.bf16 %v12685_v53  ;;  %v15687_v57 = vld [vmem:[#allocation20_spill] sm:$0xff]  ;;  %v9589_v25 = vunpack.i.l.bf16 %v12691_v9 }
 0x668   : > { %v9605_v11 = vunpack.i.h.bf16 %v9603_v4  ;;  %v9604_v41 = vunpack.i.l.bf16 %v9603_v4  ;;  %v15689_v10 = vcombine.low %v15687_v57, %v15688_v1  ;;  %v4586_v0 = vsel %vm2319_vm6, %v4581_v40, %v9575_v61 }
 0x669   : > { %v4591_v30 = vsel %vm2325_vm7, %v4586_v0, %v9580_v56 }
 0x66a   : > { %v4609_v39 = vsel %vm2343_vm10, %v4604_v19, %v9605_v11  ;;  %v4574_v54 = vsel %vm2343_vm10, %v4569_v8, %v9604_v41  ;;  %v4580_v53 = vsel %vm2313_vm5, %v15689_v10, %v9569_v43  ;;  %v15690_v41 = vcombine.low %v12326_v60, %v12389_v22 }
 0x66b   : > { %v12729_v14 = vpop.permute.xlu0 %9682  ;;  %v9623_v58 = vpop.permute.xlu1 %9622  ;;  %v4614_v21 = vsel %vm2349_vm11, %v4609_v39, %v9645_v51  ;;  %v4579_v26 = vsel %vm2349_vm11, %v4574_v54, %v9644_v23  ;;  %v4585_v2 = vsel %vm2319_vm6, %v4580_v53, %v9574_v18  ;;  %v15691_v23 = vcombine.low %v12287_v28, %v12290_v59 }
 0x66c   : > { %v4620_v55 = vpack.c.bf16 %v4614_v21, %v4614_v21  ;;  %v4619_v17 = vpack.c.bf16 %v4579_v26, %v4579_v26  ;;  %v9625_v5 = vunpack.i.h.bf16 %v9623_v58  ;;  %v9624_v4 = vunpack.i.l.bf16 %v9623_v58 }
 0x66d   : > { %v4548_v51 = vsel %vm2313_vm5, %v15690_v41, %v9630_v32  ;;  %v4547_v19 = vsel %vm2313_vm5, %v15691_v23, %v9629_v44  ;;  %v4590_v8 = vsel %vm2325_vm7, %v4585_v2, %v9579_v3  ;;  %v9634_v39 = vunpack.i.l.bf16 %v12687_v49 }
 0x66e   : > { %9279 = vmatprep.subr.msk.bf16.mxu1 %vm2407_vm12, %v4620_v55  ;;  %v4634_v46 = vsel %vm2407_vm12, %v4619_v17, 0  ;;  %v4595_v54 = vsel %vm2331_vm8, %v4590_v8, %v9584_v16  ;;  %v4596_v45 = vsel %vm2331_vm8, %v4591_v30, %v9585_v38  ;;  %v9590_v58 = vunpack.i.h.bf16 %v12691_v9 }
 0x66f   : > { %v12754_v48 = vpop.permute.xlu0 %9687  ;;  %v9638_v50 = vpop.permute.xlu1 %9637  ;;  %4650 = vmatpush1.bf16.msra.mxu1 %v4634_v46  ;;  %v4600_v28 = vsel %vm2337_vm9, %v4595_v54, %v9589_v25  ;;  %v15692_v59 = vcombine.low %v15673_v42, %v15672_v27  ;;  %v15693_v26 = vcombine.low %v15675_v63, %v15674_v15  ;;  %v9655_v9 = vunpack.i.h.bf16 %v12693_v37 }
 0x670   : > { %v9640_v35 = vunpack.i.h.bf16 %v9638_v50  ;;  %v9639_v11 = vunpack.i.l.bf16 %v9638_v50  ;;  %v9654_v17 = vunpack.i.l.bf16 %v12693_v37  ;;  %v9680_v32 = vunpack.i.h.bf16 %v12717_v62 }
 0x671   : > { %v4583_v21 = vsel %vm2313_vm5, %v15692_v59, %v9625_v5  ;;  %v4582_v49 = vsel %vm2313_vm5, %v15693_v26, %v9624_v4  ;;  %v9679_v27 = vunpack.i.l.bf16 %v12717_v62  ;;  %v9685_v42 = vunpack.i.h.bf16 %v12729_v14 }
 0x672   : > { %v4553_v43 = vsel %vm2319_vm6, %v4548_v51, %v9640_v35  ;;  %v4552_v61 = vsel %vm2319_vm6, %v4547_v19, %v9639_v11  ;;  %v9684_v15 = vunpack.i.l.bf16 %v12729_v14  ;;  %v4587_v63 = vsel %vm2319_vm6, %v4582_v49, %v9634_v39 }
 0x673   : > { %v9693_v22 = vpop.permute.xlu0 %9692  ;;  %v9648_v60 = vpop.permute.xlu1 %9647  ;;  %v4588_v44 = vsel %vm2319_vm6, %v4583_v21, %v9635_v52  ;;  %v4558_v34 = vsel %vm2325_vm7, %v4553_v43, %v9655_v9  ;;  %v4557_v13 = vsel %vm2325_vm7, %v4552_v61, %v9654_v17  ;;  %v9690_v40 = vunpack.i.h.bf16 %v12754_v48 }
 0x674   : > { %v9650_v18 = vunpack.i.h.bf16 %v9648_v60  ;;  %v9649_v55 = vunpack.i.l.bf16 %v9648_v60  ;;  %v9689_v62 = vunpack.i.l.bf16 %v12754_v48  ;;  %v9695_v16 = vunpack.i.h.bf16 %v9693_v22 }
 0x675   : > { %v9694_v50 = vunpack.i.l.bf16 %v9693_v22  ;;  %v4562_v5 = vsel %vm2331_vm8, %v4557_v13, %v9679_v27  ;;  %v4563_v48 = vsel %vm2331_vm8, %v4558_v34, %v9680_v32  ;;  %v4601_v19 = vsel %vm2337_vm9, %v4596_v45, %v9590_v58 }
 0x676   : > { %v4592_v38 = vsel %vm2325_vm7, %v4587_v63, %v9649_v55  ;;  %v4593_v14 = vsel %vm2325_vm7, %v4588_v44, %v9650_v18  ;;  %v9670_v8 = vunpack.i.h.bf16 %v12701_v36  ;;  %v9669_v39 = vunpack.i.l.bf16 %v12701_v36 }
 0x677   : > { %v9698_v56 = vpop.permute.xlu0 %9697  ;;  %v9658_v3 = vpop.permute.xlu1 %9657  ;;  %v4567_v59 = vsel %vm2337_vm9, %v4562_v5, %v9689_v62  ;;  %v4568_v21 = vsel %vm2337_vm9, %v4563_v48, %v9690_v40  ;;  %v4622_v40 = vld [vmem:[#allocation2 + $0x2] sm:$0x3] }
 0x678   : > { %v9660_v7 = vunpack.i.h.bf16 %v9658_v3  ;;  %v9659_v37 = vunpack.i.l.bf16 %v9658_v3  ;;  %v9700_v4 = vunpack.i.h.bf16 %v9698_v56  ;;  %v9699_v2 = vunpack.i.l.bf16 %v9698_v56 }
 0x679   : > { %v4566_v56 = vsel %vm2337_vm9, %v12738_v29, %v9565_v24 }
 0x67a   : > { %v4597_v46 = vsel %vm2331_vm8, %v4592_v38, %v9659_v37  ;;  %v4598_v57 = vsel %vm2331_vm8, %v4593_v14, %v9660_v7  ;;  %v4572_v45 = vsel %vm2343_vm10, %v4567_v59, %v9699_v2  ;;  %v4573_v58 = vsel %vm2343_vm10, %v4568_v21, %v9700_v4 }
 0x67b   : > { %v9703_v1 = vpop.permute.xlu0 %9702  ;;  %v9663_v10 = vpop.permute.xlu1 %9662  ;;  %v4602_v53 = vsel %vm2337_vm9, %v4597_v46, %v9684_v15  ;;  %v4603_v25 = vsel %vm2337_vm9, %v4598_v57, %v9685_v42  ;;  %v4571_v34 = vsel %vm2343_vm10, %v4566_v56, %v9670_v8  ;;  %v10067_v57 = vld [vmem:[%s10270_s9] sm:$0xff] }
 0x67c   : > { %v9705_v0 = vunpack.i.h.bf16 %v9703_v1  ;;  %v9704_v35 = vunpack.i.l.bf16 %v9703_v1  ;;  %v9665_v11 = vunpack.i.h.bf16 %v9663_v10  ;;  %v9664_v41 = vunpack.i.l.bf16 %v9663_v10 }
 0x67d   : > { %v4607_v51 = vsel %vm2343_vm10, %v4602_v53, %v9694_v50  ;;  %v4608_v23 = vsel %vm2343_vm10, %v4603_v25, %v9695_v16 }
 0x67e   : > { %v4612_v30 = vsel %vm2349_vm11, %v4607_v51, %v9704_v35  ;;  %v4613_v52 = vsel %vm2349_vm11, %v4608_v23, %v9705_v0  ;;  %v4605_v18 = vsel %vm2343_vm10, %v4600_v28, %v9664_v41  ;;  %v4606_v36 = vsel %vm2343_vm10, %v4601_v19, %v9665_v11 }
 0x67f   : > { %v9708_v54 = vpop.permute.xlu0 %9707  ;;  %v9673_v22 = vpop.permute.xlu1 %9672  ;;  %v4618_v60 = vpack.c.bf16 %v4613_v52, %v4612_v30  ;;  %v4565_v28 = vsel %vm2337_vm9, %v12735_v33, %v9564_v31 }
 0x680   : > { %v9710_v26 = vunpack.i.h.bf16 %v9708_v54  ;;  %v9709_v49 = vunpack.i.l.bf16 %v9708_v54  ;;  %v9675_v43 = vunpack.i.h.bf16 %v9673_v22  ;;  %v9674_v61 = vunpack.i.l.bf16 %v9673_v22 }
 0x681   : > { %4651 = vmatprep.subr.bf16.mxu1 %v4618_v60  ;;  %v4570_v3 = vsel %vm2343_vm10, %v4565_v28, %v9669_v39 }
 0x682   : > { %v4577_v55 = vsel %vm2349_vm11, %v4572_v45, %v9709_v49  ;;  %v4578_v9 = vsel %vm2349_vm11, %v4573_v58, %v9710_v26  ;;  %v4610_v17 = vsel %vm2349_vm11, %v4605_v18, %v9674_v61  ;;  %v4611_v32 = vsel %vm2349_vm11, %v4606_v36, %v9675_v43  ;;  %v15696_v36 = vld [vmem:[#allocation8_spill] sm:$0xff] }
 0x683   : > { %v9713_v27 = vpop.permute.xlu0 %9712  ;;  %v4617_v42 = vpack.c.bf16 %v4578_v9, %v4577_v55  ;;  %v4616_v15 = vpack.c.bf16 %v4611_v32, %v4610_v17 }
 0x684   : > { %v9715_v63 = vunpack.i.h.bf16 %v9713_v27  ;;  %v9714_v44 = vunpack.i.l.bf16 %v9713_v27 }
 0x685   : > { %4652 = vmatpush1.bf16.msra.mxu1 %v4617_v42 }
 0x686   : > { %4653 = vmatprep.subr.bf16.mxu1 %v4616_v15  ;;  %v4575_v13 = vsel %vm2349_vm11, %v4570_v3, %v9714_v44  ;;  %v4576_v7 = vsel %vm2349_vm11, %v4571_v34, %v9715_v63 }
 0x687   : > { %v4615_v37 = vpack.c.bf16 %v4576_v7, %v4575_v13 }
 0x689   : > { %4654 = vmatpush1.bf16.msra.mxu1 %v4615_v37 }
 0x68c   : > { %9280 = vmatmul.mubr.msk.bf16.vlgmr.msra.gmra.mxu1 %vm2403_vm13, %v4622_v40  ;;  %v4628_v31 = vpop.permute.xlu1 %4627 }
 0x68d   : > { %9160 = vmatprep.mubr.bf16.mxu1 %v15694_v47 }
 0x74c   : > { %v4673_v24 = vpop.f32.mrf.mxu1 }
 0x74d   : > { %v4674_v33 = vadd.f32 %v4673_v24, %v4628_v31 }
 0x74e   : > { %v4675_v29 = vpop.f32.mrf.mxu1 }
 0x74f   : > { %v4676_v62 = vadd.f32 %v4675_v29, %v4628_v31  ;;  %v4680_v14 = vmax.f32 %v4674_v33, 0.0 }
 0x750   : > { %v4677_v38 = vpop.f32.mrf.mxu1 }
 0x751   : > { %v4681_v16 = vmax.f32 %v4676_v62, 0.0 }
 0x752   : > { %v4678_v50 = vpop.f32.mrf.mxu1 }
 0x753   : > { %v4684_v46 = vcombine.low %v4680_v14, %v4681_v16 }
 0x755   : > { %v12842_v1 = vadd.f32 %v10067_v57, %v4684_v46 }
 0x757   : > { %15695 = vst [vmem:[#allocation15_spill] sm:$0xff] %v12842_v1  ;;  %4694 = vrot.lane.b32.xlu1 %v12842_v1, %s10166_s19  ;;  %4690 = vrot.lane.b32.xlu0 %v12842_v1, %s10164_s11  ;;  %v4688_v37 = vrot.slane %v12842_v1, 4 }
 0x75b   : > { %4702 = vrot.lane.b32.xlu1 %v12842_v1, %s10165_s17  ;;  %4698 = vrot.lane.b32.xlu0 %v12842_v1, %s10163_s10 }
 0x75f   : > { %4710 = vrot.lane.b32.xlu1 %v12842_v1, %s10167_s20  ;;  %4706 = vrot.lane.b32.xlu0 %v12842_v1, %s10168_s24 }
 0x763   : > { %4714 = vrot.lane.b32.xlu0 %v12842_v1, %s10169_s25 }
 0x7c9   : > { %v4695_v10 = vpop.permute.xlu1 %4694  ;;  %v4691_v53 = vpop.permute.xlu0 %4690 }
 0x7ca   : > { %v4725_v48 = vcombine.low %v12842_v1, %v4695_v10  ;;  %v4696_v63 = vrot.slane %v4695_v10, 4  ;;  %v4692_v44 = vrot.slane %v4691_v53, 4 }
 0x7cc   : > { %v4732_v11 = vrot.slane %v4725_v48, %v10296_v12  ;;  %v4793_v33 = vcombine.low %v4688_v37, %v4696_v63 }
 0x7cd   : > { %v4703_v25 = vpop.permute.xlu1 %4702  ;;  %v4699_v5 = vpop.permute.xlu0 %4698 }
 0x7ce   : > { %v4733_v4 = vcombine.low %v4691_v53, %v4699_v5  ;;  %v4700_v43 = vrot.slane %v4699_v5, 4  ;;  %v4704_v28 = vrot.slane %v4703_v25, 4  ;;  %v4800_v50 = vrot.slane %v4793_v33, %v10296_v12 }
 0x7d0   : > { %v4740_v2 = vrot.slane %v4733_v4, %v10296_v12  ;;  %v4801_v40 = vcombine.low %v4692_v44, %v4700_v43 }
 0x7d1   : > { %v4711_v0 = vpop.permute.xlu1 %4710  ;;  %v4707_v35 = vpop.permute.xlu0 %4706 }
 0x7d2   : > { %v4741_v41 = vcombine.low %v4732_v11, %v4740_v2  ;;  %v4759_v51 = vcombine.low %v4703_v25, %v4711_v0  ;;  %v4742_v8 = vcombine.high %v4732_v11, %v4740_v2  ;;  %v4712_v61 = vrot.slane %v4711_v0, 4 }
 0x7d3   : > { %v4708_v18 = vrot.slane %v4707_v35, 4  ;;  %v4808_v14 = vrot.slane %v4801_v40, %v10296_v12 }
 0x7d4   : > { %v4749_v30 = vrot.slane %v4741_v41, %v10304_v20  ;;  %v4766_v52 = vrot.slane %v4759_v51, %v10296_v12  ;;  %v4756_v60 = vrot.slane %v4742_v8, %v10304_v20  ;;  %v4827_v47 = vcombine.low %v4704_v28, %v4712_v61  ;;  %v15697_v41 = vld [vmem:[#allocation9_spill] sm:$0xff] }
 0x7d5   : > { %v4715_v23 = vpop.permute.xlu0 %4714  ;;  %v4809_v57 = vcombine.low %v4800_v50, %v4808_v14  ;;  %v4810_v48 = vcombine.high %v4800_v50, %v4808_v14 }
 0x7d6   : > { %v4767_v19 = vcombine.low %v4707_v35, %v4715_v23  ;;  %v4757_v26 = vcombine.high %v4749_v30, %v15521_v6  ;;  %v4716_v49 = vrot.slane %v4715_v23, 4  ;;  %v4868_v55 = vrot.slane %v4749_v30, %v15696_v36 }
 0x7d7   : > { %v4758_v15 = vcombine.high %v4756_v60, %v15521_v6  ;;  %v4876_v24 = vrot.slane %v4756_v60, %v15696_v36  ;;  %v4834_v16 = vrot.slane %v4827_v47, %v10296_v12  ;;  %v4817_v53 = vrot.slane %v4809_v57, %v10304_v20 }
 0x7d8   : > { %v4774_v39 = vrot.slane %v4767_v19, %v10296_v12  ;;  %v4872_v32 = vrot.slane %v4757_v26, %v15696_v36  ;;  %v4835_v56 = vcombine.low %v4708_v18, %v4716_v49  ;;  %v4824_v11 = vrot.slane %v4810_v48, %v10304_v20 }
 0x7d9   : > { %v4880_v31 = vrot.slane %v4758_v15, %v15696_v36 }
 0x7da   : > { %v4775_v54 = vcombine.low %v4766_v52, %v4774_v39  ;;  %v4776_v22 = vcombine.high %v4766_v52, %v4774_v39  ;;  %v4842_v29 = vrot.slane %v4835_v56, %v10296_v12 }
 0x7dc   : > { %v4783_v59 = vrot.slane %v4775_v54, %v10304_v20  ;;  %v4790_v21 = vrot.slane %v4776_v22, %v10304_v20  ;;  %v4843_v46 = vcombine.low %v4834_v16, %v4842_v29  ;;  %v4844_v25 = vcombine.high %v4834_v16, %v4842_v29 }
 0x7de   : > { %v9281_v45 = vcombine.high %v4749_v30, %v4783_v59  ;;  %v4897_v58 = vcombine.low %v4749_v30, %v4783_v59  ;;  %v9283_v9 = vcombine.high %v4756_v60, %v4790_v21  ;;  %v4901_v17 = vcombine.low %v4756_v60, %v4790_v21 }
 0x7df   : > { %v4851_v10 = vrot.slane %v4843_v46, %v10304_v20  ;;  %v4858_v4 = vrot.slane %v4844_v25, %v10304_v20 }
 0x7e0   : > { %v4908_v27 = vrot.slane %v9281_v45, 7  ;;  %v4905_v42 = vrot.slane %v4897_v58, 7  ;;  %v4914_v13 = vrot.slane %v9283_v9, 7  ;;  %v4911_v7 = vrot.slane %v4901_v17, 7 }
 0x7e1   : > { %v4898_v5 = vcombine.low %v4817_v53, %v4851_v10  ;;  %v9282_v0 = vcombine.high %v4817_v53, %v4851_v10  ;;  %v4859_v35 = vcombine.high %v4851_v10, %v15521_v6  ;;  %v4928_v51 = vrot.slane %v4851_v10, %v15697_v41 }
 0x7e2   : > { %v4946_v3 = vsel %vm404_vm0, %v4872_v32, %v4908_v27  ;;  %v4945_v34 = vsel %vm404_vm0, %v4868_v55, %v4905_v42  ;;  %v4948_v62 = vsel %vm404_vm0, %v4880_v31, %v4914_v13  ;;  %v4947_v38 = vsel %vm404_vm0, %v4876_v24, %v4911_v7 }
 0x7e3   : > { %4967 = vrot.lane.b32.xlu0 %v4946_v3, %s10173_s26  ;;  %4961 = vrot.lane.b32.xlu1 %v4945_v34, %s10173_s26  ;;  %v4906_v2 = vrot.slane %v4898_v5, 7  ;;  %v4902_v23 = vcombine.low %v4824_v11, %v4858_v4  ;;  %v4909_v30 = vrot.slane %v9282_v0, 7  ;;  %v4932_v52 = vrot.slane %v4859_v35, %v15697_v41 }
 0x7e4   : > { %v9284_v60 = vcombine.high %v4824_v11, %v4858_v4  ;;  %v4860_v59 = vcombine.high %v4858_v4, %v15521_v6  ;;  %v4936_v21 = vrot.slane %v4858_v4, %v15697_v41 }
 0x7e5   : > { %v4949_v19 = vsel %vm404_vm0, %v4906_v2, %v4928_v51  ;;  %v4907_v8 = vsel %vm404_vm0, %v4905_v42, %v4906_v2  ;;  %v4912_v39 = vrot.slane %v4902_v23, 7  ;;  %v4910_v54 = vsel %vm404_vm0, %v4908_v27, %v4909_v30 }
 0x7e6   : > { %v4950_v22 = vsel %vm404_vm0, %v4909_v30, %v4932_v52  ;;  %v4915_v43 = vrot.slane %v9284_v60, 7  ;;  %v4940_v61 = vrot.slane %v4860_v59, %v15697_v41 }
 0x7e7   : > { %4979 = vrot.lane.b32.xlu0 %v4948_v62, %s10173_s26  ;;  %4973 = vrot.lane.b32.xlu1 %v4947_v38, %s10173_s26  ;;  %v4951_v26 = vsel %vm404_vm0, %v4912_v39, %v4936_v21  ;;  %v4913_v49 = vsel %vm404_vm0, %v4911_v7, %v4912_v39 }
 0x7e8   : > { %v4916_v45 = vsel %vm404_vm0, %v4914_v13, %v4915_v43  ;;  %v4952_v58 = vsel %vm404_vm0, %v4915_v43, %v4940_v61 }
 0x7eb   : > { %5003 = vrot.lane.b32.xlu0 %v4946_v3, %s10174_s27  ;;  %4997 = vrot.lane.b32.xlu1 %v4945_v34, %s10174_s27 }
 0x7ef   : > { %5015 = vrot.lane.b32.xlu0 %v4948_v62, %s10174_s27  ;;  %5009 = vrot.lane.b32.xlu1 %v4947_v38, %s10174_s27 }
 0x7f3   : > { %5039 = vrot.lane.b32.xlu0 %v4946_v3, %s10175_s28  ;;  %5033 = vrot.lane.b32.xlu1 %v4945_v34, %s10175_s28 }
 0x7f7   : > { %5051 = vrot.lane.b32.xlu0 %v4948_v62, %s10175_s28  ;;  %5045 = vrot.lane.b32.xlu1 %v4947_v38, %s10175_s28 }
 0x7fb   : > { %4965 = vrot.lane.b32.xlu1 %v4949_v19, %s10173_s26  ;;  %4963 = vrot.lane.b32.xlu0 %v4907_v8, %s10173_s26 }
 0x7ff   : > { %4969 = vrot.lane.b32.xlu1 %v4910_v54, %s10173_s26  ;;  %4971 = vrot.lane.b32.xlu0 %v4950_v22, %s10173_s26 }
 0x803   : > { %4977 = vrot.lane.b32.xlu1 %v4951_v26, %s10173_s26  ;;  %4975 = vrot.lane.b32.xlu0 %v4913_v49, %s10173_s26 }
 0x807   : > { %4981 = vrot.lane.b32.xlu1 %v4916_v45, %s10173_s26  ;;  %4983 = vrot.lane.b32.xlu0 %v4952_v58, %s10173_s26 }
 0x80b   : > { %5001 = vrot.lane.b32.xlu1 %v4949_v19, %s10174_s27  ;;  %4999 = vrot.lane.b32.xlu0 %v4907_v8, %s10174_s27 }
 0x80f   : > { %5005 = vrot.lane.b32.xlu1 %v4910_v54, %s10174_s27  ;;  %5007 = vrot.lane.b32.xlu0 %v4950_v22, %s10174_s27 }
 0x813   : > { %5013 = vrot.lane.b32.xlu1 %v4951_v26, %s10174_s27  ;;  %5011 = vrot.lane.b32.xlu0 %v4913_v49, %s10174_s27 }
 0x817   : > { %5017 = vrot.lane.b32.xlu1 %v4916_v45, %s10174_s27  ;;  %5019 = vrot.lane.b32.xlu0 %v4952_v58, %s10174_s27 }
 0x81b   : > { %5037 = vrot.lane.b32.xlu1 %v4949_v19, %s10175_s28  ;;  %5035 = vrot.lane.b32.xlu0 %v4907_v8, %s10175_s28 }
 0x81f   : > { %5041 = vrot.lane.b32.xlu1 %v4910_v54, %s10175_s28  ;;  %5043 = vrot.lane.b32.xlu0 %v4950_v22, %s10175_s28 }
 0x823   : > { %5049 = vrot.lane.b32.xlu1 %v4951_v26, %s10175_s28  ;;  %5047 = vrot.lane.b32.xlu0 %v4913_v49, %s10175_s28 }
 0x827   : > { %5053 = vrot.lane.b32.xlu1 %v4916_v45, %s10175_s28  ;;  %5055 = vrot.lane.b32.xlu0 %v4952_v58, %s10175_s28 }
 0x855   : > { %v4968_v18 = vpop.permute.xlu0 %4967  ;;  %v4962_v36 = vpop.permute.xlu1 %4961 }
 0x859   : > { %v4980_v55 = vpop.permute.xlu0 %4979  ;;  %v4974_v9 = vpop.permute.xlu1 %4973 }
 0x85d   : > { %v5004_v17 = vpop.permute.xlu0 %5003  ;;  %v4998_v32 = vpop.permute.xlu1 %4997 }
 0x85e   : > { %v5072_v15 = vsel %vm569_vm1, %v4968_v18, %v5004_v17  ;;  %v5069_v63 = vsel %vm569_vm1, %v4962_v36, %v4998_v32 }
 0x861   : > { %v5016_v27 = vpop.permute.xlu0 %5015  ;;  %v5010_v42 = vpop.permute.xlu1 %5009 }
 0x862   : > { %v5078_v34 = vsel %vm569_vm1, %v4980_v55, %v5016_v27  ;;  %v5075_v13 = vsel %vm569_vm1, %v4974_v9, %v5010_v42 }
 0x865   : > { %v5040_v44 = vpop.permute.xlu0 %5039  ;;  %v5034_v28 = vpop.permute.xlu1 %5033 }
 0x866   : > { %v12939_v56 = vsel %vm582_vm2, %v5072_v15, %v5040_v44  ;;  %v12942_v3 = vsel %vm582_vm2, %v5069_v63, %v5034_v28 }
 0x867   : > { %5101 = vrot.lane.b32.xlu1 %v12942_v3, %s10173_s26  ;;  %5105 = vrot.lane.b32.xlu0 %v12939_v56, %s10173_s26  ;;  %v5229_v21 = vrot.slane %v12942_v3, 2  ;;  %v5234_v26 = vrot.slane %v12939_v56, 2  ;;  %v5153_v18 = vrot.slane %v12942_v3, 1  ;;  %v5158_v17 = vrot.slane %v12939_v56, 1 }
 0x869   : > { %v5052_v7 = vpop.permute.xlu0 %5051  ;;  %v5046_v37 = vpop.permute.xlu1 %5045 }
 0x86a   : > { %v12951_v40 = vsel %vm582_vm2, %v5078_v34, %v5052_v7  ;;  %v12954_v47 = vsel %vm582_vm2, %v5075_v13, %v5046_v37 }
 0x86b   : > { %v5321_v31 = vcombine.low %v12939_v56, %v12951_v40  ;;  %v5322_v24 = vcombine.high %v12939_v56, %v12951_v40  ;;  %v5305_v33 = vcombine.low %v12942_v3, %v12954_v47  ;;  %v5306_v29 = vcombine.high %v12942_v3, %v12954_v47  ;;  %5109 = vrot.lane.b32.xlu1 %v12954_v47, %s10173_s26 }
 0x86c   : > { %5113 = vrot.lane.b32.xlu0 %v12951_v40, %s10173_s26  ;;  %v5239_v27 = vrot.slane %v12954_v47, 2  ;;  %v5244_v42 = vrot.slane %v12951_v40, 2  ;;  %v5163_v15 = vrot.slane %v12954_v47, 1 }
 0x86d   : > { %v12969_v62 = vrot.slane %v5321_v31, %v10296_v12  ;;  %v12972_v38 = vrot.slane %v5322_v24, %v10296_v12  ;;  %v12975_v14 = vrot.slane %v5305_v33, %v10296_v12  ;;  %v12978_v16 = vrot.slane %v5306_v29, %v10296_v12  ;;  %v4966_v50 = vpop.permute.xlu1 %4965  ;;  %v4964_v46 = vpop.permute.xlu0 %4963 }
 0x86f   : > { %v5369_v57 = vcombine.low %v12975_v14, %v12969_v62  ;;  %5125 = vrot.lane.b32.xlu1 %v12942_v3, %s10176_s29 }
 0x870   : > { %5129 = vrot.lane.b32.xlu0 %v12939_v56, %s10176_s29 }
 0x871   : > { %v4970_v5 = vpop.permute.xlu1 %4969  ;;  %v4972_v48 = vpop.permute.xlu0 %4971 }
 0x875   : > { %v4978_v4 = vpop.permute.xlu1 %4977  ;;  %v4976_v2 = vpop.permute.xlu0 %4975 }
 0x879   : > { %v4982_v0 = vpop.permute.xlu1 %4981  ;;  %v4984_v35 = vpop.permute.xlu0 %4983 }
 0x87d   : > { %v5002_v11 = vpop.permute.xlu1 %5001  ;;  %v5000_v41 = vpop.permute.xlu0 %4999 }
 0x87e   : > { %v5070_v39 = vsel %vm569_vm1, %v4964_v46, %v5000_v41  ;;  %v5071_v59 = vsel %vm569_vm1, %v4966_v50, %v5002_v11 }
 0x881   : > { %v5006_v51 = vpop.permute.xlu1 %5005  ;;  %v5008_v23 = vpop.permute.xlu0 %5007 }
 0x882   : > { %v5073_v49 = vsel %vm569_vm1, %v4970_v5, %v5006_v51  ;;  %v5074_v43 = vsel %vm569_vm1, %v4972_v48, %v5008_v23 }
 0x885   : > { %v5014_v19 = vpop.permute.xlu1 %5013  ;;  %v5012_v8 = vpop.permute.xlu0 %5011 }
 0x886   : > { %v5077_v32 = vsel %vm569_vm1, %v4978_v4, %v5014_v19  ;;  %v5076_v63 = vsel %vm569_vm1, %v4976_v2, %v5012_v8 }
 0x889   : > { %v5018_v30 = vpop.permute.xlu1 %5017  ;;  %v5020_v52 = vpop.permute.xlu0 %5019 }
 0x88a   : > { %v5079_v34 = vsel %vm569_vm1, %v4982_v0, %v5018_v30  ;;  %v5080_v13 = vsel %vm569_vm1, %v4984_v35, %v5020_v52 }
 0x88d   : > { %v5038_v54 = vpop.permute.xlu1 %5037  ;;  %v5036_v22 = vpop.permute.xlu0 %5035 }
 0x88e   : > { %v12994_v60 = vsel %vm582_vm2, %v5070_v39, %v5036_v22  ;;  %v5083_v61 = vsel %vm582_vm2, %v5071_v59, %v5038_v54 }
 0x88f   : > { %5103 = vrot.lane.b32.xlu1 %v12994_v60, %s10173_s26  ;;  %v5230_v9 = vrot.slane %v12994_v60, 2  ;;  %v5156_v44 = vrot.slane %v5083_v61, 1  ;;  %v5232_v28 = vrot.slane %v5083_v61, 2  ;;  %v5154_v3 = vrot.slane %v12994_v60, 1 }
 0x891   : > { %v5042_v45 = vpop.permute.xlu1 %5041  ;;  %v5044_v58 = vpop.permute.xlu0 %5043  ;;  %v13027_v46 = vsel %vm732_vm3, %v5229_v21, %v5230_v9  ;;  %v13037_v0 = vsel %vm732_vm3, %v5230_v9, %v5232_v28  ;;  %v13041_v11 = vsel %vm655_vm4, %v5154_v3, %v5156_v44  ;;  %v13044_v41 = vsel %vm655_vm4, %v5153_v18, %v5154_v3 }
 0x892   : > { %v13006_v36 = vsel %vm582_vm2, %v5073_v49, %v5042_v45  ;;  %v5086_v55 = vsel %vm582_vm2, %v5074_v43, %v5044_v58 }
 0x893   : > { %5107 = vrot.lane.b32.xlu0 %v13006_v36, %s10173_s26  ;;  %v5237_v7 = vrot.slane %v5086_v55, 2  ;;  %v5235_v24 = vrot.slane %v13006_v36, 2  ;;  %v5161_v33 = vrot.slane %v5086_v55, 1  ;;  %v5159_v2 = vrot.slane %v13006_v36, 1 }
 0x895   : > { %v5050_v37 = vpop.permute.xlu1 %5049  ;;  %v5048_v31 = vpop.permute.xlu0 %5047  ;;  %v13047_v8 = vsel %vm732_vm3, %v5234_v26, %v5235_v24  ;;  %v13050_v30 = vsel %vm732_vm3, %v5235_v24, %v5237_v7  ;;  %v13074_v43 = vsel %vm655_vm4, %v5159_v2, %v5161_v33 }
 0x896   : > { %v5089_v29 = vsel %vm582_vm2, %v5077_v32, %v5050_v37  ;;  %v13024_v50 = vsel %vm582_vm2, %v5076_v63, %v5048_v31 }
 0x897   : > { %v5242_v5 = vrot.slane %v5089_v29, 2  ;;  %v5917_v48 = vcombine.low %v12994_v60, %v13024_v50  ;;  %v5918_v4 = vcombine.high %v12994_v60, %v13024_v50  ;;  %5111 = vrot.lane.b32.xlu1 %v13024_v50, %s10173_s26  ;;  %v5240_v35 = vrot.slane %v13024_v50, 2 }
 0x898   : > { %v5166_v51 = vrot.slane %v5089_v29, 1  ;;  %v5164_v52 = vrot.slane %v13024_v50, 1 }
 0x899   : > { %v5054_v23 = vpop.permute.xlu1 %5053  ;;  %v5056_v19 = vpop.permute.xlu0 %5055  ;;  %v13058_v22 = vsel %vm732_vm3, %v5239_v27, %v5240_v35  ;;  %v13061_v59 = vsel %vm732_vm3, %v5240_v35, %v5242_v5  ;;  %v13085_v55 = vrot.slane %v5917_v48, %v10296_v12  ;;  %v13205_v56 = vrot.slane %v5918_v4, %v10296_v12 }
 0x89a   : > { %v13054_v39 = vsel %vm582_vm2, %v5079_v34, %v5054_v23  ;;  %v5092_v54 = vsel %vm582_vm2, %v5080_v13, %v5056_v19  ;;  %v5713_v61 = vcombine.low %v13027_v46, %v13058_v22  ;;  %v5714_v45 = vcombine.high %v13027_v46, %v13058_v22 }
 0x89b   : > { %v5933_v21 = vcombine.low %v13006_v36, %v13054_v39  ;;  %v5934_v26 = vcombine.high %v13006_v36, %v13054_v39  ;;  %v5247_v49 = vrot.slane %v5092_v54, 2  ;;  %5115 = vrot.lane.b32.xlu0 %v13054_v39, %s10173_s26  ;;  %5127 = vrot.lane.b32.xlu1 %v12994_v60, %s10176_s29  ;;  %v6325_v58 = vcombine.low %v13037_v0, %v13061_v59 }
 0x89c   : > { %v6326_v18 = vcombine.high %v13037_v0, %v13061_v59  ;;  %v5171_v32 = vrot.slane %v5092_v54, 1  ;;  %v5245_v27 = vrot.slane %v13054_v39, 2  ;;  %v13092_v63 = vrot.slane %v5713_v61, %v10296_v12 }
 0x89d   : > { %v13088_v9 = vrot.slane %v5933_v21, %v10296_v12  ;;  %v13095_v44 = vrot.slane %v5714_v45, %v10296_v12  ;;  %v13098_v28 = vrot.slane %v6325_v58, %v10296_v12  ;;  %v13101_v3 = vsel %vm655_vm4, %v5164_v52, %v5166_v51 }
 0x89e   : > { %v13110_v13 = vsel %vm732_vm3, %v5244_v42, %v5245_v27  ;;  %v13113_v7 = vsel %vm732_vm3, %v5245_v27, %v5247_v49  ;;  %v5169_v37 = vrot.slane %v13054_v39, 1  ;;  %v13125_v42 = vrot.slane %v6326_v18, %v10296_v12 }
 0x89f   : > { %15698 = vst [vmem:[#allocation23_spill] sm:$0xff] %v13095_v44  ;;  %v5981_v34 = vcombine.low %v13085_v55, %v13088_v9  ;;  %5131 = vrot.lane.b32.xlu0 %v13006_v36, %s10176_s29  ;;  %5135 = vrot.lane.b32.xlu1 %v13024_v50, %s10176_s29  ;;  %v5729_v31 = vcombine.low %v13047_v8, %v13110_v13  ;;  %v5168_v45 = vrot.slane %v12951_v40, 1 }
 0x8a0   : > { %v5730_v24 = vcombine.high %v13047_v8, %v13110_v13  ;;  %v6341_v33 = vcombine.low %v13050_v30, %v13113_v7  ;;  %v6342_v29 = vcombine.high %v13050_v30, %v13113_v7  ;;  %15699 = vst [vmem:[#allocation16_spill] sm:$0xff] %v13125_v42  ;;  %v6085_v5 = vcombine.low %v13041_v11, %v13101_v3 }
 0x8a1   : > { %v6086_v48 = vcombine.high %v13041_v11, %v13101_v3  ;;  %v5172_v35 = vsel %vm655_vm4, %v5169_v37, %v5171_v32  ;;  %v13133_v51 = vrot.slane %v5729_v31, %v10296_v12  ;;  %v5165_v61 = vsel %vm655_vm4, %v5163_v15, %v5164_v52 }
 0x8a2   : > { %v13136_v23 = vrot.slane %v5730_v24, %v10296_v12  ;;  %v13139_v19 = vrot.slane %v6341_v33, %v10296_v12  ;;  %v13142_v54 = vrot.slane %v6342_v29, %v10296_v12  ;;  %v13149_v21 = vrot.slane %v6085_v5, %v10296_v12 }
 0x8a3   : > { %5139 = vrot.lane.b32.xlu0 %v13054_v39, %s10176_s29  ;;  %5281 = vrot.lane.b32.xlu1 %v13027_v46, %s10176_s29  ;;  %v6101_v49 = vcombine.low %v13074_v43, %v5172_v35  ;;  %v6102_v24 = vcombine.high %v13074_v43, %v5172_v35  ;;  %v5473_v29 = vcombine.low %v13044_v41, %v5165_v61 }
 0x8a4   : > { %15700 = vst [vmem:[#allocation18_spill] sm:$0xff] %v13136_v23  ;;  %15701 = vst [vmem:[#allocation17_spill] sm:$0xff] %v13142_v54  ;;  %v5474_v5 = vcombine.high %v13044_v41, %v5165_v61  ;;  %v13179_v32 = vrot.slane %v5934_v26, %v10296_v12  ;;  %v5170_v31 = vsel %vm655_vm4, %v5168_v45, %v5169_v37 }
 0x8a5   : > { %v13174_v33 = vrot.slane %v6101_v49, %v10296_v12  ;;  %v5160_v49 = vsel %vm655_vm4, %v5158_v17, %v5159_v2  ;;  %v13192_v52 = vrot.slane %v6086_v48, %v10296_v12  ;;  %v13195_v26 = vrot.slane %v6102_v24, %v10296_v12 }
 0x8a6   : > { %v5489_v36 = vcombine.low %v5160_v49, %v5170_v31  ;;  %v5490_v17 = vcombine.high %v5160_v49, %v5170_v31  ;;  %v13212_v48 = vrot.slane %v5473_v29, %v10296_v12  ;;  %v5982_v45 = vcombine.high %v13085_v55, %v13088_v9 }
 0x8a7   : > { %5283 = vrot.lane.b32.xlu0 %v13037_v0, %s10176_s29  ;;  %5285 = vrot.lane.b32.xlu1 %v13047_v8, %s10176_s29  ;;  %v6149_v18 = vcombine.low %v13149_v21, %v13174_v33  ;;  %v6150_v39 = vcombine.high %v13149_v21, %v13174_v33  ;;  %v6165_v2 = vcombine.low %v13192_v52, %v13195_v26 }
 0x8a8   : > { %v13221_v60 = vrot.slane %v5474_v5, %v10296_v12  ;;  %v13224_v50 = vrot.slane %v5489_v36, %v10296_v12  ;;  %v13227_v4 = vrot.slane %v5490_v17, %v10296_v12  ;;  %v5997_v24 = vcombine.low %v13205_v56, %v13179_v32 }
 0x8a9   : > { %v13334_v10 = vrot.slane %v5981_v34, %v10304_v20  ;;  %v13347_v34 = vrot.slane %v6149_v18, %v10304_v20  ;;  %v6164_v18 = vrot.slane %v6150_v39, %v10304_v20  ;;  %v6173_v55 = vrot.slane %v6165_v2, %v10304_v20 }
 0x8aa   : > { %v15707_v9 = vcombine.high %v13192_v52, %v13195_v26  ;;  %v15709_v52 = vcombine.high %v13205_v56, %v13179_v32  ;;  %v15732_v54 = vcombine.low %v13098_v28, %v13139_v19 }
 0x8ab   : > { %5287 = vrot.lane.b32.xlu0 %v13050_v30, %s10176_s29  ;;  %5289 = vrot.lane.b32.xlu1 %v13058_v22, %s10176_s29  ;;  %15704 = vst [vmem:[#allocation10_spill] sm:$0xff] %v13334_v10  ;;  %15706 = vst [vmem:[#allocation37_spill] sm:$0xff] %v13347_v34 }
 0x8ac   : > { %v6180_v21 = vrot.slane %v15707_v9, %v10304_v20  ;;  %v6012_v26 = vrot.slane %v15709_v52, %v10304_v20 }
 0x8af   : > { %5291 = vrot.lane.b32.xlu0 %v13061_v59, %s10176_s29  ;;  %5293 = vrot.lane.b32.xlu1 %v13110_v13, %s10176_s29 }
 0x8b3   : > { %5183 = vrot.lane.b32.xlu1 %v13041_v11, %s10173_s26  ;;  %5295 = vrot.lane.b32.xlu0 %v13113_v7, %s10176_s29 }
 0x8b7   : > { %5191 = vrot.lane.b32.xlu1 %v13101_v3, %s10173_s26  ;;  %5187 = vrot.lane.b32.xlu0 %v13074_v43, %s10173_s26 }
 0x8bb   : > { %5207 = vrot.lane.b32.xlu1 %v13041_v11, %s10176_s29  ;;  %5195 = vrot.lane.b32.xlu0 %v5172_v35, %s10173_s26 }
 0x8bf   : > { %5215 = vrot.lane.b32.xlu1 %v13101_v3, %s10176_s29  ;;  %5211 = vrot.lane.b32.xlu0 %v13074_v43, %s10176_s29 }
 0x8c3   : > { %5259 = vrot.lane.b32.xlu1 %v13037_v0, %s10173_s26  ;;  %5219 = vrot.lane.b32.xlu0 %v5172_v35, %s10176_s29 }
 0x8c7   : > { %5267 = vrot.lane.b32.xlu1 %v13061_v59, %s10173_s26  ;;  %5263 = vrot.lane.b32.xlu0 %v13050_v30, %s10173_s26 }
 0x8cb   : > { %5181 = vrot.lane.b32.xlu1 %v13044_v41, %s10173_s26  ;;  %5271 = vrot.lane.b32.xlu0 %v13113_v7, %s10173_s26 }
 0x8cf   : > { %5189 = vrot.lane.b32.xlu1 %v5165_v61, %s10173_s26  ;;  %5185 = vrot.lane.b32.xlu0 %v5160_v49, %s10173_s26 }
 0x8d3   : > { %5205 = vrot.lane.b32.xlu1 %v13044_v41, %s10176_s29  ;;  %5193 = vrot.lane.b32.xlu0 %v5170_v31, %s10173_s26 }
 0x8d7   : > { %5213 = vrot.lane.b32.xlu1 %v5165_v61, %s10176_s29  ;;  %5209 = vrot.lane.b32.xlu0 %v5160_v49, %s10176_s29 }
 0x8d9   : > { %v13278_v0 = vpop.permute.xlu1 %5101  ;;  %v13280_v11 = vpop.permute.xlu0 %5105 }
 0x8db   : > { %5257 = vrot.lane.b32.xlu1 %v13027_v46, %s10173_s26  ;;  %5217 = vrot.lane.b32.xlu0 %v5170_v31, %s10176_s29 }
 0x8dd   : > { %v13285_v30 = vpop.permute.xlu1 %5109 }
 0x8de   : > { %v5337_v41 = vcombine.low %v13278_v0, %v13285_v30  ;;  %v13289_v59 = vpop.permute.xlu0 %5113 }
 0x8df   : > { %v5353_v43 = vcombine.low %v13280_v11, %v13289_v59  ;;  %5265 = vrot.lane.b32.xlu1 %v13058_v22, %s10173_s26  ;;  %5261 = vrot.lane.b32.xlu0 %v13047_v8, %s10173_s26  ;;  %v13313_v8 = vrot.slane %v5369_v57, %v10304_v20 }
 0x8e0   : > { %v13298_v46 = vrot.slane %v5337_v41, %v10296_v12 }
 0x8e1   : > { %v13301_v3 = vrot.slane %v5353_v43, %v10296_v12  ;;  %15702 = vst [vmem:[#allocation14_spill] sm:$0xff] %v13313_v8  ;;  %v13322_v61 = vpop.permute.xlu1 %5125 }
 0x8e3   : > { %v5401_v7 = vcombine.low %v13298_v46, %v13301_v3  ;;  %5133 = vrot.lane.b32.xlu1 %v12954_v47, %s10176_s29  ;;  %5269 = vrot.lane.b32.xlu0 %v13110_v13, %s10173_s26  ;;  %v13324_v47 = vpop.permute.xlu0 %5129 }
 0x8e5   : > { %v13316_v22 = vrot.slane %v5401_v7, %v10304_v20 }
 0x8e7   : > { %15703 = vst [vmem:[#allocation41_spill] sm:$0xff] %v13316_v22  ;;  %5137 = vrot.lane.b32.xlu0 %v12951_v40, %s10176_s29 }
 0x901   : > { %v5104_v13 = vpop.permute.xlu1 %5103 }
 0x905   : > { %v5108_v31 = vpop.permute.xlu0 %5107 }
 0x909   : > { %v5112_v49 = vpop.permute.xlu1 %5111 }
 0x90a   : > { %v5949_v17 = vcombine.low %v5104_v13, %v5112_v49  ;;  %v5950_v7 = vcombine.high %v5104_v13, %v5112_v49 }
 0x90c   : > { %v5957_v15 = vrot.slane %v5949_v17, %v10296_v12  ;;  %v5964_v53 = vrot.slane %v5950_v7, %v10296_v12 }
 0x90d   : > { %v5128_v41 = vpop.permute.xlu1 %5127  ;;  %v5116_v57 = vpop.permute.xlu0 %5115 }
 0x90e   : > { %v5965_v43 = vcombine.low %v5108_v31, %v5116_v57  ;;  %v5966_v5 = vcombine.high %v5108_v31, %v5116_v57 }
 0x910   : > { %v5973_v35 = vrot.slane %v5965_v43, %v10296_v12  ;;  %v5980_v58 = vrot.slane %v5966_v5, %v10296_v12 }
 0x911   : > { %v5136_v40 = vpop.permute.xlu1 %5135  ;;  %v5132_v29 = vpop.permute.xlu0 %5131 }
 0x912   : > { %v6013_v25 = vcombine.low %v5957_v15, %v5973_v35  ;;  %v6053_v13 = vcombine.low %v5128_v41, %v5136_v40  ;;  %v6054_v49 = vcombine.high %v5128_v41, %v5136_v40  ;;  %v6014_v17 = vcombine.high %v5957_v15, %v5973_v35 }
 0x913   : > { %v6029_v57 = vcombine.low %v5964_v53, %v5980_v58  ;;  %v6030_v37 = vcombine.high %v5964_v53, %v5980_v58  ;;  %v5996_v58 = vrot.slane %v5982_v45, %v10304_v20 }
 0x914   : > { %v13337_v31 = vrot.slane %v6013_v25, %v10304_v20  ;;  %v6061_v25 = vrot.slane %v6053_v13, %v10296_v12  ;;  %v6068_v15 = vrot.slane %v6054_v49, %v10296_v12  ;;  %v6028_v40 = vrot.slane %v6014_v17, %v10304_v20 }
 0x915   : > { %v13339_v43 = vpop.permute.xlu1 %5281  ;;  %v5140_v5 = vpop.permute.xlu0 %5139  ;;  %v6037_v27 = vrot.slane %v6029_v57, %v10304_v20  ;;  %v6044_v57 = vrot.slane %v6030_v37, %v10304_v20 }
 0x916   : > { %15705 = vst [vmem:[#allocation28_spill] sm:$0xff] %v13337_v31  ;;  %v6069_v7 = vcombine.low %v5132_v29, %v5140_v5  ;;  %v6070_v36 = vcombine.high %v5132_v29, %v5140_v5  ;;  %v6005_v5 = vrot.slane %v5997_v24, %v10304_v20  ;;  %v6046_v2 = vcombine.high %v13334_v10, %v13337_v31 }
 0x918   : > { %v6077_v35 = vrot.slane %v6069_v7, %v10296_v12  ;;  %v6084_v41 = vrot.slane %v6070_v36, %v10296_v12 }
 0x919   : > { %v13355_v29 = vpop.permute.xlu1 %5285  ;;  %v13357_v53 = vpop.permute.xlu0 %5283 }
 0x91a   : > { %v6117_v13 = vcombine.low %v6061_v25, %v6077_v35  ;;  %v6118_v36 = vcombine.high %v6061_v25, %v6077_v35  ;;  %v6133_v49 = vcombine.low %v6068_v15, %v6084_v41  ;;  %v6134_v17 = vcombine.high %v6068_v15, %v6084_v41 }
 0x91b   : > { %v6047_v25 = vcombine.low %v5996_v58, %v6028_v40  ;;  %v6048_v15 = vcombine.high %v5996_v58, %v6028_v40  ;;  %v6051_v40 = vcombine.low %v6012_v26, %v6044_v57 }
 0x91c   : > { %v13381_v39 = vrot.slane %v6117_v13, %v10304_v20  ;;  %v6132_v33 = vrot.slane %v6118_v36, %v10304_v20  ;;  %v6141_v37 = vrot.slane %v6133_v49, %v10304_v20  ;;  %v6148_v45 = vrot.slane %v6134_v17, %v10304_v20 }
 0x91d   : > { %v13386_v24 = vpop.permute.xlu1 %5289  ;;  %v13388_v7 = vpop.permute.xlu0 %5287  ;;  %v6049_v13 = vcombine.low %v6005_v5, %v6037_v27  ;;  %v6050_v36 = vcombine.high %v6005_v5, %v6037_v27 }
 0x91e   : > { %15708 = vst [vmem:[#allocation11_spill] sm:$0xff] %v13381_v39  ;;  %v6182_v41 = vcombine.high %v13381_v39, %v13347_v34  ;;  %v6183_v49 = vcombine.low %v6132_v33, %v6164_v18  ;;  %v6184_v17 = vcombine.high %v6132_v33, %v6164_v18  ;;  %v6185_v9 = vcombine.low %v6141_v37, %v6173_v55 }
 0x91f   : > { %v6186_v1 = vcombine.high %v6141_v37, %v6173_v55  ;;  %v6187_v58 = vcombine.low %v6148_v45, %v6180_v21  ;;  %v6052_v18 = vcombine.high %v6012_v26, %v6044_v57  ;;  %v6188_v5 = vcombine.high %v6148_v45, %v6180_v21 }
 0x920   : > { %v13400_v31 = vpack.i.bf16 %v6182_v41, %v6046_v2  ;;  %v13406_v56 = vpack.i.bf16 %v6183_v49, %v6047_v25  ;;  %v13408_v52 = vpack.i.bf16 %v6184_v17, %v6048_v15  ;;  %v13410_v35 = vpack.i.bf16 %v6185_v9, %v6049_v13 }
 0x921   : > { %v13402_v10 = vpop.permute.xlu1 %5293  ;;  %v13404_v32 = vpop.permute.xlu0 %5291  ;;  %v13412_v34 = vpack.i.bf16 %v6186_v1, %v6050_v36  ;;  %v13414_v27 = vpack.i.bf16 %v6187_v58, %v6051_v40  ;;  %v13420_v37 = vpack.i.bf16 %v6188_v5, %v6052_v18 }
 0x922   : > { %15710 = vst [vmem:[#allocation25_spill] sm:$0xff] %v13408_v52  ;;  %15711 = vst [vmem:[#allocation19_spill] sm:$0xff] %v13410_v35 }
 0x923   : > { %15712 = vst [vmem:[#allocation36_spill] sm:$0xff] %v13412_v34  ;;  %15713 = vst [vmem:[#allocation42_spill] sm:$0xff] %v13414_v27 }
 0x924   : > { %15715 = vst [vmem:[#allocation33_spill] sm:$0xff] %v13420_v37 }
 0x925   : > { %v13416_v55 = vpop.permute.xlu1 %5183  ;;  %v13418_v33 = vpop.permute.xlu0 %5295 }
 0x926   : > { %15714 = vst [vmem:[#allocation34_spill] sm:$0xff] %v13416_v55 }
 0x929   : > { %v13422_v2 = vpop.permute.xlu1 %5191  ;;  %v13424_v25 = vpop.permute.xlu0 %5187 }
 0x92a   : > { %15716 = vst [vmem:[#allocation21_spill] sm:$0xff] %v13422_v2  ;;  %15717 = vst [vmem:[#allocation40_spill] sm:$0xff] %v13424_v25  ;;  %v6189_v21 = vcombine.low %v13416_v55, %v13422_v2 }
 0x92c   : > { %v13448_v17 = vrot.slane %v6189_v21, %v10296_v12 }
 0x92d   : > { %v13426_v15 = vpop.permute.xlu1 %5207  ;;  %v13428_v41 = vpop.permute.xlu0 %5195 }
 0x92e   : > { %15718 = vst [vmem:[#allocation30_spill] sm:$0xff] %v13426_v15  ;;  %15719 = vst [vmem:[#allocation38_spill] sm:$0xff] %v13428_v41  ;;  %v6205_v1 = vcombine.low %v13424_v25, %v13428_v41 }
 0x930   : > { %v13439_v45 = vrot.slane %v6205_v1, %v10296_v12 }
 0x931   : > { %v13432_v13 = vpop.permute.xlu1 %5215  ;;  %v13434_v57 = vpop.permute.xlu0 %5211 }
 0x932   : > { %15720 = vst [vmem:[#allocation12_spill] sm:$0xff] %v13432_v13  ;;  %15721 = vst [vmem:[#allocation22_spill] sm:$0xff] %v13434_v57  ;;  %v6221_v26 = vcombine.low %v13426_v15, %v13432_v13  ;;  %v6253_v40 = vcombine.low %v13448_v17, %v13439_v45  ;;  %v5338_v15 = vcombine.high %v13278_v0, %v13285_v30 }
 0x934   : > { %v13455_v58 = vrot.slane %v6221_v26, %v10296_v12  ;;  %v13467_v39 = vrot.slane %v6253_v40, %v10304_v20 }
 0x935   : > { %v13443_v36 = vpop.permute.xlu1 %5259  ;;  %v13445_v49 = vpop.permute.xlu0 %5219 }
 0x936   : > { %15722 = vst [vmem:[#allocation48_spill] sm:$0xff] %v13443_v36  ;;  %15723 = vst [vmem:[#allocation32_spill] sm:$0xff] %v13445_v49  ;;  %v6237_v9 = vcombine.low %v13434_v57, %v13445_v49  ;;  %v5402_v57 = vcombine.high %v13298_v46, %v13301_v3  ;;  %v15746_v46 = vcombine.low %v12978_v16, %v12972_v38 }
 0x937   : > { %15726 = vst [vmem:[#allocation44_spill] sm:$0xff] %v13467_v39  ;;  %v13498_v39 = vrot.slane %v15732_v54, %v10304_v20  ;;  %v5354_v54 = vcombine.high %v13280_v11, %v13289_v59 }
 0x938   : > { %v13458_v18 = vrot.slane %v6237_v9, %v10296_v12  ;;  %v13572_v3 = vrot.slane %v15746_v46, %v10304_v20  ;;  %v15749_v46 = vcombine.low %v13092_v63, %v13133_v51 }
 0x939   : > { %v13460_v5 = vpop.permute.xlu1 %5267  ;;  %v13462_v1 = vpop.permute.xlu0 %5263  ;;  %15733 = vst [vmem:[#allocation43_spill] sm:$0xff] %v13498_v39  ;;  %v5352_v39 = vrot.slane %v5338_v15, %v10296_v12  ;;  %v5368_v0 = vrot.slane %v5354_v54, %v10296_v12 }
 0x93a   : > { %15724 = vst [vmem:[#allocation31_spill] sm:$0xff] %v13460_v5  ;;  %15725 = vst [vmem:[#allocation27_spill] sm:$0xff] %v13462_v1  ;;  %v6285_v21 = vcombine.low %v13455_v58, %v13458_v18  ;;  %v6357_v26 = vcombine.low %v13443_v36, %v13460_v5 }
 0x93b   : > { %v5417_v54 = vcombine.low %v5352_v39, %v5368_v0  ;;  %v5418_v49 = vcombine.high %v5352_v39, %v5368_v0  ;;  %v15747_v39 = vcombine.high %v12975_v14, %v12969_v62  ;;  %v15750_v14 = vcombine.low %v13212_v48, %v13224_v50 }
 0x93c   : > { %v13470_v37 = vrot.slane %v6285_v21, %v10304_v20  ;;  %v13483_v23 = vrot.slane %v6357_v26, %v10296_v12 }
 0x93d   : > { %v13474_v27 = vpop.permute.xlu1 %5181  ;;  %v13476_v9 = vpop.permute.xlu0 %5271  ;;  %v13578_v0 = vrot.slane %v15747_v39, %v10304_v20 }
 0x93e   : > { %15727 = vst [vmem:[#allocation51_spill] sm:$0xff] %v13470_v37  ;;  %15728 = vst [vmem:[#allocation50_spill] sm:$0xff] %v13474_v27  ;;  %v6373_v42 = vcombine.low %v13462_v1, %v13476_v9 }
 0x93f   : > { %15729 = vst [vmem:[#allocation53_spill] sm:$0xff] %v13476_v9 }
 0x940   : > { %v13486_v40 = vrot.slane %v6373_v42, %v10296_v12 }
 0x941   : > { %v13488_v21 = vpop.permute.xlu1 %5189  ;;  %v13490_v44 = vpop.permute.xlu0 %5185 }
 0x942   : > { %15730 = vst [vmem:[#allocation47_spill] sm:$0xff] %v13488_v21  ;;  %15731 = vst [vmem:[#allocation52_spill] sm:$0xff] %v13490_v44  ;;  %v6421_v34 = vcombine.low %v13483_v23, %v13486_v40  ;;  %v5577_v35 = vcombine.low %v13474_v27, %v13488_v21 }
 0x944   : > { %v13501_v37 = vrot.slane %v6421_v34, %v10304_v20  ;;  %v13533_v59 = vrot.slane %v5577_v35, %v10296_v12 }
 0x945   : > { %v13503_v26 = vpop.permute.xlu1 %5205  ;;  %v13505_v42 = vpop.permute.xlu0 %5193 }
 0x946   : > { %15734 = vst [vmem:[#allocation13_spill] sm:$0xff] %v13501_v37  ;;  %15735 = vst [vmem:[#allocation24_spill] sm:$0xff] %v13503_v26  ;;  %v5593_v2 = vcombine.low %v13490_v44, %v13505_v42 }
 0x947   : > { %15736 = vst [vmem:[#allocation26_spill] sm:$0xff] %v13505_v42  ;;  %15742 = vst [vmem:[#allocation35_spill] sm:$0xff] %v13533_v59 }
 0x948   : > { %v13522_v36 = vrot.slane %v5593_v2, %v10296_v12 }
 0x949   : > { %v13515_v13 = vpop.permute.xlu1 %5213  ;;  %v13517_v34 = vpop.permute.xlu0 %5209 }
 0x94a   : > { %15737 = vst [vmem:[#allocation46_spill] sm:$0xff] %v13515_v13  ;;  %15738 = vst [vmem:[#allocation29_spill] sm:$0xff] %v13517_v34  ;;  %v5609_v55 = vcombine.low %v13503_v26, %v13515_v13  ;;  %v5641_v2 = vcombine.low %v13533_v59, %v13522_v36  ;;  %v13593_v59 = vrot.slane %v15749_v46, %v10304_v20 }
 0x94b   : > { %15739 = vst [vmem:[#allocation54_spill] sm:$0xff] %v13522_v36  ;;  %v15753_v36 = vcombine.high %v13221_v60, %v13227_v4 }
 0x94c   : > { %v13540_v27 = vrot.slane %v5609_v55, %v10296_v12  ;;  %v13554_v25 = vrot.slane %v5641_v2, %v10304_v20  ;;  %v15748_v2 = vcombine.high %v12978_v16, %v12972_v38  ;;  %v13601_v38 = vrot.slane %v15750_v14, %v10304_v20 }
 0x94d   : > { %v13528_v30 = vpop.permute.xlu1 %5257  ;;  %v13530_v11 = vpop.permute.xlu0 %5217  ;;  %v13604_v16 = vrot.slane %v5418_v49, %v10304_v20  ;;  %v13618_v44 = vrot.slane %v15753_v36, %v10304_v20  ;;  %v6477_v49 = vcombine.low %v13388_v7, %v13418_v33  ;;  %v6461_v36 = vcombine.low %v13357_v53, %v13404_v32 }
 0x94e   : > { %15740 = vst [vmem:[#allocation49_spill] sm:$0xff] %v13528_v30  ;;  %15741 = vst [vmem:[#allocation45_spill] sm:$0xff] %v13530_v11  ;;  %v5625_v37 = vcombine.low %v13517_v34, %v13530_v11 }
 0x94f   : > { %15743 = vst [vmem:[#allocation20_spill] sm:$0xff] %v13540_v27  ;;  %v6485_v9 = vrot.slane %v6477_v49, %v10296_v12 }
 0x950   : > { %v13543_v15 = vrot.slane %v5625_v37, %v10296_v12  ;;  %v13560_v37 = vrot.slane %v5417_v54, %v10304_v20  ;;  %v13584_v54 = vrot.slane %v15748_v2, %v10304_v20  ;;  %v15752_v2 = vcombine.high %v13212_v48, %v13224_v50 }
 0x951   : > { %v13545_v21 = vpop.permute.xlu1 %5265  ;;  %v13547_v5 = vpop.permute.xlu0 %5261 }
 0x952   : > { %15744 = vst [vmem:[#allocation39_spill] sm:$0xff] %v13543_v15  ;;  %15745 = vst [vmem:[#allocation8_spill] sm:$0xff] %v13545_v21  ;;  %v5673_v35 = vcombine.low %v13540_v27, %v13543_v15  ;;  %v5745_v41 = vcombine.low %v13528_v30, %v13545_v21  ;;  %v5552_v46 = vrot.slane %v15752_v2, %v10304_v20 }
 0x953   : > { %v6469_v21 = vrot.slane %v6461_v36, %v10296_v12 }
 0x954   : > { %v13557_v55 = vrot.slane %v5673_v35, %v10304_v20  ;;  %v13587_v35 = vrot.slane %v5402_v57, %v10304_v20  ;;  %v15751_v57 = vcombine.low %v13221_v60, %v13227_v4  ;;  %v13623_v14 = vrot.slane %v5745_v41, %v10296_v12 }
 0x955   : > { %v13566_v13 = vpop.permute.xlu0 %5269  ;;  %v5134_v26 = vpop.permute.xlu1 %5133  ;;  %v5434_v60 = vcombine.high %v13313_v8, %v13316_v22  ;;  %v5438_v4 = vcombine.high %v13572_v3, %v13560_v37  ;;  %v5865_v41 = vcombine.low %v13355_v29, %v13402_v10  ;;  %v5866_v8 = vcombine.high %v13355_v29, %v13402_v10 }
 0x956   : > { %v5761_v62 = vcombine.low %v13547_v5, %v13566_v13  ;;  %v5561_v39 = vrot.slane %v15751_v57, %v10304_v20  ;;  %v5437_v57 = vcombine.low %v13572_v3, %v13560_v37  ;;  %v5441_v48 = vcombine.low %v13322_v61, %v5134_v26 }
 0x957   : > { %v5442_v50 = vcombine.high %v13322_v61, %v5134_v26  ;;  %v5435_v1 = vcombine.low %v13578_v0, %v13587_v35  ;;  %v5436_v22 = vcombine.high %v13578_v0, %v13587_v35  ;;  %v5439_v37 = vcombine.low %v13584_v54, %v13604_v16 }
 0x958   : > { %v13626_v42 = vrot.slane %v5761_v62, %v10296_v12  ;;  %v5849_v3 = vcombine.low %v13339_v43, %v13386_v24  ;;  %v5449_v30 = vrot.slane %v5441_v48, %v10296_v12  ;;  %v6478_v10 = vcombine.high %v13388_v7, %v13418_v33 }
 0x959   : > { %v5138_v2 = vpop.permute.xlu0 %5137 }
 0x95a   : > { %v5809_v62 = vcombine.low %v13623_v14, %v13626_v42  ;;  %v5457_v61 = vcombine.low %v13324_v47, %v5138_v2  ;;  %v5458_v26 = vcombine.high %v13324_v47, %v5138_v2  ;;  %v5456_v47 = vrot.slane %v5442_v50, %v10296_v12 }
 0x95b   : > { %v5873_v2 = vrot.slane %v5865_v41, %v10296_v12  ;;  %v5850_v50 = vcombine.high %v13339_v43, %v13386_v24  ;;  %v5440_v41 = vcombine.high %v13584_v54, %v13604_v16  ;;  %v6462_v43 = vcombine.high %v13357_v53, %v13404_v32 }
 0x95c   : > { %v13656_v52 = vrot.slane %v5809_v62, %v10304_v20  ;;  %v5465_v0 = vrot.slane %v5457_v61, %v10296_v12  ;;  %v5472_v35 = vrot.slane %v5458_v26, %v10296_v12  ;;  %v5857_v61 = vrot.slane %v5849_v3, %v10296_v12 }
 0x95d   : > { %v6493_v26 = vcombine.low %v6469_v21, %v6485_v9  ;;  %v6492_v24 = vrot.slane %v6478_v10, %v10296_v12  ;;  %v6476_v10 = vrot.slane %v6462_v43, %v10296_v12 }
 0x95e   : > { %v5505_v49 = vcombine.low %v5449_v30, %v5465_v0  ;;  %v5506_v62 = vcombine.high %v5449_v30, %v5465_v0  ;;  %v5521_v27 = vcombine.low %v5456_v47, %v5472_v35  ;;  %v5522_v48 = vcombine.high %v5456_v47, %v5472_v35 }
 0x95f   : > { %v5880_v47 = vrot.slane %v5866_v8, %v10296_v12  ;;  %v5881_v0 = vcombine.low %v5857_v61, %v5873_v2  ;;  %v13689_v8 = vrot.slane %v6493_v26, %v10304_v20  ;;  %v5882_v11 = vcombine.high %v5857_v61, %v5873_v2 }
 0x960   : > { %v13674_v36 = vrot.slane %v5505_v49, %v10304_v20  ;;  %v5520_v7 = vrot.slane %v5506_v62, %v10304_v20  ;;  %v5529_v33 = vrot.slane %v5521_v27, %v10304_v20  ;;  %v5536_v30 = vrot.slane %v5522_v48, %v10304_v20 }
 0x961   : > { %v6494_v49 = vcombine.high %v6469_v21, %v6485_v9  ;;  %v5864_v21 = vrot.slane %v5850_v50, %v10296_v12 }
 0x962   : > { %v5573_v16 = vcombine.low %v5529_v33, %v5561_v39  ;;  %v5570_v3 = vcombine.high %v13674_v36, %v13601_v38  ;;  %v5574_v35 = vcombine.high %v5529_v33, %v5561_v39  ;;  %v5571_v27 = vcombine.low %v5520_v7, %v5552_v46 }
 0x963   : > { %v5572_v62 = vcombine.high %v5520_v7, %v5552_v46  ;;  %v5575_v48 = vcombine.low %v5536_v30, %v13618_v44  ;;  %v13695_v39 = vrot.slane %v5881_v0, %v10304_v20  ;;  %v5576_v9 = vcombine.high %v5536_v30, %v13618_v44 }
 0x964   : > { %v9732_v29 = vpack.i.bf16 %v5573_v16, %v5437_v57  ;;  %v9717_v53 = vpack.i.bf16 %v5570_v3, %v5434_v60  ;;  %v9737_v32 = vpack.i.bf16 %v5574_v35, %v5438_v4  ;;  %v9722_v15 = vpack.i.bf16 %v5571_v27, %v5435_v1  ;;  %v15756_v27 = vld [vmem:[#allocation45_spill] sm:$0xff] }
 0x965   : > { %v9727_v54 = vpack.i.bf16 %v5572_v62, %v5436_v22  ;;  %v13692_v34 = vpack.i.bf16 %v5575_v48, %v5439_v37  ;;  %v13702_v46 = vrot.slane %v6494_v49, %v10304_v20  ;;  %v6509_v57 = vcombine.low %v6476_v10, %v6492_v24  ;;  %v15757_v62 = vld [vmem:[#allocation29_spill] sm:$0xff] }
 0x966   : > { %9733 = vrot.lane.b32.xlu1 %v9732_v29, %s10165_s17  ;;  %9718 = vrot.lane.b32.xlu0 %v9717_v53, %s10169_s25  ;;  %v6525_v22 = vcombine.high %v13689_v8, %v15521_v6  ;;  %v13706_v1 = vpack.i.bf16 %v5576_v9, %v5440_v41  ;;  %v13709_v60 = vrot.slane %v5882_v11, %v10304_v20  ;;  %v15763_v9 = vld [vmem:[#allocation53_spill] sm:$0xff] }
 0x967   : > { %v5897_v4 = vcombine.low %v5864_v21, %v5880_v47  ;;  %v5913_v44 = vcombine.high %v13695_v39, %v15521_v6  ;;  %v13716_v37 = vrot.slane %v6509_v57, %v10304_v20  ;;  %v6526_v29 = vcombine.high %v13702_v46, %v15521_v6 }
 0x968   : > { %v5914_v11 = vcombine.high %v13709_v60, %v15521_v6  ;;  %v5898_v41 = vcombine.high %v5864_v21, %v5880_v47  ;;  %v6286_v7 = vcombine.high %v13455_v58, %v13458_v18  ;;  %v6510_v30 = vcombine.high %v6476_v10, %v6492_v24  ;;  %v15762_v10 = vld [vmem:[#allocation25_spill] sm:$0xff]  ;;  %v15764_v21 = vld [vmem:[#allocation27_spill] sm:$0xff] }
 0x969   : > { %v9782_v2 = vpack.i.bf16 %v6525_v22, %v5913_v44  ;;  %v13721_v50 = vrot.slane %v5897_v4, %v10304_v20  ;;  %v6527_v26 = vcombine.high %v13716_v37, %v15521_v6  ;;  %v5842_v47 = vcombine.high %v13593_v59, %v13656_v52 }
 0x96a   : > { %9738 = vrot.lane.b32.xlu1 %v9737_v32, %s10163_s10  ;;  %9723 = vrot.lane.b32.xlu0 %v9722_v15, %s10167_s20  ;;  %v6422_v15 = vcombine.high %v13483_v23, %v13486_v40  ;;  %v9787_v61 = vpack.i.bf16 %v6526_v29, %v5914_v11  ;;  %v6254_v23 = vcombine.high %v13448_v17, %v13439_v45  ;;  %v15768_v29 = vld [vmem:[#allocation35_spill] sm:$0xff] }
 0x96b   : > { %v5915_v33 = vcombine.high %v13721_v50, %v15521_v6  ;;  %v13746_v58 = vrot.slane %v5898_v41, %v10304_v20  ;;  %v13749_v18 = vrot.slane %v6286_v7, %v10304_v20  ;;  %v5706_v45 = vcombine.high %v13554_v25, %v13557_v55 }
 0x96c   : > { %v13741_v40 = vrot.slane %v6422_v15, %v10304_v20  ;;  %v13763_v17 = vrot.slane %v6510_v30, %v10304_v20  ;;  %v13766_v24 = vrot.slane %v6254_v23, %v10304_v20  ;;  %v15755_v35 = vcombine.high %v13092_v63, %v13133_v51  ;;  %v15765_v63 = vld [vmem:[#allocation26_spill] sm:$0xff]  ;;  %v15766_v51 = vld [vmem:[#allocation52_spill] sm:$0xff] }
 0x96d   : > { %v9792_v0 = vpack.i.bf16 %v6527_v26, %v5915_v33  ;;  %v9802_v16 = vpack.i.bf16 %v5842_v47, %v5706_v45  ;;  %v5916_v3 = vcombine.high %v13746_v58, %v15521_v6  ;;  %v5626_v48 = vcombine.high %v15757_v62, %v15756_v27  ;;  %v15769_v15 = vld [vmem:[#allocation46_spill] sm:$0xff]  ;;  %v15772_v30 = vld [vmem:[#allocation40_spill] sm:$0xff]  ;;  %v15775_v45 = vld [vmem:[#allocation31_spill] sm:$0xff] }
 0x96e   : > { %9783 = vrot.lane.b32.xlu1 %v9782_v2, %s10169_s25  ;;  %9728 = vrot.lane.b32.xlu0 %v9727_v54, %s10168_s24  ;;  %v13782_v49 = vrot.slane %v15755_v35, %v10304_v20  ;;  %v6374_v57 = vcombine.high %v15764_v21, %v15763_v9  ;;  %v5594_v22 = vcombine.high %v15766_v51, %v15765_v63  ;;  %v15767_v2 = vld [vmem:[#allocation54_spill] sm:$0xff]  ;;  %v15782_v51 = vld [vmem:[#allocation21_spill] sm:$0xff] }
 0x96f   : > { %v6528_v44 = vcombine.high %v13763_v17, %v15521_v6  ;;  %v5642_v11 = vcombine.high %v15768_v29, %v15767_v2  ;;  %v15771_v33 = vld [vmem:[#allocation38_spill] sm:$0xff]  ;;  %v13818_v62 = vrot.slane %v5626_v48, %v10296_v12  ;;  %v15784_v29 = vld [vmem:[#allocation36_spill] sm:$0xff] }
 0x970   : > { %v6206_v23 = vcombine.high %v15772_v30, %v15771_v33  ;;  %v15774_v47 = vld [vmem:[#allocation22_spill] sm:$0xff]  ;;  %v13833_v9 = vrot.slane %v5594_v22, %v10296_v12 }
 0x971   : > { %v15778_v35 = vld [vmem:[#allocation50_spill] sm:$0xff]  ;;  %v9817_v48 = vpack.i.bf16 %v6528_v44, %v5916_v3 }
 0x972   : > { %9788 = vrot.lane.b32.xlu1 %v9787_v61, %s10168_s24  ;;  %9743 = vrot.lane.b32.xlu0 %v13400_v31, %s10169_s25  ;;  %v15754_v31 = vcombine.high %v13098_v28, %v13139_v19  ;;  %v5762_v28 = vcombine.high %v13547_v5, %v13566_v13  ;;  %v5810_v19 = vcombine.high %v13623_v14, %v13626_v42  ;;  %v15758_v13 = vld [vmem:[#allocation39_spill] sm:$0xff]  ;;  %v15759_v5 = vld [vmem:[#allocation20_spill] sm:$0xff]  ;;  %v15761_v14 = vld [vmem:[#allocation49_spill] sm:$0xff] }
 0x973   : > { %v5674_v53 = vcombine.high %v15759_v5, %v15758_v13  ;;  %v15760_v42 = vld [vmem:[#allocation8_spill] sm:$0xff]  ;;  %v15779_v13 = vld [vmem:[#allocation19_spill] sm:$0xff] }
 0x974   : > { %v13755_v43 = vrot.slane %v15754_v31, %v10304_v20  ;;  %v5746_v32 = vcombine.high %v15761_v14, %v15760_v42  ;;  %v15770_v61 = vld [vmem:[#allocation24_spill] sm:$0xff]  ;;  %v13804_v41 = vrot.slane %v5762_v28, %v10296_v12  ;;  %v13807_v7 = vrot.slane %v5810_v19, %v10304_v20  ;;  %v15781_v42 = vld [vmem:[#allocation30_spill] sm:$0xff] }
 0x975   : > { %v5610_v26 = vcombine.high %v15770_v61, %v15769_v15  ;;  %v13821_v28 = vrot.slane %v5674_v53, %v10304_v20  ;;  %v15780_v5 = vld [vmem:[#allocation12_spill] sm:$0xff]  ;;  %v13836_v53 = vrot.slane %v5642_v11, %v10304_v20  ;;  %v6220_v15 = vrot.slane %v6206_v23, %v10296_v12  ;;  %v15785_v23 = vld [vmem:[#allocation23_spill] sm:$0xff] }
 0x976   : > { %9793 = vrot.lane.b32.xlu1 %v9792_v0, %s10163_s10  ;;  %9748 = vrot.lane.b32.xlu0 %v13406_v56, %s10167_s20  ;;  %v6455_v54 = vcombine.low %v13755_v43, %v13741_v40  ;;  %v6319_v56 = vcombine.low %v13766_v24, %v13749_v18  ;;  %v15773_v0 = vld [vmem:[#allocation32_spill] sm:$0xff]  ;;  %v13824_v19 = vrot.slane %v5746_v32, %v10296_v12 }
 0x977   : > { %v6238_v31 = vcombine.high %v15774_v47, %v15773_v0  ;;  %v6222_v14 = vcombine.high %v15781_v42, %v15780_v5  ;;  %v13839_v32 = vrot.slane %v5610_v26, %v10296_v12  ;;  %v5844_v63 = vcombine.high %v13782_v49, %v13807_v7 }
 0x978   : > { %v9807_v4 = vpack.i.bf16 %v6455_v54, %v6319_v56  ;;  %v15776_v54 = vld [vmem:[#allocation48_spill] sm:$0xff]  ;;  %v15777_v56 = vld [vmem:[#allocation47_spill] sm:$0xff]  ;;  %v5825_v21 = vcombine.low %v13824_v19, %v13804_v41  ;;  %v5708_v11 = vcombine.high %v13836_v53, %v13821_v28  ;;  %v9767_v47 = vpack.i.bf16 %v13702_v46, %v13709_v60 }
 0x979   : > { %v5578_v27 = vcombine.high %v15778_v35, %v15777_v56  ;;  %v5689_v44 = vcombine.low %v13839_v32, %v13818_v62  ;;  %v6236_v61 = vrot.slane %v6222_v14, %v10296_v12  ;;  %v9772_v46 = vpack.i.bf16 %v13716_v37, %v13721_v50  ;;  %v15788_v14 = vld [vmem:[#allocation16_spill] sm:$0xff]  ;;  %v15791_v50 = vld [vmem:[#allocation13_spill] sm:$0xff] }
 0x97a   : > { %9803 = vrot.lane.b32.xlu1 %v9802_v16, %s10169_s25  ;;  %9753 = vrot.lane.b32.xlu0 %v15762_v10, %s10168_s24  ;;  %v6358_v16 = vcombine.high %v15776_v54, %v15775_v45  ;;  %v6388_v10 = vrot.slane %v6374_v57, %v10296_v12  ;;  %v6252_v57 = vrot.slane %v6238_v31, %v10296_v12 }
 0x97b   : > { %v13850_v3 = vrot.slane %v5578_v27, %v10296_v12  ;;  %v5833_v30 = vrot.slane %v5825_v21, %v10304_v20  ;;  %v9827_v0 = vpack.i.bf16 %v5844_v63, %v5708_v11  ;;  %v5697_v54 = vrot.slane %v5689_v44, %v10304_v20  ;;  %v15792_v11 = vld [vmem:[#allocation43_spill] sm:$0xff] }
 0x97c   : > { %v6372_v22 = vrot.slane %v6358_v16, %v10296_v12  ;;  %v6301_v45 = vcombine.low %v6236_v61, %v6252_v57  ;;  %v15786_v16 = vld [vmem:[#allocation18_spill] sm:$0xff]  ;;  %v9777_v37 = vpack.i.bf16 %v13763_v17, %v13746_v58 }
 0x97d   : > { %v5657_v33 = vcombine.low %v13850_v3, %v13833_v9  ;;  %v15787_v56 = vcombine.low %v15785_v23, %v15786_v16 }
 0x97e   : > { %9808 = vrot.lane.b32.xlu1 %v9807_v4, %s10167_s20  ;;  %9758 = vrot.lane.b32.xlu0 %v15779_v13, %s10165_s17  ;;  %v15783_v4 = vld [vmem:[#allocation34_spill] sm:$0xff]  ;;  %v6437_v26 = vcombine.low %v6372_v22, %v6388_v10  ;;  %v6309_v42 = vrot.slane %v6301_v45, %v10304_v20 }
 0x97f   : > { %v6190_v2 = vcombine.high %v15783_v4, %v15782_v51  ;;  %v5801_v35 = vrot.slane %v15787_v56, %v10304_v20  ;;  %v5665_v5 = vrot.slane %v5657_v33, %v10304_v20  ;;  %v6302_v33 = vcombine.high %v6236_v61, %v6252_v57 }
 0x980   : > { %v6445_v13 = vrot.slane %v6437_v26, %v10304_v20  ;;  %v6454_v26 = vcombine.high %v15792_v11, %v15791_v50  ;;  %v5843_v57 = vcombine.low %v13782_v49, %v13807_v7 }
 0x981   : > { %v6204_v31 = vrot.slane %v6190_v2, %v10296_v12  ;;  %v5845_v60 = vcombine.low %v5801_v35, %v5833_v30  ;;  %v5709_v51 = vcombine.low %v5665_v5, %v5697_v54  ;;  %v6438_v2 = vcombine.high %v6372_v22, %v6388_v10 }
 0x982   : > { %9818 = vrot.lane.b32.xlu1 %v9817_v48, %s10164_s11  ;;  %9763 = vrot.lane.b32.xlu0 %v15784_v29, %s10163_s10  ;;  %v15789_v48 = vld [vmem:[#allocation17_spill] sm:$0xff]  ;;  %v5846_v17 = vcombine.high %v5801_v35, %v5833_v30  ;;  %v6316_v61 = vrot.slane %v6302_v33, %v10304_v20  ;;  %v6456_v30 = vcombine.high %v13755_v43, %v13741_v40 }
 0x983   : > { %v6269_v27 = vcombine.low %v6204_v31, %v6220_v15  ;;  %v15790_v21 = vcombine.low %v15788_v14, %v15789_v48  ;;  %v9852_v29 = vpack.i.bf16 %v5845_v60, %v5709_v51  ;;  %v6270_v56 = vcombine.high %v6204_v31, %v6220_v15 }
 0x984   : > { %v6452_v10 = vrot.slane %v6438_v2, %v10304_v20  ;;  %v5690_v15 = vcombine.high %v13839_v32, %v13818_v62  ;;  %v5658_v31 = vcombine.high %v13850_v3, %v13833_v9  ;;  %v6320_v40 = vcombine.high %v13766_v24, %v13749_v18 }
 0x985   : > { %v6413_v63 = vrot.slane %v15790_v21, %v10304_v20  ;;  %v6277_v4 = vrot.slane %v6269_v27, %v10304_v20  ;;  %v5826_v27 = vcombine.high %v13824_v19, %v13804_v41  ;;  %v5710_v41 = vcombine.high %v5665_v5, %v5697_v54 }
 0x986   : > { %9828 = vrot.lane.b32.xlu1 %v9827_v0, %s10168_s24  ;;  %9768 = vrot.lane.b32.xlu0 %v9767_v47, %s10167_s20  ;;  %v15794_v47 = vld [vmem:[#allocation44_spill] sm:$0xff]  ;;  %v5707_v19 = vcombine.low %v13836_v53, %v13821_v28  ;;  %v6284_v49 = vrot.slane %v6270_v56, %v10304_v20  ;;  %v15796_v54 = vcombine.high %v15785_v23, %v15786_v16 }
 0x987   : > { %v6458_v44 = vcombine.high %v6413_v63, %v6445_v13  ;;  %v6322_v0 = vcombine.high %v6277_v4, %v6309_v42  ;;  %v5840_v35 = vrot.slane %v5826_v27, %v10304_v20  ;;  %v9862_v62 = vpack.i.bf16 %v5846_v17, %v5710_v41 }
 0x988   : > { %v9812_v32 = vpack.i.bf16 %v5843_v57, %v5707_v19  ;;  %v5808_v5 = vrot.slane %v15796_v54, %v10304_v20  ;;  %v5704_v28 = vrot.slane %v5690_v15, %v10304_v20  ;;  %v6323_v53 = vcombine.low %v6284_v49, %v6316_v61 }
 0x989   : > { %v9857_v22 = vpack.i.bf16 %v6458_v44, %v6322_v0  ;;  %v6457_v43 = vcombine.low %v6413_v63, %v6445_v13  ;;  %v5672_v9 = vrot.slane %v5658_v31, %v10304_v20  ;;  %v6321_v16 = vcombine.low %v6277_v4, %v6309_v42  ;;  %v15797_v63 = vld [vmem:[#allocation42_spill] sm:$0xff]  ;;  %v15798_v42 = vld [vmem:[#allocation33_spill] sm:$0xff] }
 0x98a   : > { %9843 = vrot.lane.b32.xlu1 %v13692_v34, %s10166_s19  ;;  %9773 = vrot.lane.b32.xlu0 %v9772_v46, %s10165_s17  ;;  %v15793_v34 = vld [vmem:[#allocation51_spill] sm:$0xff]  ;;  %v15795_v46 = vcombine.high %v15788_v14, %v15789_v48  ;;  %v9822_v14 = vpack.i.bf16 %v6456_v30, %v6320_v40  ;;  %v5847_v48 = vcombine.low %v5808_v5, %v5840_v35  ;;  %v9285_v4 = vld [vmem:[%s15288_s2 + $0x8] sm:$0xf] }
 0x98b   : > { %v6318_v45 = vcombine.high %v15794_v47, %v15793_v34  ;;  %v5711_v23 = vcombine.low %v5672_v9, %v5704_v28  ;;  %v9832_v51 = vpack.i.bf16 %v6457_v43, %v6321_v16  ;;  %v6324_v18 = vcombine.high %v6284_v49, %v6316_v61 }
 0x98c   : > { %v6420_v60 = vrot.slane %v15795_v46, %v10304_v20  ;;  %v5848_v13 = vcombine.high %v5808_v5, %v5840_v35  ;;  %v5712_v44 = vcombine.high %v5672_v9, %v5704_v28 }
 0x98d   : > { %v9797_v58 = vpack.i.bf16 %v6454_v26, %v6318_v45  ;;  %v9872_v21 = vpack.i.bf16 %v5847_v48, %v5711_v23 }
 0x98e   : > { %9853 = vrot.lane.b32.xlu1 %v9852_v29, %s10165_s17  ;;  %9778 = vrot.lane.b32.xlu0 %v9777_v37, %s10166_s19  ;;  %v6459_v7 = vcombine.low %v6420_v60, %v6452_v10  ;;  %v6460_v2 = vcombine.high %v6420_v60, %v6452_v10  ;;  %v9882_v29 = vpack.i.bf16 %v5848_v13, %v5712_v44 }
 0x990   : > { %v9867_v3 = vpack.i.bf16 %v6459_v7, %v6323_v53  ;;  %v9877_v24 = vpack.i.bf16 %v6460_v2, %v6324_v18 }
 0x992   : > { %9858 = vrot.lane.b32.xlu1 %v9857_v22, %s10163_s10  ;;  %9798 = vrot.lane.b32.xlu0 %v9797_v58, %s10169_s25 }
 0x996   : > { %9863 = vrot.lane.b32.xlu1 %v9862_v62, %s10163_s10  ;;  %9813 = vrot.lane.b32.xlu0 %v9812_v32, %s10167_s20 }
 0x99a   : > { %9868 = vrot.lane.b32.xlu1 %v9867_v3, %s10166_s19  ;;  %9823 = vrot.lane.b32.xlu0 %v9822_v14, %s10168_s24 }
 0x99e   : > { %9873 = vrot.lane.b32.xlu1 %v9872_v21, %s10166_s19  ;;  %9833 = vrot.lane.b32.xlu0 %v9832_v51, %s10165_s17  ;;  %v15799_v21 = vld [vmem:[#allocation14_spill] sm:$0xff]  ;;  %v15800_v51 = vld [vmem:[#allocation41_spill] sm:$0xff] }
 0x99f   : > { %v15801_v2 = vcombine.low %v15799_v21, %v15800_v51  ;;  %v15803_v51 = vld [vmem:[#allocation11_spill] sm:$0xff] }
 0x9a2   : > { %9878 = vrot.lane.b32.xlu1 %v9877_v24, %s10164_s11  ;;  %9838 = vrot.lane.b32.xlu0 %v15797_v63, %s10166_s19  ;;  %v15802_v24 = vcombine.low %v13674_v36, %v13601_v38 }
 0x9a6   : > { %9883 = vrot.lane.b32.xlu1 %v9882_v29, %s10164_s11  ;;  %9848 = vrot.lane.b32.xlu0 %v15798_v42, %s10164_s11 }
 0x9aa   : > { %9888 = vrot.lane.b32.xlu1 %v13706_v1, %s10164_s11  ;;  %6891 = vperm.xlu0 %9540, %v9285_v4  }
 0x9d8   : > { %v13942_v37 = vpop.permute.xlu1 %9733  ;;  %v9719_v26 = vpop.permute.xlu0 %9718 }
 0x9d9   : > { %v9721_v62 = vunpack.i.h.bf16 %v9719_v26  ;;  %v9720_v32 = vunpack.i.l.bf16 %v9719_v26 }
 0x9db   : > { %v6809_v18 = vsel %vm2313_vm5, %v15801_v2, %v9720_v32  ;;  %v6810_v13 = vsel %vm2313_vm5, %v15802_v24, %v9721_v62  ;;  %v15804_v2 = vld [vmem:[#allocation37_spill] sm:$0xff] }
 0x9dc   : > { %v13944_v33 = vpop.permute.xlu1 %9738  ;;  %v9724_v0 = vpop.permute.xlu0 %9723 }
 0x9dd   : > { %v9726_v28 = vunpack.i.h.bf16 %v9724_v0  ;;  %v9725_v53 = vunpack.i.l.bf16 %v9724_v0  ;;  %v9741_v62 = vunpack.i.h.bf16 %v13944_v33 }
 0x9df   : > { %v6814_v29 = vsel %vm2319_vm6, %v6809_v18, %v9725_v53  ;;  %v6815_v42 = vsel %vm2319_vm6, %v6810_v13, %v9726_v28  ;;  %v9740_v53 = vunpack.i.l.bf16 %v13944_v33  ;;  %v15805_v18 = vcombine.low %v15803_v51, %v15804_v2 }
 0x9e0   : > { %v9784_v45 = vpop.permute.xlu1 %9783  ;;  %v9729_v56 = vpop.permute.xlu0 %9728 }
 0x9e1   : > { %v9786_v15 = vunpack.i.h.bf16 %v9784_v45  ;;  %v9785_v41 = vunpack.i.l.bf16 %v9784_v45  ;;  %v9731_v14 = vunpack.i.h.bf16 %v9729_v56  ;;  %v9730_v48 = vunpack.i.l.bf16 %v9729_v56 }
 0x9e3   : > { %v6848_v31 = vsel %vm2313_vm5, %v13689_v8, %v9786_v15  ;;  %v6813_v35 = vsel %vm2313_vm5, %v13695_v39, %v9785_v41  ;;  %v6819_v56 = vsel %vm2325_vm7, %v6814_v29, %v9730_v48  ;;  %v15807_v29 = vld [vmem:[#allocation28_spill] sm:$0xff] }
 0x9e4   : > { %v9789_v10 = vpop.permute.xlu1 %9788  ;;  %v13946_v22 = vpop.permute.xlu0 %9743 }
 0x9e5   : > { %v9791_v40 = vunpack.i.h.bf16 %v9789_v10  ;;  %v9790_v43 = vunpack.i.l.bf16 %v9789_v10  ;;  %v6820_v10 = vsel %vm2325_vm7, %v6815_v42, %v9731_v14  ;;  %v9746_v32 = vunpack.i.h.bf16 %v13946_v22 }
 0x9e7   : > { %v6845_v24 = vsel %vm2313_vm5, %v15805_v18, %v9746_v32 }
 0x9e8   : > { %v9794_v27 = vpop.permute.xlu1 %9793  ;;  %v13948_v58 = vpop.permute.xlu0 %9748 }
 0x9e9   : > { %v9796_v4 = vunpack.i.h.bf16 %v9794_v27  ;;  %v9795_v26 = vunpack.i.l.bf16 %v9794_v27  ;;  %v9750_v14 = vunpack.i.l.bf16 %v13948_v58 }
 0x9ec   : > { %v13950_v17 = vpop.permute.xlu1 %9803  ;;  %v13952_v57 = vpop.permute.xlu0 %9753 }
 0x9ed   : > { %v9755_v21 = vunpack.i.l.bf16 %v13952_v57 }
 0x9f0   : > { %v13954_v1 = vpop.permute.xlu1 %9808  ;;  %v13956_v61 = vpop.permute.xlu0 %9758 }
 0x9f1   : > { %v9760_v13 = vunpack.i.l.bf16 %v13956_v61 }
 0x9f4   : > { %v9819_v46 = vpop.permute.xlu1 %9818  ;;  %v13958_v60 = vpop.permute.xlu0 %9763 }
 0x9f5   : > { %v9821_v15 = vunpack.i.h.bf16 %v9819_v46  ;;  %v9820_v41 = vunpack.i.l.bf16 %v9819_v46 }
 0x9f8   : > { %v13960_v19 = vpop.permute.xlu1 %9828  ;;  %v9769_v49 = vpop.permute.xlu0 %9768 }
 0x9f9   : > { %v9771_v7 = vunpack.i.h.bf16 %v9769_v49  ;;  %v9770_v30 = vunpack.i.l.bf16 %v9769_v49 }
 0x9fb   : > { %v6853_v54 = vsel %vm2319_vm6, %v6848_v31, %v9771_v7  ;;  %v6818_v5 = vsel %vm2319_vm6, %v6813_v35, %v9770_v30  ;;  %v9736_v30 = vunpack.i.h.bf16 %v13942_v37  ;;  %v9735_v31 = vunpack.i.l.bf16 %v13942_v37 }
 0x9fc   : > { %v13968_v9 = vpop.permute.xlu1 %9843  ;;  %v9774_v3 = vpop.permute.xlu0 %9773  ;;  %v6823_v16 = vsel %vm2325_vm7, %v6818_v5, %v9790_v43  ;;  %v6858_v39 = vsel %vm2325_vm7, %v6853_v54, %v9791_v40  ;;  %v9745_v43 = vunpack.i.l.bf16 %v13946_v22  ;;  %v9761_v22 = vunpack.i.h.bf16 %v13956_v61 }
 0x9fd   : > { %v9776_v23 = vunpack.i.h.bf16 %v9774_v3  ;;  %v9775_v8 = vunpack.i.l.bf16 %v9774_v3  ;;  %v14002_v40 = vsel %vm2331_vm8, %v6819_v56, %v9735_v31  ;;  %v14005_v37 = vsel %vm2331_vm8, %v6820_v10, %v9736_v30 }
 0x9fe   : > { %v9751_v3 = vunpack.i.h.bf16 %v13948_v58  ;;  %v9811_v31 = vunpack.i.h.bf16 %v13954_v1 }
 0x9ff   : > { %v6828_v63 = vsel %vm2331_vm8, %v6823_v16, %v9775_v8  ;;  %v6863_v44 = vsel %vm2331_vm8, %v6858_v39, %v9776_v23  ;;  %v9806_v8 = vunpack.i.h.bf16 %v13950_v17  ;;  %v9805_v16 = vunpack.i.l.bf16 %v13950_v17 }
 0xa00   : > { %v13984_v0 = vpop.permute.xlu1 %9853  ;;  %v9779_v45 = vpop.permute.xlu0 %9778  ;;  %v6868_v49 = vsel %vm2337_vm9, %v6863_v44, %v9796_v4  ;;  %v6833_v7 = vsel %vm2337_vm9, %v6828_v63, %v9795_v26  ;;  %v9756_v39 = vunpack.i.h.bf16 %v13952_v57  ;;  %v15806_v44 = vld [vmem:[#allocation10_spill] sm:$0xff]  ;;  %v9765_v4 = vunpack.i.l.bf16 %v13958_v60 }
 0xa01   : > { %v9781_v38 = vunpack.i.h.bf16 %v9779_v45  ;;  %v9780_v36 = vunpack.i.l.bf16 %v9779_v45  ;;  %v15808_v42 = vcombine.low %v15806_v44, %v15807_v29  ;;  %v6850_v61 = vsel %vm2319_vm6, %v6845_v24, %v9751_v3 }
 0xa02   : > { %v6855_v30 = vsel %vm2325_vm7, %v6850_v61, %v9756_v39 }
 0xa03   : > { %v6873_v27 = vsel %vm2343_vm10, %v6868_v49, %v9781_v38  ;;  %v6838_v35 = vsel %vm2343_vm10, %v6833_v7, %v9780_v36  ;;  %v6844_v57 = vsel %vm2313_vm5, %v15808_v42, %v9745_v43  ;;  %v15809_v36 = vcombine.low %v13593_v59, %v13656_v52 }
 0xa04   : > { %v13996_v54 = vpop.permute.xlu1 %9858  ;;  %v9799_v5 = vpop.permute.xlu0 %9798  ;;  %v6878_v46 = vsel %vm2349_vm11, %v6873_v27, %v9821_v15  ;;  %v6843_v28 = vsel %vm2349_vm11, %v6838_v35, %v9820_v41  ;;  %v6849_v56 = vsel %vm2319_vm6, %v6844_v57, %v9750_v14  ;;  %v15810_v41 = vcombine.low %v13554_v25, %v13557_v55 }
 0xa05   : > { %v6884_v48 = vpack.c.bf16 %v6878_v46, %v6878_v46  ;;  %v6883_v23 = vpack.c.bf16 %v6843_v28, %v6843_v28  ;;  %v9801_v26 = vunpack.i.h.bf16 %v9799_v5  ;;  %v9800_v45 = vunpack.i.l.bf16 %v9799_v5 }
 0xa06   : > { %v6812_v15 = vsel %vm2313_vm5, %v15809_v36, %v9806_v8  ;;  %v6811_v49 = vsel %vm2313_vm5, %v15810_v41, %v9805_v16  ;;  %v6854_v7 = vsel %vm2325_vm7, %v6849_v56, %v9755_v21  ;;  %v9810_v27 = vunpack.i.l.bf16 %v13954_v1 }
 0xa07   : > { %9286 = vmatprep.subr.msk.bf16.mxu0 %vm2407_vm12, %v6884_v48  ;;  %v6898_v17 = vsel %vm2407_vm12, %v6883_v23, 0  ;;  %v6859_v35 = vsel %vm2331_vm8, %v6854_v7, %v9760_v13  ;;  %v6860_v32 = vsel %vm2331_vm8, %v6855_v30, %v9761_v22  ;;  %v9766_v5 = vunpack.i.h.bf16 %v13958_v60 }
 0xa08   : > { %v14021_v58 = vpop.permute.xlu1 %9863  ;;  %v9814_v63 = vpop.permute.xlu0 %9813  ;;  %6914 = vmatpush1.bf16.msra.mxu0 %v6898_v17  ;;  %v6864_v25 = vsel %vm2337_vm9, %v6859_v35, %v9765_v4  ;;  %v15811_v55 = vcombine.low %v15792_v11, %v15791_v50  ;;  %v15812_v28 = vcombine.low %v15794_v47, %v15793_v34  ;;  %v9831_v60 = vunpack.i.h.bf16 %v13960_v19 }
 0xa09   : > { %v9816_v10 = vunpack.i.h.bf16 %v9814_v63  ;;  %v9815_v38 = vunpack.i.l.bf16 %v9814_v63  ;;  %v9830_v23 = vunpack.i.l.bf16 %v13960_v19  ;;  %v9856_v8 = vunpack.i.h.bf16 %v13984_v0 }
 0xa0a   : > { %v6847_v46 = vsel %vm2313_vm5, %v15811_v55, %v9801_v26  ;;  %v6846_v1 = vsel %vm2313_vm5, %v15812_v28, %v9800_v45  ;;  %v9855_v50 = vunpack.i.l.bf16 %v13984_v0  ;;  %v9861_v11 = vunpack.i.h.bf16 %v13996_v54 }
 0xa0b   : > { %v6817_v43 = vsel %vm2319_vm6, %v6812_v15, %v9816_v10  ;;  %v6816_v3 = vsel %vm2319_vm6, %v6811_v49, %v9815_v38  ;;  %v9860_v34 = vunpack.i.l.bf16 %v13996_v54  ;;  %v6851_v47 = vsel %vm2319_vm6, %v6846_v1, %v9810_v27 }
 0xa0c   : > { %v9869_v52 = vpop.permute.xlu1 %9868  ;;  %v9824_v59 = vpop.permute.xlu0 %9823  ;;  %v6852_v16 = vsel %vm2319_vm6, %v6847_v46, %v9811_v31  ;;  %v6822_v51 = vsel %vm2325_vm7, %v6817_v43, %v9831_v60  ;;  %v6821_v2 = vsel %vm2325_vm7, %v6816_v3, %v9830_v23  ;;  %v9866_v24 = vunpack.i.h.bf16 %v14021_v58 }
 0xa0d   : > { %v9826_v14 = vunpack.i.h.bf16 %v9824_v59  ;;  %v9825_v48 = vunpack.i.l.bf16 %v9824_v59  ;;  %v9865_v0 = vunpack.i.l.bf16 %v14021_v58  ;;  %v9871_v13 = vunpack.i.h.bf16 %v9869_v52 }
 0xa0e   : > { %v9870_v63 = vunpack.i.l.bf16 %v9869_v52  ;;  %v6826_v29 = vsel %vm2331_vm8, %v6821_v2, %v9855_v50  ;;  %v6827_v42 = vsel %vm2331_vm8, %v6822_v51, %v9856_v8  ;;  %v6865_v49 = vsel %vm2337_vm9, %v6860_v32, %v9766_v5 }
 0xa0f   : > { %v6856_v22 = vsel %vm2325_vm7, %v6851_v47, %v9825_v48  ;;  %v6857_v54 = vsel %vm2325_vm7, %v6852_v16, %v9826_v14  ;;  %v9846_v7 = vunpack.i.h.bf16 %v13968_v9  ;;  %v9845_v27 = vunpack.i.l.bf16 %v13968_v9 }
 0xa10   : > { %v9874_v39 = vpop.permute.xlu1 %9873  ;;  %v9834_v21 = vpop.permute.xlu0 %9833  ;;  %v6831_v35 = vsel %vm2337_vm9, %v6826_v29, %v9865_v0  ;;  %v6832_v52 = vsel %vm2337_vm9, %v6827_v42, %v9866_v24  ;;  %v6829_v47 = vsel %vm2337_vm9, %v14002_v40, %v9740_v53  ;;  %v6886_v53 = vld [vmem:[#allocation2 + $0x4] sm:$0x3] }
 0xa11   : > { %v9836_v18 = vunpack.i.h.bf16 %v9834_v21  ;;  %v9835_v19 = vunpack.i.l.bf16 %v9834_v21  ;;  %v9876_v45 = vunpack.i.h.bf16 %v9874_v39  ;;  %v9875_v56 = vunpack.i.l.bf16 %v9874_v39 }
 0xa12   : > { %v6834_v21 = vsel %vm2343_vm10, %v6829_v47, %v9845_v27 }
 0xa13   : > { %v6861_v17 = vsel %vm2331_vm8, %v6856_v22, %v9835_v19  ;;  %v6862_v44 = vsel %vm2331_vm8, %v6857_v54, %v9836_v18  ;;  %v6836_v32 = vsel %vm2343_vm10, %v6831_v35, %v9875_v56  ;;  %v6837_v5 = vsel %vm2343_vm10, %v6832_v52, %v9876_v45 }
 0xa14   : > { %v9879_v57 = vpop.permute.xlu1 %9878  ;;  %v9839_v4 = vpop.permute.xlu0 %9838  ;;  %v6866_v26 = vsel %vm2337_vm9, %v6861_v17, %v9860_v34  ;;  %v6867_v58 = vsel %vm2337_vm9, %v6862_v44, %v9861_v11 }
 0xa15   : > { %v9881_v61 = vunpack.i.h.bf16 %v9879_v57  ;;  %v9880_v10 = vunpack.i.l.bf16 %v9879_v57  ;;  %v9841_v38 = vunpack.i.h.bf16 %v9839_v4  ;;  %v9840_v36 = vunpack.i.l.bf16 %v9839_v4 }
 0xa16   : > { %v6871_v15 = vsel %vm2343_vm10, %v6866_v26, %v9870_v63  ;;  %v6872_v41 = vsel %vm2343_vm10, %v6867_v58, %v9871_v13 }
 0xa17   : > { %v6876_v30 = vsel %vm2349_vm11, %v6871_v15, %v9880_v10  ;;  %v6877_v31 = vsel %vm2349_vm11, %v6872_v41, %v9881_v61  ;;  %v6869_v14 = vsel %vm2343_vm10, %v6864_v25, %v9840_v36  ;;  %v6870_v9 = vsel %vm2343_vm10, %v6865_v49, %v9841_v38 }
 0xa18   : > { %v9884_v59 = vpop.permute.xlu1 %9883  ;;  %v9849_v55 = vpop.permute.xlu0 %9848  ;;  %v6882_v46 = vpack.c.bf16 %v6877_v31, %v6876_v30  ;;  %v6830_v25 = vsel %vm2337_vm9, %v14005_v37, %v9741_v62 }
 0xa19   : > { %v9886_v28 = vunpack.i.h.bf16 %v9884_v59  ;;  %v9885_v1 = vunpack.i.l.bf16 %v9884_v59  ;;  %v9851_v43 = vunpack.i.h.bf16 %v9849_v55  ;;  %v9850_v3 = vunpack.i.l.bf16 %v9849_v55 }
 0xa1a   : > { %6915 = vmatprep.subr.bf16.mxu0 %v6882_v46  ;;  %v6835_v51 = vsel %vm2343_vm10, %v6830_v25, %v9846_v7 }
 0xa1b   : > { %v6841_v48 = vsel %vm2349_vm11, %v6836_v32, %v9885_v1  ;;  %v6842_v60 = vsel %vm2349_vm11, %v6837_v5, %v9886_v28  ;;  %v6874_v23 = vsel %vm2349_vm11, %v6869_v14, %v9850_v3  ;;  %v6875_v8 = vsel %vm2349_vm11, %v6870_v9, %v9851_v43 }
 0xa1c   : > { %v9889_v50 = vpop.permute.xlu1 %9888  ;;  %v6881_v11 = vpack.c.bf16 %v6842_v60, %v6841_v48  ;;  %v6880_v34 = vpack.c.bf16 %v6875_v8, %v6874_v23 }
 0xa1d   : > { %v9891_v16 = vunpack.i.h.bf16 %v9889_v50  ;;  %v9890_v39 = vunpack.i.l.bf16 %v9889_v50 }
 0xa1e   : > { %6916 = vmatpush1.bf16.msra.mxu0 %v6881_v11 }
 0xa1f   : > { %v6839_v2 = vsel %vm2349_vm11, %v6834_v21, %v9890_v39  ;;  %v6840_v18 = vsel %vm2349_vm11, %v6835_v51, %v9891_v16  ;;  %6917 = vmatprep.subr.bf16.mxu0 %v6880_v34 }
 0xa20   : > { %v6879_v19 = vpack.c.bf16 %v6840_v18, %v6839_v2 }
 0xa22   : > { %6918 = vmatpush1.bf16.msra.mxu0 %v6879_v19 }
 0xa25   : > { %9287 = vmatmul.mubr.msk.bf16.vlgmr.msra.gmra.mxu0 %vm2403_vm13, %v6886_v53  ;;  %v6892_v33 = vpop.permute.xlu0 %6891 }
 0xae5   : > { %v6937_v40 = vpop.f32.mrf.mxu0 }
 0xae6   : > { %v6938_v62 = vadd.f32 %v6937_v40, %v6892_v33 }
 0xae7   : > { %v6939_v37 = vpop.f32.mrf.mxu0 }
 0xae8   : > { %v6944_v24 = vmax.f32 %v6938_v62, 0.0  ;;  %v6940_v54 = vadd.f32 %v6939_v37, %v6892_v33 }
 0xae9   : > { %v6941_v0 = vpop.f32.mrf.mxu0 }
 0xaea   : > { %6950 = vrot.lane.b32.xlu0 %v6944_v24, %s10166_s19  ;;  %6947 = vrot.lane.b32.xlu1 %v6944_v24, %s10164_s11  ;;  %v14113_v13 = vmax.f32 %v6940_v54, 0.0 }
 0xaeb   : > { %v6942_v22 = vpop.f32.mrf.mxu0 }
 0xaee   : > { %6956 = vrot.lane.b32.xlu0 %v6944_v24, %s10165_s17  ;;  %6953 = vrot.lane.b32.xlu1 %v6944_v24, %s10163_s10 }
 0xaf2   : > { %6962 = vrot.lane.b32.xlu0 %v6944_v24, %s10167_s20  ;;  %6959 = vrot.lane.b32.xlu1 %v6944_v24, %s10168_s24 }
 0xaf6   : > { %6969 = vrot.lane.b32.xlu0 %v14113_v13, %s10164_s11  ;;  %6965 = vrot.lane.b32.xlu1 %v6944_v24, %s10169_s25 }
 0xafa   : > { %6975 = vrot.lane.b32.xlu0 %v14113_v13, %s10163_s10  ;;  %6972 = vrot.lane.b32.xlu1 %v14113_v13, %s10166_s19 }
 0xafe   : > { %6981 = vrot.lane.b32.xlu0 %v14113_v13, %s10168_s24  ;;  %6978 = vrot.lane.b32.xlu1 %v14113_v13, %s10165_s17 }
 0xb02   : > { %6987 = vrot.lane.b32.xlu0 %v14113_v13, %s10169_s25  ;;  %6984 = vrot.lane.b32.xlu1 %v14113_v13, %s10167_s20 }
 0xb5c   : > { %v6951_v63 = vpop.permute.xlu0 %6950  ;;  %v6948_v17 = vpop.permute.xlu1 %6947 }
 0xb5d   : > { %v6990_v26 = vcombine.low %v6944_v24, %v6951_v63 }
 0xb5f   : > { %v6997_v10 = vrot.slane %v6990_v26, %v10296_v12 }
 0xb60   : > { %v6957_v44 = vpop.permute.xlu0 %6956  ;;  %v6954_v29 = vpop.permute.xlu1 %6953 }
 0xb61   : > { %v6998_v42 = vcombine.low %v6948_v17, %v6954_v29 }
 0xb63   : > { %v7005_v58 = vrot.slane %v6998_v42, %v10296_v12 }
 0xb64   : > { %v6963_v57 = vpop.permute.xlu0 %6962  ;;  %v6960_v4 = vpop.permute.xlu1 %6959 }
 0xb65   : > { %v7006_v45 = vcombine.low %v6957_v44, %v6963_v57  ;;  %v7022_v36 = vcombine.low %v6997_v10, %v7005_v58  ;;  %v7023_v15 = vcombine.high %v6997_v10, %v7005_v58 }
 0xb67   : > { %v7013_v41 = vrot.slane %v7006_v45, %v10296_v12  ;;  %v7030_v35 = vrot.slane %v7022_v36, %v10304_v20  ;;  %v7037_v52 = vrot.slane %v7023_v15, %v10304_v20 }
 0xb68   : > { %v6970_v56 = vpop.permute.xlu0 %6969  ;;  %v6966_v61 = vpop.permute.xlu1 %6965 }
 0xb69   : > { %v7014_v38 = vcombine.low %v6960_v4, %v6966_v61 }
 0xb6b   : > { %v7021_v49 = vrot.slane %v7014_v38, %v10296_v12 }
 0xb6c   : > { %v6976_v7 = vpop.permute.xlu0 %6975  ;;  %v6973_v30 = vpop.permute.xlu1 %6972 }
 0xb6d   : > { %v7038_v31 = vcombine.low %v7013_v41, %v7021_v49  ;;  %v7039_v27 = vcombine.high %v7013_v41, %v7021_v49  ;;  %v7066_v21 = vcombine.low %v6970_v56, %v6976_v7  ;;  %v7058_v51 = vcombine.low %v14113_v13, %v6973_v30 }
 0xb6f   : > { %v7046_v59 = vrot.slane %v7038_v31, %v10304_v20  ;;  %v7053_v55 = vrot.slane %v7039_v27, %v10304_v20  ;;  %v7073_v33 = vrot.slane %v7066_v21, %v10296_v12  ;;  %v7065_v40 = vrot.slane %v7058_v51, %v10296_v12 }
 0xb70   : > { %v6982_v46 = vpop.permute.xlu0 %6981  ;;  %v6979_v28 = vpop.permute.xlu1 %6978 }
 0xb71   : > { %v7054_v1 = vcombine.low %v7030_v35, %v7046_v59  ;;  %v7055_v43 = vcombine.high %v7030_v35, %v7046_v59  ;;  %v14138_v3 = vcombine.high %v7037_v52, %v7053_v55  ;;  %v14140_v32 = vcombine.low %v7037_v52, %v7053_v55 }
 0xb72   : > { %v7090_v37 = vcombine.low %v7065_v40, %v7073_v33  ;;  %v7091_v13 = vcombine.high %v7065_v40, %v7073_v33 }
 0xb73   : > { %v7131_v5 = vrot.slane %v7055_v43, 1  ;;  %v7145_v14 = vrot.slane %v7055_v43, 7  ;;  %v7130_v9 = vrot.slane %v7054_v1, 1  ;;  %v7142_v48 = vrot.slane %v7054_v1, 7 }
 0xb74   : > { %v6988_v60 = vpop.permute.xlu0 %6987  ;;  %v6985_v23 = vpop.permute.xlu1 %6984  ;;  %v7133_v8 = vrot.slane %v14138_v3, 1  ;;  %v7151_v50 = vrot.slane %v14138_v3, 7  ;;  %v7132_v16 = vrot.slane %v14140_v32, 1  ;;  %v7148_v39 = vrot.slane %v14140_v32, 7 }
 0xb75   : > { %v7082_v11 = vcombine.low %v6982_v46, %v6988_v60  ;;  %v7074_v34 = vcombine.low %v6979_v28, %v6985_v23  ;;  %v7171_v47 = vsel %vm404_vm0, %v7131_v5, %v7145_v14  ;;  %v7170_v25 = vsel %vm404_vm0, %v7130_v9, %v7142_v48 }
 0xb76   : > { %7192 = vrot.lane.b32.xlu0 %v7171_v47, %s10173_s26  ;;  %7186 = vrot.lane.b32.xlu1 %v7170_v25, %s10173_s26  ;;  %v7173_v19 = vsel %vm404_vm0, %v7133_v8, %v7151_v50  ;;  %v7172_v53 = vsel %vm404_vm0, %v7132_v16, %v7148_v39  ;;  %v7098_v0 = vrot.slane %v7090_v37, %v10304_v20 }
 0xb77   : > { %v7089_v2 = vrot.slane %v7082_v11, %v10296_v12  ;;  %v7081_v18 = vrot.slane %v7074_v34, %v10296_v12  ;;  %v7105_v42 = vrot.slane %v7091_v13, %v10304_v20 }
 0xb79   : > { %v7106_v62 = vcombine.low %v7081_v18, %v7089_v2  ;;  %v7107_v22 = vcombine.high %v7081_v18, %v7089_v2 }
 0xb7a   : > { %7204 = vrot.lane.b32.xlu0 %v7173_v19, %s10173_s26  ;;  %7198 = vrot.lane.b32.xlu1 %v7172_v53, %s10173_s26 }
 0xb7b   : > { %v7114_v24 = vrot.slane %v7106_v62, %v10304_v20  ;;  %v7121_v63 = vrot.slane %v7107_v22, %v10304_v20 }
 0xb7d   : > { %v7122_v54 = vcombine.low %v7098_v0, %v7114_v24  ;;  %v7123_v17 = vcombine.high %v7098_v0, %v7114_v24  ;;  %v7124_v57 = vcombine.low %v7105_v42, %v7121_v63  ;;  %v7125_v56 = vcombine.high %v7105_v42, %v7121_v63 }
 0xb7e   : > { %7228 = vrot.lane.b32.xlu0 %v7171_v47, %s10174_s27  ;;  %7222 = vrot.lane.b32.xlu1 %v7170_v25, %s10174_s27 }
 0xb7f   : > { %v7143_v44 = vrot.slane %v7122_v54, 7  ;;  %v7162_v29 = vrot.slane %v7122_v54, 5  ;;  %v7146_v58 = vrot.slane %v7123_v17, 7  ;;  %v7163_v45 = vrot.slane %v7123_v17, 5 }
 0xb80   : > { %v7149_v38 = vrot.slane %v7124_v57, 7  ;;  %v7164_v36 = vrot.slane %v7124_v57, 5  ;;  %v7152_v49 = vrot.slane %v7125_v56, 7  ;;  %v7165_v7 = vrot.slane %v7125_v56, 5 }
 0xb81   : > { %v7174_v4 = vsel %vm404_vm0, %v7143_v44, %v7162_v29  ;;  %v7144_v26 = vsel %vm404_vm0, %v7142_v48, %v7143_v44  ;;  %v7147_v61 = vsel %vm404_vm0, %v7145_v14, %v7146_v58  ;;  %v7175_v10 = vsel %vm404_vm0, %v7146_v58, %v7163_v45 }
 0xb82   : > { %7240 = vrot.lane.b32.xlu0 %v7173_v19, %s10174_s27  ;;  %7234 = vrot.lane.b32.xlu1 %v7172_v53, %s10174_s27  ;;  %v7176_v15 = vsel %vm404_vm0, %v7149_v38, %v7164_v36  ;;  %v7150_v41 = vsel %vm404_vm0, %v7148_v39, %v7149_v38  ;;  %v7153_v30 = vsel %vm404_vm0, %v7151_v50, %v7152_v49 }
 0xb83   : > { %v7177_v31 = vsel %vm404_vm0, %v7152_v49, %v7165_v7 }
 0xb86   : > { %7264 = vrot.lane.b32.xlu0 %v7171_v47, %s10175_s28  ;;  %7258 = vrot.lane.b32.xlu1 %v7170_v25, %s10175_s28 }
 0xb8a   : > { %7276 = vrot.lane.b32.xlu0 %v7173_v19, %s10175_s28  ;;  %7270 = vrot.lane.b32.xlu1 %v7172_v53, %s10175_s28 }
 0xb8e   : > { %7190 = vrot.lane.b32.xlu1 %v7174_v4, %s10173_s26  ;;  %7188 = vrot.lane.b32.xlu0 %v7144_v26, %s10173_s26 }
 0xb92   : > { %7194 = vrot.lane.b32.xlu1 %v7147_v61, %s10173_s26  ;;  %7196 = vrot.lane.b32.xlu0 %v7175_v10, %s10173_s26 }
 0xb96   : > { %7202 = vrot.lane.b32.xlu1 %v7176_v15, %s10173_s26  ;;  %7200 = vrot.lane.b32.xlu0 %v7150_v41, %s10173_s26 }
 0xb9a   : > { %7206 = vrot.lane.b32.xlu1 %v7153_v30, %s10173_s26  ;;  %7208 = vrot.lane.b32.xlu0 %v7177_v31, %s10173_s26 }
 0xb9e   : > { %7226 = vrot.lane.b32.xlu1 %v7174_v4, %s10174_s27  ;;  %7224 = vrot.lane.b32.xlu0 %v7144_v26, %s10174_s27 }
 0xba2   : > { %7230 = vrot.lane.b32.xlu1 %v7147_v61, %s10174_s27  ;;  %7232 = vrot.lane.b32.xlu0 %v7175_v10, %s10174_s27 }
 0xba6   : > { %7238 = vrot.lane.b32.xlu1 %v7176_v15, %s10174_s27  ;;  %7236 = vrot.lane.b32.xlu0 %v7150_v41, %s10174_s27 }
 0xbaa   : > { %7242 = vrot.lane.b32.xlu1 %v7153_v30, %s10174_s27  ;;  %7244 = vrot.lane.b32.xlu0 %v7177_v31, %s10174_s27 }
 0xbae   : > { %7262 = vrot.lane.b32.xlu1 %v7174_v4, %s10175_s28  ;;  %7260 = vrot.lane.b32.xlu0 %v7144_v26, %s10175_s28 }
 0xbb2   : > { %7266 = vrot.lane.b32.xlu1 %v7147_v61, %s10175_s28  ;;  %7268 = vrot.lane.b32.xlu0 %v7175_v10, %s10175_s28 }
 0xbb6   : > { %7274 = vrot.lane.b32.xlu1 %v7176_v15, %s10175_s28  ;;  %7272 = vrot.lane.b32.xlu0 %v7150_v41, %s10175_s28 }
 0xbba   : > { %7278 = vrot.lane.b32.xlu1 %v7153_v30, %s10175_s28  ;;  %7280 = vrot.lane.b32.xlu0 %v7177_v31, %s10175_s28 }
 0xbe8   : > { %v7193_v27 = vpop.permute.xlu0 %7192  ;;  %v7187_v35 = vpop.permute.xlu1 %7186 }
 0xbec   : > { %v7205_v52 = vpop.permute.xlu0 %7204  ;;  %v7199_v59 = vpop.permute.xlu1 %7198 }
 0xbf0   : > { %v7229_v55 = vpop.permute.xlu0 %7228  ;;  %v7223_v46 = vpop.permute.xlu1 %7222 }
 0xbf1   : > { %v7297_v43 = vsel %vm569_vm1, %v7193_v27, %v7229_v55  ;;  %v7294_v3 = vsel %vm569_vm1, %v7187_v35, %v7223_v46 }
 0xbf4   : > { %v7241_v28 = vpop.permute.xlu0 %7240  ;;  %v7235_v1 = vpop.permute.xlu1 %7234 }
 0xbf5   : > { %v7303_v48 = vsel %vm569_vm1, %v7205_v52, %v7241_v28  ;;  %v7300_v60 = vsel %vm569_vm1, %v7199_v59, %v7235_v1 }
 0xbf8   : > { %v7265_v32 = vpop.permute.xlu0 %7264  ;;  %v7259_v5 = vpop.permute.xlu1 %7258 }
 0xbf9   : > { %v14206_v14 = vsel %vm582_vm2, %v7297_v43, %v7265_v32  ;;  %v14209_v9 = vsel %vm582_vm2, %v7294_v3, %v7259_v5 }
 0xbfa   : > { %7330 = vrot.lane.b32.xlu0 %v14206_v14, %s10173_s26  ;;  %7326 = vrot.lane.b32.xlu1 %v14209_v9, %s10173_s26  ;;  %v7454_v36 = vrot.slane %v14209_v9, 2  ;;  %v7459_v15 = vrot.slane %v14206_v14, 2  ;;  %v7378_v41 = vrot.slane %v14209_v9, 1  ;;  %v7383_v35 = vrot.slane %v14206_v14, 1 }
 0xbfc   : > { %v7277_v23 = vpop.permute.xlu0 %7276  ;;  %v7271_v8 = vpop.permute.xlu1 %7270 }
 0xbfd   : > { %v14218_v50 = vsel %vm582_vm2, %v7303_v48, %v7277_v23  ;;  %v14221_v11 = vsel %vm582_vm2, %v7300_v60, %v7271_v8 }
 0xbfe   : > { %v7546_v34 = vcombine.low %v14206_v14, %v14218_v50  ;;  %v7547_v47 = vcombine.high %v14206_v14, %v14218_v50  ;;  %v7530_v25 = vcombine.low %v14209_v9, %v14221_v11  ;;  %v7531_v16 = vcombine.high %v14209_v9, %v14221_v11  ;;  %7338 = vrot.lane.b32.xlu0 %v14218_v50, %s10173_s26 }
 0xbff   : > { %7334 = vrot.lane.b32.xlu1 %v14221_v11, %s10173_s26  ;;  %v7464_v27 = vrot.slane %v14221_v11, 2  ;;  %v7469_v1 = vrot.slane %v14218_v50, 2  ;;  %v7388_v3 = vrot.slane %v14221_v11, 1 }
 0xc00   : > { %v14236_v39 = vrot.slane %v7546_v34, %v10296_v12  ;;  %v14239_v21 = vrot.slane %v7547_v47, %v10296_v12  ;;  %v14242_v51 = vrot.slane %v7530_v25, %v10296_v12  ;;  %v14245_v2 = vrot.slane %v7531_v16, %v10296_v12  ;;  %v7189_v18 = vpop.permute.xlu0 %7188  ;;  %v7191_v19 = vpop.permute.xlu1 %7190 }
 0xc02   : > { %7354 = vrot.lane.b32.xlu0 %v14206_v14, %s10176_s29  ;;  %v7594_v53 = vcombine.low %v14242_v51, %v14236_v39  ;;  %v7610_v33 = vcombine.low %v14245_v2, %v14239_v21  ;;  %v7595_v40 = vcombine.high %v14242_v51, %v14236_v39  ;;  %v7611_v62 = vcombine.high %v14245_v2, %v14239_v21 }
 0xc03   : > { %7350 = vrot.lane.b32.xlu1 %v14209_v9, %s10176_s29 }
 0xc04   : > { %v7197_v37 = vpop.permute.xlu0 %7196  ;;  %v7195_v24 = vpop.permute.xlu1 %7194 }
 0xc08   : > { %v7201_v0 = vpop.permute.xlu0 %7200  ;;  %v7203_v22 = vpop.permute.xlu1 %7202 }
 0xc0c   : > { %v7209_v54 = vpop.permute.xlu0 %7208  ;;  %v7207_v13 = vpop.permute.xlu1 %7206 }
 0xc10   : > { %v7225_v63 = vpop.permute.xlu0 %7224  ;;  %v7227_v17 = vpop.permute.xlu1 %7226 }
 0xc11   : > { %v7295_v58 = vsel %vm569_vm1, %v7189_v18, %v7225_v63  ;;  %v7296_v61 = vsel %vm569_vm1, %v7191_v19, %v7227_v17 }
 0xc14   : > { %v7233_v44 = vpop.permute.xlu0 %7232  ;;  %v7231_v29 = vpop.permute.xlu1 %7230 }
 0xc15   : > { %v7299_v49 = vsel %vm569_vm1, %v7197_v37, %v7233_v44  ;;  %v7298_v7 = vsel %vm569_vm1, %v7195_v24, %v7231_v29 }
 0xc18   : > { %v7237_v42 = vpop.permute.xlu0 %7236  ;;  %v7239_v57 = vpop.permute.xlu1 %7238 }
 0xc19   : > { %v7301_v32 = vsel %vm569_vm1, %v7201_v0, %v7237_v42  ;;  %v7302_v5 = vsel %vm569_vm1, %v7203_v22, %v7239_v57 }
 0xc1c   : > { %v7245_v4 = vpop.permute.xlu0 %7244  ;;  %v7243_v26 = vpop.permute.xlu1 %7242 }
 0xc1d   : > { %v7305_v48 = vsel %vm569_vm1, %v7209_v54, %v7245_v4  ;;  %v7304_v60 = vsel %vm569_vm1, %v7207_v13, %v7243_v26 }
 0xc20   : > { %v7261_v45 = vpop.permute.xlu0 %7260  ;;  %v7263_v56 = vpop.permute.xlu1 %7262 }
 0xc21   : > { %v14262_v10 = vsel %vm582_vm2, %v7295_v58, %v7261_v45  ;;  %v7308_v38 = vsel %vm582_vm2, %v7296_v61, %v7263_v56 }
 0xc22   : > { %7328 = vrot.lane.b32.xlu1 %v14262_v10, %s10173_s26  ;;  %v7457_v52 = vrot.slane %v7308_v38, 2  ;;  %v7455_v46 = vrot.slane %v14262_v10, 2  ;;  %v7381_v28 = vrot.slane %v7308_v38, 1  ;;  %v7379_v43 = vrot.slane %v14262_v10, 1 }
 0xc24   : > { %v7269_v30 = vpop.permute.xlu0 %7268  ;;  %v7267_v31 = vpop.permute.xlu1 %7266  ;;  %v14295_v18 = vsel %vm732_vm3, %v7454_v36, %v7455_v46  ;;  %v14298_v19 = vsel %vm732_vm3, %v7455_v46, %v7457_v52  ;;  %v14307_v22 = vsel %vm655_vm4, %v7379_v43, %v7381_v28  ;;  %v14317_v17 = vsel %vm655_vm4, %v7378_v41, %v7379_v43 }
 0xc25   : > { %v7311_v59 = vsel %vm582_vm2, %v7299_v49, %v7269_v30  ;;  %v14276_v55 = vsel %vm582_vm2, %v7298_v7, %v7267_v31 }
 0xc26   : > { %7332 = vrot.lane.b32.xlu0 %v14276_v55, %s10173_s26  ;;  %v7462_v14 = vrot.slane %v7311_v59, 2  ;;  %v7460_v9 = vrot.slane %v14276_v55, 2  ;;  %v7386_v23 = vrot.slane %v7311_v59, 1  ;;  %v7384_v47 = vrot.slane %v14276_v55, 1 }
 0xc28   : > { %v7273_v8 = vpop.permute.xlu0 %7272  ;;  %v7275_v34 = vpop.permute.xlu1 %7274  ;;  %v14310_v54 = vsel %vm732_vm3, %v7459_v15, %v7460_v9  ;;  %v14314_v63 = vsel %vm732_vm3, %v7460_v9, %v7462_v14  ;;  %v14320_v57 = vsel %vm655_vm4, %v7384_v47, %v7386_v23  ;;  %v14324_v26 = vsel %vm655_vm4, %v7383_v35, %v7384_v47 }
 0xc29   : > { %v14291_v25 = vsel %vm582_vm2, %v7301_v32, %v7273_v8  ;;  %v7314_v16 = vsel %vm582_vm2, %v7302_v5, %v7275_v34 }
 0xc2a   : > { %v8142_v37 = vcombine.low %v14262_v10, %v14291_v25  ;;  %v8143_v24 = vcombine.high %v14262_v10, %v14291_v25  ;;  %v7467_v0 = vrot.slane %v7314_v16, 2  ;;  %7336 = vrot.lane.b32.xlu1 %v14291_v25, %s10173_s26  ;;  %v7465_v13 = vrot.slane %v14291_v25, 2 }
 0xc2b   : > { %v7391_v44 = vrot.slane %v7314_v16, 1  ;;  %v7389_v4 = vrot.slane %v14291_v25, 1 }
 0xc2c   : > { %v7281_v29 = vpop.permute.xlu0 %7280  ;;  %v7279_v42 = vpop.permute.xlu1 %7278  ;;  %v14329_v56 = vsel %vm732_vm3, %v7464_v27, %v7465_v13  ;;  %v14332_v61 = vsel %vm732_vm3, %v7465_v13, %v7467_v0  ;;  %v14335_v38 = vrot.slane %v8142_v37, %v10296_v12 }
 0xc2d   : > { %v7317_v58 = vsel %vm582_vm2, %v7305_v48, %v7281_v29  ;;  %v7316_v45 = vsel %vm582_vm2, %v7304_v60, %v7279_v42  ;;  %v7938_v49 = vcombine.low %v14295_v18, %v14329_v56  ;;  %v7939_v7 = vcombine.high %v14295_v18, %v14329_v56 }
 0xc2e   : > { %v7472_v36 = vrot.slane %v7317_v58, 2  ;;  %v8158_v15 = vcombine.low %v14276_v55, %v7316_v45  ;;  %v8159_v41 = vcombine.high %v14276_v55, %v7316_v45  ;;  %7352 = vrot.lane.b32.xlu1 %v14262_v10, %s10176_s29  ;;  %7340 = vrot.lane.b32.xlu0 %v7316_v45, %s10173_s26  ;;  %v8550_v30 = vcombine.low %v14298_v19, %v14332_v61 }
 0xc2f   : > { %v8551_v31 = vcombine.high %v14298_v19, %v14332_v61  ;;  %v7396_v27 = vrot.slane %v7317_v58, 1  ;;  %v7470_v52 = vrot.slane %v7316_v45, 2  ;;  %v14354_v59 = vsel %vm655_vm4, %v7389_v4, %v7391_v44 }
 0xc30   : > { %v14351_v35 = vrot.slane %v8158_v15, %v10296_v12  ;;  %v14357_v46 = vrot.slane %v7938_v49, %v10296_v12  ;;  %v14360_v28 = vrot.slane %v7939_v7, %v10296_v12  ;;  %v14363_v43 = vrot.slane %v8550_v30, %v10296_v12 }
 0xc31   : > { %v14366_v32 = vrot.slane %v8551_v31, %v10296_v12  ;;  %v14373_v5 = vsel %vm732_vm3, %v7469_v1, %v7470_v52  ;;  %v14376_v14 = vsel %vm732_vm3, %v7470_v52, %v7472_v36  ;;  %v8310_v9 = vcombine.low %v14307_v22, %v14354_v59 }
 0xc32   : > { %7360 = vrot.lane.b32.xlu1 %v14291_v25, %s10176_s29  ;;  %7356 = vrot.lane.b32.xlu0 %v14276_v55, %s10176_s29  ;;  %v7394_v48 = vrot.slane %v7316_v45, 1  ;;  %v7954_v60 = vcombine.low %v14310_v54, %v14373_v5  ;;  %v7955_v23 = vcombine.high %v14310_v54, %v14373_v5  ;;  %v8566_v8 = vcombine.low %v14314_v63, %v14376_v14 }
 0xc33   : > { %v8567_v55 = vcombine.high %v14314_v63, %v14376_v14  ;;  %v8311_v1 = vcombine.high %v14307_v22, %v14354_v59  ;;  %v14391_v34 = vrot.slane %v8310_v9, %v10296_v12  ;;  %v14397_v16 = vsel %vm655_vm4, %v7388_v3, %v7389_v4 }
 0xc34   : > { %v7397_v47 = vsel %vm655_vm4, %v7394_v48, %v7396_v27  ;;  %v14400_v37 = vrot.slane %v7954_v60, %v10296_v12  ;;  %v14403_v0 = vrot.slane %v7955_v23, %v10296_v12  ;;  %v14406_v13 = vrot.slane %v8566_v8, %v10296_v12 }
 0xc35   : > { %v14409_v44 = vrot.slane %v8567_v55, %v10296_v12  ;;  %v14415_v3 = vrot.slane %v8311_v1, %v10296_v12  ;;  %v8326_v29 = vcombine.low %v14320_v57, %v7397_v47  ;;  %v8327_v42 = vcombine.high %v14320_v57, %v7397_v47 }
 0xc36   : > { %7506 = vrot.lane.b32.xlu1 %v14295_v18, %s10176_s29  ;;  %7364 = vrot.lane.b32.xlu0 %v7316_v45, %s10176_s29  ;;  %v7393_v4 = vrot.slane %v14218_v50, 1  ;;  %v7698_v9 = vcombine.low %v14317_v17, %v14397_v16  ;;  %v7699_v60 = vcombine.high %v14317_v17, %v14397_v16  ;;  %v14447_v23 = vrot.slane %v8159_v41, %v10296_v12 }
 0xc37   : > { %v14437_v27 = vrot.slane %v8326_v29, %v10296_v12  ;;  %v14440_v52 = vrot.slane %v8327_v42, %v10296_v12  ;;  %v8206_v55 = vcombine.low %v14335_v38, %v14351_v35  ;;  %v8207_v15 = vcombine.high %v14335_v38, %v14351_v35 }
 0xc38   : > { %v7395_v8 = vsel %vm655_vm4, %v7393_v4, %v7394_v48  ;;  %v14470_v48 = vrot.slane %v8143_v24, %v10296_v12  ;;  %v14473_v4 = vrot.slane %v7698_v9, %v10296_v12  ;;  %v14482_v58 = vrot.slane %v7699_v60, %v10296_v12 }
 0xc39   : > { %v8374_v1 = vcombine.low %v14391_v34, %v14437_v27  ;;  %v8375_v29 = vcombine.high %v14391_v34, %v14437_v27  ;;  %v8390_v41 = vcombine.low %v14415_v3, %v14440_v52  ;;  %v8391_v42 = vcombine.high %v14415_v3, %v14440_v52 }
 0xc3a   : > { %7510 = vrot.lane.b32.xlu1 %v14310_v54, %s10176_s29  ;;  %7508 = vrot.lane.b32.xlu0 %v14298_v19, %s10176_s29  ;;  %v7714_v36 = vcombine.low %v14324_v26, %v7395_v8  ;;  %v7715_v45 = vcombine.high %v14324_v26, %v7395_v8  ;;  %v8222_v25 = vcombine.low %v14470_v48, %v14447_v23 }
 0xc3c   : > { %v14485_v31 = vrot.slane %v7714_v36, %v10296_v12  ;;  %v14488_v10 = vrot.slane %v7715_v45, %v10296_v12  ;;  %v8223_v36 = vcombine.high %v14470_v48, %v14447_v23  ;;  %v8230_v38 = vrot.slane %v8222_v25, %v10304_v20 }
 0xc3e   : > { %7514 = vrot.lane.b32.xlu1 %v14329_v56, %s10176_s29  ;;  %7512 = vrot.lane.b32.xlu0 %v14314_v63, %s10176_s29  ;;  %v8237_v35 = vrot.slane %v8223_v36, %v10304_v20 }
 0xc42   : > { %7516 = vrot.lane.b32.xlu0 %v14332_v61, %s10176_s29  ;;  %7518 = vrot.lane.b32.xlu1 %v14373_v5, %s10176_s29 }
 0xc46   : > { %7520 = vrot.lane.b32.xlu0 %v14376_v14, %s10176_s29  ;;  %7408 = vrot.lane.b32.xlu1 %v14307_v22, %s10173_s26 }
 0xc4a   : > { %7412 = vrot.lane.b32.xlu0 %v14320_v57, %s10173_s26  ;;  %7416 = vrot.lane.b32.xlu1 %v14354_v59, %s10173_s26 }
 0xc4e   : > { %7432 = vrot.lane.b32.xlu1 %v14307_v22, %s10176_s29  ;;  %7420 = vrot.lane.b32.xlu0 %v7397_v47, %s10173_s26 }
 0xc52   : > { %7440 = vrot.lane.b32.xlu1 %v14354_v59, %s10176_s29  ;;  %7436 = vrot.lane.b32.xlu0 %v14320_v57, %s10176_s29 }
 0xc56   : > { %7484 = vrot.lane.b32.xlu1 %v14298_v19, %s10173_s26  ;;  %7444 = vrot.lane.b32.xlu0 %v7397_v47, %s10176_s29 }
 0xc5a   : > { %7492 = vrot.lane.b32.xlu1 %v14332_v61, %s10173_s26  ;;  %7488 = vrot.lane.b32.xlu0 %v14314_v63, %s10173_s26 }
 0xc5e   : > { %7406 = vrot.lane.b32.xlu1 %v14317_v17, %s10173_s26  ;;  %7496 = vrot.lane.b32.xlu0 %v14376_v14, %s10173_s26 }
 0xc62   : > { %7414 = vrot.lane.b32.xlu1 %v14397_v16, %s10173_s26  ;;  %7410 = vrot.lane.b32.xlu0 %v14324_v26, %s10173_s26 }
 0xc66   : > { %7430 = vrot.lane.b32.xlu1 %v14317_v17, %s10176_s29  ;;  %7418 = vrot.lane.b32.xlu0 %v7395_v8, %s10173_s26 }
 0xc6a   : > { %7438 = vrot.lane.b32.xlu1 %v14397_v16, %s10176_s29  ;;  %7434 = vrot.lane.b32.xlu0 %v14324_v26, %s10176_s29 }
 0xc6c   : > { %v7331_v19 = vpop.permute.xlu0 %7330  ;;  %v7327_v22 = vpop.permute.xlu1 %7326 }
 0xc6e   : > { %7482 = vrot.lane.b32.xlu1 %v14295_v18, %s10173_s26  ;;  %7442 = vrot.lane.b32.xlu0 %v7395_v8, %s10176_s29 }
 0xc70   : > { %v7339_v63 = vpop.permute.xlu0 %7338 }
 0xc71   : > { %v7578_v57 = vcombine.low %v7331_v19, %v7339_v63  ;;  %v7579_v61 = vcombine.high %v7331_v19, %v7339_v63  ;;  %v7335_v59 = vpop.permute.xlu1 %7334 }
 0xc72   : > { %v7562_v17 = vcombine.low %v7327_v22, %v7335_v59  ;;  %v7563_v14 = vcombine.high %v7327_v22, %v7335_v59  ;;  %7490 = vrot.lane.b32.xlu1 %v14329_v56, %s10173_s26  ;;  %7486 = vrot.lane.b32.xlu0 %v14310_v54, %s10173_s26  ;;  %v14560_v54 = vrot.slane %v7594_v53, %v10304_v20 }
 0xc73   : > { %v7586_v26 = vrot.slane %v7578_v57, %v10296_v12  ;;  %v7593_v47 = vrot.slane %v7579_v61, %v10296_v12  ;;  %v14568_v56 = vrot.slane %v7610_v33, %v10304_v20  ;;  %v14592_v33 = vrot.slane %v7611_v62, %v10304_v20 }
 0xc74   : > { %v7570_v18 = vrot.slane %v7562_v17, %v10296_v12  ;;  %v7577_v16 = vrot.slane %v7563_v14, %v10296_v12  ;;  %v14614_v14 = vpop.permute.xlu0 %7354 }
 0xc75   : > { %v14612_v62 = vpop.permute.xlu1 %7350 }
 0xc76   : > { %v7626_v45 = vcombine.low %v7570_v18, %v7586_v26  ;;  %v7627_v8 = vcombine.high %v7570_v18, %v7586_v26  ;;  %v7642_v19 = vcombine.low %v7577_v16, %v7593_v47  ;;  %v7643_v63 = vcombine.high %v7577_v16, %v7593_v47  ;;  %7358 = vrot.lane.b32.xlu1 %v14221_v11, %s10176_s29 }
 0xc77   : > { %7494 = vrot.lane.b32.xlu0 %v14373_v5, %s10173_s26  ;;  %v14586_v5 = vrot.slane %v7595_v40, %v10304_v20 }
 0xc78   : > { %v14571_v22 = vrot.slane %v7626_v45, %v10304_v20  ;;  %v14574_v11 = vrot.slane %v7627_v8, %v10304_v20  ;;  %v14577_v57 = vrot.slane %v7642_v19, %v10304_v20  ;;  %v14580_v53 = vrot.slane %v7643_v63, %v10304_v20 }
 0xc7b   : > { %7362 = vrot.lane.b32.xlu0 %v14218_v50, %s10176_s29 }
 0xc94   : > { %v7329_v26 = vpop.permute.xlu1 %7328 }
 0xc98   : > { %v7333_v47 = vpop.permute.xlu0 %7332 }
 0xc9c   : > { %v7337_v18 = vpop.permute.xlu1 %7336 }
 0xc9d   : > { %v8174_v50 = vcombine.low %v7329_v26, %v7337_v18  ;;  %v8175_v16 = vcombine.high %v7329_v26, %v7337_v18  ;;  %v14624_v26 = vrot.slane %v8206_v55, %v10304_v20 }
 0xc9f   : > { %v8182_v61 = vrot.slane %v8174_v50, %v10296_v12  ;;  %v8189_v2 = vrot.slane %v8175_v16, %v10296_v12  ;;  %15813 = vst [vmem:[#allocation9_spill] sm:$0xff] %v14624_v26  ;;  %v8221_v50 = vrot.slane %v8207_v15, %v10304_v20 }
 0xca0   : > { %v7341_v45 = vpop.permute.xlu0 %7340  ;;  %v7353_v8 = vpop.permute.xlu1 %7352 }
 0xca1   : > { %v8190_v19 = vcombine.low %v7333_v47, %v7341_v45  ;;  %v8191_v63 = vcombine.high %v7333_v47, %v7341_v45 }
 0xca3   : > { %v8198_v51 = vrot.slane %v8190_v19, %v10296_v12  ;;  %v8205_v40 = vrot.slane %v8191_v63, %v10296_v12 }
 0xca4   : > { %v7357_v21 = vpop.permute.xlu0 %7356  ;;  %v7361_v39 = vpop.permute.xlu1 %7360 }
 0xca5   : > { %v8238_v17 = vcombine.low %v8182_v61, %v8198_v51  ;;  %v8239_v59 = vcombine.high %v8182_v61, %v8198_v51  ;;  %v8254_v60 = vcombine.low %v8189_v2, %v8205_v40  ;;  %v8255_v9 = vcombine.high %v8189_v2, %v8205_v40 }
 0xca6   : > { %v8278_v47 = vcombine.low %v7353_v8, %v7361_v39  ;;  %v8279_v18 = vcombine.high %v7353_v8, %v7361_v39 }
 0xca7   : > { %v14631_v16 = vrot.slane %v8238_v17, %v10304_v20  ;;  %v8253_v61 = vrot.slane %v8239_v59, %v10304_v20  ;;  %v8262_v51 = vrot.slane %v8254_v60, %v10304_v20  ;;  %v14636_v2 = vrot.slane %v8255_v9, %v10304_v20 }
 0xca8   : > { %v8286_v55 = vrot.slane %v8278_v47, %v10296_v12  ;;  %v8293_v40 = vrot.slane %v8279_v18, %v10296_v12  ;;  %v7365_v39 = vpop.permute.xlu0 %7364  ;;  %v7507_v45 = vpop.permute.xlu1 %7506 }
 0xca9   : > { %15814 = vst [vmem:[#allocation45_spill] sm:$0xff] %v14631_v16  ;;  %v8294_v9 = vcombine.low %v7357_v21, %v7365_v39  ;;  %v8295_v60 = vcombine.high %v7357_v21, %v7365_v39  ;;  %v8271_v59 = vcombine.high %v14624_v26, %v14631_v16  ;;  %v8272_v17 = vcombine.low %v8221_v50, %v8253_v61 }
 0xcaa   : > { %v8273_v8 = vcombine.high %v8221_v50, %v8253_v61  ;;  %v8274_v19 = vcombine.low %v8230_v38, %v8262_v51  ;;  %v8275_v63 = vcombine.high %v8230_v38, %v8262_v51  ;;  %v8276_v18 = vcombine.low %v8237_v35, %v14636_v2 }
 0xcab   : > { %v8302_v47 = vrot.slane %v8294_v9, %v10296_v12  ;;  %v8309_v25 = vrot.slane %v8295_v60, %v10296_v12  ;;  %v8277_v23 = vcombine.high %v8237_v35, %v14636_v2  ;;  %v14660_v50 = vrot.slane %v8374_v1, %v10304_v20 }
 0xcac   : > { %v7509_v48 = vpop.permute.xlu0 %7508  ;;  %v7511_v36 = vpop.permute.xlu1 %7510  ;;  %v8398_v1 = vrot.slane %v8390_v41, %v10304_v20 }
 0xcad   : > { %v8342_v15 = vcombine.low %v8286_v55, %v8302_v47  ;;  %v8343_v30 = vcombine.high %v8286_v55, %v8302_v47  ;;  %v8358_v21 = vcombine.low %v8293_v40, %v8309_v25  ;;  %v8359_v39 = vcombine.high %v8293_v40, %v8309_v25  ;;  %15815 = vst [vmem:[#allocation29_spill] sm:$0xff] %v14660_v50 }
 0xcae   : > { %v8389_v55 = vrot.slane %v8375_v29, %v10304_v20 }
 0xcaf   : > { %v14663_v61 = vrot.slane %v8342_v15, %v10304_v20  ;;  %v8357_v51 = vrot.slane %v8343_v30, %v10304_v20  ;;  %v8366_v38 = vrot.slane %v8358_v21, %v10304_v20  ;;  %v8373_v2 = vrot.slane %v8359_v39, %v10304_v20 }
 0xcb0   : > { %v7513_v35 = vpop.permute.xlu0 %7512  ;;  %v7515_v9 = vpop.permute.xlu1 %7514  ;;  %v8405_v30 = vrot.slane %v8391_v42, %v10304_v20 }
 0xcb1   : > { %15816 = vst [vmem:[#allocation39_spill] sm:$0xff] %v14663_v61  ;;  %v8074_v15 = vcombine.low %v7507_v45, %v7515_v9  ;;  %v8075_v60 = vcombine.high %v7507_v45, %v7515_v9  ;;  %v8407_v47 = vcombine.high %v14663_v61, %v14660_v50  ;;  %v8408_v34 = vcombine.low %v8357_v51, %v8389_v55 }
 0xcb2   : > { %v8409_v27 = vcombine.high %v8357_v51, %v8389_v55  ;;  %v8410_v29 = vcombine.low %v8366_v38, %v8398_v1  ;;  %v8411_v25 = vcombine.high %v8366_v38, %v8398_v1  ;;  %v8412_v41 = vcombine.low %v8373_v2, %v8405_v30 }
 0xcb3   : > { %v14684_v21 = vpack.i.bf16 %v8407_v47, %v8271_v59  ;;  %v14686_v7 = vpack.i.bf16 %v8408_v34, %v8272_v17  ;;  %v8413_v38 = vcombine.high %v8373_v2, %v8405_v30  ;;  %v14697_v59 = vrot.slane %v8074_v15, %v10296_v12 }
 0xcb4   : > { %v7517_v39 = vpop.permute.xlu0 %7516  ;;  %v7519_v24 = vpop.permute.xlu1 %7518  ;;  %v14688_v3 = vpack.i.bf16 %v8409_v27, %v8273_v8  ;;  %v14690_v52 = vpack.i.bf16 %v8410_v29, %v8274_v19  ;;  %v14692_v42 = vpack.i.bf16 %v8411_v25, %v8275_v63  ;;  %v14694_v51 = vpack.i.bf16 %v8412_v41, %v8276_v18 }
 0xcb5   : > { %15817 = vst [vmem:[#allocation20_spill] sm:$0xff] %v14684_v21  ;;  %15818 = vst [vmem:[#allocation8_spill] sm:$0xff] %v14686_v7  ;;  %v8686_v45 = vcombine.low %v7509_v48, %v7517_v39  ;;  %v8687_v9 = vcombine.high %v7509_v48, %v7517_v39  ;;  %v8090_v40 = vcombine.low %v7511_v36, %v7519_v24 }
 0xcb6   : > { %15819 = vst [vmem:[#allocation49_spill] sm:$0xff] %v14688_v3  ;;  %15820 = vst [vmem:[#allocation25_spill] sm:$0xff] %v14690_v52  ;;  %v8091_v49 = vcombine.high %v7511_v36, %v7519_v24  ;;  %v8089_v55 = vrot.slane %v8075_v60, %v10296_v12  ;;  %v14704_v1 = vpack.i.bf16 %v8413_v38, %v8277_v23 }
 0xcb7   : > { %15821 = vst [vmem:[#allocation53_spill] sm:$0xff] %v14692_v42  ;;  %15822 = vst [vmem:[#allocation27_spill] sm:$0xff] %v14694_v51  ;;  %v14701_v17 = vrot.slane %v8090_v40, %v10296_v12  ;;  %v14714_v40 = vrot.slane %v8686_v45, %v10296_v12 }
 0xcb8   : > { %v8105_v8 = vrot.slane %v8091_v49, %v10296_v12  ;;  %v7521_v19 = vpop.permute.xlu0 %7520  ;;  %v7409_v63 = vpop.permute.xlu1 %7408  ;;  %15823 = vst [vmem:[#allocation26_spill] sm:$0xff] %v14704_v1  ;;  %v8701_v49 = vrot.slane %v8687_v9, %v10296_v12 }
 0xcb9   : > { %v8107_v18 = vcombine.high %v14697_v59, %v14701_v17  ;;  %v8702_v2 = vcombine.low %v7513_v35, %v7521_v19  ;;  %v8703_v30 = vcombine.high %v7513_v35, %v7521_v19 }
 0xcba   : > { %v8122_v48 = vcombine.low %v8089_v55, %v8105_v8  ;;  %v8123_v36 = vcombine.high %v8089_v55, %v8105_v8 }
 0xcbb   : > { %v14711_v15 = vrot.slane %v8107_v18, %v10304_v20  ;;  %v14718_v23 = vrot.slane %v8702_v2, %v10296_v12  ;;  %v8717_v60 = vrot.slane %v8703_v30, %v10296_v12 }
 0xcbc   : > { %v7413_v47 = vpop.permute.xlu0 %7412  ;;  %v7417_v34 = vpop.permute.xlu1 %7416  ;;  %v14722_v27 = vrot.slane %v8122_v48, %v10304_v20  ;;  %v14725_v35 = vrot.slane %v8123_v36, %v10304_v20 }
 0xcbd   : > { %15824 = vst [vmem:[#allocation52_spill] sm:$0xff] %v14711_v15  ;;  %v8414_v29 = vcombine.low %v7409_v63, %v7417_v34  ;;  %v8415_v25 = vcombine.high %v7409_v63, %v7417_v34  ;;  %v8719_v39 = vcombine.high %v14714_v40, %v14718_v23  ;;  %v8734_v45 = vcombine.low %v8701_v49, %v8717_v60 }
 0xcbe   : > { %15825 = vst [vmem:[#allocation54_spill] sm:$0xff] %v14722_v27  ;;  %15826 = vst [vmem:[#allocation35_spill] sm:$0xff] %v14725_v35  ;;  %v8735_v9 = vcombine.high %v8701_v49, %v8717_v60  ;;  %v14733_v38 = vcombine.high %v14711_v15, %v15521_v6  ;;  %v14748_v49 = vcombine.high %v14722_v27, %v15521_v6 }
 0xcbf   : > { %v14736_v55 = vrot.slane %v8719_v39, %v10304_v20  ;;  %v14739_v8 = vrot.slane %v8734_v45, %v10304_v20  ;;  %v8422_v63 = vrot.slane %v8414_v29, %v10296_v12  ;;  %v8429_v36 = vrot.slane %v8415_v25, %v10296_v12 }
 0xcc0   : > { %v14742_v19 = vrot.slane %v8735_v9, %v10304_v20  ;;  %v7421_v18 = vpop.permute.xlu0 %7420  ;;  %v7433_v48 = vpop.permute.xlu1 %7432  ;;  %15830 = vst [vmem:[#allocation40_spill] sm:$0xff] %v14748_v49  ;;  %v14760_v29 = vcombine.high %v14725_v35, %v15521_v6 }
 0xcc1   : > { %15827 = vst [vmem:[#allocation46_spill] sm:$0xff] %v14736_v55  ;;  %15828 = vst [vmem:[#allocation24_spill] sm:$0xff] %v14739_v8  ;;  %v8430_v2 = vcombine.low %v7413_v47, %v7421_v18  ;;  %v8431_v30 = vcombine.high %v7413_v47, %v7421_v18  ;;  %v14752_v60 = vcombine.high %v14736_v55, %v15521_v6 }
 0xcc2   : > { %15829 = vst [vmem:[#allocation38_spill] sm:$0xff] %v14742_v19  ;;  %v14756_v34 = vcombine.high %v14739_v8, %v15521_v6  ;;  %15832 = vst [vmem:[#allocation22_spill] sm:$0xff] %v14760_v29  ;;  %v14764_v25 = vcombine.high %v14742_v19, %v15521_v6 }
 0xcc3   : > { %v8438_v47 = vrot.slane %v8430_v2, %v10296_v12  ;;  %v8445_v39 = vrot.slane %v8431_v30, %v10296_v12 }
 0xcc4   : > { %15831 = vst [vmem:[#allocation32_spill] sm:$0xff] %v14756_v34  ;;  %15833 = vst [vmem:[#allocation31_spill] sm:$0xff] %v14764_v25  ;;  %v7437_v18 = vpop.permute.xlu0 %7436  ;;  %v7441_v24 = vpop.permute.xlu1 %7440 }
 0xcc5   : > { %v8478_v2 = vcombine.low %v8422_v63, %v8438_v47  ;;  %v8479_v50 = vcombine.high %v8422_v63, %v8438_v47  ;;  %v8494_v30 = vcombine.low %v8429_v36, %v8445_v39  ;;  %v8495_v61 = vcombine.high %v8429_v36, %v8445_v39 }
 0xcc6   : > { %v8447_v1 = vcombine.high %v7433_v48, %v7441_v24  ;;  %v8446_v9 = vcombine.low %v7433_v48, %v7441_v24 }
 0xcc7   : > { %v14785_v24 = vrot.slane %v8478_v2, %v10304_v20  ;;  %v8493_v48 = vrot.slane %v8479_v50, %v10304_v20 }
 0xcc8   : > { %v7445_v51 = vpop.permute.xlu0 %7444  ;;  %v7485_v27 = vpop.permute.xlu1 %7484  ;;  %v8454_v41 = vrot.slane %v8446_v9, %v10296_v12  ;;  %v8461_v16 = vrot.slane %v8447_v1, %v10296_v12 }
 0xcc9   : > { %v8462_v8 = vcombine.low %v7437_v18, %v7445_v51  ;;  %v8463_v15 = vcombine.high %v7437_v18, %v7445_v51  ;;  %15834 = vst [vmem:[#allocation48_spill] sm:$0xff] %v14785_v24 }
 0xccb   : > { %v8470_v55 = vrot.slane %v8462_v8, %v10296_v12  ;;  %v8477_v26 = vrot.slane %v8463_v15, %v10296_v12 }
 0xccc   : > { %v7489_v63 = vpop.permute.xlu0 %7488  ;;  %v7493_v47 = vpop.permute.xlu1 %7492 }
 0xccd   : > { %v8510_v36 = vcombine.low %v8454_v41, %v8470_v55  ;;  %v8511_v39 = vcombine.high %v8454_v41, %v8470_v55  ;;  %v8526_v42 = vcombine.low %v8461_v16, %v8477_v26  ;;  %v8527_v29 = vcombine.high %v8461_v16, %v8477_v26 }
 0xcce   : > { %v8582_v51 = vcombine.low %v7485_v27, %v7493_v47  ;;  %v8583_v18 = vcombine.high %v7485_v27, %v7493_v47  ;;  %v8502_v41 = vrot.slane %v8494_v30, %v10304_v20  ;;  %v8509_v26 = vrot.slane %v8495_v61, %v10304_v20 }
 0xccf   : > { %v14789_v9 = vrot.slane %v8510_v36, %v10304_v20  ;;  %v8525_v1 = vrot.slane %v8511_v39, %v10304_v20  ;;  %v8534_v15 = vrot.slane %v8526_v42, %v10304_v20  ;;  %v14794_v8 = vrot.slane %v8527_v29, %v10304_v20 }
 0xcd0   : > { %v8590_v16 = vrot.slane %v8582_v51, %v10296_v12  ;;  %v8597_v50 = vrot.slane %v8583_v18, %v10296_v12  ;;  %v7497_v55 = vpop.permute.xlu0 %7496  ;;  %v7407_v27 = vpop.permute.xlu1 %7406 }
 0xcd1   : > { %15835 = vst [vmem:[#allocation47_spill] sm:$0xff] %v14789_v9  ;;  %v8598_v47 = vcombine.low %v7489_v63, %v7497_v55  ;;  %v8599_v36 = vcombine.high %v7489_v63, %v7497_v55  ;;  %v8544_v39 = vcombine.low %v8493_v48, %v8525_v1  ;;  %v8547_v42 = vcombine.high %v8502_v41, %v8534_v15 }
 0xcd2   : > { %v8543_v29 = vcombine.high %v14785_v24, %v14789_v9  ;;  %v8548_v30 = vcombine.low %v8509_v26, %v14794_v8  ;;  %v8545_v45 = vcombine.high %v8493_v48, %v8525_v1  ;;  %v8546_v18 = vcombine.low %v8502_v41, %v8534_v15 }
 0xcd3   : > { %v8606_v61 = vrot.slane %v8598_v47, %v10296_v12  ;;  %v8613_v51 = vrot.slane %v8599_v36, %v10296_v12  ;;  %v8549_v35 = vcombine.high %v8509_v26, %v14794_v8  ;;  %v15836_v9 = vcombine.low %v14363_v43, %v14406_v13 }
 0xcd4   : > { %v7411_v19 = vpop.permute.xlu0 %7410  ;;  %v7415_v25 = vpop.permute.xlu1 %7414  ;;  %v15838_v1 = vcombine.high %v14363_v43, %v14406_v13  ;;  %v15841_v43 = vcombine.high %v14366_v32, %v14409_v44 }
 0xcd5   : > { %v8646_v2 = vcombine.low %v8590_v16, %v8606_v61  ;;  %v8647_v52 = vcombine.high %v8590_v16, %v8606_v61  ;;  %v8662_v63 = vcombine.low %v8597_v50, %v8613_v51  ;;  %v8663_v55 = vcombine.high %v8597_v50, %v8613_v51 }
 0xcd6   : > { %v14812_v24 = vrot.slane %v15836_v9, %v10304_v20  ;;  %v7803_v48 = vcombine.high %v7407_v27, %v7415_v25  ;;  %v8629_v15 = vrot.slane %v15838_v1, %v10304_v20  ;;  %v15840_v9 = vcombine.low %v14366_v32, %v14409_v44 }
 0xcd7   : > { %v14819_v8 = vrot.slane %v8646_v2, %v10304_v20  ;;  %v8661_v41 = vrot.slane %v8647_v52, %v10304_v20  ;;  %v8670_v26 = vrot.slane %v8662_v63, %v10304_v20  ;;  %v8677_v16 = vrot.slane %v8663_v55, %v10304_v20 }
 0xcd8   : > { %15837 = vst [vmem:[#allocation50_spill] sm:$0xff] %v14812_v24  ;;  %v7419_v50 = vpop.permute.xlu0 %7418  ;;  %v7431_v47 = vpop.permute.xlu1 %7430  ;;  %v8638_v36 = vrot.slane %v15840_v9, %v10304_v20  ;;  %v8645_v13 = vrot.slane %v15841_v43, %v10304_v20  ;;  %v14835_v52 = vrot.slane %v7803_v48, %v10296_v12 }
 0xcd9   : > { %15839 = vst [vmem:[#allocation19_spill] sm:$0xff] %v14819_v8  ;;  %v7819_v61 = vcombine.high %v7411_v19, %v7419_v50  ;;  %v8680_v51 = vcombine.low %v8629_v15, %v8661_v41  ;;  %v8679_v55 = vcombine.high %v14812_v24, %v14819_v8  ;;  %v8681_v3 = vcombine.high %v8629_v15, %v8661_v41 }
 0xcda   : > { %v8683_v63 = vcombine.high %v8638_v36, %v8670_v26  ;;  %v8684_v1 = vcombine.low %v8645_v13, %v8677_v16  ;;  %v7818_v9 = vcombine.low %v7411_v19, %v7419_v50  ;;  %v8682_v44 = vcombine.low %v8638_v36, %v8670_v26 }
 0xcdb   : > { %v14840_v7 = vrot.slane %v7819_v61, %v10296_v12  ;;  %v14842_v32 = vpack.i.bf16 %v8680_v51, %v8544_v39  ;;  %v14846_v48 = vpack.i.bf16 %v8679_v55, %v8543_v29  ;;  %v14850_v21 = vpack.i.bf16 %v8681_v3, %v8545_v45 }
 0xcdc   : > { %v7435_v43 = vpop.permute.xlu0 %7434  ;;  %v7439_v2 = vpop.permute.xlu1 %7438  ;;  %v14844_v49 = vpack.i.bf16 %v8683_v63, %v8547_v42  ;;  %v14848_v34 = vpack.i.bf16 %v8684_v1, %v8548_v30  ;;  %v7802_v8 = vcombine.low %v7407_v27, %v7415_v25  ;;  %v14856_v39 = vpack.i.bf16 %v8682_v44, %v8546_v18 }
 0xcdd   : > { %v7882_v19 = vcombine.low %v14835_v52, %v14840_v7  ;;  %v8685_v41 = vcombine.high %v8645_v13, %v8677_v16  ;;  %v14859_v26 = vrot.slane %v7818_v9, %v10296_v12  ;;  %v7834_v42 = vcombine.low %v7431_v47, %v7439_v2 }
 0xcde   : > { %15842 = vst [vmem:[#allocation12_spill] sm:$0xff] %v14856_v39  ;;  %v14864_v3 = vrot.slane %v7802_v8, %v10296_v12  ;;  %v7835_v36 = vcombine.high %v7431_v47, %v7439_v2  ;;  %v15848_v15 = vcombine.high %v14473_v4, %v14485_v31 }
 0xcdf   : > { %v14861_v30 = vpack.i.bf16 %v8685_v41, %v8549_v35  ;;  %v14869_v18 = vrot.slane %v7834_v42, %v10296_v12 }
 0xce0   : > { %v7443_v29 = vpop.permute.xlu0 %7442  ;;  %v7483_v50 = vpop.permute.xlu1 %7482  ;;  %v7866_v27 = vcombine.low %v14864_v3, %v14859_v26  ;;  %v7849_v55 = vrot.slane %v7835_v36, %v10296_v12  ;;  %v15846_v36 = vcombine.low %v14482_v58, %v14488_v10 }
 0xce1   : > { %15843 = vst [vmem:[#allocation30_spill] sm:$0xff] %v14861_v30  ;;  %v7850_v25 = vcombine.low %v7435_v43, %v7443_v29  ;;  %v7851_v45 = vcombine.high %v7435_v43, %v7443_v29  ;;  %v15844_v43 = vcombine.low %v14357_v46, %v14400_v37 }
 0xce2   : > { %v14878_v51 = vrot.slane %v7866_v27, %v10304_v20  ;;  %v15845_v27 = vcombine.low %v14473_v4, %v14485_v31 }
 0xce3   : > { %v14872_v16 = vrot.slane %v7850_v25, %v10296_v12  ;;  %v7865_v8 = vrot.slane %v7851_v45, %v10296_v12  ;;  %v14890_v41 = vrot.slane %v15844_v43, %v10304_v20 }
 0xce4   : > { %v7487_v13 = vpop.permute.xlu0 %7486  ;;  %v7491_v61 = vpop.permute.xlu1 %7490 }
 0xce5   : > { %v7898_v35 = vcombine.low %v14869_v18, %v14872_v16  ;;  %v7970_v1 = vcombine.low %v7483_v50, %v7491_v61  ;;  %v7971_v9 = vcombine.high %v7483_v50, %v7491_v61  ;;  %v7914_v44 = vcombine.low %v7849_v55, %v7865_v8 }
 0xce6   : > { %v7915_v45 = vcombine.high %v7849_v55, %v7865_v8  ;;  %v14896_v50 = vrot.slane %v15845_v27, %v10304_v20  ;;  %v7786_v61 = vrot.slane %v15846_v36, %v10304_v20 }
 0xce7   : > { %v14881_v63 = vrot.slane %v7898_v35, %v10304_v20  ;;  %v15847_v35 = vcombine.low %v14360_v28, %v14403_v0  ;;  %v7985_v8 = vrot.slane %v7971_v9, %v10296_v12 }
 0xce8   : > { %v7359_v25 = vpop.permute.xlu1 %7358 }
 0xce9   : > { %v7495_v2 = vpop.permute.xlu0 %7494  ;;  %v8026_v43 = vrot.slane %v15847_v35, %v10304_v20  ;;  %v7666_v27 = vcombine.low %v14612_v62, %v7359_v25  ;;  %v7667_v47 = vcombine.high %v14612_v62, %v7359_v25  ;;  %v7777_v35 = vrot.slane %v15848_v15, %v10304_v20 }
 0xcea   : > { %v7986_v42 = vcombine.low %v7487_v13, %v7495_v2  ;;  %v7987_v29 = vcombine.high %v7487_v13, %v7495_v2  ;;  %v14907_v13 = vrot.slane %v7970_v1, %v10296_v12  ;;  %v15849_v1 = vcombine.high %v14482_v58, %v14488_v10 }
 0xceb   : > { %v15850_v62 = vcombine.low %v14714_v40, %v14718_v23  ;;  %v15851_v58 = vcombine.high %v14360_v28, %v14403_v0  ;;  %v7890_v15 = vrot.slane %v7882_v19, %v10304_v20  ;;  %v7674_v23 = vrot.slane %v7666_v27, %v10296_v12 }
 0xcec   : > { %v14911_v55 = vrot.slane %v7986_v42, %v10296_v12  ;;  %v8001_v2 = vrot.slane %v7987_v29, %v10296_v12  ;;  %v7793_v9 = vrot.slane %v15849_v1, %v10304_v20  ;;  %v7922_v42 = vrot.slane %v7914_v44, %v10304_v20 }
 0xced   : > { %v7363_v36 = vpop.permute.xlu0 %7362  ;;  %v14931_v25 = vrot.slane %v15850_v62, %v10304_v20  ;;  %v8033_v10 = vrot.slane %v15851_v58, %v10304_v20  ;;  %v7929_v44 = vrot.slane %v7915_v45, %v10304_v20 }
 0xcee   : > { %v8034_v29 = vcombine.low %v14907_v13, %v14911_v55  ;;  %v8050_v24 = vcombine.low %v7985_v8, %v8001_v2  ;;  %v8051_v30 = vcombine.high %v7985_v8, %v8001_v2  ;;  %v7682_v31 = vcombine.low %v14614_v14, %v7363_v36 }
 0xcef   : > { %v7683_v4 = vcombine.high %v14614_v14, %v7363_v36  ;;  %v7681_v2 = vrot.slane %v7667_v47, %v10296_v12  ;;  %v7934_v19 = vcombine.low %v7890_v15, %v7922_v42 }
 0xcf0   : > { %v14942_v8 = vrot.slane %v8034_v29, %v10304_v20  ;;  %v8058_v40 = vrot.slane %v8050_v24, %v10304_v20  ;;  %v7690_v14 = vrot.slane %v7682_v31, %v10296_v12  ;;  %v8065_v28 = vrot.slane %v8051_v30, %v10304_v20 }
 0xcf1   : > { %v7697_v36 = vrot.slane %v7683_v4, %v10296_v12  ;;  %v15852_v24 = vcombine.high %v14835_v52, %v14840_v7  ;;  %v7935_v31 = vcombine.high %v7890_v15, %v7922_v42 }
 0xcf2   : > { %v8070_v45 = vcombine.low %v8026_v43, %v8058_v40  ;;  %v7730_v1 = vcombine.low %v7674_v23, %v7690_v14  ;;  %v7731_v29 = vcombine.high %v7674_v23, %v7690_v14  ;;  %v8071_v12 = vcombine.high %v8026_v43, %v8058_v40 }
 0xcf3   : > { %v7746_v62 = vcombine.low %v7681_v2, %v7697_v36  ;;  %v7747_v58 = vcombine.high %v7681_v2, %v7697_v36  ;;  %v7897_v47 = vrot.slane %v15852_v24, %v10304_v20  ;;  %v8072_v36 = vcombine.low %v8033_v10, %v8065_v28 }
 0xcf4   : > { %v14956_v27 = vpack.i.bf16 %v8070_v45, %v7934_v19  ;;  %v14959_v30 = vrot.slane %v7730_v1, %v10304_v20  ;;  %v7745_v4 = vrot.slane %v7731_v29, %v10304_v20  ;;  %v14964_v14 = vpack.i.bf16 %v8071_v12, %v7935_v31 }
 0xcf5   : > { %v7754_v0 = vrot.slane %v7746_v62, %v10304_v20  ;;  %v7761_v23 = vrot.slane %v7747_v58, %v10304_v20  ;;  %v7936_v2 = vcombine.low %v7897_v47, %v7929_v44  ;;  %v8073_v39 = vcombine.high %v8033_v10, %v8065_v28 }
 0xcf6   : > { %v7794_v7 = vcombine.low %v14959_v30, %v14896_v50  ;;  %v7795_v43 = vcombine.high %v14959_v30, %v14896_v50  ;;  %v7796_v15 = vcombine.low %v7745_v4, %v7777_v35  ;;  %v7797_v40 = vcombine.high %v7745_v4, %v7777_v35 }
 0xcf7   : > { %v7798_v52 = vcombine.low %v7754_v0, %v7786_v61  ;;  %v7799_v42 = vcombine.high %v7754_v0, %v7786_v61  ;;  %v7800_v19 = vcombine.low %v7761_v23, %v7793_v9  ;;  %v7937_v45 = vcombine.high %v7897_v47, %v7929_v44 }
 0xcf8   : > { %v15853_v1 = vcombine.low %v14568_v56, %v14577_v57  ;;  %v15854_v62 = vcombine.high %v14560_v54, %v14571_v22  ;;  %v15855_v28 = vcombine.high %v14568_v56, %v14577_v57  ;;  %v10047_v24 = vpack.i.bf16 %v8072_v36, %v7936_v2  ;;  %v15866_v36 = vld [vmem:[#allocation8_spill] sm:$0xff] }
 0xcf9   : > { %v15856_v61 = vcombine.low %v14586_v5, %v14574_v11  ;;  %v15857_v35 = vcombine.high %v14586_v5, %v14574_v11  ;;  %v15858_v47 = vcombine.low %v14592_v33, %v14580_v53  ;;  %v10057_v12 = vpack.i.bf16 %v8073_v39, %v7937_v45 }
 0xcfa   : > { %v9907_v29 = vpack.i.bf16 %v7798_v52, %v15853_v1  ;;  %v9892_v10 = vpack.i.bf16 %v7795_v43, %v15854_v62  ;;  %v9912_v58 = vpack.i.bf16 %v7799_v42, %v15855_v28  ;;  %v15859_v4 = vcombine.low %v14697_v59, %v14701_v17  ;;  %v15867_v42 = vld [vmem:[#allocation49_spill] sm:$0xff]  ;;  %v15875_v28 = vld [vmem:[#allocation52_spill] sm:$0xff] }
 0xcfb   : > { %v9897_v0 = vpack.i.bf16 %v7796_v15, %v15856_v61  ;;  %v9902_v44 = vpack.i.bf16 %v7797_v40, %v15857_v35  ;;  %v10017_v31 = vpack.i.bf16 %v7800_v19, %v15858_v47  ;;  %v7801_v57 = vcombine.high %v7761_v23, %v7793_v9  ;;  %v15863_v9 = vld [vmem:[#allocation32_spill] sm:$0xff]  ;;  %v15880_v61 = vld [vmem:[#allocation38_spill] sm:$0xff] }
 0xcfc   : > { %v14992_v56 = vrot.slane %v15859_v4, %v10304_v20  ;;  %9908 = vrot.lane.b32.xlu1 %v9907_v29, %s10165_s17  ;;  %9893 = vrot.lane.b32.xlu0 %v9892_v10, %s10169_s25  ;;  %v8750_v11 = vcombine.high %v14931_v25, %v15521_v6  ;;  %v15860_v5 = vcombine.high %v14592_v33, %v14580_v53  ;;  %v15862_v53 = vld [vmem:[#allocation20_spill] sm:$0xff]  ;;  %v15873_v29 = vld [vmem:[#allocation53_spill] sm:$0xff]  ;;  %v15874_v10 = vld [vmem:[#allocation46_spill] sm:$0xff] }
 0xcfd   : > { %v15861_v39 = vpack.i.bf16 %v14752_v60, %v14733_v38  ;;  %v8067_v33 = vcombine.high %v14890_v41, %v14942_v8  ;;  %v15864_v23 = vld [vmem:[#allocation40_spill] sm:$0xff]  ;;  %v7931_v52 = vcombine.high %v14878_v51, %v14881_v63  ;;  %v8035_v38 = vcombine.high %v14907_v13, %v14911_v55  ;;  %v15868_v13 = vld [vmem:[#allocation25_spill] sm:$0xff] }
 0xcfe   : > { %v10062_v2 = vpack.i.bf16 %v7801_v57, %v15860_v5  ;;  %v8138_v59 = vcombine.high %v14992_v56, %v15521_v6  ;;  %v15865_v6 = vpack.i.bf16 %v15863_v9, %v15864_v23  ;;  %v7899_v43 = vcombine.high %v14869_v18, %v14872_v16 }
 0xcff   : > { %v9977_v60 = vpack.i.bf16 %v8067_v33, %v7931_v52  ;;  %v7867_v15 = vcombine.high %v14864_v3, %v14859_v26  ;;  %v8049_v40 = vrot.slane %v8035_v38, %v10304_v20  ;;  %v15869_v18 = vcombine.high %v14357_v46, %v14400_v37  ;;  %v15870_v26 = vld [vmem:[#allocation31_spill] sm:$0xff]  ;;  %v15871_v3 = vld [vmem:[#allocation22_spill] sm:$0xff] }
 0xd00   : > { %9913 = vrot.lane.b32.xlu1 %v9912_v58, %s10163_s10  ;;  %9898 = vrot.lane.b32.xlu0 %v9897_v0, %s10167_s20  ;;  %v9957_v17 = vpack.i.bf16 %v8750_v11, %v8138_v59  ;;  %v7913_v19 = vrot.slane %v7899_v43, %v10304_v20  ;;  %v15872_v1 = vpack.i.bf16 %v15870_v26, %v15871_v3  ;;  %v15878_v37 = vld [vmem:[#allocation54_spill] sm:$0xff]  ;;  %v15881_v0 = vld [vmem:[#allocation35_spill] sm:$0xff] }
 0xd01   : > { %v8017_v16 = vrot.slane %v15869_v18, %v10304_v20  ;;  %v7881_v55 = vrot.slane %v7867_v15, %v10304_v20  ;;  %v15876_v46 = vpack.i.bf16 %v15874_v10, %v15875_v28  ;;  %v15877_v20 = vld [vmem:[#allocation24_spill] sm:$0xff]  ;;  %v15882_v35 = vpack.i.bf16 %v15880_v61, %v15881_v0 }
 0xd02   : > { %v15879_v58 = vpack.i.bf16 %v15877_v20, %v15878_v37 }
 0xd03   : > { %v8069_v45 = vcombine.high %v8017_v16, %v8049_v40  ;;  %v7932_v47 = vcombine.low %v7881_v55, %v7913_v19 }
 0xd04   : > { %9958 = vrot.lane.b32.xlu1 %v9957_v17, %s10169_s25  ;;  %9903 = vrot.lane.b32.xlu0 %v9902_v44, %s10168_s24  ;;  %v8068_v44 = vcombine.low %v8017_v16, %v8049_v40 }
 0xd08   : > { %9963 = vrot.lane.b32.xlu1 %v15861_v39, %s10168_s24  ;;  %9918 = vrot.lane.b32.xlu0 %v15862_v53, %s10169_s25  ;;  %v15887_v53 = vcombine.low %v14560_v54, %v14571_v22 }
 0xd0c   : > { %9968 = vrot.lane.b32.xlu1 %v15865_v6, %s10163_s10  ;;  %9923 = vrot.lane.b32.xlu0 %v15866_v36, %s10167_s20 }
 0xd10   : > { %9978 = vrot.lane.b32.xlu1 %v9977_v60, %s10169_s25  ;;  %9928 = vrot.lane.b32.xlu0 %v15867_v42, %s10168_s24 }
 0xd14   : > { %9983 = vrot.lane.b32.xlu1 %v14842_v32, %s10167_s20  ;;  %9933 = vrot.lane.b32.xlu0 %v15868_v13, %s10165_s17  ;;  %v7933_v32 = vcombine.high %v7881_v55, %v7913_v19 }
 0xd16   : > { %v10002_v62 = vpack.i.bf16 %v8069_v45, %v7933_v32 }
 0xd18   : > { %9993 = vrot.lane.b32.xlu1 %v15872_v1, %s10164_s11  ;;  %9938 = vrot.lane.b32.xlu0 %v15873_v29, %s10163_s10 }
 0xd1c   : > { %10003 = vrot.lane.b32.xlu1 %v10002_v62, %s10168_s24  ;;  %9943 = vrot.lane.b32.xlu0 %v15876_v46, %s10167_s20 }
 0xd20   : > { %10018 = vrot.lane.b32.xlu1 %v10017_v31, %s10166_s19  ;;  %9948 = vrot.lane.b32.xlu0 %v15879_v58, %s10165_s17  ;;  %v9987_v31 = vpack.i.bf16 %v8068_v44, %v7932_v47 }
 0xd24   : > { %10028 = vrot.lane.b32.xlu1 %v14956_v27, %s10165_s17  ;;  %9953 = vrot.lane.b32.xlu0 %v15882_v35, %s10166_s19  ;;  %v15885_v27 = vld [vmem:[#allocation27_spill] sm:$0xff] }
 0xd28   : > { %10033 = vrot.lane.b32.xlu1 %v14844_v49, %s10163_s10  ;;  %9973 = vrot.lane.b32.xlu0 %v14846_v48, %s10169_s25  ;;  %v15883_v49 = vld [vmem:[#allocation12_spill] sm:$0xff]  ;;  %v15884_v48 = vld [vmem:[#allocation30_spill] sm:$0xff] }
 0xd2c   : > { %10038 = vrot.lane.b32.xlu1 %v14964_v14, %s10163_s10  ;;  %9988 = vrot.lane.b32.xlu0 %v9987_v31, %s10167_s20  ;;  %v15886_v14 = vld [vmem:[#allocation26_spill] sm:$0xff] }
 0xd30   : > { %10043 = vrot.lane.b32.xlu1 %v14848_v34, %s10166_s19  ;;  %9998 = vrot.lane.b32.xlu0 %v14850_v21, %s10168_s24  ;;  %v9288_v21 = vld [vmem:[%s15288_s2 + $0xc] sm:$0xf] }
 0xd34   : > { %10048 = vrot.lane.b32.xlu1 %v10047_v24, %s10166_s19  ;;  %10008 = vrot.lane.b32.xlu0 %v15883_v49, %s10165_s17 }
 0xd38   : > { %10053 = vrot.lane.b32.xlu1 %v15884_v48, %s10164_s11  ;;  %10013 = vrot.lane.b32.xlu0 %v15885_v27, %s10166_s19  ;;  %s9297_s19 = sshll.u32 %s10220_s16, 7  ;;  %s10100_s16 = scalar_lea.vmem %s10099_s4, 256 }
 0xd39   : > { %s9190_s27 = scalar_lea.hbm %s15289_s3, %s9297_s19 }
 0xd3c   : > { %10058 = vrot.lane.b32.xlu1 %v10057_v12, %s10164_s11  ;;  %10023 = vrot.lane.b32.xlu0 %v15886_v14, %s10164_s11 }
 0xd40   : > { %10063 = vrot.lane.b32.xlu1 %v10062_v2, %s10164_s11  ;;  %9116 = vperm.xlu0 %9540, %v9288_v21   ;;  %s176_s11 = sand.u32 1, %s10150_s13  }
 0xd41   : > { %s9269_s17 = sshll.u32 %s176_s11, 3  ;;  %s9178_s28 = scalar_lea.sflag [#allocation4], %s176_s11 }
 0xd42   : > { %s178_s20 = scalar_lea.vmem [#allocation5], %s9269_s17 }
 0xd43   : > { %s9192_s24 = sshll.u32 %s178_s20, 4  ;;  %s9193_s24 = int_to_ptr.vmem [resolvable:$true] %s9192_s24 }
 0xd44   : > { %s10094_s29 = scalar_lea.vmem %s9193_s24, 128  ;;  %p10101_p11 = scmp.lt.s32.totalorder %s9193_s24, %s10099_s4 }
 0xd45   : > { %p10095_p6 = scmp.ne.s32.totalorder %s9193_s24, %s10094_s29  ;;  %p10102_p12 = scmp.lt.s32.totalorder %s10100_s16, %s10094_s29 }
 0xd47   : > { %p10096_p9 = pnand %p10095_p6, %p10237_p5  ;;  %p10103_p13 = por %p10102_p12, %p10101_p11 }
 0xd49   : > { %p10097_p10 = pneg %p10096_p9 }
 0xd4b   : > { %p10104_p0 = pnand %p10103_p13, %p10097_p10 }
 0xd6e   : > { %v9909_v34 = vpop.permute.xlu1 %9908  ;;  %v9894_v24 = vpop.permute.xlu0 %9893 }
 0xd6f   : > { %v9896_v11 = vunpack.i.h.bf16 %v9894_v24  ;;  %v9895_v5 = vunpack.i.l.bf16 %v9894_v24  ;;  %v9911_v6 = vunpack.i.h.bf16 %v9909_v34  ;;  %v9910_v36 = vunpack.i.l.bf16 %v9909_v34 }
 0xd71   : > { %v9034_v33 = vsel %vm2313_vm5, %v15887_v53, %v9895_v5  ;;  %v9035_v2 = vsel %vm2313_vm5, %v7794_v7, %v9896_v11 }
 0xd72   : > { %v15090_v4 = vpop.permute.xlu1 %9913  ;;  %v9899_v57 = vpop.permute.xlu0 %9898 }
 0xd73   : > { %v9901_v59 = vunpack.i.h.bf16 %v9899_v57  ;;  %v9900_v17 = vunpack.i.l.bf16 %v9899_v57 }
 0xd75   : > { %v9039_v52 = vsel %vm2319_vm6, %v9034_v33, %v9900_v17  ;;  %v9040_v38 = vsel %vm2319_vm6, %v9035_v2, %v9901_v59  ;;  %v9916_v33 = vunpack.i.h.bf16 %v15090_v4  ;;  %v9915_v2 = vunpack.i.l.bf16 %v15090_v4 }
 0xd76   : > { %v9959_v12 = vpop.permute.xlu1 %9958  ;;  %v9904_v39 = vpop.permute.xlu0 %9903 }
 0xd77   : > { %v9906_v9 = vunpack.i.h.bf16 %v9904_v39  ;;  %v9905_v23 = vunpack.i.l.bf16 %v9904_v39  ;;  %v9961_v55 = vunpack.i.h.bf16 %v9959_v12  ;;  %v9960_v45 = vunpack.i.l.bf16 %v9959_v12 }
 0xd79   : > { %v9044_v60 = vsel %vm2325_vm7, %v9039_v52, %v9905_v23  ;;  %v9045_v43 = vsel %vm2325_vm7, %v9040_v38, %v9906_v9  ;;  %v9073_v32 = vsel %vm2313_vm5, %v14931_v25, %v9961_v55  ;;  %v9038_v62 = vsel %vm2313_vm5, %v14992_v56, %v9960_v45 }
 0xd7a   : > { %v15105_v54 = vsel %vm2331_vm8, %v9044_v60, %v9910_v36  ;;  %v15108_v22 = vsel %vm2331_vm8, %v9045_v43, %v9911_v6  ;;  %v9964_v50 = vpop.permute.xlu1 %9963  ;;  %v15110_v30 = vpop.permute.xlu0 %9918 }
 0xd7b   : > { %v9966_v46 = vunpack.i.h.bf16 %v9964_v50  ;;  %v9965_v20 = vunpack.i.l.bf16 %v9964_v50  ;;  %v9921_v59 = vunpack.i.h.bf16 %v15110_v30  ;;  %v9920_v9 = vunpack.i.l.bf16 %v15110_v30 }
 0xd7e   : > { %v9969_v7 = vpop.permute.xlu1 %9968  ;;  %v15112_v42 = vpop.permute.xlu0 %9923 }
 0xd7f   : > { %v9971_v56 = vunpack.i.h.bf16 %v9969_v7  ;;  %v9970_v31 = vunpack.i.l.bf16 %v9969_v7  ;;  %v9926_v23 = vunpack.i.h.bf16 %v15112_v42  ;;  %v9925_v6 = vunpack.i.l.bf16 %v15112_v42  ;;  %v15888_v7 = vld [vmem:[#allocation39_spill] sm:$0xff] }
 0xd82   : > { %v15114_v15 = vpop.permute.xlu1 %9978  ;;  %v15116_v40 = vpop.permute.xlu0 %9928 }
 0xd83   : > { %v9981_v38 = vunpack.i.h.bf16 %v15114_v15  ;;  %v9980_v60 = vunpack.i.l.bf16 %v15114_v15  ;;  %v9931_v43 = vunpack.i.h.bf16 %v15116_v40  ;;  %v9930_v50 = vunpack.i.l.bf16 %v15116_v40 }
 0xd86   : > { %v15118_v19 = vpop.permute.xlu1 %9983  ;;  %v15120_v13 = vpop.permute.xlu0 %9933 }
 0xd87   : > { %v9936_v30 = vunpack.i.h.bf16 %v15120_v13 }
 0xd8a   : > { %v9994_v18 = vpop.permute.xlu1 %9993  ;;  %v15122_v16 = vpop.permute.xlu0 %9938 }
 0xd8b   : > { %v9996_v21 = vunpack.i.h.bf16 %v9994_v18  ;;  %v9995_v34 = vunpack.i.l.bf16 %v9994_v18  ;;  %v15889_v18 = vld [vmem:[#allocation29_spill] sm:$0xff] }
 0xd8c   : > { %v15890_v55 = vcombine.low %v15888_v7, %v15889_v18 }
 0xd8e   : > { %v15124_v26 = vpop.permute.xlu1 %10003  ;;  %v9944_v3 = vpop.permute.xlu0 %9943  ;;  %v9070_v45 = vsel %vm2313_vm5, %v15890_v55, %v9921_v59 }
 0xd8f   : > { %v9946_v1 = vunpack.i.h.bf16 %v9944_v3  ;;  %v9945_v29 = vunpack.i.l.bf16 %v9944_v3  ;;  %v9935_v3 = vunpack.i.l.bf16 %v15120_v13  ;;  %v9075_v13 = vsel %vm2319_vm6, %v9070_v45, %v9926_v23 }
 0xd90   : > { %v10005_v23 = vunpack.i.l.bf16 %v15124_v26 }
 0xd91   : > { %v9078_v10 = vsel %vm2319_vm6, %v9073_v32, %v9946_v1  ;;  %v9043_v28 = vsel %vm2319_vm6, %v9038_v62, %v9945_v29  ;;  %v15891_v29 = vld [vmem:[#allocation9_spill] sm:$0xff] }
 0xd92   : > { %v15132_v37 = vpop.permute.xlu1 %10018  ;;  %v9949_v58 = vpop.permute.xlu0 %9948  ;;  %v9048_v35 = vsel %vm2325_vm7, %v9043_v28, %v9965_v20  ;;  %v9083_v44 = vsel %vm2325_vm7, %v9078_v10, %v9966_v46  ;;  %v15892_v32 = vld [vmem:[#allocation45_spill] sm:$0xff]  ;;  %v9940_v10 = vunpack.i.l.bf16 %v15122_v16 }
 0xd93   : > { %v9951_v61 = vunpack.i.h.bf16 %v9949_v58  ;;  %v9950_v0 = vunpack.i.l.bf16 %v9949_v58  ;;  %v15893_v62 = vcombine.low %v15891_v29, %v15892_v32 }
 0xd95   : > { %v9053_v25 = vsel %vm2331_vm8, %v9048_v35, %v9950_v0  ;;  %v9088_v47 = vsel %vm2331_vm8, %v9083_v44, %v9951_v61  ;;  %v9069_v40 = vsel %vm2313_vm5, %v15893_v62, %v9920_v9  ;;  %v15894_v0 = vcombine.low %v14890_v41, %v14942_v8 }
 0xd96   : > { %v15138_v49 = vpop.permute.xlu1 %10028  ;;  %v9954_v48 = vpop.permute.xlu0 %9953  ;;  %v9058_v24 = vsel %vm2337_vm9, %v9053_v25, %v9970_v31  ;;  %v9093_v57 = vsel %vm2337_vm9, %v9088_v47, %v9971_v56  ;;  %v9074_v20 = vsel %vm2319_vm6, %v9069_v40, %v9925_v6  ;;  %v15895_v44 = vcombine.low %v14878_v51, %v14881_v63  ;;  %v15896_v63 = vld [vmem:[#allocation50_spill] sm:$0xff] }
 0xd97   : > { %v9956_v27 = vunpack.i.h.bf16 %v9954_v48  ;;  %v9955_v14 = vunpack.i.l.bf16 %v9954_v48  ;;  %v9037_v35 = vsel %vm2313_vm5, %v15894_v0, %v9981_v38  ;;  %v9079_v47 = vsel %vm2325_vm7, %v9074_v20, %v9930_v50 }
 0xd98   : > { %v9036_v25 = vsel %vm2313_vm5, %v15895_v44, %v9980_v60  ;;  %v9080_v56 = vsel %vm2325_vm7, %v9075_v13, %v9931_v43  ;;  %v9986_v31 = vunpack.i.h.bf16 %v15118_v19  ;;  %v9985_v48 = vunpack.i.l.bf16 %v15118_v19 }
 0xd99   : > { %v9063_v11 = vsel %vm2343_vm10, %v9058_v24, %v9955_v14  ;;  %v9098_v5 = vsel %vm2343_vm10, %v9093_v57, %v9956_v27  ;;  %v9084_v27 = vsel %vm2331_vm8, %v9079_v47, %v9935_v3  ;;  %v9085_v14 = vsel %vm2331_vm8, %v9080_v56, %v9936_v30 }
 0xd9a   : > { %v15145_v17 = vpop.permute.xlu1 %10033  ;;  %v9974_v12 = vpop.permute.xlu0 %9973  ;;  %v9103_v39 = vsel %vm2349_vm11, %v9098_v5, %v9996_v21  ;;  %v9068_v53 = vsel %vm2349_vm11, %v9063_v11, %v9995_v34  ;;  %v9941_v21 = vunpack.i.h.bf16 %v15122_v16  ;;  %v9089_v51 = vsel %vm2337_vm9, %v9084_v27, %v9940_v10  ;;  %v15897_v34 = vld [vmem:[#allocation19_spill] sm:$0xff]  ;;  %v15899_v11 = vld [vmem:[#allocation48_spill] sm:$0xff] }
 0xd9b   : > { %v9109_v36 = vpack.c.bf16 %v9103_v39, %v9103_v39  ;;  %v9108_v52 = vpack.c.bf16 %v9068_v53, %v9068_v53  ;;  %v9976_v28 = vunpack.i.h.bf16 %v9974_v12  ;;  %v9975_v46 = vunpack.i.l.bf16 %v9974_v12  ;;  %v15900_v5 = vld [vmem:[#allocation47_spill] sm:$0xff] }
 0xd9c   : > { %v15898_v24 = vcombine.low %v15896_v63, %v15897_v34  ;;  %v15901_v59 = vcombine.low %v15899_v11, %v15900_v5  ;;  %v10006_v16 = vunpack.i.h.bf16 %v15124_v26  ;;  %v10031_v6 = vunpack.i.h.bf16 %v15138_v49 }
 0xd9d   : > { %9289 = vmatprep.subr.msk.bf16.mxu1 %vm2407_vm12, %v9109_v36  ;;  %v9123_v15 = vsel %vm2407_vm12, %v9108_v52, 0  ;;  %v10030_v36 = vunpack.i.l.bf16 %v15138_v49  ;;  %v10036_v52 = vunpack.i.h.bf16 %v15145_v17  ;;  %v10035_v38 = vunpack.i.l.bf16 %v15145_v17 }
 0xd9e   : > { %v15165_v42 = vpop.permute.xlu1 %10038  ;;  %v9989_v1 = vpop.permute.xlu0 %9988  ;;  %9139 = vmatpush1.bf16.msra.mxu1 %v9123_v15  ;;  %v9072_v57 = vsel %vm2313_vm5, %v15898_v24, %v9976_v28  ;;  %v9071_v19 = vsel %vm2313_vm5, %v15901_v59, %v9975_v46  ;;  %v9090_v47 = vsel %vm2337_vm9, %v9085_v14, %v9941_v21  ;;  %v10021_v56 = vunpack.i.h.bf16 %v15132_v37 }
 0xd9f   : > { %v9991_v58 = vunpack.i.h.bf16 %v9989_v1  ;;  %v9990_v61 = vunpack.i.l.bf16 %v9989_v1  ;;  %v9076_v60 = vsel %vm2319_vm6, %v9071_v19, %v9985_v48  ;;  %v9077_v43 = vsel %vm2319_vm6, %v9072_v57, %v9986_v31 }
 0xda0   : > { %v10041_v30 = vunpack.i.h.bf16 %v15165_v42  ;;  %v10040_v49 = vunpack.i.l.bf16 %v15165_v42  ;;  %v10020_v27 = vunpack.i.l.bf16 %v15132_v37 }
 0xda1   : > { %v9042_v12 = vsel %vm2319_vm6, %v9037_v35, %v9991_v58  ;;  %v9041_v39 = vsel %vm2319_vm6, %v9036_v25, %v9990_v61 }
 0xda2   : > { %v10044_v41 = vpop.permute.xlu1 %10043  ;;  %v9999_v8 = vpop.permute.xlu0 %9998  ;;  %v9047_v18 = vsel %vm2325_vm7, %v9042_v12, %v10006_v16  ;;  %v9046_v55 = vsel %vm2325_vm7, %v9041_v39, %v10005_v23 }
 0xda3   : > { %v10001_v53 = vunpack.i.h.bf16 %v9999_v8  ;;  %v10000_v9 = vunpack.i.l.bf16 %v9999_v8  ;;  %v10046_v1 = vunpack.i.h.bf16 %v10044_v41  ;;  %v10045_v15 = vunpack.i.l.bf16 %v10044_v41 }
 0xda4   : > { %v9051_v62 = vsel %vm2331_vm8, %v9046_v55, %v10030_v36  ;;  %v9052_v40 = vsel %vm2331_vm8, %v9047_v18, %v10031_v6  ;;  %v9055_v36 = vsel %vm2337_vm9, %v15108_v22, %v9916_v33 }
 0xda5   : > { %v9081_v3 = vsel %vm2325_vm7, %v9076_v60, %v10000_v9  ;;  %v9082_v17 = vsel %vm2325_vm7, %v9077_v43, %v10001_v53  ;;  %v9056_v41 = vsel %vm2337_vm9, %v9051_v62, %v10040_v49  ;;  %v9057_v8 = vsel %vm2337_vm9, %v9052_v40, %v10041_v30 }
 0xda6   : > { %v10049_v50 = vpop.permute.xlu1 %10048  ;;  %v10009_v7 = vpop.permute.xlu0 %10008  ;;  %v9060_v43 = vsel %vm2343_vm10, %v9055_v36, %v10021_v56 }
 0xda7   : > { %v10011_v45 = vunpack.i.h.bf16 %v10009_v7  ;;  %v10010_v26 = vunpack.i.l.bf16 %v10009_v7  ;;  %v10051_v20 = vunpack.i.h.bf16 %v10049_v50  ;;  %v10050_v13 = vunpack.i.l.bf16 %v10049_v50 }
 0xda9   : > { %v9086_v29 = vsel %vm2331_vm8, %v9081_v3, %v10010_v26  ;;  %v9087_v32 = vsel %vm2331_vm8, %v9082_v17, %v10011_v45  ;;  %v9061_v14 = vsel %vm2343_vm10, %v9056_v41, %v10050_v13  ;;  %v9062_v21 = vsel %vm2343_vm10, %v9057_v8, %v10051_v20  ;;  %v15902_v17 = vld [vmem:[#allocation15_spill] sm:$0xff] }
 0xdaa   : > { %v9091_v10 = vsel %vm2337_vm9, %v9086_v29, %v10035_v38  ;;  %v9092_v28 = vsel %vm2337_vm9, %v9087_v32, %v10036_v52  ;;  %v10054_v46 = vpop.permute.xlu1 %10053  ;;  %v10014_v42 = vpop.permute.xlu0 %10013 }
 0xdab   : > { %v10056_v58 = vunpack.i.h.bf16 %v10054_v46  ;;  %v10055_v61 = vunpack.i.l.bf16 %v10054_v46  ;;  %v10016_v0 = vunpack.i.h.bf16 %v10014_v42  ;;  %v10015_v35 = vunpack.i.l.bf16 %v10014_v42 }
 0xdac   : > { %v9096_v44 = vsel %vm2343_vm10, %v9091_v10, %v10045_v15  ;;  %v9097_v25 = vsel %vm2343_vm10, %v9092_v28, %v10046_v1 }
 0xdad   : > { %v9101_v31 = vsel %vm2349_vm11, %v9096_v44, %v10055_v61  ;;  %v9102_v48 = vsel %vm2349_vm11, %v9097_v25, %v10056_v58  ;;  %v9094_v19 = vsel %vm2343_vm10, %v9089_v51, %v10015_v35  ;;  %v9095_v12 = vsel %vm2343_vm10, %v9090_v47, %v10016_v0 }
 0xdae   : > { %v10059_v63 = vpop.permute.xlu1 %10058  ;;  %v10024_v34 = vpop.permute.xlu0 %10023  ;;  %v9107_v24 = vpack.c.bf16 %v9102_v48, %v9101_v31  ;;  %v9054_v51 = vsel %vm2337_vm9, %v15105_v54, %v9915_v2  ;;  %v9111_v54 = vld [vmem:[#allocation2 + $0x6] sm:$0x3] }
 0xdaf   : > { %v10061_v57 = vunpack.i.h.bf16 %v10059_v63  ;;  %v10060_v11 = vunpack.i.l.bf16 %v10059_v63  ;;  %v10026_v5 = vunpack.i.h.bf16 %v10024_v34  ;;  %v10025_v59 = vunpack.i.l.bf16 %v10024_v34 }
 0xdb0   : > { %9140 = vmatprep.subr.bf16.mxu1 %v9107_v24  ;;  %v9059_v60 = vsel %vm2343_vm10, %v9054_v51, %v10020_v27 }
 0xdb1   : > { %v9066_v37 = vsel %vm2349_vm11, %v9061_v14, %v10060_v11  ;;  %v9067_v39 = vsel %vm2349_vm11, %v9062_v21, %v10061_v57  ;;  %v9099_v53 = vsel %vm2349_vm11, %v9094_v19, %v10025_v59  ;;  %v9100_v9 = vsel %vm2349_vm11, %v9095_v12, %v10026_v5 }
 0xdb2   : > { %v9106_v16 = vpack.c.bf16 %v9067_v39, %v9066_v37  ;;  %v10064_v23 = vpop.permute.xlu1 %10063  ;;  %v9105_v6 = vpack.c.bf16 %v9100_v9, %v9099_v53 }
 0xdb3   : > { %v10066_v52 = vunpack.i.h.bf16 %v10064_v23  ;;  %v10065_v38 = vunpack.i.l.bf16 %v10064_v23 }
 0xdb4   : > { %9141 = vmatpush1.bf16.msra.mxu1 %v9106_v16 }
 0xdb5   : > { %v9064_v50 = vsel %vm2349_vm11, %v9059_v60, %v10065_v38  ;;  %v9065_v7 = vsel %vm2349_vm11, %v9060_v43, %v10066_v52  ;;  %9142 = vmatprep.subr.bf16.mxu1 %v9105_v6 }
 0xdb6   : > { %v9104_v18 = vpack.c.bf16 %v9065_v7, %v9064_v50 }
 0xdb8   : > { %9143 = vmatpush1.bf16.msra.mxu1 %v9104_v18 }
 0xdbb   : > { %9290 = vmatmul.mubr.msk.bf16.vlgmr.msra.gmra.mxu1 %vm2403_vm13, %v9111_v54  ;;  %v9117_v4 = vpop.permute.xlu0 %9116 }
 0xe7b   : > { %v9162_v22 = vpop.f32.mrf.mxu1 }
 0xe7c   : > { %v9163_v33 = vadd.f32 %v9162_v22, %v9117_v4 }
 0xe7d   : > { %v9164_v2 = vpop.f32.mrf.mxu1 }
 0xe7e   : > { %v9165_v55 = vadd.f32 %v9164_v2, %v9117_v4  ;;  %v9169_v26 = vmax.f32 %v9163_v33, 0.0 }
 0xe7f   : > { %v9166_v45 = vpop.f32.mrf.mxu1 }
 0xe80   : > { %v9170_v30 = vmax.f32 %v9165_v55, 0.0 }
 0xe81   : > { %v9167_v49 = vpop.f32.mrf.mxu1 }
 0xe82   : > { %v9173_v3 = vcombine.low %v9169_v26, %v9170_v30 }
 0xe84   : > { %v9175_v1 = vadd.f32 %v9173_v3, %v15902_v17 }
 0xe86   : > { %9176 = vst [vmem:[%s178_s20] sm:$0xff] %v9175_v1 }
 0xe87   : > { %10107 = shalt.err (!%p10104_p0)
}
 0xe88   : > { %s10108_s5 = scalar_lea.hbm %s9190_s27, 128  ;;  %s10112_s8 = scalar_lea.hbm %s15289_s3, 256 }
 0xe89   : > { %p10109_p1 = scmp.ne.s32.totalorder %s9190_s27, %s10108_s5  ;;  %p10113_p4 = scmp.lt.s32.totalorder %s9190_s27, %s15289_s3 }
 0xe8a   : > { %p10114_p7 = scmp.lt.s32.totalorder %s10112_s8, %s10108_s5 }
 0xe8b   : > { %p10110_p2 = pnand %p10109_p1, %p10237_p5 }
 0xe8c   : > { %p10115_p8 = por %p10114_p7, %p10113_p4 }
 0xe8d   : > { %p10111_p3 = pneg %p10110_p2 }
 0xe8f   : > { %p10116_p6 = pnand %p10115_p8, %p10111_p3 }
 0xe91   : > { %10119 = shalt.err (!%p10116_p6)
}
 0xe92   : > { %9302 = dma.vmem_to_hbm [thread:$0]  (%p10237_p5), %s9193_s24, 128, %s9190_s27, %s9178_s28  }
 0xe93 PF: > { %p9314_p9 = scmp.ge.s32.totalorder %s10158_s15, 2  ;;  %s9204_s11 = sand.u32 1, %s10146_s12  }
 0xe94   : > { %p15903_p10 = scmp.ne.s32.totalorder %s15461_s23, 0  ;;  %s9205_s17 = scalar_lea.sflag [#allocation4], %s9204_s11 }
 0xe96   : > { %p9309_p11 = pnand %p9314_p9, %p15903_p10 }
 0xe98   : > { %p9310_p12 = pneg %p9309_p11 }
 0xe9a   : > { %10141 = dma.done.wait (%p9310_p12), %s9205_s17, 128  }
 0xe9b   : > { %10143 = vsyncadd (%p9310_p12), %s9205_s17, 4294967168  ;;  %p14_p13 = scmp.ge.s32.totalorder %s10224_s18, 4   ;;  %s15904_s12 = smov %s10150_s13 }
 0xe9c   : > { %s15905_s13 = smov %s10154_s14  ;;  %s15906_s14 = smov %s10235_s21 }
 0xe9d   : > { %s15907_s15 = smov %s10224_s18  ;;  %16 = sbr.rel (!%p14_p13) target bundleno = 4 (0x4), region = 78 }
 0xea2   :  { %9210 = vsyncpa [#allocation3], 1 }
 0xea3   :  { %9212 = vsyncpa [#allocation3 + $0x1], 1 }
 0xea4   :  { %9213 = vsyncpa [#allocation4], 1 }
 0xea5   :  { %9215 = vsyncpa [#allocation4 + $0x1], 1 }

</bundles_post_ra>
